<compile_context>
chip_gen: v7x
topology: tpu7x:2x2x1
jax: 0.10.0
libtpu: 0.0.40
codegen_flags: <defaults>
</compile_context>

<pallas_src>
import functools

import jax
import jax.numpy as jnp
from jax.experimental import pallas as pl
from jax.experimental.pallas import tpu as pltpu

NOISE_DIM = 100
NUM_CLASSES = 10
CHANNEL_SIZE = 1
BN_EPS = 1e-5

# Row-tile targets.  Sized so  2*LHS_tile + resident W + 2*out_tile + f32 temps
# stays ~<24 MiB -> fits v7x's 64 MiB physical VMEM with headroom (v5e/v6e easy).
_TILE_L1 = 128     # layer 1: N=6272 wide -> modest row tile
_TILE_L2 = 2048    # layer 2: K=1152, N=256
_TILE_L3 = 4096    # layer 3: K=576,  N=4


def _round_up(x, m):
    return -(-x // m) * m


def _pick_tile(m, target):
    # Multiples of 16 keep bf16 sublane packing aligned; cap at the target.
    return int(min(target, _round_up(m, 16)))


def _vmem_limit(est_bytes):
    # Explicit scoped-VMEM limit sized to the chosen tiles; floored at 32 MiB,
    # capped well below v7x's 64 MiB physical VMEM.
    return int(min(max(int(1.25 * est_bytes) + (2 << 20), 32 << 20), 56 << 20))


# ----------------------------------------------------------------------------
# Pallas kernels
# ----------------------------------------------------------------------------
def _matmul_stats_kernel(x_ref, w_ref, y_ref, s1_ref, s2_ref, acc1, acc2):
    """y = x @ w (bf16 in, f32 accumulate), plus per-column sum / sum-of-squares
    accumulated in VMEM scratch across the row grid (for exact batch-norm)."""
    @pl.when(pl.program_id(0) == 0)
    def _init():
        acc1[...] = jnp.zeros_like(acc1)
        acc2[...] = jnp.zeros_like(acc2)

    y = jnp.dot(x_ref[...], w_ref[...], preferred_element_type=jnp.float32)
    y_ref[...] = y.astype(y_ref.dtype)
    acc1[...] += jnp.sum(y, axis=0, keepdims=True)
    acc2[...] += jnp.sum(y * y, axis=0, keepdims=True)

    @pl.when(pl.program_id(0) == pl.num_programs(0) - 1)
    def _finalize():
        s1_ref[...] = acc1[...]
        s2_ref[...] = acc2[...]


def _matmul_bias_tanh_kernel(x_ref, w_ref, b_ref, o_ref):
    y = jnp.dot(x_ref[...], w_ref[...], preferred_element_type=jnp.float32)
    o_ref[...] = jnp.tanh(y + b_ref[...])


# ----------------------------------------------------------------------------
# pallas_call wrappers (row-gridded, weight resident, padded rows are zeros)
# ----------------------------------------------------------------------------
def matmul_stats(x, w, *, tile_target, out_dtype):
    m, k = x.shape
    n = w.shape[1]
    tile_m = _pick_tile(m, tile_target)
    m_pad = _round_up(m, tile_m)
    if m_pad != m:
        # Zero rows contribute exactly 0 to both sums -> BN stats stay exact.
        x = jnp.pad(x, ((0, m_pad - m), (0, 0)))
    grid = (m_pad // tile_m,)

    xb, wb = x.dtype.itemsize, w.dtype.itemsize
    yb = jnp.dtype(out_dtype).itemsize
    est = (2 * tile_m * k * xb + 2 * k * n * wb + 2 * tile_m * n * yb
           + 3 * tile_m * n * 4 + 4 * n * 4)
    cost = pl.CostEstimate(
        flops=2 * m_pad * k * n, transcendentals=0,
        bytes_accessed=m_pad * k * xb + k * n * wb + m_pad * n * yb + 2 * n * 4)

    y, s1, s2 = pl.pallas_call(
        _matmul_stats_kernel,
        out_shape=(jax.ShapeDtypeStruct((m_pad, n), out_dtype),
                   jax.ShapeDtypeStruct((1, n), jnp.float32),
                   jax.ShapeDtypeStruct((1, n), jnp.float32)),
        grid_spec=pltpu.PrefetchScalarGridSpec(
            num_scalar_prefetch=0,
            grid=grid,
            in_specs=[pl.BlockSpec((tile_m, k), lambda i: (i, 0)),
                      pl.BlockSpec((k, n), lambda i: (0, 0))],       # resident
            out_specs=(pl.BlockSpec((tile_m, n), lambda i: (i, 0)),
                       pl.BlockSpec((1, n), lambda i: (0, 0)),
                       pl.BlockSpec((1, n), lambda i: (0, 0))),
            scratch_shapes=[pltpu.VMEM((1, n), jnp.float32),
                            pltpu.VMEM((1, n), jnp.float32)]),
        compiler_params=pltpu.CompilerParams(
            # Row axis must be "arbitrary": BN stats accumulate across it.
            dimension_semantics=("arbitrary",),
            vmem_limit_bytes=_vmem_limit(est)),
        cost_estimate=cost,
    )(x, w)
    return y[:m], s1, s2


def matmul_bias_tanh(x, w, bias_row, *, tile_target):
    m, k = x.shape
    n = w.shape[1]
    tile_m = _pick_tile(m, tile_target)
    m_pad = _round_up(m, tile_m)
    if m_pad != m:
        x = jnp.pad(x, ((0, m_pad - m), (0, 0)))
    grid = (m_pad // tile_m,)

    xb, wb = x.dtype.itemsize, w.dtype.itemsize
    est = 2 * tile_m * k * xb + 2 * k * n * wb + 4 * tile_m * n * 4
    cost = pl.CostEstimate(
        flops=2 * m_pad * k * n, transcendentals=m_pad * n,
        bytes_accessed=m_pad * k * xb + k * n * wb + m_pad * n * 4)

    out = pl.pallas_call(
        _matmul_bias_tanh_kernel,
        out_shape=jax.ShapeDtypeStruct((m_pad, n), jnp.float32),
        grid_spec=pltpu.PrefetchScalarGridSpec(
            num_scalar_prefetch=0,
            grid=grid,
            in_specs=[pl.BlockSpec((tile_m, k), lambda i: (i, 0)),
                      pl.BlockSpec((k, n), lambda i: (0, 0)),
                      pl.BlockSpec((1, n), lambda i: (0, 0))],
            out_specs=pl.BlockSpec((tile_m, n), lambda i: (i, 0))),
        compiler_params=pltpu.CompilerParams(
            dimension_semantics=("parallel",),      # independent rows -> megacore
            vmem_limit_bytes=_vmem_limit(est)),
        cost_estimate=cost,
    )(x, w, bias_row)
    return out[:m]


# ----------------------------------------------------------------------------
# Cheap XLA glue: BN affine, 3x3 patch matrix, depth_to_space (all fuse in XLA)
# ----------------------------------------------------------------------------
def _bn_affine(csum, csq, gamma, beta, *, n_groups, count):
    """Training-mode BN scale/shift from per-column sums; columns are ordered
    (group, channel) with `n_groups` lane groups of width C, and every conv
    output element appears exactly once, so folding groups is exact."""
    c = gamma.shape[0]
    s1 = jnp.sum(csum.reshape(n_groups, c), axis=0)
    s2 = jnp.sum(csq.reshape(n_groups, c), axis=0)
    mean = s1 / count
    # TODO(synk): single-pass E[y^2]-mean^2 in f32; clamp guards tiny negatives.
    var = jnp.maximum(s2 / count - mean * mean, 0.0)
    scale = gamma * jax.lax.rsqrt(var + BN_EPS)
    shift = beta - mean * scale
    return scale, shift


def _im2col3x3(a):
    """a: (B, H, W, C) NHWC -> (B*H*W, 9*C); columns ordered (dh, dw, ci).
    TODO(synk): still round-trips HBM (in bf16); in-kernel tap accumulation
    needs shifted-window sublane regrouping Mosaic does not lower robustly."""
    b, h, w, c = a.shape
    p = jnp.pad(a, ((0, 0), (1, 1), (1, 1), (0, 0)))
    taps = [p[:, dh:dh + h, dw:dw + w, :] for dh in range(3) for dw in range(3)]
    return jnp.concatenate(taps, axis=-1).reshape(b * h * w, 9 * c)


def _depth_to_space2(y, b, h, w, c):
    """y: (B*H*W, 4*C) with columns (rh, rw, c) -> NHWC (B, 2H, 2W, C)."""
    y = y.reshape(b, h, w, 2, 2, c).transpose(0, 1, 3, 2, 4, 5)
    return y.reshape(b, 2 * h, 2 * w, c)


# ----------------------------------------------------------------------------
# Weight pre-arrangement (done once at init, never per forward)
# ----------------------------------------------------------------------------
def _convt1x1_to_matmul(w):
    """ConvTranspose2d weight (Cin,Cout,K,K) on a 1x1 input == dense map:
    (Cin, K*K*Cout) with columns ordered (h, w, co)."""
    cin, cout, kh, kw = w.shape
    return w.transpose(0, 2, 3, 1).reshape(cin, kh * kw * cout)


def _convt4x4s2p1_to_conv3x3_matrix(w):
    """ConvTranspose2d(k=4,s=2,p=1) == 3x3 stride-1 conv (pad 1) + depth_to_space(2).
    w: (Cin,Cout,4,4) -> (9*Cin, 4*Cout); rows (dh,dw,ci), cols (rh,rw,co)."""
    cin, cout = w.shape[:2]
    kmap = {(0, 0): 3, (0, 1): 1, (1, 1): 2, (1, 2): 0}
    zero = jnp.zeros((cin, cout), w.dtype)
    blocks = []
    for dh in range(3):
        for dw in range(3):
            cols = []
            for rh in range(2):
                for rw in range(2):
                    kh = kmap.get((rh, dh))
                    kw = kmap.get((rw, dw))
                    cols.append(zero if (kh is None or kw is None)
                                else w[:, :, kh, kw])
            blocks.append(jnp.concatenate(cols, axis=1))     # (Cin, 4*Cout)
    return jnp.concatenate(blocks, axis=0)                   # (9*Cin, 4*Cout)


def init_generator_params(key, noise_dim=NOISE_DIM, num_classes=NUM_CLASSES,
                          channel_size=CHANNEL_SIZE):
    ks = jax.random.split(key, 9)
    rnd = lambda k, s, scale=0.02: scale * jax.random.normal(k, s, jnp.float32)
    bf16_exact = lambda x: x.astype(jnp.bfloat16).astype(jnp.float32)
    # Raw weights are rounded to bf16-representable values once so the f32
    # reference and the bf16 Pallas path share identical weight values.
    w1 = bf16_exact(rnd(ks[1], (2 * noise_dim, 128, 7, 7)))
    w2 = bf16_exact(rnd(ks[2], (128, 64, 4, 4)))
    w3 = bf16_exact(rnd(ks[3], (64, channel_size, 4, 4)))
    # Conv biases of layers 1/2 are omitted: training-mode BatchNorm subtracts
    # the per-channel batch mean, which cancels a constant bias exactly.
    return {
        "emb": jax.random.normal(ks[0], (num_classes, noise_dim), jnp.float32),
        "w1": w1, "w2": w2, "w3": w3,                        # raw (reference)
        "w1mat": _convt1x1_to_matmul(w1).astype(jnp.bfloat16),              # (200, 6272)
        "w2mat": _convt4x4s2p1_to_conv3x3_matrix(w2).astype(jnp.bfloat16),  # (1152, 256)
        "w3mat": _convt4x4s2p1_to_conv3x3_matrix(w3).astype(jnp.bfloat16),  # (576, 4)
        "b3": bf16_exact(rnd(ks[4], (channel_size,))),
        "bn1_g": 1.0 + rnd(ks[5], (128,), 0.1),
        "bn1_b": rnd(ks[6], (128,), 0.1),
        "bn2_g": 1.0 + rnd(ks[7], (64,), 0.1),
        "bn2_b": rnd(ks[8], (64,), 0.1),
    }


# ----------------------------------------------------------------------------
# Generator forward
# ----------------------------------------------------------------------------
def generator_forward(params, noise, labels, *, compute_dtype=jnp.bfloat16):
    """noise: (B, 100, 1, 1) f32, labels: (B,) int32 -> (B, 1, 28, 28) f32."""
    B = noise.shape[0]
    cdt = jnp.dtype(compute_dtype)
    emb = jnp.take(params["emb"], labels, axis=0)                    # (B, 100)
    z = jnp.concatenate([noise.reshape(B, NOISE_DIM), emb], axis=1)  # (B, 200)

    w1 = params["w1mat"].astype(cdt)
    w2 = params["w2mat"].astype(cdt)
    w3 = params["w3mat"].astype(cdt)

    # Layer 1: ConvTranspose2d(200,128,7,1,0) on 1x1 input == dense matmul.
    y1, s1, q1 = matmul_stats(z.astype(cdt), w1, tile_target=_TILE_L1,
                              out_dtype=cdt)                         # (B, 6272)
    sc1, sh1 = _bn_affine(s1, q1, params["bn1_g"], params["bn1_b"],
                          n_groups=49, count=B * 49)
    # BN+ReLU apply fused (in XLA) with the im2col the next layer needs anyway.
    a1 = jnp.maximum(
        y1.astype(jnp.float32).reshape(B, 7, 7, 128) * sc1 + sh1, 0.0
    ).astype(cdt)                                                    # (B,7,7,128)

    # Layer 2: ConvTranspose2d(128,64,4,2,1) == 3x3 conv + depth_to_space(2).
    x2 = _im2col3x3(a1)                                              # (B*49, 1152)
    y2, s2, q2 = matmul_stats(x2, w2, tile_target=_TILE_L2, out_dtype=cdt)
    sc2, sh2 = _bn_affine(s2, q2, params["bn2_g"], params["bn2_b"],
                          n_groups=4, count=B * 196)
    a2 = jnp.maximum(
        y2.astype(jnp.float32).reshape(B, 7, 7, 2, 2, 64) * sc2 + sh2, 0.0
    ).astype(cdt).transpose(0, 1, 3, 2, 4, 5).reshape(B, 14, 14, 64)

    # Layer 3: ConvTranspose2d(64,1,4,2,1) + bias + tanh.
    x3 = _im2col3x3(a2)                                              # (B*196, 576)
    b3_row = jnp.tile(params["b3"], 4).reshape(1, 4 * CHANNEL_SIZE)
    y3 = matmul_bias_tanh(x3, w3, b3_row, tile_target=_TILE_L3)      # (B*196, 4)
    img = _depth_to_space2(y3, B, 14, 14, CHANNEL_SIZE)              # (B,28,28,1)
    return img.transpose(0, 3, 1, 2)                                 # NCHW


# ----------------------------------------------------------------------------
# Pure-JAX reference (no Pallas) used only for the self-check in __main__
# ----------------------------------------------------------------------------
def _reference_forward(params, noise, labels):
    def convt(x, w, stride, padding):
        k = w.shape[-1]
        wf = jnp.flip(w, (2, 3)).transpose(1, 0, 2, 3)       # (Cout, Cin, K, K)
        pad = k - 1 - padding
        return jax.lax.conv_general_dilated(
            x, wf, window_strides=(1, 1), padding=((pad, pad), (pad, pad)),
            lhs_dilation=(stride, stride),
            dimension_numbers=("NCHW", "OIHW", "NCHW"),
            precision=jax.lax.Precision.HIGHEST)

    def bn_relu(x, g, b):
        mean = jnp.mean(x, axis=(0, 2, 3), keepdims=True)
        var = jnp.mean((x - mean) ** 2, axis=(0, 2, 3), keepdims=True)
        xn = (x - mean) * jax.lax.rsqrt(var + BN_EPS)
        return jnp.maximum(xn * g.reshape(1, -1, 1, 1) + b.reshape(1, -1, 1, 1),
                           0.0)

    B = noise.shape[0]
    emb = jnp.take(params["emb"], labels, axis=0)
    x = jnp.concatenate([noise.reshape(B, NOISE_DIM), emb], axis=1)
    x = x.reshape(B, 2 * NOISE_DIM, 1, 1)
    x = bn_relu(convt(x, params["w1"], 1, 0), params["bn1_g"], params["bn1_b"])
    x = bn_relu(convt(x, params["w2"], 2, 1), params["bn2_g"], params["bn2_b"])
    x = convt(x, params["w3"], 2, 1) + params["b3"].reshape(1, -1, 1, 1)
    return jnp.tanh(x)


if __name__ == "__main__":
    key = jax.random.PRNGKey(0)
    kp, kn, kl = jax.random.split(key, 3)
    params = init_generator_params(kp)

    B = 2
    noise = jax.random.normal(kn, (B, NOISE_DIM, 1, 1), jnp.float32)
    labels = jax.random.randint(kl, (B,), 0, NUM_CLASSES, jnp.int32)

    fwd_bf16 = jax.jit(functools.partial(generator_forward,
                                         compute_dtype=jnp.bfloat16))
    fwd_f32 = jax.jit(functools.partial(generator_forward,
                                        compute_dtype=jnp.float32))

    out = jax.block_until_ready(fwd_bf16(params, noise, labels))
    assert out.shape == (B, CHANNEL_SIZE, 28, 28), out.shape
    assert bool(jnp.all(jnp.isfinite(out)))
    assert bool(jnp.all(jnp.abs(out) <= 1.0))        # tanh output range

    ref = _reference_forward(params, noise, labels)
    # f32 path first (tight layout check), then the production bf16 path.
    out32 = jax.block_until_ready(fwd_f32(params, noise, labels))
    d32 = float(jnp.max(jnp.abs(out32 - ref)))
    dbf = float(jnp.max(jnp.abs(out - ref)))
    assert d32 < 1e-2, d32                           # exact layout / BN check
    assert dbf < 6e-2, dbf                           # bf16 operand rounding only

    print("KERNEL_OK")
</pallas_src>

<mosaic_0001>
module attributes {stable_mosaic.version = 11 : i64} {
  func.func @_matmul_stats_kernel(%arg0: i32, %arg1: memref<16x200xbf16, #tpu.memory_space<vmem>>, %arg2: memref<200x6272xbf16, #tpu.memory_space<vmem>>, %arg3: memref<16x6272xbf16, #tpu.memory_space<vmem>>, %arg4: memref<1x6272xf32, #tpu.memory_space<vmem>>, %arg5: memref<1x6272xf32, #tpu.memory_space<vmem>>, %arg6: memref<1x6272xf32, #tpu.memory_space<vmem>>, %arg7: memref<1x6272xf32, #tpu.memory_space<vmem>>) attributes {dimension_semantics = [#tpu.dimension_semantics<arbitrary>], iteration_bounds = array<i64: 1>, scalar_prefetch = 0 : i64, scratch_operands = 2 : i64, tpu.core_type = #tpu.core_type<tc>, window_params = [{transform_indices = @transform_0, window_bounds = array<i64: 16, 200>}, {pipeline_mode = #tpu.pipeline_mode<synchronous>, transform_indices = @transform_1, window_bounds = array<i64: 200, 6272>}, {transform_indices = @transform_2, window_bounds = array<i64: 16, 6272>}, {pipeline_mode = #tpu.pipeline_mode<synchronous>, transform_indices = @transform_3, window_bounds = array<i64: 1, 6272>}, {pipeline_mode = #tpu.pipeline_mode<synchronous>, transform_indices = @transform_4, window_bounds = array<i64: 1, 6272>}]} {
    %c0_i32 = arith.constant 0 : i32
    %0 = arith.cmpi eq, %arg0, %c0_i32 : i32
    %1 = arith.extui %0 : i1 to i32
    %c0_i32_0 = arith.constant 0 : i32
    %2 = arith.cmpi ne, %1, %c0_i32_0 : i32
    scf.if %2 {
      %cst_18 = arith.constant 0.000000e+00 : f32
      %22 = vector.broadcast %cst_18 : f32 to vector<1x6272xf32>
      %c0_19 = arith.constant 0 : index
      %c0_20 = arith.constant 0 : index
      %23 = vector.load %arg6[%c0_19, %c0_20] : memref<1x6272xf32, #tpu.memory_space<vmem>>, vector<1x6272xf32>
      tpu.vector_store %arg6[%c0_19, %c0_20], %22 {strides = array<i32>} : memref<1x6272xf32, #tpu.memory_space<vmem>>, vector<1x6272xf32>,
      %cst_21 = arith.constant 0.000000e+00 : f32
      %24 = vector.broadcast %cst_21 : f32 to vector<1x6272xf32>
      %c0_22 = arith.constant 0 : index
      %c0_23 = arith.constant 0 : index
      %25 = vector.load %arg7[%c0_22, %c0_23] : memref<1x6272xf32, #tpu.memory_space<vmem>>, vector<1x6272xf32>
      tpu.vector_store %arg7[%c0_22, %c0_23], %24 {strides = array<i32>} : memref<1x6272xf32, #tpu.memory_space<vmem>>, vector<1x6272xf32>,
    } else {
    }
    %c0 = arith.constant 0 : index
    %c0_1 = arith.constant 0 : index
    %3 = vector.load %arg1[%c0, %c0_1] : memref<16x200xbf16, #tpu.memory_space<vmem>>, vector<16x200xbf16>
    %c0_2 = arith.constant 0 : index
    %c0_3 = arith.constant 0 : index
    %4 = vector.load %arg2[%c0_2, %c0_3] : memref<200x6272xbf16, #tpu.memory_space<vmem>>, vector<200x6272xbf16>
    %cst = arith.constant dense<0.000000e+00> : vector<16x6272xf32>
    %5 = tpu.matmul %3, %4, %cst {dimension_numbers = #tpu.dot_dimension_numbers<[1], [0], [0], [1], [0, 0, 1, 1], [], []>} : vector<16x200xbf16>, vector<200x6272xbf16>, vector<16x6272xf32> -> vector<16x6272xf32>
    %6 = arith.truncf %5 : vector<16x6272xf32> to vector<16x6272xbf16>
    %c0_4 = arith.constant 0 : index
    %c0_5 = arith.constant 0 : index
    %7 = vector.load %arg3[%c0_4, %c0_5] : memref<16x6272xbf16, #tpu.memory_space<vmem>>, vector<16x6272xbf16>
    tpu.vector_store %arg3[%c0_4, %c0_5], %6 {strides = array<i32>} : memref<16x6272xbf16, #tpu.memory_space<vmem>>, vector<16x6272xbf16>,
    %c0_6 = arith.constant 0 : index
    %c0_7 = arith.constant 0 : index
    %8 = vector.load %arg6[%c0_6, %c0_7] : memref<1x6272xf32, #tpu.memory_space<vmem>>, vector<1x6272xf32>
    %cst_8 = arith.constant dense<0.000000e+00> : vector<6272xf32>
    %9 = vector.multi_reduction <add>, %5, %cst_8 [0] : vector<16x6272xf32> to vector<6272xf32>
    %10 = vector.shape_cast %9 : vector<6272xf32> to vector<1x6272xf32>
    %11 = arith.addf %8, %10 : vector<1x6272xf32>
    %c0_9 = arith.constant 0 : index
    %c0_10 = arith.constant 0 : index
    %12 = vector.load %arg6[%c0_9, %c0_10] : memref<1x6272xf32, #tpu.memory_space<vmem>>, vector<1x6272xf32>
    tpu.vector_store %arg6[%c0_9, %c0_10], %11 {strides = array<i32>} : memref<1x6272xf32, #tpu.memory_space<vmem>>, vector<1x6272xf32>,
    %c0_11 = arith.constant 0 : index
    %c0_12 = arith.constant 0 : index
    %13 = vector.load %arg7[%c0_11, %c0_12] : memref<1x6272xf32, #tpu.memory_space<vmem>>, vector<1x6272xf32>
    %14 = arith.mulf %5, %5 : vector<16x6272xf32>
    %cst_13 = arith.constant dense<0.000000e+00> : vector<6272xf32>
    %15 = vector.multi_reduction <add>, %14, %cst_13 [0] : vector<16x6272xf32> to vector<6272xf32>
    %16 = vector.shape_cast %15 : vector<6272xf32> to vector<1x6272xf32>
    %17 = arith.addf %13, %16 : vector<1x6272xf32>
    %c0_14 = arith.constant 0 : index
    %c0_15 = arith.constant 0 : index
    %18 = vector.load %arg7[%c0_14, %c0_15] : memref<1x6272xf32, #tpu.memory_space<vmem>>, vector<1x6272xf32>
    tpu.vector_store %arg7[%c0_14, %c0_15], %17 {strides = array<i32>} : memref<1x6272xf32, #tpu.memory_space<vmem>>, vector<1x6272xf32>,
    %c0_i32_16 = arith.constant 0 : i32
    %19 = arith.cmpi eq, %arg0, %c0_i32_16 : i32
    %20 = arith.extui %19 : i1 to i32
    %c0_i32_17 = arith.constant 0 : i32
    %21 = arith.cmpi ne, %20, %c0_i32_17 : i32
    scf.if %21 {
      %c0_18 = arith.constant 0 : index
      %c0_19 = arith.constant 0 : index
      %22 = vector.load %arg6[%c0_18, %c0_19] : memref<1x6272xf32, #tpu.memory_space<vmem>>, vector<1x6272xf32>
      %c0_20 = arith.constant 0 : index
      %c0_21 = arith.constant 0 : index
      %23 = vector.load %arg4[%c0_20, %c0_21] : memref<1x6272xf32, #tpu.memory_space<vmem>>, vector<1x6272xf32>
      tpu.vector_store %arg4[%c0_20, %c0_21], %22 {strides = array<i32>} : memref<1x6272xf32, #tpu.memory_space<vmem>>, vector<1x6272xf32>,
      %c0_22 = arith.constant 0 : index
      %c0_23 = arith.constant 0 : index
      %24 = vector.load %arg7[%c0_22, %c0_23] : memref<1x6272xf32, #tpu.memory_space<vmem>>, vector<1x6272xf32>
      %c0_24 = arith.constant 0 : index
      %c0_25 = arith.constant 0 : index
      %25 = vector.load %arg5[%c0_24, %c0_25] : memref<1x6272xf32, #tpu.memory_space<vmem>>, vector<1x6272xf32>
      tpu.vector_store %arg5[%c0_24, %c0_25], %24 {strides = array<i32>} : memref<1x6272xf32, #tpu.memory_space<vmem>>, vector<1x6272xf32>,
    } else {
    }
    return
  }
  func.func @transform_0(%arg0: i32) -> (i32, i32) {
    %c0_i32 = arith.constant 0 : i32
    %c0_i32_0 = arith.constant 0 : i32
    return %arg0, %c0_i32 : i32, i32
  }
  func.func @transform_1(%arg0: i32) -> (i32, i32) {
    %c0_i32 = arith.constant 0 : i32
    %c0_i32_0 = arith.constant 0 : i32
    %c0_i32_1 = arith.constant 0 : i32
    return %c0_i32, %c0_i32_0 : i32, i32
  }
  func.func @transform_2(%arg0: i32) -> (i32, i32) {
    %c0_i32 = arith.constant 0 : i32
    %c0_i32_0 = arith.constant 0 : i32
    return %arg0, %c0_i32 : i32, i32
  }
  func.func @transform_3(%arg0: i32) -> (i32, i32) {
    %c0_i32 = arith.constant 0 : i32
    %c0_i32_0 = arith.constant 0 : i32
    %c0_i32_1 = arith.constant 0 : i32
    return %c0_i32, %c0_i32_0 : i32, i32
  }
  func.func @transform_4(%arg0: i32) -> (i32, i32) {
    %c0_i32 = arith.constant 0 : i32
    %c0_i32_0 = arith.constant 0 : i32
    %c0_i32_1 = arith.constant 0 : i32
    return %c0_i32, %c0_i32_0 : i32, i32
  }
}

module attributes {stable_mosaic.version = 11 : i64} {
  func.func @_matmul_stats_kernel(%arg0: i32, %arg1: memref<112x1152xbf16, #tpu.memory_space<vmem>>, %arg2: memref<1152x256xbf16, #tpu.memory_space<vmem>>, %arg3: memref<112x256xbf16, #tpu.memory_space<vmem>>, %arg4: memref<1x256xf32, #tpu.memory_space<vmem>>, %arg5: memref<1x256xf32, #tpu.memory_space<vmem>>, %arg6: memref<1x256xf32, #tpu.memory_space<vmem>>, %arg7: memref<1x256xf32, #tpu.memory_space<vmem>>) attributes {dimension_semantics = [#tpu.dimension_semantics<arbitrary>], iteration_bounds = array<i64: 1>, scalar_prefetch = 0 : i64, scratch_operands = 2 : i64, tpu.core_type = #tpu.core_type<tc>, window_params = [{transform_indices = @transform_0, window_bounds = array<i64: 112, 1152>}, {pipeline_mode = #tpu.pipeline_mode<synchronous>, transform_indices = @transform_1, window_bounds = array<i64: 1152, 256>}, {transform_indices = @transform_2, window_bounds = array<i64: 112, 256>}, {pipeline_mode = #tpu.pipeline_mode<synchronous>, transform_indices = @transform_3, window_bounds = array<i64: 1, 256>}, {pipeline_mode = #tpu.pipeline_mode<synchronous>, transform_indices = @transform_4, window_bounds = array<i64: 1, 256>}]} {
    %c0_i32 = arith.constant 0 : i32
    %0 = arith.cmpi eq, %arg0, %c0_i32 : i32
    %1 = arith.extui %0 : i1 to i32
    %c0_i32_0 = arith.constant 0 : i32
    %2 = arith.cmpi ne, %1, %c0_i32_0 : i32
    scf.if %2 {
      %cst_18 = arith.constant 0.000000e+00 : f32
      %22 = vector.broadcast %cst_18 : f32 to vector<1x256xf32>
      %c0_19 = arith.constant 0 : index
      %c0_20 = arith.constant 0 : index
      %23 = vector.load %arg6[%c0_19, %c0_20] : memref<1x256xf32, #tpu.memory_space<vmem>>, vector<1x256xf32>
      tpu.vector_store %arg6[%c0_19, %c0_20], %22 {strides = array<i32>} : memref<1x256xf32, #tpu.memory_space<vmem>>, vector<1x256xf32>,
      %cst_21 = arith.constant 0.000000e+00 : f32
      %24 = vector.broadcast %cst_21 : f32 to vector<1x256xf32>
      %c0_22 = arith.constant 0 : index
      %c0_23 = arith.constant 0 : index
      %25 = vector.load %arg7[%c0_22, %c0_23] : memref<1x256xf32, #tpu.memory_space<vmem>>, vector<1x256xf32>
      tpu.vector_store %arg7[%c0_22, %c0_23], %24 {strides = array<i32>} : memref<1x256xf32, #tpu.memory_space<vmem>>, vector<1x256xf32>,
    } else {
    }
    %c0 = arith.constant 0 : index
    %c0_1 = arith.constant 0 : index
    %3 = vector.load %arg1[%c0, %c0_1] : memref<112x1152xbf16, #tpu.memory_space<vmem>>, vector<112x1152xbf16>
    %c0_2 = arith.constant 0 : index
    %c0_3 = arith.constant 0 : index
    %4 = vector.load %arg2[%c0_2, %c0_3] : memref<1152x256xbf16, #tpu.memory_space<vmem>>, vector<1152x256xbf16>
    %cst = arith.constant dense<0.000000e+00> : vector<112x256xf32>
    %5 = tpu.matmul %3, %4, %cst {dimension_numbers = #tpu.dot_dimension_numbers<[1], [0], [0], [1], [0, 0, 1, 1], [], []>} : vector<112x1152xbf16>, vector<1152x256xbf16>, vector<112x256xf32> -> vector<112x256xf32>
    %6 = arith.truncf %5 : vector<112x256xf32> to vector<112x256xbf16>
    %c0_4 = arith.constant 0 : index
    %c0_5 = arith.constant 0 : index
    %7 = vector.load %arg3[%c0_4, %c0_5] : memref<112x256xbf16, #tpu.memory_space<vmem>>, vector<112x256xbf16>
    tpu.vector_store %arg3[%c0_4, %c0_5], %6 {strides = array<i32>} : memref<112x256xbf16, #tpu.memory_space<vmem>>, vector<112x256xbf16>,
    %c0_6 = arith.constant 0 : index
    %c0_7 = arith.constant 0 : index
    %8 = vector.load %arg6[%c0_6, %c0_7] : memref<1x256xf32, #tpu.memory_space<vmem>>, vector<1x256xf32>
    %cst_8 = arith.constant dense<0.000000e+00> : vector<256xf32>
    %9 = vector.multi_reduction <add>, %5, %cst_8 [0] : vector<112x256xf32> to vector<256xf32>
    %10 = vector.shape_cast %9 : vector<256xf32> to vector<1x256xf32>
    %11 = arith.addf %8, %10 : vector<1x256xf32>
    %c0_9 = arith.constant 0 : index
    %c0_10 = arith.constant 0 : index
    %12 = vector.load %arg6[%c0_9, %c0_10] : memref<1x256xf32, #tpu.memory_space<vmem>>, vector<1x256xf32>
    tpu.vector_store %arg6[%c0_9, %c0_10], %11 {strides = array<i32>} : memref<1x256xf32, #tpu.memory_space<vmem>>, vector<1x256xf32>,
    %c0_11 = arith.constant 0 : index
    %c0_12 = arith.constant 0 : index
    %13 = vector.load %arg7[%c0_11, %c0_12] : memref<1x256xf32, #tpu.memory_space<vmem>>, vector<1x256xf32>
    %14 = arith.mulf %5, %5 : vector<112x256xf32>
    %cst_13 = arith.constant dense<0.000000e+00> : vector<256xf32>
    %15 = vector.multi_reduction <add>, %14, %cst_13 [0] : vector<112x256xf32> to vector<256xf32>
    %16 = vector.shape_cast %15 : vector<256xf32> to vector<1x256xf32>
    %17 = arith.addf %13, %16 : vector<1x256xf32>
    %c0_14 = arith.constant 0 : index
    %c0_15 = arith.constant 0 : index
    %18 = vector.load %arg7[%c0_14, %c0_15] : memref<1x256xf32, #tpu.memory_space<vmem>>, vector<1x256xf32>
    tpu.vector_store %arg7[%c0_14, %c0_15], %17 {strides = array<i32>} : memref<1x256xf32, #tpu.memory_space<vmem>>, vector<1x256xf32>,
    %c0_i32_16 = arith.constant 0 : i32
    %19 = arith.cmpi eq, %arg0, %c0_i32_16 : i32
    %20 = arith.extui %19 : i1 to i32
    %c0_i32_17 = arith.constant 0 : i32
    %21 = arith.cmpi ne, %20, %c0_i32_17 : i32
    scf.if %21 {
      %c0_18 = arith.constant 0 : index
      %c0_19 = arith.constant 0 : index
      %22 = vector.load %arg6[%c0_18, %c0_19] : memref<1x256xf32, #tpu.memory_space<vmem>>, vector<1x256xf32>
      %c0_20 = arith.constant 0 : index
      %c0_21 = arith.constant 0 : index
      %23 = vector.load %arg4[%c0_20, %c0_21] : memref<1x256xf32, #tpu.memory_space<vmem>>, vector<1x256xf32>
      tpu.vector_store %arg4[%c0_20, %c0_21], %22 {strides = array<i32>} : memref<1x256xf32, #tpu.memory_space<vmem>>, vector<1x256xf32>,
      %c0_22 = arith.constant 0 : index
      %c0_23 = arith.constant 0 : index
      %24 = vector.load %arg7[%c0_22, %c0_23] : memref<1x256xf32, #tpu.memory_space<vmem>>, vector<1x256xf32>
      %c0_24 = arith.constant 0 : index
      %c0_25 = arith.constant 0 : index
      %25 = vector.load %arg5[%c0_24, %c0_25] : memref<1x256xf32, #tpu.memory_space<vmem>>, vector<1x256xf32>
      tpu.vector_store %arg5[%c0_24, %c0_25], %24 {strides = array<i32>} : memref<1x256xf32, #tpu.memory_space<vmem>>, vector<1x256xf32>,
    } else {
    }
    return
  }
  func.func @transform_0(%arg0: i32) -> (i32, i32) {
    %c0_i32 = arith.constant 0 : i32
    %c0_i32_0 = arith.constant 0 : i32
    return %arg0, %c0_i32 : i32, i32
  }
  func.func @transform_1(%arg0: i32) -> (i32, i32) {
    %c0_i32 = arith.constant 0 : i32
    %c0_i32_0 = arith.constant 0 : i32
    %c0_i32_1 = arith.constant 0 : i32
    return %c0_i32, %c0_i32_0 : i32, i32
  }
  func.func @transform_2(%arg0: i32) -> (i32, i32) {
    %c0_i32 = arith.constant 0 : i32
    %c0_i32_0 = arith.constant 0 : i32
    return %arg0, %c0_i32 : i32, i32
  }
  func.func @transform_3(%arg0: i32) -> (i32, i32) {
    %c0_i32 = arith.constant 0 : i32
    %c0_i32_0 = arith.constant 0 : i32
    %c0_i32_1 = arith.constant 0 : i32
    return %c0_i32, %c0_i32_0 : i32, i32
  }
  func.func @transform_4(%arg0: i32) -> (i32, i32) {
    %c0_i32 = arith.constant 0 : i32
    %c0_i32_0 = arith.constant 0 : i32
    %c0_i32_1 = arith.constant 0 : i32
    return %c0_i32, %c0_i32_0 : i32, i32
  }
}

module attributes {stable_mosaic.version = 11 : i64} {
  func.func @_matmul_bias_tanh_kernel(%arg0: i32, %arg1: memref<400x576xbf16, #tpu.memory_space<vmem>>, %arg2: memref<576x4xbf16, #tpu.memory_space<vmem>>, %arg3: memref<1x4xf32, #tpu.memory_space<vmem>>, %arg4: memref<400x4xf32, #tpu.memory_space<vmem>>) attributes {dimension_semantics = [#tpu.dimension_semantics<parallel>], iteration_bounds = array<i64: 1>, scalar_prefetch = 0 : i64, scratch_operands = 0 : i64, tpu.core_type = #tpu.core_type<tc>, window_params = [{transform_indices = @transform_0, window_bounds = array<i64: 400, 576>}, {pipeline_mode = #tpu.pipeline_mode<synchronous>, transform_indices = @transform_1, window_bounds = array<i64: 576, 4>}, {pipeline_mode = #tpu.pipeline_mode<synchronous>, transform_indices = @transform_2, window_bounds = array<i64: 1, 4>}, {transform_indices = @transform_3, window_bounds = array<i64: 400, 4>}]} {
    %c0 = arith.constant 0 : index
    %c0_0 = arith.constant 0 : index
    %0 = vector.load %arg1[%c0, %c0_0] : memref<400x576xbf16, #tpu.memory_space<vmem>>, vector<400x576xbf16>
    %c0_1 = arith.constant 0 : index
    %c0_2 = arith.constant 0 : index
    %1 = vector.load %arg2[%c0_1, %c0_2] : memref<576x4xbf16, #tpu.memory_space<vmem>>, vector<576x4xbf16>
    %cst = arith.constant dense<0.000000e+00> : vector<400x4xf32>
    %2 = tpu.matmul %0, %1, %cst {dimension_numbers = #tpu.dot_dimension_numbers<[1], [0], [0], [1], [0, 0, 1, 1], [], []>} : vector<400x576xbf16>, vector<576x4xbf16>, vector<400x4xf32> -> vector<400x4xf32>
    %c0_3 = arith.constant 0 : index
    %c0_4 = arith.constant 0 : index
    %3 = vector.load %arg3[%c0_3, %c0_4] : memref<1x4xf32, #tpu.memory_space<vmem>>, vector<1x4xf32>
    %4 = vector.broadcast %3 : vector<1x4xf32> to vector<400x4xf32>
    %5 = arith.addf %2, %4 : vector<400x4xf32>
    %6 = math.tanh %5 : vector<400x4xf32>
    %c0_5 = arith.constant 0 : index
    %c0_6 = arith.constant 0 : index
    %7 = vector.load %arg4[%c0_5, %c0_6] : memref<400x4xf32, #tpu.memory_space<vmem>>, vector<400x4xf32>
    tpu.vector_store %arg4[%c0_5, %c0_6], %6 {strides = array<i32>} : memref<400x4xf32, #tpu.memory_space<vmem>>, vector<400x4xf32>,
    return
  }
  func.func @transform_0(%arg0: i32) -> (i32, i32) {
    %c0_i32 = arith.constant 0 : i32
    %c0_i32_0 = arith.constant 0 : i32
    return %arg0, %c0_i32 : i32, i32
  }
  func.func @transform_1(%arg0: i32) -> (i32, i32) {
    %c0_i32 = arith.constant 0 : i32
    %c0_i32_0 = arith.constant 0 : i32
    %c0_i32_1 = arith.constant 0 : i32
    return %c0_i32, %c0_i32_0 : i32, i32
  }
  func.func @transform_2(%arg0: i32) -> (i32, i32) {
    %c0_i32 = arith.constant 0 : i32
    %c0_i32_0 = arith.constant 0 : i32
    %c0_i32_1 = arith.constant 0 : i32
    return %c0_i32, %c0_i32_0 : i32, i32
  }
  func.func @transform_3(%arg0: i32) -> (i32, i32) {
    %c0_i32 = arith.constant 0 : i32
    %c0_i32_0 = arith.constant 0 : i32
    return %arg0, %c0_i32 : i32, i32
  }
}

</mosaic_0001>

<bundles_post_ra>
// kernel: generator_forward.4
= control target key start
LH: loop header
LB: loop body
LE: loop exit
PB: predicated region body
PF: predicated region fallthrough
CT: control target
= control target key end

     0   :  { %s3673_s1 = inlined_call_operand.vmem [shape: bf16[1152,256], index: 1, kind: input, shape index: {}]   ;;  %s3674_s0 = inlined_call_operand.vmem [shape: bf16[112,1152], index: 0, kind: input, shape index: {}]   ;;  %s3675_s2 = inlined_call_operand.vmem [shape: bf16[112,256], index: 2, kind: output, shape index: {0}]   ;;  %s3676_s3 = inlined_call_operand.vmem [shape: f32[1,256], index: 3, kind: output, shape index: {1}]   ;;  %s3677_s4 = inlined_call_operand.vmem [shape: f32[1,256], index: 4, kind: output, shape index: {2}]  }
   0x1   :  { %v2445_v0 = vld [vmem:[%s3673_s1 + $0x4] ss:$8 sps:$4 sm:$0xff]   ;;  %v2449_v2 = vld [vmem:[%s3673_s1] ss:$8 sps:$4 sm:$0xff]   ;;  %v2451_v4 = vld [vmem:[%s3673_s1 + $0x14] ss:$8 sps:$4 sm:$0xff]  }
   0x2   :  { %v2447_v1 = vld [vmem:[%s3673_s1 + $0x204] ss:$8 sps:$4 sm:$0xff]   ;;  %1281 = vmatprep.subr.bf16.mxu1 %v2445_v0  ;;  %v2450_v3 = vld [vmem:[%s3673_s1 + $0x200] ss:$8 sps:$4 sm:$0xff]   ;;  %v2453_v5 = vld [vmem:[%s3673_s1 + $0x214] ss:$8 sps:$4 sm:$0xff]  }
   0x3   :  { %1487 = vmatprep.subr.bf16.mxu0 %v2447_v1  ;;  %1282 = vmatpush1.bf16.msra.mxu1 %v2449_v2  ;;  %v2455_v6 = vld [vmem:[%s3673_s1 + $0x10] ss:$8 sps:$4 sm:$0xff]   ;;  %v2457_v8 = vld [vmem:[%s3673_s1 + $0x24] ss:$8 sps:$4 sm:$0xff]   ;;  %v2461_v10 = vld [vmem:[%s3673_s1 + $0x20] ss:$8 sps:$4 sm:$0xff]  }
   0x4   :  { %1488 = vmatpush1.bf16.msra.mxu0 %v2450_v3  ;;  %1283 = vmatprep.subr.bf16.mxu1 %v2451_v4  ;;  %v2456_v7 = vld [vmem:[%s3673_s1 + $0x210] ss:$8 sps:$4 sm:$0xff]   ;;  %v2459_v9 = vld [vmem:[%s3673_s1 + $0x224] ss:$8 sps:$4 sm:$0xff]   ;;  %v2462_v11 = vld [vmem:[%s3673_s1 + $0x220] ss:$8 sps:$4 sm:$0xff]  }
   0x5   :  { %1489 = vmatprep.subr.bf16.mxu0 %v2453_v5  ;;  %v2463_v12 = vld [vmem:[%s3673_s1 + $0x34] ss:$8 sps:$4 sm:$0xff]   ;;  %v2467_v14 = vld [vmem:[%s3673_s1 + $0x30] ss:$8 sps:$4 sm:$0xff]   ;;  %v2469_v16 = vld [vmem:[%s3673_s1 + $0x44] ss:$8 sps:$4 sm:$0xff]  }
   0x6   :  { %v2465_v13 = vld [vmem:[%s3673_s1 + $0x234] ss:$8 sps:$4 sm:$0xff]   ;;  %v2468_v15 = vld [vmem:[%s3673_s1 + $0x230] ss:$8 sps:$4 sm:$0xff]   ;;  %v2471_v17 = vld [vmem:[%s3673_s1 + $0x244] ss:$8 sps:$4 sm:$0xff]  }
   0x7   :  { %1284 = vmatpush1.bf16.msra.mxu1 %v2455_v6  ;;  %v2473_v18 = vld [vmem:[%s3673_s1 + $0x40] ss:$8 sps:$4 sm:$0xff]   ;;  %v2475_v20 = vld [vmem:[%s3673_s1 + $0x54] ss:$8 sps:$4 sm:$0xff]   ;;  %v2479_v22 = vld [vmem:[%s3673_s1 + $0x50] ss:$8 sps:$4 sm:$0xff]  }
   0x8   :  { %1490 = vmatpush1.bf16.msra.mxu0 %v2456_v7  ;;  %1285 = vmatprep.subr.bf16.mxu1 %v2457_v8  ;;  %v2474_v19 = vld [vmem:[%s3673_s1 + $0x240] ss:$8 sps:$4 sm:$0xff]   ;;  %v2477_v21 = vld [vmem:[%s3673_s1 + $0x254] ss:$8 sps:$4 sm:$0xff]   ;;  %v2480_v23 = vld [vmem:[%s3673_s1 + $0x250] ss:$8 sps:$4 sm:$0xff]  }
   0x9   :  { %1491 = vmatprep.subr.bf16.mxu0 %v2459_v9  ;;  %v2481_v24 = vld [vmem:[%s3673_s1 + $0x64] ss:$8 sps:$4 sm:$0xff]   ;;  %v2485_v26 = vld [vmem:[%s3673_s1 + $0x60] ss:$8 sps:$4 sm:$0xff]   ;;  %v2487_v28 = vld [vmem:[%s3673_s1 + $0x74] ss:$8 sps:$4 sm:$0xff]  }
   0xa   :  { %v2483_v25 = vld [vmem:[%s3673_s1 + $0x264] ss:$8 sps:$4 sm:$0xff]   ;;  %v2486_v27 = vld [vmem:[%s3673_s1 + $0x260] ss:$8 sps:$4 sm:$0xff]   ;;  %v2489_v29 = vld [vmem:[%s3673_s1 + $0x274] ss:$8 sps:$4 sm:$0xff]  }
   0xb   :  { %1286 = vmatpush1.bf16.msra.mxu1 %v2461_v10  ;;  %v2491_v30 = vld [vmem:[%s3673_s1 + $0x70] ss:$8 sps:$4 sm:$0xff]   ;;  %v2493_v32 = vld [vmem:[%s3673_s1 + $0x84] ss:$8 sps:$4 sm:$0xff]   ;;  %v2497_v34 = vld [vmem:[%s3673_s1 + $0x80] ss:$8 sps:$4 sm:$0xff]  }
   0xc   :  { %1492 = vmatpush1.bf16.msra.mxu0 %v2462_v11  ;;  %1287 = vmatprep.subr.bf16.mxu1 %v2463_v12  ;;  %v2492_v31 = vld [vmem:[%s3673_s1 + $0x270] ss:$8 sps:$4 sm:$0xff]   ;;  %v2495_v33 = vld [vmem:[%s3673_s1 + $0x284] ss:$8 sps:$4 sm:$0xff]   ;;  %v2498_v35 = vld [vmem:[%s3673_s1 + $0x280] ss:$8 sps:$4 sm:$0xff]  }
   0xd   :  { %1493 = vmatprep.subr.bf16.mxu0 %v2465_v13  ;;  %v2499_v36 = vld [vmem:[%s3673_s1 + $0x94] ss:$8 sps:$4 sm:$0xff]   ;;  %v2503_v38 = vld [vmem:[%s3673_s1 + $0x90] ss:$8 sps:$4 sm:$0xff]   ;;  %v2505_v40 = vld [vmem:[%s3673_s1 + $0xa4] ss:$8 sps:$4 sm:$0xff]  }
   0xe   :  { %v2501_v37 = vld [vmem:[%s3673_s1 + $0x294] ss:$8 sps:$4 sm:$0xff]   ;;  %v2504_v39 = vld [vmem:[%s3673_s1 + $0x290] ss:$8 sps:$4 sm:$0xff]   ;;  %v2507_v41 = vld [vmem:[%s3673_s1 + $0x2a4] ss:$8 sps:$4 sm:$0xff]  }
   0xf   :  { %1288 = vmatpush1.bf16.msra.mxu1 %v2467_v14  ;;  %v2509_v42 = vld [vmem:[%s3673_s1 + $0xa0] ss:$8 sps:$4 sm:$0xff]   ;;  %v2511_v44 = vld [vmem:[%s3673_s1 + $0xb4] ss:$8 sps:$4 sm:$0xff]   ;;  %v2515_v46 = vld [vmem:[%s3673_s1 + $0xb0] ss:$8 sps:$4 sm:$0xff]  }
  0x10   :  { %1494 = vmatpush1.bf16.msra.mxu0 %v2468_v15  ;;  %1289 = vmatprep.subr.bf16.mxu1 %v2469_v16  ;;  %v2510_v43 = vld [vmem:[%s3673_s1 + $0x2a0] ss:$8 sps:$4 sm:$0xff]   ;;  %v2513_v45 = vld [vmem:[%s3673_s1 + $0x2b4] ss:$8 sps:$4 sm:$0xff]   ;;  %v2516_v47 = vld [vmem:[%s3673_s1 + $0x2b0] ss:$8 sps:$4 sm:$0xff]  }
  0x11   :  { %1495 = vmatprep.subr.bf16.mxu0 %v2471_v17  ;;  %v2543_v48 = vld [vmem:[%s3674_s0 + $0x4] ss:$36 sps:$4 sm:$0xff]   ;;  %v2549_v51 = vld [vmem:[%s3674_s0 + $0x14] ss:$36 sps:$4 sm:$0xff]   ;;  %v2571_v10 = vld [vmem:[%s3674_s0 + $0x5c] ss:$36 sps:$4 sm:$0xff]  }
  0x12   :  { %v2517_v49 = vld [vmem:[%s3673_s1 + $0xc4] ss:$8 sps:$4 sm:$0xff]   ;;  %1313 = vmatprep.mubr.bf16.mxu1 %v2543_v48  ;;  %v2521_v52 = vld [vmem:[%s3673_s1 + $0xc0] ss:$8 sps:$4 sm:$0xff]   ;;  %v2523_v54 = vld [vmem:[%s3673_s1 + $0xd4] ss:$8 sps:$4 sm:$0xff]   ;;  %1519 = vmatprep.mubr.bf16.mxu0 %v2549_v51 }
  0x13   :  { %1290 = vmatpush1.bf16.msra.mxu1 %v2473_v18  ;;  %v2519_v50 = vld [vmem:[%s3673_s1 + $0x2c4] ss:$8 sps:$4 sm:$0xff]   ;;  %v2522_v53 = vld [vmem:[%s3673_s1 + $0x2c0] ss:$8 sps:$4 sm:$0xff]   ;;  %v2525_v55 = vld [vmem:[%s3673_s1 + $0x2d4] ss:$8 sps:$4 sm:$0xff]  }
  0x14   :  { %1496 = vmatpush1.bf16.msra.mxu0 %v2474_v19  ;;  %1291 = vmatprep.subr.bf16.mxu1 %v2475_v20  ;;  %v2527_v56 = vld [vmem:[%s3673_s1 + $0xd0] ss:$8 sps:$4 sm:$0xff]   ;;  %v2529_v58 = vld [vmem:[%s3673_s1 + $0xe4] ss:$8 sps:$4 sm:$0xff]   ;;  %v2533_v60 = vld [vmem:[%s3673_s1 + $0xe0] ss:$8 sps:$4 sm:$0xff]  }
  0x15   :  { %1497 = vmatprep.subr.bf16.mxu0 %v2477_v21  ;;  %v2528_v57 = vld [vmem:[%s3673_s1 + $0x2d0] ss:$8 sps:$4 sm:$0xff]   ;;  %v2531_v59 = vld [vmem:[%s3673_s1 + $0x2e4] ss:$8 sps:$4 sm:$0xff]   ;;  %v2534_v61 = vld [vmem:[%s3673_s1 + $0x2e0] ss:$8 sps:$4 sm:$0xff]  }
  0x16   :  { %v2535_v62 = vld [vmem:[%s3673_s1 + $0xf4] ss:$8 sps:$4 sm:$0xff]   ;;  %v2539_v0 = vld [vmem:[%s3673_s1 + $0xf0] ss:$8 sps:$4 sm:$0xff]   ;;  %v2546_v2 = vld [vmem:[%s3673_s1 + $0x104] ss:$8 sps:$4 sm:$0xff]  }
  0x17   :  { %1292 = vmatpush1.bf16.msra.mxu1 %v2479_v22  ;;  %v2537_v63 = vld [vmem:[%s3673_s1 + $0x2f4] ss:$8 sps:$4 sm:$0xff]   ;;  %v2540_v1 = vld [vmem:[%s3673_s1 + $0x2f0] ss:$8 sps:$4 sm:$0xff]   ;;  %v2984_v3 = vld [vmem:[%s3673_s1 + $0x304] ss:$8 sps:$4 sm:$0xff]  }
  0x18   :  { %1498 = vmatpush1.bf16.msra.mxu0 %v2480_v23  ;;  %1293 = vmatprep.subr.bf16.mxu1 %v2481_v24  ;;  %v2541_v4 = vld [vmem:[%s3674_s0] ss:$36 sps:$4 sm:$0xff]   ;;  %v2547_v6 = vld [vmem:[%s3674_s0 + $0x10] ss:$36 sps:$4 sm:$0xff]   ;;  %v2575_v18 = vld [vmem:[%s3674_s0 + $0x58] ss:$36 sps:$4 sm:$0xff]  }
  0x19   :  { %1499 = vmatprep.subr.bf16.mxu0 %v2483_v25  ;;  %v2544_v5 = vld [vmem:[%s3673_s1 + $0x100] ss:$8 sps:$4 sm:$0xff]   ;;  %v2555_v8 = vld [vmem:[%s3673_s1 + $0x114] ss:$8 sps:$4 sm:$0xff]   ;;  %v2573_v11 = vld [vmem:[%s3674_s0 + $0x4c] ss:$36 sps:$4 sm:$0xff]  }
  0x1a   :  { %v2998_v7 = vld [vmem:[%s3673_s1 + $0x300] ss:$8 sps:$4 sm:$0xff]   ;;  %v3007_v9 = vld [vmem:[%s3673_s1 + $0x314] ss:$8 sps:$4 sm:$0xff]   ;;  %v2553_v12 = vld [vmem:[%s3673_s1 + $0x110] ss:$8 sps:$4 sm:$0xff]  }
  0x1b   :  { %1294 = vmatpush1.bf16.msra.mxu1 %v2485_v26  ;;  %v3021_v13 = vld [vmem:[%s3673_s1 + $0x310] ss:$8 sps:$4 sm:$0xff]   ;;  %v2561_v14 = vld [vmem:[%s3673_s1 + $0x124] ss:$8 sps:$4 sm:$0xff]   ;;  %v2559_v16 = vld [vmem:[%s3673_s1 + $0x120] ss:$8 sps:$4 sm:$0xff]  }
  0x1c   :  { %1500 = vmatpush1.bf16.msra.mxu0 %v2486_v27  ;;  %1295 = vmatprep.subr.bf16.mxu1 %v2487_v28  ;;  %v3031_v15 = vld [vmem:[%s3673_s1 + $0x324] ss:$8 sps:$4 sm:$0xff]   ;;  %v3039_v17 = vld [vmem:[%s3673_s1 + $0x320] ss:$8 sps:$4 sm:$0xff]   ;;  %v2567_v20 = vld [vmem:[%s3673_s1 + $0x134] ss:$8 sps:$4 sm:$0xff]  }
  0x1d   :  { %1501 = vmatprep.subr.bf16.mxu0 %v2489_v29  ;;  %v2576_v19 = vld [vmem:[%s3674_s0 + $0x48] ss:$36 sps:$4 sm:$0xff]   ;;  %v3055_v21 = vld [vmem:[%s3673_s1 + $0x334] ss:$8 sps:$4 sm:$0xff]   ;;  %v2565_v24 = vld [vmem:[%s3673_s1 + $0x130] ss:$8 sps:$4 sm:$0xff]  }
  0x1e   :  { %v2589_v22 = vld [vmem:[%s3674_s0 + $0xa4] ss:$36 sps:$4 sm:$0xff]   ;;  %v2591_v23 = vld [vmem:[%s3674_s0 + $0x94] ss:$36 sps:$4 sm:$0xff]  }
  0x1f   :  { %1296 = vmatpush1.bf16.msra.mxu1 %v2491_v30  ;;  %v3069_v25 = vld [vmem:[%s3673_s1 + $0x330] ss:$8 sps:$4 sm:$0xff]   ;;  %v2579_v26 = vld [vmem:[%s3673_s1 + $0x144] ss:$8 sps:$4 sm:$0xff]   ;;  %v2577_v28 = vld [vmem:[%s3673_s1 + $0x140] ss:$8 sps:$4 sm:$0xff]  }
  0x20   :  { %1502 = vmatpush1.bf16.msra.mxu0 %v2492_v31  ;;  %1297 = vmatprep.subr.bf16.mxu1 %v2493_v32  ;;  %v3079_v27 = vld [vmem:[%s3673_s1 + $0x344] ss:$8 sps:$4 sm:$0xff]   ;;  %v3087_v29 = vld [vmem:[%s3673_s1 + $0x340] ss:$8 sps:$4 sm:$0xff]   ;;  %v2594_v31 = vld [vmem:[%s3674_s0 + $0x90] ss:$36 sps:$4 sm:$0xff]  }
  0x21   :  { %1503 = vmatprep.subr.bf16.mxu0 %v2495_v33  ;;  %v2593_v30 = vld [vmem:[%s3674_s0 + $0xa0] ss:$36 sps:$4 sm:$0xff]   ;;  %v2585_v32 = vld [vmem:[%s3673_s1 + $0x154] ss:$8 sps:$4 sm:$0xff]   ;;  %v2601_v48 = vld [vmem:[%s3673_s1 + $0x170] ss:$8 sps:$4 sm:$0xff]  }
  0x22   :  { %v3103_v33 = vld [vmem:[%s3673_s1 + $0x354] ss:$8 sps:$4 sm:$0xff]   ;;  %v3175_v51 = vld [vmem:[%s3673_s1 + $0x384] ss:$8 sps:$4 sm:$0xff]  }
  0x23   :  { %1298 = vmatpush1.bf16.msra.mxu1 %v2497_v34  ;;  %v2607_v34 = vld [vmem:[%s3674_s0 + $0xec] ss:$36 sps:$4 sm:$0xff]  }
  0x24   :  { %1504 = vmatpush1.bf16.msra.mxu0 %v2498_v35  ;;  %1299 = vmatprep.subr.bf16.mxu1 %v2499_v36  ;;  %v2609_v35 = vld [vmem:[%s3674_s0 + $0xdc] ss:$36 sps:$4 sm:$0xff]   ;;  %v2583_v36 = vld [vmem:[%s3673_s1 + $0x150] ss:$8 sps:$4 sm:$0xff]  }
  0x25   :  { %1505 = vmatprep.subr.bf16.mxu0 %v2501_v37  ;;  %v3117_v37 = vld [vmem:[%s3673_s1 + $0x350] ss:$8 sps:$4 sm:$0xff]  }
  0x27   :  { %1300 = vmatpush1.bf16.msra.mxu1 %v2503_v38  ;;  %v2597_v38 = vld [vmem:[%s3673_s1 + $0x164] ss:$8 sps:$4 sm:$0xff]  }
  0x28   :  { %1506 = vmatpush1.bf16.msra.mxu0 %v2504_v39  ;;  %1301 = vmatprep.subr.bf16.mxu1 %v2505_v40  ;;  %v3127_v39 = vld [vmem:[%s3673_s1 + $0x364] ss:$8 sps:$4 sm:$0xff]   ;;  %v2595_v40 = vld [vmem:[%s3673_s1 + $0x160] ss:$8 sps:$4 sm:$0xff]  }
  0x29   :  { %1507 = vmatprep.subr.bf16.mxu0 %v2507_v41  ;;  %v3135_v41 = vld [vmem:[%s3673_s1 + $0x360] ss:$8 sps:$4 sm:$0xff]  }
  0x2b   :  { %1302 = vmatpush1.bf16.msra.mxu1 %v2509_v42  ;;  %v2611_v42 = vld [vmem:[%s3674_s0 + $0xe8] ss:$36 sps:$4 sm:$0xff]  }
  0x2c   :  { %1508 = vmatpush1.bf16.msra.mxu0 %v2510_v43  ;;  %1303 = vmatprep.subr.bf16.mxu1 %v2511_v44  ;;  %v2612_v43 = vld [vmem:[%s3674_s0 + $0xd8] ss:$36 sps:$4 sm:$0xff]  }
  0x2d   :  { %1509 = vmatprep.subr.bf16.mxu0 %v2513_v45  ;;  %v2603_v44 = vld [vmem:[%s3673_s1 + $0x174] ss:$8 sps:$4 sm:$0xff]  }
  0x2e   :  { %v3151_v45 = vld [vmem:[%s3673_s1 + $0x374] ss:$8 sps:$4 sm:$0xff]  }
  0x2f   :  { %1304 = vmatpush1.bf16.msra.mxu1 %v2515_v46  ;;  %v2625_v46 = vld [vmem:[%s3674_s0 + $0x134] ss:$36 sps:$4 sm:$0xff]  }
  0x30   :  { %1510 = vmatpush1.bf16.msra.mxu0 %v2516_v47  ;;  %1305 = vmatprep.subr.bf16.mxu1 %v2517_v49  ;;  %v2627_v47 = vld [vmem:[%s3674_s0 + $0x124] ss:$36 sps:$4 sm:$0xff]   ;;  %v3165_v49 = vld [vmem:[%s3673_s1 + $0x370] ss:$8 sps:$4 sm:$0xff]  }
  0x31   :  { %1511 = vmatprep.subr.bf16.mxu0 %v2519_v50  ;;  %v2615_v50 = vld [vmem:[%s3673_s1 + $0x184] ss:$8 sps:$4 sm:$0xff]  }
  0x33   :  { %1306 = vmatpush1.bf16.msra.mxu1 %v2521_v52  ;;  %v2613_v52 = vld [vmem:[%s3673_s1 + $0x180] ss:$8 sps:$4 sm:$0xff]  }
  0x34   :  { %1512 = vmatpush1.bf16.msra.mxu0 %v2522_v53  ;;  %1307 = vmatprep.subr.bf16.mxu1 %v2523_v54  ;;  %v3183_v53 = vld [vmem:[%s3673_s1 + $0x380] ss:$8 sps:$4 sm:$0xff]   ;;  %v2629_v54 = vld [vmem:[%s3674_s0 + $0x130] ss:$36 sps:$4 sm:$0xff]  }
  0x35   :  { %1513 = vmatprep.subr.bf16.mxu0 %v2525_v55  ;;  %v2630_v55 = vld [vmem:[%s3674_s0 + $0x120] ss:$36 sps:$4 sm:$0xff]  }
  0x37   :  { %1308 = vmatpush1.bf16.msra.mxu1 %v2527_v56  ;;  %v2621_v56 = vld [vmem:[%s3673_s1 + $0x194] ss:$8 sps:$4 sm:$0xff]  }
  0x38   :  { %1514 = vmatpush1.bf16.msra.mxu0 %v2528_v57  ;;  %1309 = vmatprep.subr.bf16.mxu1 %v2529_v58  ;;  %v3199_v57 = vld [vmem:[%s3673_s1 + $0x394] ss:$8 sps:$4 sm:$0xff]  }
  0x39   :  { %1515 = vmatprep.subr.bf16.mxu0 %v2531_v59  ;;  %v2643_v58 = vld [vmem:[%s3674_s0 + $0x17c] ss:$36 sps:$4 sm:$0xff]   ;;  %v2645_v59 = vld [vmem:[%s3674_s0 + $0x16c] ss:$36 sps:$4 sm:$0xff]  }
  0x3b   :  { %1310 = vmatpush1.bf16.msra.mxu1 %v2533_v60  ;;  %v2619_v60 = vld [vmem:[%s3673_s1 + $0x190] ss:$8 sps:$4 sm:$0xff]  }
  0x3c   :  { %1516 = vmatpush1.bf16.msra.mxu0 %v2534_v61  ;;  %1311 = vmatprep.subr.bf16.mxu1 %v2535_v62  ;;  %v3213_v61 = vld [vmem:[%s3673_s1 + $0x390] ss:$8 sps:$4 sm:$0xff]   ;;  %v2633_v62 = vld [vmem:[%s3673_s1 + $0x1a4] ss:$8 sps:$4 sm:$0xff]  }
  0x3d   :  { %1517 = vmatprep.subr.bf16.mxu0 %v2537_v63  ;;  %v3223_v63 = vld [vmem:[%s3673_s1 + $0x3a4] ss:$8 sps:$4 sm:$0xff]  }
  0x3f   :  { %1312 = vmatpush1.bf16.msra.mxu1 %v2539_v0  ;;  %v2631_v0 = vld [vmem:[%s3673_s1 + $0x1a0] ss:$8 sps:$4 sm:$0xff]  }
  0x40   :  { %1518 = vmatpush1.bf16.msra.mxu0 %v2540_v1  ;;  %1384 = vmatprep.subr.bf16.mxu1 %v2546_v2  ;;  %v3231_v1 = vld [vmem:[%s3673_s1 + $0x3a0] ss:$8 sps:$4 sm:$0xff]   ;;  %v2647_v2 = vld [vmem:[%s3674_s0 + $0x178] ss:$36 sps:$4 sm:$0xff]  }
  0x41   :  { %1590 = vmatprep.subr.bf16.mxu0 %v2984_v3 }
  0x42   :  { %1314 = vmatmul.mubr.bf16.vlgmr.msra.gmra.mrb[0].mxu1 %v2541_v4  ;;  %v2648_v4 = vld [vmem:[%s3674_s0 + $0x168] ss:$36 sps:$4 sm:$0xff]  }
  0x43   :  { %1520 = vmatmul.mubr.bf16.vlgmr.msra.gmra.mrb[0].mxu0 %v2547_v6  ;;  %1385 = vmatpush1.bf16.msra.mxu1 %v2544_v5  ;;  %v2639_v5 = vld [vmem:[%s3673_s1 + $0x1b4] ss:$8 sps:$4 sm:$0xff]  }
  0x44   :  { %1591 = vmatpush1.bf16.msra.mxu0 %v2998_v7  ;;  %1386 = vmatprep.subr.bf16.mxu1 %v2555_v8  ;;  %v3247_v6 = vld [vmem:[%s3673_s1 + $0x3b4] ss:$8 sps:$4 sm:$0xff]   ;;  %v2661_v8 = vld [vmem:[%s3674_s0 + $0x1c4] ss:$36 sps:$4 sm:$0xff]  }
  0x45   :  { %1592 = vmatprep.subr.bf16.mxu0 %v3007_v9  ;;  %1529 = vmatprep.mubr.bf16.mxu0 %v2571_v10  ;;  %v2663_v10 = vld [vmem:[%s3674_s0 + $0x1b4] ss:$36 sps:$4 sm:$0xff]  }
  0x46   :  { %1323 = vmatprep.mubr.bf16.mxu1 %v2573_v11  ;;  %v2637_v11 = vld [vmem:[%s3673_s1 + $0x1b0] ss:$8 sps:$4 sm:$0xff]  }
  0x47   :  { %1387 = vmatpush1.bf16.msra.mxu1 %v2553_v12  ;;  %v3261_v12 = vld [vmem:[%s3673_s1 + $0x3b0] ss:$8 sps:$4 sm:$0xff]  }
  0x48   :  { %1593 = vmatpush1.bf16.msra.mxu0 %v3021_v13  ;;  %1388 = vmatprep.subr.bf16.mxu1 %v2561_v14  ;;  %v2651_v14 = vld [vmem:[%s3673_s1 + $0x1c4] ss:$8 sps:$4 sm:$0xff]  }
  0x49   :  { %1594 = vmatprep.subr.bf16.mxu0 %v3031_v15 }
  0x4a   :  { %1324 = vmatmul.mubr.bf16.gmra.mrb[4].mxu1 %v2576_v19  ;;  %v3279_v19 = vld [vmem:[%s3673_s1 + $0x3c0] ss:$8 sps:$4 sm:$0xff]  }
  0x4b   :  { %1530 = vmatmul.mubr.bf16.gmra.mrb[4].mxu0 %v2575_v18  ;;  %1389 = vmatpush1.bf16.msra.mxu1 %v2559_v16  ;;  %v3271_v16 = vld [vmem:[%s3673_s1 + $0x3c4] ss:$8 sps:$4 sm:$0xff]   ;;  %v2649_v18 = vld [vmem:[%s3673_s1 + $0x1c0] ss:$8 sps:$4 sm:$0xff]  }
  0x4c   :  { %1595 = vmatpush1.bf16.msra.mxu0 %v3039_v17  ;;  %1390 = vmatprep.subr.bf16.mxu1 %v2567_v20  ;;  %v2665_v20 = vld [vmem:[%s3674_s0 + $0x1c0] ss:$36 sps:$4 sm:$0xff]  }
  0x4d   :  { %1596 = vmatprep.subr.bf16.mxu0 %v3055_v21  ;;  %1539 = vmatprep.mubr.bf16.mxu0 %v2589_v22  ;;  %v2666_v22 = vld [vmem:[%s3674_s0 + $0x1b0] ss:$36 sps:$4 sm:$0xff]  }
  0x4e   :  { %1333 = vmatprep.mubr.bf16.mxu1 %v2591_v23  ;;  %v2657_v23 = vld [vmem:[%s3673_s1 + $0x1d4] ss:$8 sps:$4 sm:$0xff]  }
  0x4f   :  { %1391 = vmatpush1.bf16.msra.mxu1 %v2565_v24  ;;  %v3295_v24 = vld [vmem:[%s3673_s1 + $0x3d4] ss:$8 sps:$4 sm:$0xff]  }
  0x50   :  { %1597 = vmatpush1.bf16.msra.mxu0 %v3069_v25  ;;  %1392 = vmatprep.subr.bf16.mxu1 %v2579_v26  ;;  %v2681_v26 = vld [vmem:[%s3674_s0 + $0xc] ss:$36 sps:$4 sm:$0xff]  }
  0x51   :  { %1598 = vmatprep.subr.bf16.mxu0 %v3079_v27 }
  0x52   :  { %1334 = vmatmul.mubr.bf16.gmra.mrb[8].mxu1 %v2594_v31  ;;  %v3310_v31 = vld [vmem:[%s3673_s1 + $0x3d0] ss:$8 sps:$4 sm:$0xff]  }
  0x53   :  { %1540 = vmatmul.mubr.bf16.gmra.mrb[8].mxu0 %v2593_v30  ;;  %1393 = vmatpush1.bf16.msra.mxu1 %v2577_v28  ;;  %v2684_v28 = vld [vmem:[%s3674_s0 + $0x1c] ss:$36 sps:$4 sm:$0xff]   ;;  %v2655_v30 = vld [vmem:[%s3673_s1 + $0x1d0] ss:$8 sps:$4 sm:$0xff]  }
  0x54   :  { %1599 = vmatpush1.bf16.msra.mxu0 %v3087_v29  ;;  %1394 = vmatprep.subr.bf16.mxu1 %v2585_v32  ;;  %v2669_v32 = vld [vmem:[%s3673_s1 + $0x1e4] ss:$8 sps:$4 sm:$0xff]  }
  0x55   :  { %1600 = vmatprep.subr.bf16.mxu0 %v3103_v33  ;;  %1549 = vmatprep.mubr.bf16.mxu0 %v2607_v34  ;;  %v3319_v34 = vld [vmem:[%s3673_s1 + $0x3e4] ss:$8 sps:$4 sm:$0xff]  }
  0x56   :  { %1343 = vmatprep.mubr.bf16.mxu1 %v2609_v35  ;;  %v2667_v35 = vld [vmem:[%s3673_s1 + $0x1e0] ss:$8 sps:$4 sm:$0xff]  }
  0x57   :  { %1395 = vmatpush1.bf16.msra.mxu1 %v2583_v36  ;;  %v3327_v36 = vld [vmem:[%s3673_s1 + $0x3e0] ss:$8 sps:$4 sm:$0xff]  }
  0x58   :  { %1601 = vmatpush1.bf16.msra.mxu0 %v3117_v37  ;;  %1396 = vmatprep.subr.bf16.mxu1 %v2597_v38  ;;  %v2675_v38 = vld [vmem:[%s3673_s1 + $0x1f4] ss:$8 sps:$4 sm:$0xff]  }
  0x59   :  { %1602 = vmatprep.subr.bf16.mxu0 %v3127_v39 }
  0x5a   :  { %1344 = vmatmul.mubr.bf16.gmra.mrb[12].mxu1 %v2612_v43  ;;  %v3346_v43 = vld [vmem:[%s3673_s1 + $0x3f0] ss:$8 sps:$4 sm:$0xff]  }
  0x5b   :  { %1550 = vmatmul.mubr.bf16.gmra.mrb[12].mxu0 %v2611_v42  ;;  %1397 = vmatpush1.bf16.msra.mxu1 %v2595_v40  ;;  %v3337_v40 = vld [vmem:[%s3673_s1 + $0x3f4] ss:$8 sps:$4 sm:$0xff]   ;;  %v2673_v42 = vld [vmem:[%s3673_s1 + $0x1f0] ss:$8 sps:$4 sm:$0xff]  }
  0x5c   :  { %1603 = vmatpush1.bf16.msra.mxu0 %v3135_v41  ;;  %1398 = vmatprep.subr.bf16.mxu1 %v2603_v44  ;;  %v2687_v44 = vld [vmem:[%s3673_s1 + $0x404] ss:$8 sps:$4 sm:$0xff]  }
  0x5d   :  { %1604 = vmatprep.subr.bf16.mxu0 %v3151_v45  ;;  %1559 = vmatprep.mubr.bf16.mxu0 %v2625_v46  ;;  %v2679_v46 = vld [vmem:[%s3674_s0 + $0x8] ss:$36 sps:$4 sm:$0xff]  }
  0x5e   :  { %1353 = vmatprep.mubr.bf16.mxu1 %v2627_v47  ;;  %v2682_v47 = vld [vmem:[%s3674_s0 + $0x18] ss:$36 sps:$4 sm:$0xff]  }
  0x5f   :  { %1399 = vmatpush1.bf16.msra.mxu1 %v2601_v48  ;;  %v2685_v48 = vld [vmem:[%s3673_s1 + $0x400] ss:$8 sps:$4 sm:$0xff]  }
  0x60   :  { %1605 = vmatpush1.bf16.msra.mxu0 %v3165_v49  ;;  %1400 = vmatprep.subr.bf16.mxu1 %v2615_v50  ;;  %v2690_v50 = vld [vmem:[%s3673_s1 + $0x414] ss:$8 sps:$4 sm:$0xff]  }
  0x61   :  { %1606 = vmatprep.subr.bf16.mxu0 %v3175_v51 }
  0x62   :  { %1354 = vmatmul.mubr.bf16.gmra.mrb[16].mxu1 %v2630_v55  ;;  %v2688_v55 = vld [vmem:[%s3673_s1 + $0x410] ss:$8 sps:$4 sm:$0xff]  }
  0x63   :  { %1560 = vmatmul.mubr.bf16.gmra.mrb[16].mxu0 %v2629_v54  ;;  %1401 = vmatpush1.bf16.msra.mxu1 %v2613_v52  ;;  %v2691_v52 = vld [vmem:[%s3674_s0 + $0x54] ss:$36 sps:$4 sm:$0xff]   ;;  %v2693_v54 = vld [vmem:[%s3674_s0 + $0x64] ss:$36 sps:$4 sm:$0xff]  }
  0x64   :  { %1607 = vmatpush1.bf16.msra.mxu0 %v3183_v53  ;;  %1402 = vmatprep.subr.bf16.mxu1 %v2621_v56  ;;  %v2695_v56 = vld [vmem:[%s3674_s0 + $0x50] ss:$36 sps:$4 sm:$0xff]  }
  0x65   :  { %1608 = vmatprep.subr.bf16.mxu0 %v3199_v57  ;;  %1569 = vmatprep.mubr.bf16.mxu0 %v2643_v58  ;;  %v2702_v58 = vld [vmem:[%s3673_s1 + $0x434] ss:$8 sps:$4 sm:$0xff]  }
  0x66   :  { %1363 = vmatprep.mubr.bf16.mxu1 %v2645_v59  ;;  %v2703_v59 = vld [vmem:[%s3674_s0 + $0x9c] ss:$36 sps:$4 sm:$0xff]  }
  0x67   :  { %1403 = vmatpush1.bf16.msra.mxu1 %v2619_v60  ;;  %v2700_v60 = vld [vmem:[%s3673_s1 + $0x430] ss:$8 sps:$4 sm:$0xff]  }
  0x68   :  { %1609 = vmatpush1.bf16.msra.mxu0 %v3213_v61  ;;  %1404 = vmatprep.subr.bf16.mxu1 %v2633_v62  ;;  %v2707_v62 = vld [vmem:[%s3674_s0 + $0x98] ss:$36 sps:$4 sm:$0xff]  }
  0x69   :  { %1610 = vmatprep.subr.bf16.mxu0 %v3223_v63 }
  0x6a   :  { %1364 = vmatmul.mubr.bf16.gmra.mrb[20].mxu1 %v2648_v4  ;;  %v2723_v4 = vld [vmem:[%s3673_s1 + $0x464] ss:$8 sps:$4 sm:$0xff]  }
  0x6b   :  { %1570 = vmatmul.mubr.bf16.gmra.mrb[20].mxu0 %v2647_v2  ;;  %1405 = vmatpush1.bf16.msra.mxu1 %v2631_v0  ;;  %v2714_v0 = vld [vmem:[%s3673_s1 + $0x454] ss:$8 sps:$4 sm:$0xff]   ;;  %v2715_v2 = vld [vmem:[%s3674_s0 + $0xe4] ss:$36 sps:$4 sm:$0xff]  }
  0x6c   :  { %1611 = vmatpush1.bf16.msra.mxu0 %v3231_v1  ;;  %1406 = vmatprep.subr.bf16.mxu1 %v2639_v5  ;;  %v2719_v5 = vld [vmem:[%s3674_s0 + $0xe0] ss:$36 sps:$4 sm:$0xff]  }
  0x6d   :  { %1612 = vmatprep.subr.bf16.mxu0 %v3247_v6  ;;  %1579 = vmatprep.mubr.bf16.mxu0 %v2661_v8  ;;  %v2726_v8 = vld [vmem:[%s3673_s1 + $0x474] ss:$8 sps:$4 sm:$0xff]  }
  0x6e   :  { %1373 = vmatprep.mubr.bf16.mxu1 %v2663_v10  ;;  %v2727_v10 = vld [vmem:[%s3674_s0 + $0x12c] ss:$36 sps:$4 sm:$0xff]  }
  0x6f   :  { %1407 = vmatpush1.bf16.msra.mxu1 %v2637_v11  ;;  %v2729_v11 = vld [vmem:[%s3674_s0 + $0x128] ss:$36 sps:$4 sm:$0xff]  }
  0x70   :  { %1613 = vmatpush1.bf16.msra.mxu0 %v3261_v12  ;;  %1408 = vmatprep.subr.bf16.mxu1 %v2651_v14  ;;  %v2730_v14 = vld [vmem:[%s3674_s0 + $0x20] ss:$36 sps:$4 sm:$0xff]  }
  0x71   :  { %1614 = vmatprep.subr.bf16.mxu0 %v3271_v16 }
  0x72   :  { %1374 = vmatmul.mubr.bf16.gmra.mrb[24].mxu1 %v2666_v22  ;;  %v2751_v22 = vld [vmem:[%s3674_s0 + $0x1d0] ss:$36 sps:$4 sm:$0xff]  }
  0x73   :  { %1580 = vmatmul.mubr.bf16.gmra.mrb[24].mxu0 %v2665_v20  ;;  %1409 = vmatpush1.bf16.msra.mxu1 %v2649_v18  ;;  %v2747_v18 = vld [vmem:[%s3674_s0 + $0x188] ss:$36 sps:$4 sm:$0xff]  }
  0x74   :  { %1615 = vmatpush1.bf16.msra.mxu0 %v3279_v19  ;;  %1410 = vmatprep.subr.bf16.mxu1 %v2657_v23  ;;  %v2750_v20 = vld [vmem:[%s3674_s0 + $0x1c8] ss:$36 sps:$4 sm:$0xff]  }
  0x75   :  { %1616 = vmatprep.subr.bf16.mxu0 %v3295_v24  ;;  %1416 = vmatprep.mubr.bf16.mxu1 %v2681_v26 }
  0x76   :  { %1622 = vmatprep.mubr.bf16.mxu0 %v2684_v28  ;;  %v19_v28 = vlaneseq }
  0x77   :  { %1411 = vmatpush1.bf16.msra.mxu1 %v2655_v30 }
  0x78   :  { %1617 = vmatpush1.bf16.msra.mxu0 %v3310_v31  ;;  %1412 = vmatprep.subr.bf16.mxu1 %v2669_v32  ;;  %vm3530_vm0 = vcmp.lt.s32.totalorder %v19_v28, 256  ;;  %v2753_v32 = vmov 0.0  }
  0x79   :  { %1618 = vmatprep.subr.bf16.mxu0 %v3319_v34  ;;  %23 = vst.msk [vmem:[#allocation2] sm:$0x3] %vm3530_vm0, %v2753_v32  ;;  %24 = vst.msk [vmem:[#allocation3] sm:$0x3] %vm3530_vm0, %v2753_v32 }
  0x7b   :  { %1413 = vmatpush1.bf16.msra.mxu1 %v2667_v35 }
  0x7c   :  { %1619 = vmatpush1.bf16.msra.mxu0 %v3327_v36  ;;  %1414 = vmatprep.subr.bf16.mxu1 %v2675_v38 }
  0x7d   :  { %1620 = vmatprep.subr.bf16.mxu0 %v3337_v40 }
  0x7f   :  { %1415 = vmatpush1.bf16.msra.mxu1 %v2673_v42 }
  0x80   :  { %1621 = vmatpush1.bf16.msra.mxu0 %v3346_v43  ;;  %2298 = vmatprep.subr.bf16.mxu1 %v2984_v3  ;;  %v2699_v3 = vld [vmem:[%s3673_s1 + $0x424] ss:$8 sps:$4 sm:$0xff]  }
  0x81   :  { %1693 = vmatprep.subr.bf16.mxu0 %v2687_v44 }
  0x82   :  { %1417 = vmatmul.mubr.bf16.vlgmr.msra.gmra.mrb[0].mxu1 %v2679_v46 }
  0x83   :  { %1623 = vmatmul.mubr.bf16.vlgmr.msra.gmra.mrb[0].mxu0 %v2682_v47  ;;  %2314 = vmatpush1.bf16.msra.mxu1 %v2998_v7  ;;  %v2696_v7 = vld [vmem:[%s3674_s0 + $0x60] ss:$36 sps:$4 sm:$0xff]  }
  0x84   :  { %1694 = vmatpush1.bf16.msra.mxu0 %v2685_v48  ;;  %2299 = vmatprep.subr.bf16.mxu1 %v3007_v9  ;;  %v2697_v9 = vld [vmem:[%s3673_s1 + $0x420] ss:$8 sps:$4 sm:$0xff]  }
  0x85   :  { %1695 = vmatprep.subr.bf16.mxu0 %v2690_v50  ;;  %1426 = vmatprep.mubr.bf16.mxu1 %v2691_v52 }
  0x86   :  { %1632 = vmatprep.mubr.bf16.mxu0 %v2693_v54 }
  0x87   :  { %2315 = vmatpush1.bf16.msra.mxu1 %v3021_v13  ;;  %v2705_v13 = vld [vmem:[%s3674_s0 + $0xac] ss:$36 sps:$4 sm:$0xff]  }
  0x88   :  { %1696 = vmatpush1.bf16.msra.mxu0 %v2688_v55  ;;  %2300 = vmatprep.subr.bf16.mxu1 %v3031_v15  ;;  %v2711_v15 = vld [vmem:[%s3673_s1 + $0x444] ss:$8 sps:$4 sm:$0xff]  }
  0x89   :  { %1697 = vmatprep.subr.bf16.mxu0 %v2699_v3 }
  0x8a   :  { %1427 = vmatmul.mubr.bf16.gmra.mrb[4].mxu1 %v2695_v56 }
  0x8b   :  { %1633 = vmatmul.mubr.bf16.gmra.mrb[4].mxu0 %v2696_v7  ;;  %2316 = vmatpush1.bf16.msra.mxu1 %v3039_v17  ;;  %v2708_v17 = vld [vmem:[%s3674_s0 + $0xa8] ss:$36 sps:$4 sm:$0xff]  }
  0x8c   :  { %1698 = vmatpush1.bf16.msra.mxu0 %v2697_v9  ;;  %2301 = vmatprep.subr.bf16.mxu1 %v3055_v21  ;;  %v2709_v21 = vld [vmem:[%s3673_s1 + $0x440] ss:$8 sps:$4 sm:$0xff]  }
  0x8d   :  { %1699 = vmatprep.subr.bf16.mxu0 %v2702_v58  ;;  %1436 = vmatprep.mubr.bf16.mxu1 %v2703_v59 }
  0x8e   :  { %1642 = vmatprep.mubr.bf16.mxu0 %v2705_v13 }
  0x8f   :  { %2317 = vmatpush1.bf16.msra.mxu1 %v3069_v25  ;;  %v2717_v25 = vld [vmem:[%s3674_s0 + $0xf4] ss:$36 sps:$4 sm:$0xff]  }
  0x90   :  { %1700 = vmatpush1.bf16.msra.mxu0 %v2700_v60  ;;  %2302 = vmatprep.subr.bf16.mxu1 %v3079_v27  ;;  %v2712_v27 = vld [vmem:[%s3673_s1 + $0x450] ss:$8 sps:$4 sm:$0xff]  }
  0x91   :  { %1701 = vmatprep.subr.bf16.mxu0 %v2711_v15 }
  0x92   :  { %1437 = vmatmul.mubr.bf16.gmra.mrb[8].mxu1 %v2707_v62 }
  0x93   :  { %1643 = vmatmul.mubr.bf16.gmra.mrb[8].mxu0 %v2708_v17  ;;  %2318 = vmatpush1.bf16.msra.mxu1 %v3087_v29  ;;  %v2720_v29 = vld [vmem:[%s3674_s0 + $0xf0] ss:$36 sps:$4 sm:$0xff]  }
  0x94   :  { %1702 = vmatpush1.bf16.msra.mxu0 %v2709_v21  ;;  %2303 = vmatprep.subr.bf16.mxu1 %v3103_v33  ;;  %v2721_v33 = vld [vmem:[%s3673_s1 + $0x460] ss:$8 sps:$4 sm:$0xff]  }
  0x95   :  { %1703 = vmatprep.subr.bf16.mxu0 %v2714_v0  ;;  %1446 = vmatprep.mubr.bf16.mxu1 %v2715_v2 }
  0x96   :  { %1652 = vmatprep.mubr.bf16.mxu0 %v2717_v25 }
  0x97   :  { %2319 = vmatpush1.bf16.msra.mxu1 %v3117_v37  ;;  %v2724_v37 = vld [vmem:[%s3673_s1 + $0x470] ss:$8 sps:$4 sm:$0xff]  }
  0x98   :  { %1704 = vmatpush1.bf16.msra.mxu0 %v2712_v27  ;;  %2304 = vmatprep.subr.bf16.mxu1 %v3127_v39  ;;  %v2752_v39 = vmov 0  }
  0x99   :  { %1705 = vmatprep.subr.bf16.mxu0 %v2723_v4 }
  0x9a   :  { %1447 = vmatmul.mubr.bf16.gmra.mrb[12].mxu1 %v2719_v5 }
  0x9b   :  { %1653 = vmatmul.mubr.bf16.gmra.mrb[12].mxu0 %v2720_v29  ;;  %2320 = vmatpush1.bf16.msra.mxu1 %v3135_v41  ;;  %v2731_v41 = vld [vmem:[%s3674_s0 + $0x174] ss:$36 sps:$4 sm:$0xff]  }
  0x9c   :  { %1706 = vmatpush1.bf16.msra.mxu0 %v2721_v33  ;;  %2305 = vmatprep.subr.bf16.mxu1 %v3151_v45  ;;  %v2733_v45 = vld [vmem:[%s3674_s0 + $0x170] ss:$36 sps:$4 sm:$0xff]  }
  0x9d   :  { %1707 = vmatprep.subr.bf16.mxu0 %v2726_v8  ;;  %1456 = vmatprep.mubr.bf16.mxu1 %v2727_v10 }
  0x9e   :  { %1725 = vmatprep.mubr.bf16.mxu0 %v2752_v39 }
  0x9f   :  { %2321 = vmatpush1.bf16.msra.mxu1 %v3165_v49  ;;  %v2734_v49 = vld [vmem:[%s3674_s0 + $0x68] ss:$36 sps:$4 sm:$0xff]  }
  0xa0   :  { %1708 = vmatpush1.bf16.msra.mxu0 %v2724_v37  ;;  %2306 = vmatprep.subr.bf16.mxu1 %v3175_v51  ;;  %v2735_v51 = vld [vmem:[%s3674_s0 + $0x1bc] ss:$36 sps:$4 sm:$0xff]  }
  0xa2   :  { %1457 = vmatmul.mubr.bf16.gmra.mrb[16].mxu1 %v2729_v11 }
  0xa3   :  { %1726 = vmatmul.mubr.bf16.vlgmr.msra.gmra.mrb[0].mxu0 %v2730_v14  ;;  %2322 = vmatpush1.bf16.msra.mxu1 %v3183_v53  ;;  %v2737_v53 = vld [vmem:[%s3674_s0 + $0x1b8] ss:$36 sps:$4 sm:$0xff]  }
  0xa4   :  { %1466 = vmatprep.mubr.bf16.mxu1 %v2731_v41  ;;  %2307 = vmatprep.subr.bf16.mxu1 %v3199_v57  ;;  %v2738_v57 = vld [vmem:[%s3674_s0 + $0xb0] ss:$36 sps:$4 sm:$0xff]  }
  0xa5   :  { %1735 = vmatprep.mubr.bf16.mxu0 %v2752_v39 }
  0xa7   :  { %2323 = vmatpush1.bf16.msra.mxu1 %v3213_v61  ;;  %v2742_v61 = vld [vmem:[%s3674_s0 + $0x13c] ss:$36 sps:$4 sm:$0xff]  }
  0xa8   :  { %2308 = vmatprep.subr.bf16.mxu1 %v3223_v63  ;;  %v2739_v63 = vld [vmem:[%s3674_s0 + $0xf8] ss:$36 sps:$4 sm:$0xff]  }
  0xaa   :  { %1467 = vmatmul.mubr.bf16.gmra.mrb[20].mxu1 %v2733_v45 }
  0xab   :  { %1736 = vmatmul.mubr.bf16.gmra.mrb[4].mxu0 %v2734_v49  ;;  %2324 = vmatpush1.bf16.msra.mxu1 %v3231_v1  ;;  %v2740_v1 = vld [vmem:[%s3674_s0 + $0x138] ss:$36 sps:$4 sm:$0xff]  }
  0xac   :  { %1476 = vmatprep.mubr.bf16.mxu1 %v2735_v51  ;;  %2309 = vmatprep.subr.bf16.mxu1 %v3247_v6  ;;  %v2743_v6 = vld [vmem:[%s3674_s0 + $0x140] ss:$36 sps:$4 sm:$0xff]  }
  0xad   :  { %1745 = vmatprep.mubr.bf16.mxu0 %v2752_v39 }
  0xaf   :  { %2325 = vmatpush1.bf16.msra.mxu1 %v3261_v12  ;;  %v2744_v12 = vld [vmem:[%s3674_s0 + $0x184] ss:$36 sps:$4 sm:$0xff]  }
  0xb0   :  { %2310 = vmatprep.subr.bf16.mxu1 %v3271_v16  ;;  %v2746_v16 = vld [vmem:[%s3674_s0 + $0x180] ss:$36 sps:$4 sm:$0xff]  }
  0xb2   :  { %1477 = vmatmul.mubr.bf16.gmra.mrb[24].mxu1 %v2737_v53 }
  0xb3   :  { %1746 = vmatmul.mubr.bf16.gmra.mrb[8].mxu0 %v2738_v57  ;;  %2326 = vmatpush1.bf16.msra.mxu1 %v3279_v19  ;;  %v2748_v19 = vld [vmem:[%s3674_s0 + $0x1cc] ss:$36 sps:$4 sm:$0xff]  }
  0xb4   :  { %1755 = vmatprep.mubr.bf16.mxu0 %v2752_v39  ;;  %2311 = vmatprep.subr.bf16.mxu1 %v3295_v24 }
  0xb5   :  { %1662 = vmatprep.mubr.bf16.mxu1 %v2742_v61 }
  0xb7   :  { %2327 = vmatpush1.bf16.msra.mxu1 %v3310_v31 }
  0xb8   :  { %2312 = vmatprep.subr.bf16.mxu1 %v3319_v34 }
  0xbb   :  { %1756 = vmatmul.mubr.bf16.gmra.mrb[12].mxu0 %v2739_v63  ;;  %2328 = vmatpush1.bf16.msra.mxu1 %v3327_v36 }
  0xbc   :  { %1765 = vmatprep.mubr.bf16.mxu0 %v2752_v39  ;;  %2313 = vmatprep.subr.bf16.mxu1 %v3337_v40 }
  0xbf   :  { %2329 = vmatpush1.bf16.msra.mxu1 %v3346_v43 }
  0xc2   :  { %1663 = vmatmul.mubr.bf16.vlgmr.msra.gmra.mrb[28].mxu1 %v2740_v1 }
  0xc3   :  { %1766 = vmatmul.mubr.bf16.gmra.mrb[28].mxu0 %v2743_v6  ;;  %1672 = vmatprep.mubr.bf16.mxu1 %v2744_v12 }
  0xc4   :  { %1775 = vmatprep.mubr.bf16.mxu0 %v2752_v39 }
  0xca   :  { %1673 = vmatmul.mubr.bf16.gmra.mrb[32].mxu1 %v2746_v16 }
  0xcb   :  { %1776 = vmatmul.mubr.bf16.gmra.mrb[32].mxu0 %v2747_v18  ;;  %1682 = vmatprep.mubr.bf16.mxu1 %v2748_v19 }
  0xcc   :  { %1785 = vmatprep.mubr.bf16.mxu0 %v2752_v39 }
  0xd2   :  { %1683 = vmatmul.mubr.bf16.gmra.mrb[36].mxu1 %v2750_v20 }
  0xd3   :  { %1786 = vmatmul.mubr.bf16.gmra.mrb[36].mxu0 %v2751_v22 }
 0x136   :  { %v1561_v23 = vpop.f32.mrb[16].mxu0 }
 0x137   :  { %v1563_v24 = vpop.f32.mrb[17].mxu0 }
 0x138   :  { %v1565_v26 = vpop.f32.mrb[18].mxu0 }
 0x139   :  { %v1567_v30 = vpop.f32.mrb[19].mxu0 }
 0x13e   :  { %v1571_v34 = vpop.f32.mrb[20].mxu0 }
 0x13f   :  { %v1573_v35 = vpop.f32.mrb[21].mxu0 }
 0x140   :  { %v3538_v36 = vpop.f32.mrb[22].mxu0 }
 0x141   :  { %v3540_v38 = vpop.f32.mrb[23].mxu0 }
 0x146   :  { %v3542_v40 = vpop.f32.mrb[24].mxu0 }
 0x147   :  { %v3544_v42 = vpop.f32.mrb[25].mxu0 }
 0x148   :  { %v3546_v43 = vpop.f32.mrb[26].mxu0 }
 0x149   :  { %v3548_v44 = vpop.f32.mrb[27].mxu0 }
 0x155   :  { %v1418_v46 = vpop.f32.mrb[0].mxu1 }
 0x156   :  { %v1420_v47 = vpop.f32.mrb[1].mxu1 }
 0x157   :  { %v1422_v48 = vpop.f32.mrb[2].mxu1 }
 0x158   :  { %v1424_v50 = vpop.f32.mrb[3].mxu1 }
 0x15d   :  { %v1428_v52 = vpop.f32.mrb[4].mxu1 }
 0x15e   :  { %v1430_v54 = vpop.f32.mrb[5].mxu1 }
 0x15f   :  { %v1432_v55 = vpop.f32.mrb[6].mxu1 }
 0x160   :  { %v1434_v3 = vpop.f32.mrb[7].mxu1 }
 0x165   :  { %v3550_v56 = vpop.f32.mrb[8].mxu1 }
 0x166   :  { %v3552_v7 = vpop.f32.mrb[9].mxu1 }
 0x167   :  { %v3554_v9 = vpop.f32.mrb[10].mxu1 }
 0x168   :  { %v3556_v58 = vpop.f32.mrb[11].mxu1 }
 0x16d   :  { %v3558_v59 = vpop.f32.mrb[12].mxu1 }
 0x16e   :  { %v3560_v13 = vpop.f32.mrb[13].mxu1 }
 0x16f   :  { %v3562_v60 = vpop.f32.mrb[14].mxu1 }
 0x170   :  { %v3564_v15 = vpop.f32.mrb[15].mxu1 }
 0x175   :  { %v1458_v62 = vpop.f32.mrb[16].mxu1 }
 0x176   :  { %v1727_v17 = vpop.f32.mrb[0].mxu0  ;;  %v3566_v21 = vadd.f32 %v1561_v23, %v1458_v62  ;;  %v1460_v2 = vpop.f32.mrb[17].mxu1 }
 0x177   :  { %v2330_v0 = vadd.f32 %v1727_v17, %v1418_v46  ;;  %v1729_v25 = vpop.f32.mrb[1].mxu0  ;;  %v3568_v27 = vadd.f32 %v1563_v24, %v1460_v2  ;;  %v1462_v5 = vpop.f32.mrb[18].mxu1 }
 0x178   :  { %v2331_v4 = vadd.f32 %v1729_v25, %v1420_v47  ;;  %v1731_v29 = vpop.f32.mrb[2].mxu0  ;;  %v3570_v33 = vadd.f32 %v1565_v26, %v1462_v5  ;;  %v1464_v10 = vpop.f32.mrb[19].mxu1 }
 0x179   :  { %v2332_v8 = vadd.f32 %v1731_v29, %v1422_v48  ;;  %v1733_v37 = vpop.f32.mrb[3].mxu0  ;;  %v3572_v11 = vadd.f32 %v1567_v30, %v1464_v10  ;;  %v1958_v41 = vmul.f32 %v2330_v0, %v2330_v0 }
 0x17a   :  { %v2284_v39 = vpack.c.bf16 %v2331_v4, %v2330_v0  ;;  %v2333_v14 = vadd.f32 %v1733_v37, %v1424_v50  ;;  %v1959_v51 = vmul.f32 %v2331_v4, %v2331_v4 }
 0x17b   :  { %v1895_v45 = vadd.f32 %v2332_v8, %v2330_v0  ;;  %v1960_v49 = vmul.f32 %v2332_v8, %v2332_v8 }
 0x17c   :  { %1880 = vst [vmem:[%s3675_s2] sm:$0xff] %v2284_v39  ;;  %v2285_v53 = vpack.c.bf16 %v2333_v14, %v2332_v8  ;;  %v1914_v57 = vadd.f32 %v2333_v14, %v2331_v4  ;;  %v1961_v61 = vmul.f32 %v2333_v14, %v2333_v14 }
 0x17d   :  { %v1986_v63 = vadd.f32 %v1960_v49, %v1958_v41  ;;  %v1468_v6 = vpop.f32.mrb[20].mxu1 }
 0x17e   :  { %1881 = vst [vmem:[%s3675_s2 + $0x8] sm:$0xff] %v2285_v53  ;;  %v2005_v1 = vadd.f32 %v1961_v61, %v1959_v51  ;;  %v1737_v12 = vpop.f32.mrb[4].mxu0  ;;  %v3580_v16 = vadd.f32 %v1571_v34, %v1468_v6  ;;  %v1470_v19 = vpop.f32.mrb[21].mxu1 }
 0x17f   :  { %v2334_v18 = vadd.f32 %v1737_v12, %v1428_v52  ;;  %v1739_v20 = vpop.f32.mrb[5].mxu0  ;;  %v3582_v22 = vadd.f32 %v1573_v35, %v1470_v19  ;;  %v1472_v24 = vpop.f32.mrb[22].mxu1 }
 0x180   :  { %v2335_v23 = vadd.f32 %v1739_v20, %v1430_v54  ;;  %v1741_v26 = vpop.f32.mrb[6].mxu0  ;;  %v3585_v46 = vadd.f32 %v3538_v36, %v1472_v24  ;;  %v1474_v48 = vpop.f32.mrb[23].mxu1 }
 0x181   :  { %v1896_v30 = vadd.f32 %v2334_v18, %v1895_v45  ;;  %v1962_v32 = vmul.f32 %v2334_v18, %v2334_v18  ;;  %v2336_v47 = vadd.f32 %v1741_v26, %v1432_v55  ;;  %v1743_v50 = vpop.f32.mrb[7].mxu0  ;;  %v3588_v52 = vadd.f32 %v3540_v38, %v1474_v48 }
 0x182   :  { %v2286_v62 = vpack.c.bf16 %v2335_v23, %v2334_v18  ;;  %v1915_v17 = vadd.f32 %v2335_v23, %v1914_v57  ;;  %v1963_v34 = vmul.f32 %v2335_v23, %v2335_v23  ;;  %v2337_v54 = vadd.f32 %v1743_v50, %v1434_v3 }
 0x183   :  { %v1987_v0 = vadd.f32 %v1986_v63, %v1962_v32  ;;  %v1897_v35 = vadd.f32 %v2336_v47, %v1896_v30  ;;  %v1964_v2 = vmul.f32 %v2336_v47, %v2336_v47 }
 0x184   :  { %1882 = vst [vmem:[%s3675_s2 + $0x10] sm:$0xff] %v2286_v62  ;;  %v2006_v25 = vadd.f32 %v2005_v1, %v1963_v34  ;;  %v2287_v4 = vpack.c.bf16 %v2337_v54, %v2336_v47  ;;  %v1916_v55 = vadd.f32 %v2337_v54, %v1915_v17  ;;  %v1965_v5 = vmul.f32 %v2337_v54, %v2337_v54 }
 0x185   :  { %v1988_v36 = vadd.f32 %v1987_v0, %v1964_v2  ;;  %v1478_v29 = vpop.f32.mrb[24].mxu1 }
 0x186   :  { %v1747_v8 = vpop.f32.mrb[8].mxu0  ;;  %1883 = vst [vmem:[%s3675_s2 + $0x18] sm:$0xff] %v2287_v4  ;;  %v2007_v38 = vadd.f32 %v2006_v25, %v1965_v5  ;;  %v3597_v10 = vadd.f32 %v3542_v40, %v1478_v29  ;;  %v1480_v37 = vpop.f32.mrb[25].mxu1 }
 0x187   :  { %v2338_v3 = vadd.f32 %v1747_v8, %v3550_v56  ;;  %v1749_v39 = vpop.f32.mrb[9].mxu0  ;;  %v3601_v14 = vadd.f32 %v3544_v42, %v1480_v37  ;;  %v1482_v45 = vpop.f32.mrb[26].mxu1 }
 0x188   :  { %v2339_v41 = vadd.f32 %v1749_v39, %v3552_v7  ;;  %v1751_v49 = vpop.f32.mrb[10].mxu0  ;;  %v3605_v57 = vadd.f32 %v3546_v43, %v1482_v45  ;;  %v1484_v40 = vpop.f32.mrb[27].mxu1 }
 0x189   :  { %v1898_v51 = vadd.f32 %v2338_v3, %v1897_v35  ;;  %v1966_v53 = vmul.f32 %v2338_v3, %v2338_v3  ;;  %v2340_v61 = vadd.f32 %v1751_v49, %v3554_v9  ;;  %v1753_v63 = vpop.f32.mrb[11].mxu0  ;;  %v3609_v12 = vadd.f32 %v3548_v44, %v1484_v40 }
 0x18a   :  { %v2288_v1 = vpack.c.bf16 %v2339_v41, %v2338_v3  ;;  %v1917_v56 = vadd.f32 %v2339_v41, %v1916_v55  ;;  %v1967_v6 = vmul.f32 %v2339_v41, %v2339_v41  ;;  %v2341_v19 = vadd.f32 %v1753_v63, %v3556_v58 }
 0x18b   :  { %v1989_v42 = vadd.f32 %v1988_v36, %v1966_v53  ;;  %v1899_v18 = vadd.f32 %v2340_v61, %v1898_v51  ;;  %v1968_v7 = vmul.f32 %v2340_v61, %v2340_v61 }
 0x18c   :  { %1884 = vst [vmem:[%s3675_s2 + $0x20] sm:$0xff] %v2288_v1  ;;  %v2008_v43 = vadd.f32 %v2007_v38, %v1967_v6  ;;  %v2289_v9 = vpack.c.bf16 %v2341_v19, %v2340_v61  ;;  %v1918_v23 = vadd.f32 %v2341_v19, %v1917_v56  ;;  %v1969_v24 = vmul.f32 %v2341_v19, %v2341_v19 }
 0x18d   :  { %v1990_v20 = vadd.f32 %v1989_v42, %v1968_v7 }
 0x18e   :  { %v1757_v26 = vpop.f32.mrb[12].mxu0  ;;  %1885 = vst [vmem:[%s3675_s2 + $0x28] sm:$0xff] %v2289_v9  ;;  %v2009_v44 = vadd.f32 %v2008_v43, %v1969_v24 }
 0x18f   :  { %v2342_v30 = vadd.f32 %v1757_v26, %v3558_v59  ;;  %v1759_v32 = vpop.f32.mrb[13].mxu0 }
 0x190   :  { %v2343_v58 = vadd.f32 %v1759_v32, %v3560_v13  ;;  %v1761_v47 = vpop.f32.mrb[14].mxu0 }
 0x191   :  { %v1900_v48 = vadd.f32 %v2342_v30, %v1899_v18  ;;  %v1970_v50 = vmul.f32 %v2342_v30, %v2342_v30  ;;  %v2344_v62 = vadd.f32 %v1761_v47, %v3562_v60  ;;  %v1763_v17 = vpop.f32.mrb[15].mxu0 }
 0x192   :  { %v2290_v34 = vpack.c.bf16 %v2343_v58, %v2342_v30  ;;  %v1919_v0 = vadd.f32 %v2343_v58, %v1918_v23  ;;  %v1971_v35 = vmul.f32 %v2343_v58, %v2343_v58  ;;  %v2345_v2 = vadd.f32 %v1763_v17, %v3564_v15 }
 0x193   :  { %v1991_v54 = vadd.f32 %v1990_v20, %v1970_v50  ;;  %v1901_v25 = vadd.f32 %v2344_v62, %v1900_v48  ;;  %v1972_v36 = vmul.f32 %v2344_v62, %v2344_v62 }
 0x194   :  { %1886 = vst [vmem:[%s3675_s2 + $0x30] sm:$0xff] %v2290_v34  ;;  %v2010_v59 = vadd.f32 %v2009_v44, %v1971_v35  ;;  %v2291_v13 = vpack.c.bf16 %v2345_v2, %v2344_v62  ;;  %v1920_v4 = vadd.f32 %v2345_v2, %v1919_v0  ;;  %v1973_v55 = vmul.f32 %v2345_v2, %v2345_v2 }
 0x195   :  { %v1992_v5 = vadd.f32 %v1991_v54, %v1972_v36  ;;  %v1664_v29 = vpop.f32.mrb[28].mxu1 }
 0x196   :  { %1887 = vst [vmem:[%s3675_s2 + $0x38] sm:$0xff] %v2291_v13  ;;  %v2011_v60 = vadd.f32 %v2010_v59, %v1973_v55  ;;  %v1767_v8 = vpop.f32.mrb[28].mxu0  ;;  %v2347_v15 = vadd.f32 %v3566_v21, %v1664_v29  ;;  %v1666_v38 = vpop.f32.mrb[29].mxu1 }
 0x197   :  { %v1769_v3 = vpop.f32.mrb[29].mxu0  ;;  %v2350_v37 = vadd.f32 %v3568_v27, %v1666_v38  ;;  %v1668_v39 = vpop.f32.mrb[30].mxu1 }
 0x198   :  { %v1771_v41 = vpop.f32.mrb[30].mxu0  ;;  %v2348_v45 = vadd.f32 %v2347_v15, %v1767_v8  ;;  %v2353_v49 = vadd.f32 %v3570_v33, %v1668_v39  ;;  %v1670_v51 = vpop.f32.mrb[31].mxu1 }
 0x199   :  { %v1773_v53 = vpop.f32.mrb[31].mxu0  ;;  %v2351_v61 = vadd.f32 %v2350_v37, %v1769_v3  ;;  %v2356_v40 = vadd.f32 %v3572_v11, %v1670_v51 }
 0x19a   :  { %v1902_v63 = vadd.f32 %v2348_v45, %v1901_v25  ;;  %v1974_v1 = vmul.f32 %v2348_v45, %v2348_v45  ;;  %v2354_v56 = vadd.f32 %v2353_v49, %v1771_v41 }
 0x19b   :  { %v2292_v6 = vpack.c.bf16 %v2351_v61, %v2348_v45  ;;  %v1921_v42 = vadd.f32 %v2351_v61, %v1920_v4  ;;  %v1975_v21 = vmul.f32 %v2351_v61, %v2351_v61  ;;  %v2357_v18 = vadd.f32 %v2356_v40, %v1773_v53 }
 0x19c   :  { %v1993_v7 = vadd.f32 %v1992_v5, %v1974_v1  ;;  %v1903_v19 = vadd.f32 %v2354_v56, %v1902_v63  ;;  %v1976_v27 = vmul.f32 %v2354_v56, %v2354_v56 }
 0x19d   :  { %1888 = vst [vmem:[%s3675_s2 + $0x40] sm:$0xff] %v2292_v6  ;;  %v2012_v33 = vadd.f32 %v2011_v60, %v1975_v21  ;;  %v2293_v43 = vpack.c.bf16 %v2357_v18, %v2354_v56  ;;  %v1922_v20 = vadd.f32 %v2357_v18, %v1921_v42  ;;  %v1977_v9 = vmul.f32 %v2357_v18, %v2357_v18  ;;  %v1674_v23 = vpop.f32.mrb[32].mxu1 }
 0x19e   :  { %v1777_v11 = vpop.f32.mrb[32].mxu0  ;;  %v1994_v24 = vadd.f32 %v1993_v7, %v1976_v27  ;;  %v2359_v26 = vadd.f32 %v3580_v16, %v1674_v23  ;;  %v1676_v44 = vpop.f32.mrb[33].mxu1 }
 0x19f   :  { %v1779_v30 = vpop.f32.mrb[33].mxu0  ;;  %1889 = vst [vmem:[%s3675_s2 + $0x48] sm:$0xff] %v2293_v43  ;;  %v2013_v32 = vadd.f32 %v2012_v33, %v1977_v9  ;;  %v2362_v58 = vadd.f32 %v3582_v22, %v1676_v44  ;;  %v1678_v47 = vpop.f32.mrb[34].mxu1 }
 0x1a0   :  { %v1781_v48 = vpop.f32.mrb[34].mxu0  ;;  %v2360_v50 = vadd.f32 %v2359_v26, %v1777_v11  ;;  %v2365_v62 = vadd.f32 %v3585_v46, %v1678_v47  ;;  %v1680_v17 = vpop.f32.mrb[35].mxu1 }
 0x1a1   :  { %v1783_v34 = vpop.f32.mrb[35].mxu0  ;;  %v2363_v0 = vadd.f32 %v2362_v58, %v1779_v30  ;;  %v2368_v35 = vadd.f32 %v3588_v52, %v1680_v17  ;;  %v2754_v30 = vmov 1966171168  }
 0x1a2   :  { %v1904_v16 = vadd.f32 %v2360_v50, %v1903_v19  ;;  %v1978_v2 = vmul.f32 %v2360_v50, %v2360_v50  ;;  %v2366_v54 = vadd.f32 %v2365_v62, %v1781_v48 }
 0x1a3   :  { %v2294_v25 = vpack.c.bf16 %v2363_v0, %v2360_v50  ;;  %v1923_v36 = vadd.f32 %v2363_v0, %v1922_v20  ;;  %v1979_v59 = vmul.f32 %v2363_v0, %v2363_v0  ;;  %v2369_v13 = vadd.f32 %v2368_v35, %v1783_v34 }
 0x1a4   :  { %v1995_v4 = vadd.f32 %v1994_v24, %v1978_v2  ;;  %v1905_v55 = vadd.f32 %v2366_v54, %v1904_v16  ;;  %v1980_v22 = vmul.f32 %v2366_v54, %v2366_v54  ;;  %v1940_v16 = vshrl.u32 %v19_v28, 7 }
 0x1a5   :  { %1890 = vst [vmem:[%s3675_s2 + $0x50] sm:$0xff] %v2294_v25  ;;  %v2014_v46 = vadd.f32 %v2013_v32, %v1979_v59  ;;  %v2295_v5 = vpack.c.bf16 %v2369_v13, %v2366_v54  ;;  %v1924_v60 = vadd.f32 %v2369_v13, %v1923_v36  ;;  %v1981_v29 = vmul.f32 %v2369_v13, %v2369_v13  ;;  %v1684_v8 = vpop.f32.mrb[36].mxu1 }
 0x1a6   :  { %v1787_v52 = vpop.f32.mrb[36].mxu0  ;;  %v1996_v15 = vadd.f32 %v1995_v4, %v1980_v22  ;;  %v2371_v38 = vadd.f32 %v3597_v10, %v1684_v8  ;;  %v1686_v3 = vpop.f32.mrb[37].mxu1  ;;  %v1937_v32 = vunpack.c.l.s4 %v2754_v30 }
 0x1a7   :  { %v1789_v37 = vpop.f32.mrb[37].mxu0  ;;  %1891 = vst [vmem:[%s3675_s2 + $0x58] sm:$0xff] %v2295_v5  ;;  %v2015_v39 = vadd.f32 %v2014_v46, %v1981_v29  ;;  %v2374_v41 = vadd.f32 %v3601_v14, %v1686_v3  ;;  %v1688_v45 = vpop.f32.mrb[38].mxu1 }
 0x1a8   :  { %v1791_v49 = vpop.f32.mrb[38].mxu0  ;;  %v2372_v51 = vadd.f32 %v2371_v38, %v1787_v52  ;;  %v2377_v53 = vadd.f32 %v3605_v57, %v1688_v45  ;;  %v1690_v61 = vpop.f32.mrb[39].mxu1  ;;  %v1938_v35 = vunpack.c.0.s8 %v1937_v32 }
 0x1a9   :  { %v1793_v40 = vpop.f32.mrb[39].mxu0  ;;  %v2375_v63 = vadd.f32 %v2374_v41, %v1789_v37  ;;  %v2380_v1 = vadd.f32 %v3609_v12, %v1690_v61  ;;  %v1957_v37 = vld [vmem:[#allocation3] sm:$0x3] }
 0x1aa   :  { %v1906_v10 = vadd.f32 %v2372_v51, %v1905_v55  ;;  %v1982_v56 = vmul.f32 %v2372_v51, %v2372_v51  ;;  %v2378_v6 = vadd.f32 %v2377_v53, %v1791_v49  ;;  %v1941_v22 = vsub.s32 %v1938_v35, %v1940_v16 }
 0x1ab   :  { %v2296_v42 = vpack.c.bf16 %v2375_v63, %v2372_v51  ;;  %v1925_v21 = vadd.f32 %v2375_v63, %v1924_v60  ;;  %v1983_v18 = vmul.f32 %v2375_v63, %v2375_v63  ;;  %v2381_v7 = vadd.f32 %v2380_v1, %v1793_v40 }
 0x1ac   :  { %v1997_v19 = vadd.f32 %v1996_v15, %v1982_v56  ;;  %v1907_v27 = vadd.f32 %v2378_v6, %v1906_v10  ;;  %v1984_v14 = vmul.f32 %v2378_v6, %v2378_v6  ;;  %v1894_v15 = vld [vmem:[#allocation2] sm:$0x3] }
 0x1ad   :  { %1892 = vst [vmem:[%s3675_s2 + $0x60] sm:$0xff] %v2296_v42  ;;  %v2016_v57 = vadd.f32 %v2015_v39, %v1983_v18  ;;  %v2297_v33 = vpack.c.bf16 %v2381_v7, %v2378_v6  ;;  %v1926_v43 = vadd.f32 %v2381_v7, %v1925_v21  ;;  %v1985_v20 = vmul.f32 %v2381_v7, %v2381_v7 }
 0x1ae   :  { %v1908_v9 = vrot.slane %v1907_v27, 4  ;;  %v1998_v12 = vadd.f32 %v1997_v19, %v1984_v14 }
 0x1af   :  { %1893 = vst [vmem:[%s3675_s2 + $0x68] sm:$0xff] %v2297_v33  ;;  %v1927_v23 = vrot.slane %v1926_v43, 4  ;;  %v2017_v11 = vadd.f32 %v2016_v57, %v1985_v20 }
 0x1b0   :  { %v1909_v24 = vadd.f32 %v1908_v9, %v1907_v27  ;;  %v1999_v26 = vrot.slane %v1998_v12, 4 }
 0x1b1   :  { %v1928_v44 = vadd.f32 %v1927_v23, %v1926_v43  ;;  %v2018_v58 = vrot.slane %v2017_v11, 4 }
 0x1b2   :  { %v1910_v47 = vrot.slane %v1909_v24, 2  ;;  %v2000_v48 = vadd.f32 %v1999_v26, %v1998_v12 }
 0x1b3   :  { %v1929_v50 = vrot.slane %v1928_v44, 2  ;;  %v2019_v62 = vadd.f32 %v2018_v58, %v2017_v11 }
 0x1b4   :  { %v1911_v17 = vadd.f32 %v1910_v47, %v1909_v24  ;;  %v2001_v34 = vrot.slane %v2000_v48, 2 }
 0x1b5   :  { %v1930_v0 = vadd.f32 %v1929_v50, %v1928_v44  ;;  %v2020_v2 = vrot.slane %v2019_v62, 2 }
 0x1b6   :  { %v1912_v54 = vrot.slane %v1911_v17, 1  ;;  %v2002_v25 = vadd.f32 %v2001_v34, %v2000_v48 }
 0x1b7   :  { %v1931_v36 = vrot.slane %v1930_v0, 1  ;;  %v2021_v59 = vadd.f32 %v2020_v2, %v2019_v62 }
 0x1b8   :  { %v1913_v13 = vadd.f32 %v1912_v54, %v1911_v17  ;;  %v2003_v4 = vrot.slane %v2002_v25, 1 }
 0x1b9   :  { %v1932_v55 = vadd.f32 %v1931_v36, %v1930_v0  ;;  %v2022_v46 = vrot.slane %v2021_v59, 1 }
 0x1ba   :  { %v2004_v5 = vadd.f32 %v2003_v4, %v2002_v25 }
 0x1bb   :  { %v1935_v60 = vcombine.low %v1913_v13, %v1932_v55  ;;  %v2023_v29 = vadd.f32 %v2022_v46, %v2021_v59 }
 0x1bd   :  { %v1942_v8 = vrot.slane %v1935_v60, %v1941_v22  ;;  %v2026_v52 = vcombine.low %v2004_v5, %v2023_v29 }
 0x1bf   :  { %v1949_v38 = vrot.slane %v1942_v8, %v1941_v22  ;;  %v2033_v3 = vrot.slane %v2026_v52, %v1941_v22 }
 0x1c1   :  { %v1951_v28 = vadd.f32 %v1949_v38, %v1894_v15  ;;  %v2040_v39 = vrot.slane %v2033_v3, %v1941_v22 }
 0x1c3   :  { %1956 = vst.msk [vmem:[#allocation2] sm:$0x3] %vm3530_vm0, %v1951_v28  ;;  %v2042_v41 = vadd.f32 %v2040_v39, %v1957_v37 }
 0x1c5   :  { %2043 = vst.msk [vmem:[#allocation3] sm:$0x3] %vm3530_vm0, %v2042_v41 }
 0x1ca   :  { %v2047_v45 = vld [vmem:[#allocation2] sm:$0x3] }
 0x1cb   :  { %2048 = vst.msk [vmem:[%s3676_s3] sm:$0x3] %vm3530_vm0, %v2047_v45 }
 0x1cc   :  { %v2049_v49 = vld [vmem:[#allocation3] sm:$0x3] }
 0x1cd   :  { %2050 = vst.msk [vmem:[%s3677_s4] sm:$0x3] %vm3530_vm0, %v2049_v49 }

// kernel: generator_forward.3
= control target key start
LH: loop header
LB: loop body
LE: loop exit
PB: predicated region body
PF: predicated region fallthrough
CT: control target
= control target key end

     0   :  { %10 = vsyncpa [#allocation5], 0  ;;  %s8689_s15 = smov [#allocation4]   ;;  %s9312_s0 = inlined_call_operand.vmem [shape: bf16[16,200], index: 0, kind: input, shape index: {}]   ;;  %s9313_s1 = inlined_call_operand.hbm [shape: bf16[200,6272], index: 1, kind: input, shape index: {}]   ;;  %s9314_s2 = inlined_call_operand.vmem [shape: bf16[16,6272], index: 2, kind: output, shape index: {0}]   ;;  %s9315_s3 = inlined_call_operand.vmem [shape: f32[1,6272], index: 3, kind: output, shape index: {1}]   ;;  %s9316_s4 = inlined_call_operand.vmem [shape: f32[1,6272], index: 4, kind: output, shape index: {2}]  }
   0x1   :  { %s18_s16 = sshll.u32 %s8689_s15, 4  ;;  %s8665_s19 = scalar_lea.hbm %s9313_s1, 78400  ;;  %s19_s16 = int_to_ptr.vmem [resolvable:$true] %s18_s16 }
   0x2   :  { %p8666_p0 = scmp.ne.s32.totalorder %s9313_s1, %s8665_s19  ;;  %p8669_p1 = scmp.lt.u32.totalorder %s8665_s19, %s9313_s1 }
   0x4   :  { %p8671_p2 = pnand %p8669_p1, %p8666_p0 }
   0x6   :  { %8674 = shalt.err (!%p8671_p2)
}
   0x7   :  { %s8675_s24 = scalar_lea.vmem %s19_s16, 78400  ;;  %p8680_p4 = scmp.lt.s32.totalorder %s19_s16, %s19_s16 }
   0x8   :  { %p8676_p3 = scmp.ne.s32.totalorder %s19_s16, %s8675_s24  ;;  %p8681_p5 = scmp.lt.s32.totalorder %s8675_s24, %s8675_s24 }
   0xa   :  { %p8682_p6 = por %p8681_p5, %p8680_p4 }
   0xc   :  { %p8683_p7 = pnand %p8682_p6, %p8676_p3 }
   0xe   :  { %8686 = shalt.err (!%p8683_p7)
}
   0xf   :  { %s8690_s25 = smov 3136   ;;  %s8691_s26 = smov 196  }
  0x10   :  { %24 = dma.hbm_to_vmem [thread:$0]  %s9313_s1, 78400, %s19_s16, [#allocation5], %s8690_s25, %s8690_s25, %s8691_s26  }
  0x11   :  { %8687 = dma.done.wait [#allocation5], 78400  }
  0x12   :  { %8688 = vsyncadd [#allocation5], 4294888896  ;;  %v7729_v0 = vld [vmem:[#allocation4 + $0x4] ss:$196 sps:$4 sm:$0xff]   ;;  %v7731_v1 = vld [vmem:[#allocation4 + $0xc] ss:$196 sps:$4 sm:$0xff]  }
  0x13   :  { %3914 = vmatprep.subr.bf16.mxu0 %v7729_v0  ;;  %v7733_v2 = vld [vmem:[#allocation4] ss:$196 sps:$4 sm:$0xff]   ;;  %v7734_v3 = vld [vmem:[#allocation4 + $0x8] ss:$196 sps:$4 sm:$0xff]   ;;  %3957 = vmatprep.subr.bf16.mxu1 %v7731_v1  ;;  %v7737_v5 = vld [vmem:[#allocation4 + $0x194] ss:$196 sps:$4 sm:$0xff]  }
  0x14   :  { %v7735_v4 = vld [vmem:[#allocation4 + $0x18c] ss:$196 sps:$4 sm:$0xff]   ;;  %3915 = vmatpush1.bf16.msra.mxu0 %v7733_v2  ;;  %3958 = vmatpush1.bf16.msra.mxu1 %v7734_v3  ;;  %v7741_v8 = vld [vmem:[#allocation4 + $0x314] ss:$196 sps:$4 sm:$0xff]   ;;  %v7743_v9 = vld [vmem:[#allocation4 + $0x31c] ss:$196 sps:$4 sm:$0xff]  }
  0x15   :  { %v7739_v6 = vld [vmem:[#allocation4 + $0x188] ss:$196 sps:$4 sm:$0xff]   ;;  %3916 = vmatprep.subr.bf16.mxu0 %v7735_v4  ;;  %v7740_v7 = vld [vmem:[#allocation4 + $0x190] ss:$196 sps:$4 sm:$0xff]   ;;  %3959 = vmatprep.subr.bf16.mxu1 %v7737_v5  ;;  %v7746_v11 = vld [vmem:[#allocation4 + $0x318] ss:$196 sps:$4 sm:$0xff]  }
  0x16   :  { %v7745_v10 = vld [vmem:[#allocation4 + $0x310] ss:$196 sps:$4 sm:$0xff]   ;;  %v7747_v12 = vld [vmem:[#allocation4 + $0x49c] ss:$196 sps:$4 sm:$0xff]   ;;  %v7749_v13 = vld [vmem:[#allocation4 + $0x4a4] ss:$196 sps:$4 sm:$0xff]  }
  0x17   :  { %v7751_v14 = vld [vmem:[#allocation4 + $0x498] ss:$196 sps:$4 sm:$0xff]   ;;  %v7752_v15 = vld [vmem:[#allocation4 + $0x4a0] ss:$196 sps:$4 sm:$0xff]   ;;  %v7755_v17 = vld [vmem:[#allocation4 + $0x62c] ss:$196 sps:$4 sm:$0xff]  }
  0x18   :  { %3917 = vmatpush1.bf16.msra.mxu0 %v7739_v6  ;;  %3960 = vmatpush1.bf16.msra.mxu1 %v7740_v7  ;;  %v7753_v16 = vld [vmem:[#allocation4 + $0x624] ss:$196 sps:$4 sm:$0xff]   ;;  %v7759_v20 = vld [vmem:[#allocation4 + $0x7ac] ss:$196 sps:$4 sm:$0xff]   ;;  %v7761_v21 = vld [vmem:[#allocation4 + $0x7b4] ss:$196 sps:$4 sm:$0xff]  }
  0x19   :  { %3918 = vmatprep.subr.bf16.mxu0 %v7741_v8  ;;  %3961 = vmatprep.subr.bf16.mxu1 %v7743_v9  ;;  %v7757_v18 = vld [vmem:[#allocation4 + $0x620] ss:$196 sps:$4 sm:$0xff]   ;;  %v7758_v19 = vld [vmem:[#allocation4 + $0x628] ss:$196 sps:$4 sm:$0xff]   ;;  %v7764_v23 = vld [vmem:[#allocation4 + $0x7b0] ss:$196 sps:$4 sm:$0xff]  }
  0x1a   :  { %v7763_v22 = vld [vmem:[#allocation4 + $0x7a8] ss:$196 sps:$4 sm:$0xff]   ;;  %v7765_v24 = vld [vmem:[#allocation4 + $0x934] ss:$196 sps:$4 sm:$0xff]   ;;  %v7767_v25 = vld [vmem:[#allocation4 + $0x93c] ss:$196 sps:$4 sm:$0xff]  }
  0x1b   :  { %v7769_v26 = vld [vmem:[#allocation4 + $0x930] ss:$196 sps:$4 sm:$0xff]   ;;  %v7770_v27 = vld [vmem:[#allocation4 + $0x938] ss:$196 sps:$4 sm:$0xff]   ;;  %v7773_v29 = vld [vmem:[#allocation4 + $0xac4] ss:$196 sps:$4 sm:$0xff]  }
  0x1c   :  { %3919 = vmatpush1.bf16.msra.mxu0 %v7745_v10  ;;  %3962 = vmatpush1.bf16.msra.mxu1 %v7746_v11  ;;  %v7771_v28 = vld [vmem:[#allocation4 + $0xabc] ss:$196 sps:$4 sm:$0xff]   ;;  %v7777_v32 = vld [vmem:[#allocation4 + $0xc44] ss:$196 sps:$4 sm:$0xff]   ;;  %v7779_v33 = vld [vmem:[#allocation4 + $0xc4c] ss:$196 sps:$4 sm:$0xff]  }
  0x1d   :  { %3920 = vmatprep.subr.bf16.mxu0 %v7747_v12  ;;  %3963 = vmatprep.subr.bf16.mxu1 %v7749_v13  ;;  %v7775_v30 = vld [vmem:[#allocation4 + $0xab8] ss:$196 sps:$4 sm:$0xff]   ;;  %v7776_v31 = vld [vmem:[#allocation4 + $0xac0] ss:$196 sps:$4 sm:$0xff]   ;;  %v7782_v35 = vld [vmem:[#allocation4 + $0xc48] ss:$196 sps:$4 sm:$0xff]  }
  0x1e   :  { %v7781_v34 = vld [vmem:[#allocation4 + $0xc40] ss:$196 sps:$4 sm:$0xff]   ;;  %v7783_v36 = vld [vmem:[#allocation4 + $0xdcc] ss:$196 sps:$4 sm:$0xff]   ;;  %vm3762_vm0 = vcmask 588800   ;;  %vm3766_vm1 = vcmask 1043456  }
  0x1f   :  { %v7785_v37 = vld [vmem:[#allocation4 + $0xdd4] ss:$196 sps:$4 sm:$0xff]   ;;  %v8735_v38 = vld [vmem:[%s9312_s0 + $0x4] ss:$8 sps:$4 sm:$0xff]   ;;  %v8748_v59 = vld [vmem:[%s9312_s0] ss:$8 sps:$4 sm:$0xff]  }
  0x20   :  { %3921 = vmatpush1.bf16.msra.mxu0 %v7751_v14  ;;  %3964 = vmatpush1.bf16.msra.mxu1 %v7752_v15  ;;  %v7787_v39 = vld [vmem:[#allocation4 + $0xdc8] ss:$196 sps:$4 sm:$0xff]   ;;  %v7788_v40 = vld [vmem:[#allocation4 + $0xdd0] ss:$196 sps:$4 sm:$0xff]   ;;  %v7791_v42 = vld [vmem:[#allocation4 + $0xf5c] ss:$196 sps:$4 sm:$0xff]  }
  0x21   :  { %3922 = vmatprep.subr.bf16.mxu0 %v7753_v16  ;;  %3965 = vmatprep.subr.bf16.mxu1 %v7755_v17  ;;  %v7789_v41 = vld [vmem:[#allocation4 + $0xf54] ss:$196 sps:$4 sm:$0xff]   ;;  %v7795_v45 = vld [vmem:[#allocation4 + $0x10dc] ss:$196 sps:$4 sm:$0xff]   ;;  %v7797_v46 = vld [vmem:[#allocation4 + $0x10e4] ss:$196 sps:$4 sm:$0xff]  }
  0x22   :  { %7575 = vmatprep.mubr.msk.bf16.mxu0 %vm3762_vm0, %v8735_v38  ;;  %7577 = vmatprep.mubr.msk.bf16.mxu1 %vm3762_vm0, %v8735_v38  ;;  %v7793_v43 = vld [vmem:[#allocation4 + $0xf50] ss:$196 sps:$4 sm:$0xff]   ;;  %v7794_v44 = vld [vmem:[#allocation4 + $0xf58] ss:$196 sps:$4 sm:$0xff]   ;;  %v653_v47 = vld [vmem:[#allocation4 + $0x1260] sm:$0xff] }
  0x23   :  { %v654_v48 = vld [vmem:[#allocation4 + $0x1268] sm:$0xff]  ;;  %v7799_v49 = vld [vmem:[#allocation4 + $0x10d8] ss:$196 sps:$4 sm:$0xff]   ;;  %v7800_v50 = vld [vmem:[#allocation4 + $0x10e0] ss:$196 sps:$4 sm:$0xff]   ;;  %v7525_v51 = vcombine.low %v653_v47, %v653_v47  ;;  %v7526_v52 = vcombine.high %v653_v47, %v653_v47 }
  0x24   :  { %3923 = vmatpush1.bf16.msra.mxu0 %v7757_v18  ;;  %3966 = vmatpush1.bf16.msra.mxu1 %v7758_v19  ;;  %v7528_v53 = vcombine.high %v654_v48, %v654_v48  ;;  %v7527_v54 = vcombine.low %v654_v48, %v654_v48  ;;  %v7810_v57 = vld [vmem:[#allocation4 + $0x14] ss:$196 sps:$4 sm:$0xff]   ;;  %v7813_v58 = vld [vmem:[#allocation4 + $0x1c] ss:$196 sps:$4 sm:$0xff]   ;;  %v7819_v63 = vld [vmem:[#allocation4 + $0x1a4] ss:$196 sps:$4 sm:$0xff]  }
  0x25   :  { %3924 = vmatprep.subr.bf16.mxu0 %v7759_v20  ;;  %3967 = vmatprep.subr.bf16.mxu1 %v7761_v21  ;;  %v3768_v55 = vsel %vm3766_vm1, %v7525_v51, 0  ;;  %v7808_v60 = vld [vmem:[#allocation4 + $0x10] ss:$196 sps:$4 sm:$0xff]   ;;  %v7811_v61 = vld [vmem:[#allocation4 + $0x18] ss:$196 sps:$4 sm:$0xff]  }
  0x26   :  { %v3774_v56 = vsel %vm3766_vm1, %v7527_v54, 0  ;;  %v7816_v62 = vld [vmem:[#allocation4 + $0x19c] ss:$196 sps:$4 sm:$0xff]   ;;  %v7822_v2 = vld [vmem:[#allocation4 + $0x324] ss:$196 sps:$4 sm:$0xff]  }
  0x27   :  { %v7814_v0 = vld [vmem:[#allocation4 + $0x198] ss:$196 sps:$4 sm:$0xff]   ;;  %v7817_v1 = vld [vmem:[#allocation4 + $0x1a0] ss:$196 sps:$4 sm:$0xff]   ;;  %v7825_v3 = vld [vmem:[#allocation4 + $0x32c] ss:$196 sps:$4 sm:$0xff]  }
  0x28   :  { %3925 = vmatpush1.bf16.msra.mxu0 %v7763_v22  ;;  %3968 = vmatpush1.bf16.msra.mxu1 %v7764_v23  ;;  %v7820_v4 = vld [vmem:[#allocation4 + $0x320] ss:$196 sps:$4 sm:$0xff]   ;;  %v7823_v5 = vld [vmem:[#allocation4 + $0x328] ss:$196 sps:$4 sm:$0xff]   ;;  %v7831_v7 = vld [vmem:[#allocation4 + $0x4b4] ss:$196 sps:$4 sm:$0xff]  }
  0x29   :  { %3926 = vmatprep.subr.bf16.mxu0 %v7765_v24  ;;  %3969 = vmatprep.subr.bf16.mxu1 %v7767_v25  ;;  %v7828_v6 = vld [vmem:[#allocation4 + $0x4ac] ss:$196 sps:$4 sm:$0xff]   ;;  %v7834_v10 = vld [vmem:[#allocation4 + $0x634] ss:$196 sps:$4 sm:$0xff]   ;;  %v7837_v11 = vld [vmem:[#allocation4 + $0x63c] ss:$196 sps:$4 sm:$0xff]  }
  0x2a   :  { %v7826_v8 = vld [vmem:[#allocation4 + $0x4a8] ss:$196 sps:$4 sm:$0xff]   ;;  %v7829_v9 = vld [vmem:[#allocation4 + $0x4b0] ss:$196 sps:$4 sm:$0xff]   ;;  %v7835_v13 = vld [vmem:[#allocation4 + $0x638] ss:$196 sps:$4 sm:$0xff]  }
  0x2b   :  { %v7832_v12 = vld [vmem:[#allocation4 + $0x630] ss:$196 sps:$4 sm:$0xff]   ;;  %v7840_v14 = vld [vmem:[#allocation4 + $0x7bc] ss:$196 sps:$4 sm:$0xff]   ;;  %v7843_v15 = vld [vmem:[#allocation4 + $0x7c4] ss:$196 sps:$4 sm:$0xff]  }
  0x2c   :  { %3927 = vmatpush1.bf16.msra.mxu0 %v7769_v26  ;;  %3970 = vmatpush1.bf16.msra.mxu1 %v7770_v27  ;;  %v7838_v16 = vld [vmem:[#allocation4 + $0x7b8] ss:$196 sps:$4 sm:$0xff]   ;;  %v7841_v17 = vld [vmem:[#allocation4 + $0x7c0] ss:$196 sps:$4 sm:$0xff]   ;;  %v7849_v19 = vld [vmem:[#allocation4 + $0x94c] ss:$196 sps:$4 sm:$0xff]  }
  0x2d   :  { %3928 = vmatprep.subr.bf16.mxu0 %v7771_v28  ;;  %3971 = vmatprep.subr.bf16.mxu1 %v7773_v29  ;;  %v7846_v18 = vld [vmem:[#allocation4 + $0x944] ss:$196 sps:$4 sm:$0xff]   ;;  %v7852_v22 = vld [vmem:[#allocation4 + $0xacc] ss:$196 sps:$4 sm:$0xff]   ;;  %v7855_v23 = vld [vmem:[#allocation4 + $0xad4] ss:$196 sps:$4 sm:$0xff]  }
  0x2e   :  { %v7844_v20 = vld [vmem:[#allocation4 + $0x940] ss:$196 sps:$4 sm:$0xff]   ;;  %v7847_v21 = vld [vmem:[#allocation4 + $0x948] ss:$196 sps:$4 sm:$0xff]   ;;  %v7853_v25 = vld [vmem:[#allocation4 + $0xad0] ss:$196 sps:$4 sm:$0xff]  }
  0x2f   :  { %v7850_v24 = vld [vmem:[#allocation4 + $0xac8] ss:$196 sps:$4 sm:$0xff]   ;;  %v7858_v26 = vld [vmem:[#allocation4 + $0xc54] ss:$196 sps:$4 sm:$0xff]   ;;  %v7861_v27 = vld [vmem:[#allocation4 + $0xc5c] ss:$196 sps:$4 sm:$0xff]  }
  0x30   :  { %3929 = vmatpush1.bf16.msra.mxu0 %v7775_v30  ;;  %3972 = vmatpush1.bf16.msra.mxu1 %v7776_v31  ;;  %v7856_v28 = vld [vmem:[#allocation4 + $0xc50] ss:$196 sps:$4 sm:$0xff]   ;;  %v7859_v29 = vld [vmem:[#allocation4 + $0xc58] ss:$196 sps:$4 sm:$0xff]   ;;  %v7867_v31 = vld [vmem:[#allocation4 + $0xde4] ss:$196 sps:$4 sm:$0xff]  }
  0x31   :  { %3930 = vmatprep.subr.bf16.mxu0 %v7777_v32  ;;  %3973 = vmatprep.subr.bf16.mxu1 %v7779_v33  ;;  %v7864_v30 = vld [vmem:[#allocation4 + $0xddc] ss:$196 sps:$4 sm:$0xff]   ;;  %v7887_v54 = vld [vmem:[#allocation4 + $0x28] ss:$196 sps:$4 sm:$0xff]  }
  0x32   :  { %v7862_v32 = vld [vmem:[#allocation4 + $0xdd8] ss:$196 sps:$4 sm:$0xff]   ;;  %v7865_v33 = vld [vmem:[#allocation4 + $0xde0] ss:$196 sps:$4 sm:$0xff]  }
  0x34   :  { %3931 = vmatpush1.bf16.msra.mxu0 %v7781_v34  ;;  %3974 = vmatpush1.bf16.msra.mxu1 %v7782_v35  ;;  %v7870_v34 = vld [vmem:[#allocation4 + $0xf64] ss:$196 sps:$4 sm:$0xff]   ;;  %v7873_v35 = vld [vmem:[#allocation4 + $0xf6c] ss:$196 sps:$4 sm:$0xff]  }
  0x35   :  { %3932 = vmatprep.subr.bf16.mxu0 %v7783_v36  ;;  %3975 = vmatprep.subr.bf16.mxu1 %v7785_v37  ;;  %v7868_v36 = vld [vmem:[#allocation4 + $0xf60] ss:$196 sps:$4 sm:$0xff]   ;;  %v7871_v37 = vld [vmem:[#allocation4 + $0xf68] ss:$196 sps:$4 sm:$0xff]  }
  0x38   :  { %3933 = vmatpush1.bf16.msra.mxu0 %v7787_v39  ;;  %3976 = vmatpush1.bf16.msra.mxu1 %v7788_v40  ;;  %v7876_v39 = vld [vmem:[#allocation4 + $0x10ec] ss:$196 sps:$4 sm:$0xff]   ;;  %v7879_v40 = vld [vmem:[#allocation4 + $0x10f4] ss:$196 sps:$4 sm:$0xff]  }
  0x39   :  { %3934 = vmatprep.subr.bf16.mxu0 %v7789_v41  ;;  %3977 = vmatprep.subr.bf16.mxu1 %v7791_v42  ;;  %v655_v41 = vld [vmem:[#allocation4 + $0x1270] sm:$0xff]  ;;  %v656_v42 = vld [vmem:[#allocation4 + $0x1278] sm:$0xff] }
  0x3a   :  { %v7529_v47 = vcombine.low %v655_v41, %v655_v41  ;;  %v7531_v48 = vcombine.low %v656_v42, %v656_v42 }
  0x3c   :  { %3935 = vmatpush1.bf16.msra.mxu0 %v7793_v43  ;;  %3978 = vmatpush1.bf16.msra.mxu1 %v7794_v44  ;;  %v7874_v43 = vld [vmem:[#allocation4 + $0x10e8] ss:$196 sps:$4 sm:$0xff]   ;;  %v7877_v44 = vld [vmem:[#allocation4 + $0x10f0] ss:$196 sps:$4 sm:$0xff]   ;;  %v3786_v51 = vsel %vm3766_vm1, %v7531_v48, 0 }
  0x3d   :  { %3936 = vmatprep.subr.bf16.mxu0 %v7795_v45  ;;  %3979 = vmatprep.subr.bf16.mxu1 %v7797_v46  ;;  %v7530_v45 = vcombine.high %v655_v41, %v655_v41  ;;  %v7532_v46 = vcombine.high %v656_v42, %v656_v42  ;;  %v7963_v48 = vld [vmem:[#allocation4 + $0x38] ss:$196 sps:$4 sm:$0xff]  }
  0x40   :  { %3937 = vmatpush1.bf16.msra.mxu0 %v7799_v49  ;;  %3980 = vmatpush1.bf16.msra.mxu1 %v7800_v50  ;;  %v7886_v49 = vld [vmem:[#allocation4 + $0x24] ss:$196 sps:$4 sm:$0xff]   ;;  %v3780_v50 = vsel %vm3766_vm1, %v7529_v47, 0  ;;  %v7960_v47 = vld [vmem:[#allocation4 + $0x30] ss:$196 sps:$4 sm:$0xff]  }
  0x41   :  { %7574 = vmatprep.subr.msk.bf16.mxu0 %vm3766_vm1, %v7526_v52  ;;  %7576 = vmatprep.subr.msk.bf16.mxu1 %vm3766_vm1, %v7528_v53  ;;  %v7889_v52 = vld [vmem:[#allocation4 + $0x2c] ss:$196 sps:$4 sm:$0xff]   ;;  %v7884_v53 = vld [vmem:[#allocation4 + $0x20] ss:$196 sps:$4 sm:$0xff]  }
  0x44   :  { %3939 = vmatpush1.bf16.msra.mxu0 %v3768_v55  ;;  %3982 = vmatpush1.bf16.msra.mxu1 %v3774_v56  ;;  %v7892_v55 = vld [vmem:[#allocation4 + $0x1ac] ss:$196 sps:$4 sm:$0xff]   ;;  %v7895_v56 = vld [vmem:[#allocation4 + $0x1b4] ss:$196 sps:$4 sm:$0xff]  }
  0x45   :  { %4000 = vmatprep.subr.bf16.mxu0 %v7810_v57  ;;  %4043 = vmatprep.subr.bf16.mxu1 %v7813_v58  ;;  %v7890_v57 = vld [vmem:[#allocation4 + $0x1a8] ss:$196 sps:$4 sm:$0xff]   ;;  %v7893_v58 = vld [vmem:[#allocation4 + $0x1b0] ss:$196 sps:$4 sm:$0xff]  }
  0x47   :  { %3947 = vmatmul.mubr.bf16.vlgmr.msra.gmra.mrb[0].mxu0 %v8748_v59  ;;  %3990 = vmatmul.mubr.bf16.vlgmr.msra.gmra.mrb[0].mxu1 %v8748_v59 }
  0x48   :  { %4001 = vmatpush1.bf16.msra.mxu0 %v7808_v60  ;;  %4044 = vmatpush1.bf16.msra.mxu1 %v7811_v61  ;;  %v7898_v60 = vld [vmem:[#allocation4 + $0x334] ss:$196 sps:$4 sm:$0xff]   ;;  %v7901_v61 = vld [vmem:[#allocation4 + $0x33c] ss:$196 sps:$4 sm:$0xff]  }
  0x49   :  { %4002 = vmatprep.subr.bf16.mxu0 %v7816_v62  ;;  %4045 = vmatprep.subr.bf16.mxu1 %v7819_v63  ;;  %v7896_v62 = vld [vmem:[#allocation4 + $0x330] ss:$196 sps:$4 sm:$0xff]   ;;  %v7899_v63 = vld [vmem:[#allocation4 + $0x338] ss:$196 sps:$4 sm:$0xff]  }
  0x4a   :  { %7579 = vmatprep.mubr.msk.bf16.mxu0 %vm3762_vm0, %v8735_v38  ;;  %7581 = vmatprep.mubr.msk.bf16.mxu1 %vm3762_vm0, %v8735_v38 }
  0x4c   :  { %4003 = vmatpush1.bf16.msra.mxu0 %v7814_v0  ;;  %4046 = vmatpush1.bf16.msra.mxu1 %v7817_v1  ;;  %v7904_v0 = vld [vmem:[#allocation4 + $0x4bc] ss:$196 sps:$4 sm:$0xff]   ;;  %v7907_v1 = vld [vmem:[#allocation4 + $0x4c4] ss:$196 sps:$4 sm:$0xff]  }
  0x4d   :  { %4004 = vmatprep.subr.bf16.mxu0 %v7822_v2  ;;  %4047 = vmatprep.subr.bf16.mxu1 %v7825_v3  ;;  %v7902_v2 = vld [vmem:[#allocation4 + $0x4b8] ss:$196 sps:$4 sm:$0xff]   ;;  %v7905_v3 = vld [vmem:[#allocation4 + $0x4c0] ss:$196 sps:$4 sm:$0xff]  }
  0x50   :  { %4005 = vmatpush1.bf16.msra.mxu0 %v7820_v4  ;;  %4048 = vmatpush1.bf16.msra.mxu1 %v7823_v5  ;;  %v7910_v4 = vld [vmem:[#allocation4 + $0x644] ss:$196 sps:$4 sm:$0xff]   ;;  %v7913_v5 = vld [vmem:[#allocation4 + $0x64c] ss:$196 sps:$4 sm:$0xff]  }
  0x51   :  { %4006 = vmatprep.subr.bf16.mxu0 %v7828_v6  ;;  %4049 = vmatprep.subr.bf16.mxu1 %v7831_v7  ;;  %v7908_v6 = vld [vmem:[#allocation4 + $0x640] ss:$196 sps:$4 sm:$0xff]   ;;  %v7911_v7 = vld [vmem:[#allocation4 + $0x648] ss:$196 sps:$4 sm:$0xff]  }
  0x54   :  { %4007 = vmatpush1.bf16.msra.mxu0 %v7826_v8  ;;  %4050 = vmatpush1.bf16.msra.mxu1 %v7829_v9  ;;  %v7916_v8 = vld [vmem:[#allocation4 + $0x7cc] ss:$196 sps:$4 sm:$0xff]   ;;  %v7919_v9 = vld [vmem:[#allocation4 + $0x7d4] ss:$196 sps:$4 sm:$0xff]  }
  0x55   :  { %4008 = vmatprep.subr.bf16.mxu0 %v7834_v10  ;;  %4051 = vmatprep.subr.bf16.mxu1 %v7837_v11  ;;  %v7914_v10 = vld [vmem:[#allocation4 + $0x7c8] ss:$196 sps:$4 sm:$0xff]   ;;  %v7917_v11 = vld [vmem:[#allocation4 + $0x7d0] ss:$196 sps:$4 sm:$0xff]  }
  0x58   :  { %4009 = vmatpush1.bf16.msra.mxu0 %v7832_v12  ;;  %4052 = vmatpush1.bf16.msra.mxu1 %v7835_v13  ;;  %v7922_v12 = vld [vmem:[#allocation4 + $0x954] ss:$196 sps:$4 sm:$0xff]   ;;  %v7925_v13 = vld [vmem:[#allocation4 + $0x95c] ss:$196 sps:$4 sm:$0xff]  }
  0x59   :  { %4010 = vmatprep.subr.bf16.mxu0 %v7840_v14  ;;  %4053 = vmatprep.subr.bf16.mxu1 %v7843_v15  ;;  %v7920_v14 = vld [vmem:[#allocation4 + $0x950] ss:$196 sps:$4 sm:$0xff]   ;;  %v7923_v15 = vld [vmem:[#allocation4 + $0x958] ss:$196 sps:$4 sm:$0xff]  }
  0x5c   :  { %4011 = vmatpush1.bf16.msra.mxu0 %v7838_v16  ;;  %4054 = vmatpush1.bf16.msra.mxu1 %v7841_v17  ;;  %v7928_v16 = vld [vmem:[#allocation4 + $0xadc] ss:$196 sps:$4 sm:$0xff]   ;;  %v7931_v17 = vld [vmem:[#allocation4 + $0xae4] ss:$196 sps:$4 sm:$0xff]  }
  0x5d   :  { %4012 = vmatprep.subr.bf16.mxu0 %v7846_v18  ;;  %4055 = vmatprep.subr.bf16.mxu1 %v7849_v19  ;;  %v7926_v18 = vld [vmem:[#allocation4 + $0xad8] ss:$196 sps:$4 sm:$0xff]   ;;  %v7929_v19 = vld [vmem:[#allocation4 + $0xae0] ss:$196 sps:$4 sm:$0xff]  }
  0x60   :  { %4013 = vmatpush1.bf16.msra.mxu0 %v7844_v20  ;;  %4056 = vmatpush1.bf16.msra.mxu1 %v7847_v21  ;;  %v7934_v20 = vld [vmem:[#allocation4 + $0xc64] ss:$196 sps:$4 sm:$0xff]   ;;  %v7937_v21 = vld [vmem:[#allocation4 + $0xc6c] ss:$196 sps:$4 sm:$0xff]  }
  0x61   :  { %4014 = vmatprep.subr.bf16.mxu0 %v7852_v22  ;;  %4057 = vmatprep.subr.bf16.mxu1 %v7855_v23  ;;  %v7932_v22 = vld [vmem:[#allocation4 + $0xc60] ss:$196 sps:$4 sm:$0xff]   ;;  %v7935_v23 = vld [vmem:[#allocation4 + $0xc68] ss:$196 sps:$4 sm:$0xff]  }
  0x64   :  { %4015 = vmatpush1.bf16.msra.mxu0 %v7850_v24  ;;  %4058 = vmatpush1.bf16.msra.mxu1 %v7853_v25  ;;  %v7940_v24 = vld [vmem:[#allocation4 + $0xdec] ss:$196 sps:$4 sm:$0xff]   ;;  %v7943_v25 = vld [vmem:[#allocation4 + $0xdf4] ss:$196 sps:$4 sm:$0xff]  }
  0x65   :  { %4016 = vmatprep.subr.bf16.mxu0 %v7858_v26  ;;  %4059 = vmatprep.subr.bf16.mxu1 %v7861_v27  ;;  %v7938_v26 = vld [vmem:[#allocation4 + $0xde8] ss:$196 sps:$4 sm:$0xff]   ;;  %v7941_v27 = vld [vmem:[#allocation4 + $0xdf0] ss:$196 sps:$4 sm:$0xff]  }
  0x68   :  { %4017 = vmatpush1.bf16.msra.mxu0 %v7856_v28  ;;  %4060 = vmatpush1.bf16.msra.mxu1 %v7859_v29  ;;  %v7946_v28 = vld [vmem:[#allocation4 + $0xf74] ss:$196 sps:$4 sm:$0xff]   ;;  %v7949_v29 = vld [vmem:[#allocation4 + $0xf7c] ss:$196 sps:$4 sm:$0xff]  }
  0x69   :  { %4018 = vmatprep.subr.bf16.mxu0 %v7864_v30  ;;  %4061 = vmatprep.subr.bf16.mxu1 %v7867_v31  ;;  %v7944_v30 = vld [vmem:[#allocation4 + $0xf70] ss:$196 sps:$4 sm:$0xff]   ;;  %v7947_v31 = vld [vmem:[#allocation4 + $0xf78] ss:$196 sps:$4 sm:$0xff]  }
  0x6c   :  { %4019 = vmatpush1.bf16.msra.mxu0 %v7862_v32  ;;  %4062 = vmatpush1.bf16.msra.mxu1 %v7865_v33  ;;  %v7952_v32 = vld [vmem:[#allocation4 + $0x10fc] ss:$196 sps:$4 sm:$0xff]   ;;  %v7955_v33 = vld [vmem:[#allocation4 + $0x1104] ss:$196 sps:$4 sm:$0xff]  }
  0x6d   :  { %4020 = vmatprep.subr.bf16.mxu0 %v7870_v34  ;;  %4063 = vmatprep.subr.bf16.mxu1 %v7873_v35  ;;  %v657_v34 = vld [vmem:[#allocation4 + $0x1280] sm:$0xff]  ;;  %v658_v35 = vld [vmem:[#allocation4 + $0x1288] sm:$0xff] }
  0x6e   :  { %v7533_v41 = vcombine.low %v657_v34, %v657_v34  ;;  %v7535_v42 = vcombine.low %v658_v35, %v658_v35 }
  0x70   :  { %4021 = vmatpush1.bf16.msra.mxu0 %v7868_v36  ;;  %4064 = vmatpush1.bf16.msra.mxu1 %v7871_v37  ;;  %v7950_v36 = vld [vmem:[#allocation4 + $0x10f8] ss:$196 sps:$4 sm:$0xff]   ;;  %v7953_v37 = vld [vmem:[#allocation4 + $0x1100] ss:$196 sps:$4 sm:$0xff]  }
  0x71   :  { %4022 = vmatprep.subr.bf16.mxu0 %v7876_v39  ;;  %4065 = vmatprep.subr.bf16.mxu1 %v7879_v40  ;;  %v7534_v39 = vcombine.high %v657_v34, %v657_v34  ;;  %v7536_v40 = vcombine.high %v658_v35, %v658_v35  ;;  %v8038_v34 = vld [vmem:[#allocation4 + $0x44] ss:$196 sps:$4 sm:$0xff]  }
  0x74   :  { %4023 = vmatpush1.bf16.msra.mxu0 %v7874_v43  ;;  %4066 = vmatpush1.bf16.msra.mxu1 %v7877_v44  ;;  %v7962_v43 = vld [vmem:[#allocation4 + $0x34] ss:$196 sps:$4 sm:$0xff]   ;;  %v3792_v44 = vsel %vm3766_vm1, %v7533_v41, 0  ;;  %v8044_v41 = vld [vmem:[#allocation4 + $0x1cc] ss:$196 sps:$4 sm:$0xff]  }
  0x75   :  { %7578 = vmatprep.subr.msk.bf16.mxu0 %vm3766_vm1, %v7530_v45  ;;  %7580 = vmatprep.subr.msk.bf16.mxu1 %vm3766_vm1, %v7532_v46  ;;  %v3798_v45 = vsel %vm3766_vm1, %v7535_v42, 0  ;;  %v7965_v46 = vld [vmem:[#allocation4 + $0x3c] ss:$196 sps:$4 sm:$0xff]   ;;  %v8047_v42 = vld [vmem:[#allocation4 + $0x1d4] ss:$196 sps:$4 sm:$0xff]  }
  0x78   :  { %4025 = vmatpush1.bf16.msra.mxu0 %v3780_v50  ;;  %4068 = vmatpush1.bf16.msra.mxu1 %v3786_v51  ;;  %v7971_v50 = vld [vmem:[#allocation4 + $0x1c4] ss:$196 sps:$4 sm:$0xff]   ;;  %v7966_v51 = vld [vmem:[#allocation4 + $0x1b8] ss:$196 sps:$4 sm:$0xff]  }
  0x79   :  { %4086 = vmatprep.subr.bf16.mxu0 %v7886_v49  ;;  %4129 = vmatprep.subr.bf16.mxu1 %v7889_v52  ;;  %v7968_v49 = vld [vmem:[#allocation4 + $0x1bc] ss:$196 sps:$4 sm:$0xff]  }
  0x7a   :  { %v7969_v52 = vld [vmem:[#allocation4 + $0x1c0] ss:$196 sps:$4 sm:$0xff]  }
  0x7b   :  { %4033 = vmatmul.mubr.bf16.vlgmr.msra.gmra.mrb[4].mxu0 %v8748_v59  ;;  %4076 = vmatmul.mubr.bf16.vlgmr.msra.gmra.mrb[4].mxu1 %v8748_v59 }
  0x7c   :  { %4087 = vmatpush1.bf16.msra.mxu0 %v7884_v53  ;;  %4130 = vmatpush1.bf16.msra.mxu1 %v7887_v54  ;;  %v7974_v53 = vld [vmem:[#allocation4 + $0x344] ss:$196 sps:$4 sm:$0xff]   ;;  %v7977_v54 = vld [vmem:[#allocation4 + $0x34c] ss:$196 sps:$4 sm:$0xff]  }
  0x7d   :  { %4088 = vmatprep.subr.bf16.mxu0 %v7892_v55  ;;  %4131 = vmatprep.subr.bf16.mxu1 %v7895_v56  ;;  %v7972_v55 = vld [vmem:[#allocation4 + $0x340] ss:$196 sps:$4 sm:$0xff]   ;;  %v7975_v56 = vld [vmem:[#allocation4 + $0x348] ss:$196 sps:$4 sm:$0xff]  }
  0x7e   :  { %7583 = vmatprep.mubr.msk.bf16.mxu0 %vm3762_vm0, %v8735_v38  ;;  %7585 = vmatprep.mubr.msk.bf16.mxu1 %vm3762_vm0, %v8735_v38 }
  0x80   :  { %4089 = vmatpush1.bf16.msra.mxu0 %v7890_v57  ;;  %4132 = vmatpush1.bf16.msra.mxu1 %v7893_v58  ;;  %v7983_v57 = vld [vmem:[#allocation4 + $0x4d4] ss:$196 sps:$4 sm:$0xff]   ;;  %v7978_v58 = vld [vmem:[#allocation4 + $0x4c8] ss:$196 sps:$4 sm:$0xff]  }
  0x81   :  { %4090 = vmatprep.subr.bf16.mxu0 %v7898_v60  ;;  %4133 = vmatprep.subr.bf16.mxu1 %v7901_v61  ;;  %v7981_v60 = vld [vmem:[#allocation4 + $0x4d0] ss:$196 sps:$4 sm:$0xff]  }
  0x82   :  { %v7986_v61 = vld [vmem:[#allocation4 + $0x654] ss:$196 sps:$4 sm:$0xff]  }
  0x84   :  { %4091 = vmatpush1.bf16.msra.mxu0 %v7896_v62  ;;  %4134 = vmatpush1.bf16.msra.mxu1 %v7899_v63  ;;  %v7989_v62 = vld [vmem:[#allocation4 + $0x65c] ss:$196 sps:$4 sm:$0xff]   ;;  %v7984_v63 = vld [vmem:[#allocation4 + $0x650] ss:$196 sps:$4 sm:$0xff]  }
  0x85   :  { %4092 = vmatprep.subr.bf16.mxu0 %v7904_v0  ;;  %4135 = vmatprep.subr.bf16.mxu1 %v7907_v1  ;;  %v7992_v0 = vld [vmem:[#allocation4 + $0x7dc] ss:$196 sps:$4 sm:$0xff]   ;;  %v7995_v1 = vld [vmem:[#allocation4 + $0x7e4] ss:$196 sps:$4 sm:$0xff]  }
  0x88   :  { %4093 = vmatpush1.bf16.msra.mxu0 %v7902_v2  ;;  %4136 = vmatpush1.bf16.msra.mxu1 %v7905_v3  ;;  %v7990_v2 = vld [vmem:[#allocation4 + $0x7d8] ss:$196 sps:$4 sm:$0xff]   ;;  %v7993_v3 = vld [vmem:[#allocation4 + $0x7e0] ss:$196 sps:$4 sm:$0xff]  }
  0x89   :  { %4094 = vmatprep.subr.bf16.mxu0 %v7910_v4  ;;  %4137 = vmatprep.subr.bf16.mxu1 %v7913_v5  ;;  %v7998_v4 = vld [vmem:[#allocation4 + $0x964] ss:$196 sps:$4 sm:$0xff]   ;;  %v8001_v5 = vld [vmem:[#allocation4 + $0x96c] ss:$196 sps:$4 sm:$0xff]  }
  0x8c   :  { %4095 = vmatpush1.bf16.msra.mxu0 %v7908_v6  ;;  %4138 = vmatpush1.bf16.msra.mxu1 %v7911_v7  ;;  %v7996_v6 = vld [vmem:[#allocation4 + $0x960] ss:$196 sps:$4 sm:$0xff]   ;;  %v7999_v7 = vld [vmem:[#allocation4 + $0x968] ss:$196 sps:$4 sm:$0xff]  }
  0x8d   :  { %4096 = vmatprep.subr.bf16.mxu0 %v7916_v8  ;;  %4139 = vmatprep.subr.bf16.mxu1 %v7919_v9  ;;  %v8004_v8 = vld [vmem:[#allocation4 + $0xaec] ss:$196 sps:$4 sm:$0xff]   ;;  %v8007_v9 = vld [vmem:[#allocation4 + $0xaf4] ss:$196 sps:$4 sm:$0xff]  }
  0x90   :  { %4097 = vmatpush1.bf16.msra.mxu0 %v7914_v10  ;;  %4140 = vmatpush1.bf16.msra.mxu1 %v7917_v11  ;;  %v8002_v10 = vld [vmem:[#allocation4 + $0xae8] ss:$196 sps:$4 sm:$0xff]   ;;  %v8005_v11 = vld [vmem:[#allocation4 + $0xaf0] ss:$196 sps:$4 sm:$0xff]  }
  0x91   :  { %4098 = vmatprep.subr.bf16.mxu0 %v7922_v12  ;;  %4141 = vmatprep.subr.bf16.mxu1 %v7925_v13  ;;  %v8010_v12 = vld [vmem:[#allocation4 + $0xc74] ss:$196 sps:$4 sm:$0xff]   ;;  %v8013_v13 = vld [vmem:[#allocation4 + $0xc7c] ss:$196 sps:$4 sm:$0xff]  }
  0x94   :  { %4099 = vmatpush1.bf16.msra.mxu0 %v7920_v14  ;;  %4142 = vmatpush1.bf16.msra.mxu1 %v7923_v15  ;;  %v8008_v14 = vld [vmem:[#allocation4 + $0xc70] ss:$196 sps:$4 sm:$0xff]   ;;  %v8011_v15 = vld [vmem:[#allocation4 + $0xc78] ss:$196 sps:$4 sm:$0xff]  }
  0x95   :  { %4100 = vmatprep.subr.bf16.mxu0 %v7928_v16  ;;  %4143 = vmatprep.subr.bf16.mxu1 %v7931_v17  ;;  %v8016_v16 = vld [vmem:[#allocation4 + $0xdfc] ss:$196 sps:$4 sm:$0xff]   ;;  %v8019_v17 = vld [vmem:[#allocation4 + $0xe04] ss:$196 sps:$4 sm:$0xff]  }
  0x98   :  { %4101 = vmatpush1.bf16.msra.mxu0 %v7926_v18  ;;  %4144 = vmatpush1.bf16.msra.mxu1 %v7929_v19  ;;  %v8014_v18 = vld [vmem:[#allocation4 + $0xdf8] ss:$196 sps:$4 sm:$0xff]   ;;  %v8017_v19 = vld [vmem:[#allocation4 + $0xe00] ss:$196 sps:$4 sm:$0xff]  }
  0x99   :  { %4102 = vmatprep.subr.bf16.mxu0 %v7934_v20  ;;  %4145 = vmatprep.subr.bf16.mxu1 %v7937_v21  ;;  %v8022_v20 = vld [vmem:[#allocation4 + $0xf84] ss:$196 sps:$4 sm:$0xff]   ;;  %v8025_v21 = vld [vmem:[#allocation4 + $0xf8c] ss:$196 sps:$4 sm:$0xff]  }
  0x9c   :  { %4103 = vmatpush1.bf16.msra.mxu0 %v7932_v22  ;;  %4146 = vmatpush1.bf16.msra.mxu1 %v7935_v23  ;;  %v8020_v22 = vld [vmem:[#allocation4 + $0xf80] ss:$196 sps:$4 sm:$0xff]   ;;  %v8023_v23 = vld [vmem:[#allocation4 + $0xf88] ss:$196 sps:$4 sm:$0xff]  }
  0x9d   :  { %4104 = vmatprep.subr.bf16.mxu0 %v7940_v24  ;;  %4147 = vmatprep.subr.bf16.mxu1 %v7943_v25  ;;  %v8028_v24 = vld [vmem:[#allocation4 + $0x110c] ss:$196 sps:$4 sm:$0xff]   ;;  %v8031_v25 = vld [vmem:[#allocation4 + $0x1114] ss:$196 sps:$4 sm:$0xff]  }
  0xa0   :  { %4105 = vmatpush1.bf16.msra.mxu0 %v7938_v26  ;;  %4148 = vmatpush1.bf16.msra.mxu1 %v7941_v27  ;;  %v659_v26 = vld [vmem:[#allocation4 + $0x1290] sm:$0xff]  ;;  %v660_v27 = vld [vmem:[#allocation4 + $0x1298] sm:$0xff] }
  0xa1   :  { %4106 = vmatprep.subr.bf16.mxu0 %v7946_v28  ;;  %4149 = vmatprep.subr.bf16.mxu1 %v7949_v29  ;;  %v8026_v28 = vld [vmem:[#allocation4 + $0x1108] ss:$196 sps:$4 sm:$0xff]   ;;  %v8029_v29 = vld [vmem:[#allocation4 + $0x1110] ss:$196 sps:$4 sm:$0xff]  }
  0xa4   :  { %4107 = vmatpush1.bf16.msra.mxu0 %v7944_v30  ;;  %4150 = vmatpush1.bf16.msra.mxu1 %v7947_v31  ;;  %v7538_v30 = vcombine.high %v659_v26, %v659_v26  ;;  %v7540_v31 = vcombine.high %v660_v27, %v660_v27 }
  0xa5   :  { %4108 = vmatprep.subr.bf16.mxu0 %v7952_v32  ;;  %4151 = vmatprep.subr.bf16.mxu1 %v7955_v33  ;;  %v7537_v32 = vcombine.low %v659_v26, %v659_v26  ;;  %v7539_v33 = vcombine.low %v660_v27, %v660_v27 }
  0xa7   :  { %v3804_v35 = vsel %vm3766_vm1, %v7537_v32, 0  ;;  %v8112_v32 = vld [vmem:[#allocation4 + $0x50] ss:$196 sps:$4 sm:$0xff]  }
  0xa8   :  { %4109 = vmatpush1.bf16.msra.mxu0 %v7950_v36  ;;  %4152 = vmatpush1.bf16.msra.mxu1 %v7953_v37  ;;  %v3810_v36 = vsel %vm3766_vm1, %v7539_v33, 0  ;;  %v8041_v37 = vld [vmem:[#allocation4 + $0x4c] ss:$196 sps:$4 sm:$0xff]   ;;  %v8115_v33 = vld [vmem:[#allocation4 + $0x58] ss:$196 sps:$4 sm:$0xff]  }
  0xa9   :  { %7582 = vmatprep.subr.msk.bf16.mxu0 %vm3766_vm1, %v7534_v39  ;;  %7584 = vmatprep.subr.msk.bf16.mxu1 %vm3766_vm1, %v7536_v40  ;;  %v8036_v39 = vld [vmem:[#allocation4 + $0x40] ss:$196 sps:$4 sm:$0xff]   ;;  %v8039_v40 = vld [vmem:[#allocation4 + $0x48] ss:$196 sps:$4 sm:$0xff]  }
  0xac   :  { %4111 = vmatpush1.bf16.msra.mxu0 %v3792_v44  ;;  %4154 = vmatpush1.bf16.msra.mxu1 %v3798_v45  ;;  %v8042_v44 = vld [vmem:[#allocation4 + $0x1c8] ss:$196 sps:$4 sm:$0xff]   ;;  %v8045_v45 = vld [vmem:[#allocation4 + $0x1d0] ss:$196 sps:$4 sm:$0xff]  }
  0xad   :  { %4172 = vmatprep.subr.bf16.mxu0 %v7962_v43  ;;  %4215 = vmatprep.subr.bf16.mxu1 %v7965_v46  ;;  %v8783_v43 = vld [vmem:[%s9312_s0] ss:$8 sps:$4 sm:$0xff]   ;;  %v8050_v46 = vld [vmem:[#allocation4 + $0x354] ss:$196 sps:$4 sm:$0xff]  }
  0xaf   :  { %4119 = vmatmul.mubr.bf16.vlgmr.msra.gmra.mrb[8].mxu0 %v8748_v59  ;;  %4162 = vmatmul.mubr.bf16.vlgmr.msra.gmra.mrb[8].mxu1 %v8748_v59  ;;  %v7980_v59 = vld [vmem:[#allocation4 + $0x4cc] ss:$196 sps:$4 sm:$0xff]  }
  0xb0   :  { %4173 = vmatpush1.bf16.msra.mxu0 %v7960_v47  ;;  %4216 = vmatpush1.bf16.msra.mxu1 %v7963_v48  ;;  %v8053_v47 = vld [vmem:[#allocation4 + $0x35c] ss:$196 sps:$4 sm:$0xff]  }
  0xb1   :  { %4174 = vmatprep.subr.bf16.mxu0 %v7968_v49  ;;  %4217 = vmatprep.subr.bf16.mxu1 %v7971_v50  ;;  %v8790_v48 = vld [vmem:[%s9312_s0 + $0x4] ss:$8 sps:$4 sm:$0xff]   ;;  %v8048_v49 = vld [vmem:[#allocation4 + $0x350] ss:$196 sps:$4 sm:$0xff]   ;;  %v8051_v50 = vld [vmem:[#allocation4 + $0x358] ss:$196 sps:$4 sm:$0xff]  }
  0xb2   :  { %7587 = vmatprep.mubr.msk.bf16.mxu0 %vm3762_vm0, %v8735_v38  ;;  %7589 = vmatprep.mubr.msk.bf16.mxu1 %vm3762_vm0, %v8735_v38  ;;  %v7987_v38 = vld [vmem:[#allocation4 + $0x658] ss:$196 sps:$4 sm:$0xff]  }
  0xb4   :  { %4175 = vmatpush1.bf16.msra.mxu0 %v7966_v51  ;;  %4218 = vmatpush1.bf16.msra.mxu1 %v7969_v52  ;;  %v8056_v51 = vld [vmem:[#allocation4 + $0x4dc] ss:$196 sps:$4 sm:$0xff]   ;;  %v8059_v52 = vld [vmem:[#allocation4 + $0x4e4] ss:$196 sps:$4 sm:$0xff]  }
  0xb5   :  { %4176 = vmatprep.subr.bf16.mxu0 %v7974_v53  ;;  %4219 = vmatprep.subr.bf16.mxu1 %v7977_v54  ;;  %v8054_v53 = vld [vmem:[#allocation4 + $0x4d8] ss:$196 sps:$4 sm:$0xff]   ;;  %v8057_v54 = vld [vmem:[#allocation4 + $0x4e0] ss:$196 sps:$4 sm:$0xff]  }
  0xb8   :  { %4177 = vmatpush1.bf16.msra.mxu0 %v7972_v55  ;;  %4220 = vmatpush1.bf16.msra.mxu1 %v7975_v56  ;;  %v8062_v55 = vld [vmem:[#allocation4 + $0x664] ss:$196 sps:$4 sm:$0xff]   ;;  %v8065_v56 = vld [vmem:[#allocation4 + $0x66c] ss:$196 sps:$4 sm:$0xff]  }
  0xb9   :  { %4178 = vmatprep.subr.bf16.mxu0 %v7980_v59  ;;  %4221 = vmatprep.subr.bf16.mxu1 %v7983_v57  ;;  %v8060_v59 = vld [vmem:[#allocation4 + $0x660] ss:$196 sps:$4 sm:$0xff]   ;;  %v8063_v57 = vld [vmem:[#allocation4 + $0x668] ss:$196 sps:$4 sm:$0xff]  }
  0xbc   :  { %4179 = vmatpush1.bf16.msra.mxu0 %v7978_v58  ;;  %4222 = vmatpush1.bf16.msra.mxu1 %v7981_v60  ;;  %v8068_v58 = vld [vmem:[#allocation4 + $0x7ec] ss:$196 sps:$4 sm:$0xff]   ;;  %v8071_v60 = vld [vmem:[#allocation4 + $0x7f4] ss:$196 sps:$4 sm:$0xff]  }
  0xbd   :  { %4180 = vmatprep.subr.bf16.mxu0 %v7986_v61  ;;  %4223 = vmatprep.subr.bf16.mxu1 %v7989_v62  ;;  %v8066_v61 = vld [vmem:[#allocation4 + $0x7e8] ss:$196 sps:$4 sm:$0xff]   ;;  %v8069_v62 = vld [vmem:[#allocation4 + $0x7f0] ss:$196 sps:$4 sm:$0xff]  }
  0xc0   :  { %4181 = vmatpush1.bf16.msra.mxu0 %v7984_v63  ;;  %4224 = vmatpush1.bf16.msra.mxu1 %v7987_v38  ;;  %v8074_v63 = vld [vmem:[#allocation4 + $0x974] ss:$196 sps:$4 sm:$0xff]   ;;  %v8077_v38 = vld [vmem:[#allocation4 + $0x97c] ss:$196 sps:$4 sm:$0xff]  }
  0xc1   :  { %4182 = vmatprep.subr.bf16.mxu0 %v7992_v0  ;;  %4225 = vmatprep.subr.bf16.mxu1 %v7995_v1  ;;  %v8072_v0 = vld [vmem:[#allocation4 + $0x970] ss:$196 sps:$4 sm:$0xff]   ;;  %v8075_v1 = vld [vmem:[#allocation4 + $0x978] ss:$196 sps:$4 sm:$0xff]  }
  0xc4   :  { %4183 = vmatpush1.bf16.msra.mxu0 %v7990_v2  ;;  %4226 = vmatpush1.bf16.msra.mxu1 %v7993_v3  ;;  %v8080_v2 = vld [vmem:[#allocation4 + $0xafc] ss:$196 sps:$4 sm:$0xff]   ;;  %v8083_v3 = vld [vmem:[#allocation4 + $0xb04] ss:$196 sps:$4 sm:$0xff]  }
  0xc5   :  { %4184 = vmatprep.subr.bf16.mxu0 %v7998_v4  ;;  %4227 = vmatprep.subr.bf16.mxu1 %v8001_v5  ;;  %v8078_v4 = vld [vmem:[#allocation4 + $0xaf8] ss:$196 sps:$4 sm:$0xff]   ;;  %v8081_v5 = vld [vmem:[#allocation4 + $0xb00] ss:$196 sps:$4 sm:$0xff]  }
  0xc8   :  { %4185 = vmatpush1.bf16.msra.mxu0 %v7996_v6  ;;  %4228 = vmatpush1.bf16.msra.mxu1 %v7999_v7  ;;  %v8086_v6 = vld [vmem:[#allocation4 + $0xc84] ss:$196 sps:$4 sm:$0xff]   ;;  %v8089_v7 = vld [vmem:[#allocation4 + $0xc8c] ss:$196 sps:$4 sm:$0xff]  }
  0xc9   :  { %4186 = vmatprep.subr.bf16.mxu0 %v8004_v8  ;;  %4229 = vmatprep.subr.bf16.mxu1 %v8007_v9  ;;  %v8084_v8 = vld [vmem:[#allocation4 + $0xc80] ss:$196 sps:$4 sm:$0xff]   ;;  %v8087_v9 = vld [vmem:[#allocation4 + $0xc88] ss:$196 sps:$4 sm:$0xff]  }
  0xcc   :  { %4187 = vmatpush1.bf16.msra.mxu0 %v8002_v10  ;;  %4230 = vmatpush1.bf16.msra.mxu1 %v8005_v11  ;;  %v8092_v10 = vld [vmem:[#allocation4 + $0xe0c] ss:$196 sps:$4 sm:$0xff]   ;;  %v8095_v11 = vld [vmem:[#allocation4 + $0xe14] ss:$196 sps:$4 sm:$0xff]  }
  0xcd   :  { %4188 = vmatprep.subr.bf16.mxu0 %v8010_v12  ;;  %4231 = vmatprep.subr.bf16.mxu1 %v8013_v13  ;;  %v8090_v12 = vld [vmem:[#allocation4 + $0xe08] ss:$196 sps:$4 sm:$0xff]   ;;  %v8093_v13 = vld [vmem:[#allocation4 + $0xe10] ss:$196 sps:$4 sm:$0xff]  }
  0xd0   :  { %4189 = vmatpush1.bf16.msra.mxu0 %v8008_v14  ;;  %4232 = vmatpush1.bf16.msra.mxu1 %v8011_v15  ;;  %v8098_v14 = vld [vmem:[#allocation4 + $0xf94] ss:$196 sps:$4 sm:$0xff]   ;;  %v8101_v15 = vld [vmem:[#allocation4 + $0xf9c] ss:$196 sps:$4 sm:$0xff]  }
  0xd1   :  { %4190 = vmatprep.subr.bf16.mxu0 %v8016_v16  ;;  %4233 = vmatprep.subr.bf16.mxu1 %v8019_v17  ;;  %v8096_v16 = vld [vmem:[#allocation4 + $0xf90] ss:$196 sps:$4 sm:$0xff]   ;;  %v8099_v17 = vld [vmem:[#allocation4 + $0xf98] ss:$196 sps:$4 sm:$0xff]  }
  0xd4   :  { %4191 = vmatpush1.bf16.msra.mxu0 %v8014_v18  ;;  %4234 = vmatpush1.bf16.msra.mxu1 %v8017_v19  ;;  %v8104_v18 = vld [vmem:[#allocation4 + $0x111c] ss:$196 sps:$4 sm:$0xff]   ;;  %v8107_v19 = vld [vmem:[#allocation4 + $0x1124] ss:$196 sps:$4 sm:$0xff]  }
  0xd5   :  { %4192 = vmatprep.subr.bf16.mxu0 %v8022_v20  ;;  %4235 = vmatprep.subr.bf16.mxu1 %v8025_v21  ;;  %v661_v20 = vld [vmem:[#allocation4 + $0x12a0] sm:$0xff]  ;;  %v662_v21 = vld [vmem:[#allocation4 + $0x12a8] sm:$0xff] }
  0xd6   :  { %v7541_v26 = vcombine.low %v661_v20, %v661_v20  ;;  %v7543_v27 = vcombine.low %v662_v21, %v662_v21 }
  0xd8   :  { %4193 = vmatpush1.bf16.msra.mxu0 %v8020_v22  ;;  %4236 = vmatpush1.bf16.msra.mxu1 %v8023_v23  ;;  %v8102_v22 = vld [vmem:[#allocation4 + $0x1118] ss:$196 sps:$4 sm:$0xff]   ;;  %v8105_v23 = vld [vmem:[#allocation4 + $0x1120] ss:$196 sps:$4 sm:$0xff]  }
  0xd9   :  { %4194 = vmatprep.subr.bf16.mxu0 %v8028_v24  ;;  %4237 = vmatprep.subr.bf16.mxu1 %v8031_v25  ;;  %v7542_v24 = vcombine.high %v661_v20, %v661_v20  ;;  %v7544_v25 = vcombine.high %v662_v21, %v662_v21  ;;  %v8133_v21 = vld [vmem:[#allocation4 + $0x4f0] ss:$196 sps:$4 sm:$0xff]  }
  0xdc   :  { %4195 = vmatpush1.bf16.msra.mxu0 %v8026_v28  ;;  %4238 = vmatpush1.bf16.msra.mxu1 %v8029_v29  ;;  %v8114_v28 = vld [vmem:[#allocation4 + $0x54] ss:$196 sps:$4 sm:$0xff]   ;;  %v8117_v29 = vld [vmem:[#allocation4 + $0x5c] ss:$196 sps:$4 sm:$0xff]  }
  0xdd   :  { %7586 = vmatprep.subr.msk.bf16.mxu0 %vm3766_vm1, %v7538_v30  ;;  %7588 = vmatprep.subr.msk.bf16.mxu1 %vm3766_vm1, %v7540_v31  ;;  %v3816_v30 = vsel %vm3766_vm1, %v7541_v26, 0  ;;  %v3822_v31 = vsel %vm3766_vm1, %v7543_v27, 0  ;;  %v8136_v27 = vld [vmem:[#allocation4 + $0x670] ss:$196 sps:$4 sm:$0xff]  }
  0xe0   :  { %4197 = vmatpush1.bf16.msra.mxu0 %v3804_v35  ;;  %4240 = vmatpush1.bf16.msra.mxu1 %v3810_v36  ;;  %v8692_v35 = vmov 1966171168  }
  0xe1   :  { %4258 = vmatprep.subr.bf16.mxu0 %v8038_v34  ;;  %4301 = vmatprep.subr.bf16.mxu1 %v8041_v37  ;;  %v39_v34 = vlaneseq  ;;  %v5737_v36 = vunpack.c.l.s4 %v8692_v35  ;;  %v8120_v37 = vld [vmem:[#allocation4 + $0x1dc] ss:$196 sps:$4 sm:$0xff]  }
  0xe3   :  { %4205 = vmatmul.mubr.bf16.vlgmr.msra.gmra.mrb[12].mxu0 %v8783_v43  ;;  %4248 = vmatmul.mubr.bf16.vlgmr.msra.gmra.mrb[12].mxu1 %v8783_v43  ;;  %vm9214_vm2 = vcmp.lt.s32.totalorder %v39_v34, 128 }
  0xe4   :  { %4259 = vmatpush1.bf16.msra.mxu0 %v8036_v39  ;;  %4302 = vmatpush1.bf16.msra.mxu1 %v8039_v40  ;;  %v8123_v39 = vld [vmem:[#allocation4 + $0x1e4] ss:$196 sps:$4 sm:$0xff]   ;;  %v8118_v40 = vld [vmem:[#allocation4 + $0x1d8] ss:$196 sps:$4 sm:$0xff]  }
  0xe5   :  { %4260 = vmatprep.subr.bf16.mxu0 %v8044_v41  ;;  %4303 = vmatprep.subr.bf16.mxu1 %v8047_v42  ;;  %v5738_v41 = vunpack.c.0.s8 %v5737_v36  ;;  %v5740_v42 = vshrl.u32 %v39_v34, 7 }
  0xe6   :  { %7591 = vmatprep.mubr.msk.bf16.mxu0 %vm3762_vm0, %v8790_v48  ;;  %7593 = vmatprep.mubr.msk.bf16.mxu1 %vm3762_vm0, %v8790_v48 }
  0xe8   :  { %4261 = vmatpush1.bf16.msra.mxu0 %v8042_v44  ;;  %4304 = vmatpush1.bf16.msra.mxu1 %v8045_v45  ;;  %v8121_v44 = vld [vmem:[#allocation4 + $0x1e0] ss:$196 sps:$4 sm:$0xff]  }
  0xe9   :  { %4262 = vmatprep.subr.bf16.mxu0 %v8050_v46  ;;  %4305 = vmatprep.subr.bf16.mxu1 %v8053_v47  ;;  %v8126_v45 = vld [vmem:[#allocation4 + $0x364] ss:$196 sps:$4 sm:$0xff]  }
  0xec   :  { %4263 = vmatpush1.bf16.msra.mxu0 %v8048_v49  ;;  %4306 = vmatpush1.bf16.msra.mxu1 %v8051_v50 }
  0xed   :  { %4264 = vmatprep.subr.bf16.mxu0 %v8056_v51  ;;  %4307 = vmatprep.subr.bf16.mxu1 %v8059_v52  ;;  %v8807_v52 = vsub.s32 %v5738_v41, %v5740_v42 }
  0xf0   :  { %4265 = vmatpush1.bf16.msra.mxu0 %v8054_v53  ;;  %4308 = vmatpush1.bf16.msra.mxu1 %v8057_v54  ;;  %v8124_v53 = vld [vmem:[#allocation4 + $0x360] ss:$196 sps:$4 sm:$0xff]   ;;  %v8129_v54 = vld [vmem:[#allocation4 + $0x36c] ss:$196 sps:$4 sm:$0xff]  }
  0xf1   :  { %4266 = vmatprep.subr.bf16.mxu0 %v8062_v55  ;;  %4309 = vmatprep.subr.bf16.mxu1 %v8065_v56 }
  0xf4   :  { %4267 = vmatpush1.bf16.msra.mxu0 %v8060_v59  ;;  %4310 = vmatpush1.bf16.msra.mxu1 %v8063_v57 }
  0xf5   :  { %4268 = vmatprep.subr.bf16.mxu0 %v8068_v58  ;;  %4311 = vmatprep.subr.bf16.mxu1 %v8071_v60 }
  0xf8   :  { %4269 = vmatpush1.bf16.msra.mxu0 %v8066_v61  ;;  %4312 = vmatpush1.bf16.msra.mxu1 %v8069_v62  ;;  %v8127_v61 = vld [vmem:[#allocation4 + $0x368] ss:$196 sps:$4 sm:$0xff]  }
  0xf9   :  { %4270 = vmatprep.subr.bf16.mxu0 %v8074_v63  ;;  %4313 = vmatprep.subr.bf16.mxu1 %v8077_v38  ;;  %v8132_v62 = vld [vmem:[#allocation4 + $0x4ec] ss:$196 sps:$4 sm:$0xff]  }
  0xfc   :  { %4271 = vmatpush1.bf16.msra.mxu0 %v8072_v0  ;;  %4314 = vmatpush1.bf16.msra.mxu1 %v8075_v1 }
  0xfd   :  { %4272 = vmatprep.subr.bf16.mxu0 %v8080_v2  ;;  %4315 = vmatprep.subr.bf16.mxu1 %v8083_v3 }
 0x100   :  { %4273 = vmatpush1.bf16.msra.mxu0 %v8078_v4  ;;  %4316 = vmatpush1.bf16.msra.mxu1 %v8081_v5 }
 0x101   :  { %4274 = vmatprep.subr.bf16.mxu0 %v8086_v6  ;;  %4317 = vmatprep.subr.bf16.mxu1 %v8089_v7  ;;  %v8135_v7 = vld [vmem:[#allocation4 + $0x4f4] ss:$196 sps:$4 sm:$0xff]  }
 0x104   :  { %4275 = vmatpush1.bf16.msra.mxu0 %v8084_v8  ;;  %4318 = vmatpush1.bf16.msra.mxu1 %v8087_v9 }
 0x105   :  { %4276 = vmatprep.subr.bf16.mxu0 %v8092_v10  ;;  %4319 = vmatprep.subr.bf16.mxu1 %v8095_v11 }
 0x108   :  { %4277 = vmatpush1.bf16.msra.mxu0 %v8090_v12  ;;  %4320 = vmatpush1.bf16.msra.mxu1 %v8093_v13  ;;  %v8130_v12 = vld [vmem:[#allocation4 + $0x4e8] ss:$196 sps:$4 sm:$0xff]  }
 0x109   :  { %4278 = vmatprep.subr.bf16.mxu0 %v8098_v14  ;;  %4321 = vmatprep.subr.bf16.mxu1 %v8101_v15 }
 0x10c   :  { %4279 = vmatpush1.bf16.msra.mxu0 %v8096_v16  ;;  %4322 = vmatpush1.bf16.msra.mxu1 %v8099_v17 }
 0x10d   :  { %4280 = vmatprep.subr.bf16.mxu0 %v8104_v18  ;;  %4323 = vmatprep.subr.bf16.mxu1 %v8107_v19 }
 0x110   :  { %4281 = vmatpush1.bf16.msra.mxu0 %v8102_v22  ;;  %4324 = vmatpush1.bf16.msra.mxu1 %v8105_v23  ;;  %v8138_v22 = vld [vmem:[#allocation4 + $0x674] ss:$196 sps:$4 sm:$0xff]  }
 0x111   :  { %7590 = vmatprep.subr.msk.bf16.mxu0 %vm3766_vm1, %v7542_v24  ;;  %7592 = vmatprep.subr.msk.bf16.mxu1 %vm3766_vm1, %v7544_v25 }
 0x114   :  { %4283 = vmatpush1.bf16.msra.mxu0 %v3816_v30  ;;  %4326 = vmatpush1.bf16.msra.mxu1 %v3822_v31 }
 0x115   :  { %4344 = vmatprep.subr.bf16.mxu0 %v8114_v28  ;;  %4387 = vmatprep.subr.bf16.mxu1 %v8117_v29  ;;  %v8141_v28 = vld [vmem:[#allocation4 + $0x67c] ss:$196 sps:$4 sm:$0xff]  }
 0x117   :  { %4291 = vmatmul.mubr.bf16.vlgmr.msra.gmra.mrb[16].mxu0 %v8783_v43  ;;  %4334 = vmatmul.mubr.bf16.vlgmr.msra.gmra.mrb[16].mxu1 %v8783_v43 }
 0x118   :  { %4345 = vmatpush1.bf16.msra.mxu0 %v8112_v32  ;;  %4388 = vmatpush1.bf16.msra.mxu1 %v8115_v33 }
 0x119   :  { %4346 = vmatprep.subr.bf16.mxu0 %v8120_v37  ;;  %4389 = vmatprep.subr.bf16.mxu1 %v8123_v39 }
 0x11a   :  { %v3948_v46 = vpop.f32.mrb[0].mxu0  ;;  %v3991_v47 = vpop.f32.mrb[0].mxu1  ;;  %7595 = vmatprep.mubr.msk.bf16.mxu0 %vm3762_vm0, %v8790_v48  ;;  %7597 = vmatprep.mubr.msk.bf16.mxu1 %vm3762_vm0, %v8790_v48 }
 0x11b   :  { %v6072_v49 = vmul.f32 %v3948_v46, %v3948_v46  ;;  %v6074_v43 = vmul.f32 %v3991_v47, %v3991_v47  ;;  %v3950_v50 = vpop.f32.mrb[1].mxu0  ;;  %v3993_v51 = vpop.f32.mrb[1].mxu1 }
 0x11c   :  { %v7673_v55 = vpack.c.bf16 %v3950_v50, %v3948_v46  ;;  %v6073_v56 = vmul.f32 %v3950_v50, %v3950_v50  ;;  %v7674_v59 = vpack.c.bf16 %v3993_v51, %v3991_v47  ;;  %v6075_v57 = vmul.f32 %v3993_v51, %v3993_v51  ;;  %v3952_v58 = vpop.f32.mrb[2].mxu0  ;;  %v3995_v60 = vpop.f32.mrb[2].mxu1  ;;  %4347 = vmatpush1.bf16.msra.mxu0 %v8118_v40 }
 0x11d   :  { %v5340_v63 = vadd.f32 %v3952_v58, %v3948_v46  ;;  %v6121_v38 = vmul.f32 %v3952_v58, %v3952_v58  ;;  %v5354_v48 = vadd.f32 %v3995_v60, %v3991_v47  ;;  %v6123_v0 = vmul.f32 %v3995_v60, %v3995_v60  ;;  %4390 = vmatpush1.bf16.msra.mxu1 %v8121_v44  ;;  %v3954_v1 = vpop.f32.mrb[3].mxu0  ;;  %v3997_v2 = vpop.f32.mrb[3].mxu1  ;;  %v8139_v44 = vld [vmem:[#allocation4 + $0x678] ss:$196 sps:$4 sm:$0xff]  }
 0x11e   :  { %5283 = vst [vmem:[%s9314_s2] sm:$0xff] %v7673_v55  ;;  %5284 = vst [vmem:[%s9314_s2 + $0x8] sm:$0xff] %v7674_v59  ;;  %v7698_v3 = vpack.c.bf16 %v3954_v1, %v3952_v58  ;;  %v5347_v4 = vadd.f32 %v3954_v1, %v3950_v50  ;;  %v6122_v5 = vmul.f32 %v3954_v1, %v3954_v1  ;;  %4348 = vmatprep.subr.bf16.mxu0 %v8126_v45  ;;  %v8144_v45 = vld [vmem:[#allocation4 + $0x7fc] ss:$196 sps:$4 sm:$0xff]  }
 0x11f   :  { %v7699_v6 = vpack.c.bf16 %v3997_v2, %v3995_v60  ;;  %v5341_v8 = vrot.slane %v5340_v63, 4  ;;  %v6170_v9 = vadd.f32 %v6121_v38, %v6072_v49  ;;  %v5355_v10 = vrot.slane %v5354_v48, 4  ;;  %4391 = vmatprep.subr.bf16.mxu1 %v8129_v54  ;;  %v8142_v50 = vld [vmem:[#allocation4 + $0x7f8] ss:$196 sps:$4 sm:$0xff]  }
 0x120   :  { %v6184_v11 = vadd.f32 %v6123_v0, %v6074_v43  ;;  %5308 = vst [vmem:[%s9314_s2 + $0xc4] sm:$0xff] %v7698_v3  ;;  %v5348_v13 = vrot.slane %v5347_v4, 4  ;;  %v6177_v14 = vadd.f32 %v6122_v5, %v6073_v56  ;;  %v5361_v15 = vadd.f32 %v3997_v2, %v3993_v51  ;;  %4349 = vmatpush1.bf16.msra.mxu0 %v8124_v53  ;;  %v8147_v51 = vld [vmem:[#allocation4 + $0x804] ss:$196 sps:$4 sm:$0xff]  }
 0x121   :  { %5309 = vst [vmem:[%s9314_s2 + $0xcc] sm:$0xff] %v7699_v6  ;;  %v6124_v16 = vmul.f32 %v3997_v2, %v3997_v2  ;;  %v5342_v17 = vadd.f32 %v5341_v8, %v5340_v63  ;;  %v6171_v18 = vrot.slane %v6170_v9, 4  ;;  %v5356_v19 = vadd.f32 %v5355_v10, %v5354_v48  ;;  %4392 = vmatpush1.bf16.msra.mxu1 %v8127_v61  ;;  %v8145_v48 = vld [vmem:[#allocation4 + $0x800] ss:$196 sps:$4 sm:$0xff]   ;;  %v8153_v6 = vld [vmem:[#allocation4 + $0x98c] ss:$196 sps:$4 sm:$0xff]  }
 0x122   :  { %v6185_v20 = vrot.slane %v6184_v11, 4  ;;  %4350 = vmatprep.subr.bf16.mxu0 %v8132_v62  ;;  %v5349_v23 = vadd.f32 %v5348_v13, %v5347_v4  ;;  %v6178_v24 = vrot.slane %v6177_v14, 4  ;;  %v5362_v25 = vrot.slane %v5361_v15, 4  ;;  %4393 = vmatprep.subr.bf16.mxu1 %v8135_v7  ;;  %v8150_v0 = vld [vmem:[#allocation4 + $0x984] ss:$196 sps:$4 sm:$0xff]  }
 0x123   :  { %v6191_v26 = vadd.f32 %v6124_v16, %v6075_v57  ;;  %v5343_v29 = vrot.slane %v5342_v17, 2  ;;  %v6172_v30 = vadd.f32 %v6171_v18, %v6170_v9  ;;  %v5357_v31 = vrot.slane %v5356_v19, 2  ;;  %v8148_v5 = vld [vmem:[#allocation4 + $0x980] ss:$196 sps:$4 sm:$0xff]   ;;  %v8151_v9 = vld [vmem:[#allocation4 + $0x988] ss:$196 sps:$4 sm:$0xff]  }
 0x124   :  { %v6186_v32 = vadd.f32 %v6185_v20, %v6184_v11  ;;  %v5350_v33 = vrot.slane %v5349_v23, 2  ;;  %v6179_v35 = vadd.f32 %v6178_v24, %v6177_v14  ;;  %v5363_v36 = vadd.f32 %v5362_v25, %v5361_v15  ;;  %4351 = vmatpush1.bf16.msra.mxu0 %v8130_v12  ;;  %v8156_v14 = vld [vmem:[#allocation4 + $0xb0c] ss:$196 sps:$4 sm:$0xff]   ;;  %v8159_v15 = vld [vmem:[#allocation4 + $0xb14] ss:$196 sps:$4 sm:$0xff]  }
 0x125   :  { %v6192_v37 = vrot.slane %v6191_v26, 4  ;;  %v5344_v39 = vadd.f32 %v5343_v29, %v5342_v17  ;;  %v6173_v40 = vrot.slane %v6172_v30, 2  ;;  %v5358_v41 = vadd.f32 %v5357_v31, %v5356_v19  ;;  %4394 = vmatpush1.bf16.msra.mxu1 %v8133_v21  ;;  %4352 = vmatprep.subr.bf16.mxu0 %v8138_v22  ;;  %v8154_v20 = vld [vmem:[#allocation4 + $0xb08] ss:$196 sps:$4 sm:$0xff]   ;;  %v8157_v21 = vld [vmem:[#allocation4 + $0xb10] ss:$196 sps:$4 sm:$0xff]  }
 0x126   :  { %v6187_v42 = vrot.slane %v6186_v32, 2  ;;  %v5351_v46 = vadd.f32 %v5350_v33, %v5349_v23  ;;  %v6180_v47 = vrot.slane %v6179_v35, 2  ;;  %v5364_v49 = vrot.slane %v5363_v36, 2  ;;  %4395 = vmatprep.subr.bf16.mxu1 %v8141_v28  ;;  %v8162_v22 = vld [vmem:[#allocation4 + $0xc94] ss:$196 sps:$4 sm:$0xff]  }
 0x127   :  { %v6193_v43 = vadd.f32 %v6192_v37, %v6191_v26  ;;  %v5345_v53 = vrot.slane %v5344_v39, 1  ;;  %v6174_v54 = vadd.f32 %v6173_v40, %v6172_v30  ;;  %v5359_v55 = vrot.slane %v5358_v41, 1  ;;  %v8165_v26 = vld [vmem:[#allocation4 + $0xc9c] ss:$196 sps:$4 sm:$0xff]   ;;  %v8160_v29 = vld [vmem:[#allocation4 + $0xc90] ss:$196 sps:$4 sm:$0xff]  }
 0x128   :  { %v6188_v56 = vadd.f32 %v6187_v42, %v6186_v32  ;;  %v5352_v59 = vrot.slane %v5351_v46, 1  ;;  %v6181_v57 = vadd.f32 %v6180_v47, %v6179_v35  ;;  %v5365_v58 = vadd.f32 %v5364_v49, %v5363_v36  ;;  %4353 = vmatpush1.bf16.msra.mxu0 %v8136_v27  ;;  %v8163_v30 = vld [vmem:[#allocation4 + $0xc98] ss:$196 sps:$4 sm:$0xff]   ;;  %v8171_v33 = vld [vmem:[#allocation4 + $0xe24] ss:$196 sps:$4 sm:$0xff]  }
 0x129   :  { %v6194_v60 = vrot.slane %v6193_v43, 2  ;;  %v5346_v61 = vadd.f32 %v5345_v53, %v5344_v39  ;;  %v6175_v62 = vrot.slane %v6174_v54, 1  ;;  %v5360_v63 = vadd.f32 %v5359_v55, %v5358_v41  ;;  %4396 = vmatpush1.bf16.msra.mxu1 %v8139_v44  ;;  %4354 = vmatprep.subr.bf16.mxu0 %v8144_v45  ;;  %v8168_v32 = vld [vmem:[#allocation4 + $0xe1c] ss:$196 sps:$4 sm:$0xff]   ;;  %v8174_v37 = vld [vmem:[#allocation4 + $0xfa4] ss:$196 sps:$4 sm:$0xff]  }
 0x12a   :  { %v6189_v38 = vrot.slane %v6188_v56, 1  ;;  %v5353_v1 = vadd.f32 %v5352_v59, %v5351_v46  ;;  %v6182_v2 = vrot.slane %v6181_v57, 1  ;;  %v5366_v3 = vrot.slane %v5365_v58, 1  ;;  %4397 = vmatprep.subr.bf16.mxu1 %v8147_v51  ;;  %v8166_v35 = vld [vmem:[#allocation4 + $0xe18] ss:$196 sps:$4 sm:$0xff]   ;;  %v663_v45 = vld [vmem:[#allocation4 + $0x12b0] sm:$0xff] }
 0x12b   :  { %v6195_v4 = vadd.f32 %v6194_v60, %v6193_v43  ;;  %v6176_v7 = vadd.f32 %v6175_v62, %v6174_v54  ;;  %v8169_v36 = vld [vmem:[#allocation4 + $0xe20] ss:$196 sps:$4 sm:$0xff]   ;;  %v8177_v39 = vld [vmem:[#allocation4 + $0xfac] ss:$196 sps:$4 sm:$0xff]   ;;  %v8183_v44 = vld [vmem:[#allocation4 + $0x1134] ss:$196 sps:$4 sm:$0xff]   ;;  %v7546_v43 = vcombine.high %v663_v45, %v663_v45 }
 0x12c   :  { %v6190_v8 = vadd.f32 %v6189_v38, %v6188_v56  ;;  %v5732_v10 = vcombine.low %v5346_v61, %v5353_v1  ;;  %v6183_v11 = vadd.f32 %v6182_v2, %v6181_v57  ;;  %v5367_v12 = vadd.f32 %v5366_v3, %v5365_v58  ;;  %4355 = vmatpush1.bf16.msra.mxu0 %v8142_v50  ;;  %v8172_v40 = vld [vmem:[#allocation4 + $0xfa0] ss:$196 sps:$4 sm:$0xff]   ;;  %v8175_v41 = vld [vmem:[#allocation4 + $0xfa8] ss:$196 sps:$4 sm:$0xff]   ;;  %v664_v46 = vld [vmem:[#allocation4 + $0x12b8] sm:$0xff] }
 0x12d   :  { %v6196_v13 = vrot.slane %v6195_v4, 1  ;;  %4398 = vmatpush1.bf16.msra.mxu1 %v8145_v48  ;;  %4356 = vmatprep.subr.bf16.mxu0 %v8150_v0  ;;  %v8180_v42 = vld [vmem:[#allocation4 + $0x112c] ss:$196 sps:$4 sm:$0xff]   ;;  %v7545_v50 = vcombine.low %v663_v45, %v663_v45  ;;  %v7548_v51 = vcombine.high %v664_v46, %v664_v46  ;;  %v7547_v53 = vcombine.low %v664_v46, %v664_v46  ;;  %v8190_v54 = vld [vmem:[#allocation4 + $0x64] ss:$196 sps:$4 sm:$0xff]  }
 0x12e   :  { %v8822_v16 = vrot.slane %v5732_v10, %v8807_v52  ;;  %v6562_v17 = vcombine.low %v6176_v7, %v6183_v11  ;;  %v5733_v18 = vcombine.low %v5360_v63, %v5367_v12  ;;  %4399 = vmatprep.subr.bf16.mxu1 %v8153_v6  ;;  %v8178_v47 = vld [vmem:[#allocation4 + $0x1128] ss:$196 sps:$4 sm:$0xff]   ;;  %v8181_v49 = vld [vmem:[#allocation4 + $0x1130] ss:$196 sps:$4 sm:$0xff]   ;;  %v8188_v57 = vld [vmem:[#allocation4 + $0x60] ss:$196 sps:$4 sm:$0xff]  }
 0x12f   :  { %v6197_v19 = vadd.f32 %v6196_v13, %v6195_v4  ;;  %v8193_v55 = vld [vmem:[#allocation4 + $0x6c] ss:$196 sps:$4 sm:$0xff]   ;;  %v3828_v56 = vsel %vm3766_vm1, %v7545_v50, 0  ;;  %v3834_v59 = vsel %vm3766_vm1, %v7547_v53, 0  ;;  %v8199_v61 = vld [vmem:[#allocation4 + $0x1f4] ss:$196 sps:$4 sm:$0xff]  }
 0x130   :  { %v8825_v23 = vrot.slane %v6562_v17, %v8807_v52  ;;  %v8828_v24 = vrot.slane %v5733_v18, %v8807_v52  ;;  %4357 = vmatpush1.bf16.msra.mxu0 %v8148_v5  ;;  %v8191_v58 = vld [vmem:[#allocation4 + $0x68] ss:$196 sps:$4 sm:$0xff]   ;;  %v8197_v38 = vld [vmem:[#allocation4 + $0x1f0] ss:$196 sps:$4 sm:$0xff]   ;;  %v8208_v17 = vld [vmem:[#allocation4 + $0x4fc] ss:$196 sps:$4 sm:$0xff]  }
 0x131   :  { %v6563_v25 = vcombine.low %v6190_v8, %v6197_v19  ;;  %4400 = vmatpush1.bf16.msra.mxu1 %v8151_v9  ;;  %4358 = vmatprep.subr.bf16.mxu0 %v8156_v14  ;;  %v8196_v60 = vld [vmem:[#allocation4 + $0x1ec] ss:$196 sps:$4 sm:$0xff]   ;;  %v8844_v62 = vld [vmem:[%s9312_s0] ss:$8 sps:$4 sm:$0xff]   ;;  %v8202_v48 = vld [vmem:[#allocation4 + $0x374] ss:$196 sps:$4 sm:$0xff]  }
 0x132   :  { %v5764_v27 = vcombine.low %v8822_v16, %v8828_v24  ;;  %4401 = vmatprep.subr.bf16.mxu1 %v8159_v15  ;;  %v8194_v63 = vld [vmem:[#allocation4 + $0x1e8] ss:$196 sps:$4 sm:$0xff]   ;;  %v8200_v2 = vld [vmem:[#allocation4 + $0x370] ss:$196 sps:$4 sm:$0xff]   ;;  %v8203_v8 = vld [vmem:[#allocation4 + $0x378] ss:$196 sps:$4 sm:$0xff]  }
 0x133   :  { %v8833_v28 = vrot.slane %v6563_v25, %v8807_v52  ;;  %v8851_v3 = vld [vmem:[%s9312_s0 + $0x4] ss:$8 sps:$4 sm:$0xff]   ;;  %v8245_v16 = vld [vmem:[#allocation4 + $0xe30] ss:$196 sps:$4 sm:$0xff]  }
 0x134   :  { %4359 = vmatpush1.bf16.msra.mxu0 %v8154_v20  ;;  %v8205_v9 = vld [vmem:[#allocation4 + $0x37c] ss:$196 sps:$4 sm:$0xff]   ;;  %v8211_v18 = vld [vmem:[#allocation4 + $0x504] ss:$196 sps:$4 sm:$0xff]  }
 0x135   :  { %v6594_v31 = vcombine.low %v8825_v23, %v8833_v28  ;;  %4402 = vmatpush1.bf16.msra.mxu1 %v8157_v21  ;;  %4360 = vmatprep.subr.bf16.mxu0 %v8162_v22  ;;  %v8251_v23 = vld [vmem:[#allocation4 + $0xfb8] ss:$196 sps:$4 sm:$0xff]  }
 0x136   :  { %4403 = vmatprep.subr.bf16.mxu1 %v8165_v26  ;;  %v8256_v28 = vld [vmem:[#allocation4 + $0x113c] ss:$196 sps:$4 sm:$0xff]  }
 0x138   :  { %4361 = vmatpush1.bf16.msra.mxu0 %v8160_v29 }
 0x139   :  { %4404 = vmatpush1.bf16.msra.mxu1 %v8163_v30  ;;  %4362 = vmatprep.subr.bf16.mxu0 %v8168_v32 }
 0x13a   :  { %4405 = vmatprep.subr.bf16.mxu1 %v8171_v33 }
 0x13c   :  { %4363 = vmatpush1.bf16.msra.mxu0 %v8166_v35 }
 0x13d   :  { %4406 = vmatpush1.bf16.msra.mxu1 %v8169_v36  ;;  %4364 = vmatprep.subr.bf16.mxu0 %v8174_v37 }
 0x13e   :  { %4407 = vmatprep.subr.bf16.mxu1 %v8177_v39 }
 0x140   :  { %4365 = vmatpush1.bf16.msra.mxu0 %v8172_v40  ;;  %v8206_v40 = vld [vmem:[#allocation4 + $0x4f8] ss:$196 sps:$4 sm:$0xff]  }
 0x141   :  { %4408 = vmatpush1.bf16.msra.mxu1 %v8175_v41  ;;  %4366 = vmatprep.subr.bf16.mxu0 %v8180_v42  ;;  %v8209_v41 = vld [vmem:[#allocation4 + $0x500] ss:$196 sps:$4 sm:$0xff]  }
 0x142   :  { %4409 = vmatprep.subr.bf16.mxu1 %v8183_v44 }
 0x144   :  { %4367 = vmatpush1.bf16.msra.mxu0 %v8178_v47  ;;  %v8214_v47 = vld [vmem:[#allocation4 + $0x684] ss:$196 sps:$4 sm:$0xff]  }
 0x145   :  { %4410 = vmatpush1.bf16.msra.mxu1 %v8181_v49  ;;  %7594 = vmatprep.subr.msk.bf16.mxu0 %vm3766_vm1, %v7546_v43  ;;  %v8217_v49 = vld [vmem:[#allocation4 + $0x68c] ss:$196 sps:$4 sm:$0xff]  }
 0x146   :  { %7596 = vmatprep.subr.msk.bf16.mxu1 %vm3766_vm1, %v7548_v51 }
 0x148   :  { %4369 = vmatpush1.bf16.msra.mxu0 %v3828_v56 }
 0x149   :  { %4412 = vmatpush1.bf16.msra.mxu1 %v3834_v59  ;;  %4430 = vmatprep.subr.bf16.mxu0 %v8190_v54 }
 0x14a   :  { %4473 = vmatprep.subr.bf16.mxu1 %v8193_v55 }
 0x14b   :  { %4377 = vmatmul.mubr.bf16.vlgmr.msra.gmra.mrb[20].mxu0 %v8844_v62 }
 0x14c   :  { %4420 = vmatmul.mubr.bf16.vlgmr.msra.gmra.mrb[20].mxu1 %v8844_v62  ;;  %4431 = vmatpush1.bf16.msra.mxu0 %v8188_v57 }
 0x14d   :  { %4474 = vmatpush1.bf16.msra.mxu1 %v8191_v58  ;;  %4432 = vmatprep.subr.bf16.mxu0 %v8196_v60 }
 0x14e   :  { %v4034_v0 = vpop.f32.mrb[4].mxu0  ;;  %v4077_v1 = vpop.f32.mrb[4].mxu1  ;;  %4475 = vmatprep.subr.bf16.mxu1 %v8199_v61  ;;  %7599 = vmatprep.mubr.msk.bf16.mxu0 %vm3762_vm0, %v8851_v3 }
 0x14f   :  { %v6076_v4 = vmul.f32 %v4034_v0, %v4034_v0  ;;  %v6078_v5 = vmul.f32 %v4077_v1, %v4077_v1  ;;  %v4036_v6 = vpop.f32.mrb[5].mxu0  ;;  %v4079_v7 = vpop.f32.mrb[5].mxu1  ;;  %7601 = vmatprep.mubr.msk.bf16.mxu1 %vm3762_vm0, %v8851_v3 }
 0x150   :  { %v7675_v10 = vpack.c.bf16 %v4036_v6, %v4034_v0  ;;  %v6077_v11 = vmul.f32 %v4036_v6, %v4036_v6  ;;  %v7676_v12 = vpack.c.bf16 %v4079_v7, %v4077_v1  ;;  %v6079_v13 = vmul.f32 %v4079_v7, %v4079_v7  ;;  %v4038_v14 = vpop.f32.mrb[6].mxu0  ;;  %v4081_v15 = vpop.f32.mrb[6].mxu1  ;;  %4433 = vmatpush1.bf16.msra.mxu0 %v8194_v63 }
 0x151   :  { %v5368_v19 = vadd.f32 %v4038_v14, %v4034_v0  ;;  %v6125_v20 = vmul.f32 %v4038_v14, %v4038_v14  ;;  %v5382_v21 = vadd.f32 %v4081_v15, %v4077_v1  ;;  %v6127_v22 = vmul.f32 %v4081_v15, %v4081_v15  ;;  %4476 = vmatpush1.bf16.msra.mxu1 %v8197_v38  ;;  %v4040_v25 = vpop.f32.mrb[7].mxu0  ;;  %v4083_v26 = vpop.f32.mrb[7].mxu1  ;;  %v8212_v1 = vld [vmem:[#allocation4 + $0x680] ss:$196 sps:$4 sm:$0xff]  }
 0x152   :  { %5285 = vst [vmem:[%s9314_s2 + $0x10] sm:$0xff] %v7675_v10  ;;  %5286 = vst [vmem:[%s9314_s2 + $0x18] sm:$0xff] %v7676_v12  ;;  %v7700_v29 = vpack.c.bf16 %v4040_v25, %v4038_v14  ;;  %v5375_v30 = vadd.f32 %v4040_v25, %v4036_v6  ;;  %v6126_v32 = vmul.f32 %v4040_v25, %v4040_v25  ;;  %4434 = vmatprep.subr.bf16.mxu0 %v8202_v48  ;;  %v8223_v14 = vld [vmem:[#allocation4 + $0x814] ss:$196 sps:$4 sm:$0xff]  }
 0x153   :  { %v7701_v33 = vpack.c.bf16 %v4083_v26, %v4081_v15  ;;  %v5369_v35 = vrot.slane %v5368_v19, 4  ;;  %v6198_v36 = vadd.f32 %v6125_v20, %v6076_v4  ;;  %v5383_v37 = vrot.slane %v5382_v21, 4  ;;  %4477 = vmatprep.subr.bf16.mxu1 %v8205_v9 }
 0x154   :  { %v6212_v39 = vadd.f32 %v6127_v22, %v6078_v5  ;;  %5310 = vst [vmem:[%s9314_s2 + $0xd4] sm:$0xff] %v7700_v29  ;;  %v5376_v42 = vrot.slane %v5375_v30, 4  ;;  %v6205_v44 = vadd.f32 %v6126_v32, %v6077_v11  ;;  %v5389_v45 = vadd.f32 %v4083_v26, %v4079_v7  ;;  %4435 = vmatpush1.bf16.msra.mxu0 %v8200_v2  ;;  %v8215_v7 = vld [vmem:[#allocation4 + $0x688] ss:$196 sps:$4 sm:$0xff]  }
 0x155   :  { %5311 = vst [vmem:[%s9314_s2 + $0xdc] sm:$0xff] %v7701_v33  ;;  %v6128_v46 = vmul.f32 %v4083_v26, %v4083_v26  ;;  %v5370_v43 = vadd.f32 %v5369_v35, %v5368_v19  ;;  %v6199_v50 = vrot.slane %v6198_v36, 4  ;;  %v5384_v51 = vadd.f32 %v5383_v37, %v5382_v21  ;;  %4478 = vmatpush1.bf16.msra.mxu1 %v8203_v8  ;;  %v8220_v8 = vld [vmem:[#allocation4 + $0x80c] ss:$196 sps:$4 sm:$0xff]   ;;  %v8226_v35 = vld [vmem:[#allocation4 + $0x994] ss:$196 sps:$4 sm:$0xff]  }
 0x156   :  { %v6213_v53 = vrot.slane %v6212_v39, 4  ;;  %4436 = vmatprep.subr.bf16.mxu0 %v8208_v17  ;;  %v5377_v54 = vadd.f32 %v5376_v42, %v5375_v30  ;;  %v6206_v55 = vrot.slane %v6205_v44, 4  ;;  %v5390_v56 = vrot.slane %v5389_v45, 4  ;;  %4479 = vmatprep.subr.bf16.mxu1 %v8211_v18  ;;  %v8221_v33 = vld [vmem:[#allocation4 + $0x810] ss:$196 sps:$4 sm:$0xff]  }
 0x157   :  { %v6219_v59 = vadd.f32 %v6128_v46, %v6079_v13  ;;  %v5371_v57 = vrot.slane %v5370_v43, 2  ;;  %v6200_v58 = vadd.f32 %v6199_v50, %v6198_v36  ;;  %v5385_v60 = vrot.slane %v5384_v51, 2  ;;  %v8218_v13 = vld [vmem:[#allocation4 + $0x808] ss:$196 sps:$4 sm:$0xff]   ;;  %v8229_v42 = vld [vmem:[#allocation4 + $0x99c] ss:$196 sps:$4 sm:$0xff]  }
 0x158   :  { %v6214_v61 = vadd.f32 %v6213_v53, %v6212_v39  ;;  %v5378_v63 = vrot.slane %v5377_v54, 2  ;;  %v6207_v38 = vadd.f32 %v6206_v55, %v6205_v44  ;;  %v5391_v48 = vadd.f32 %v5390_v56, %v5389_v45  ;;  %4437 = vmatpush1.bf16.msra.mxu0 %v8206_v40  ;;  %v8227_v46 = vld [vmem:[#allocation4 + $0x998] ss:$196 sps:$4 sm:$0xff]   ;;  %v8235_v53 = vld [vmem:[#allocation4 + $0xb24] ss:$196 sps:$4 sm:$0xff]  }
 0x159   :  { %v6220_v0 = vrot.slane %v6219_v59, 4  ;;  %v5372_v2 = vadd.f32 %v5371_v57, %v5370_v43  ;;  %v6201_v4 = vrot.slane %v6200_v58, 2  ;;  %v5386_v5 = vadd.f32 %v5385_v60, %v5384_v51  ;;  %4480 = vmatpush1.bf16.msra.mxu1 %v8209_v41  ;;  %4438 = vmatprep.subr.bf16.mxu0 %v8214_v47  ;;  %v8224_v41 = vld [vmem:[#allocation4 + $0x990] ss:$196 sps:$4 sm:$0xff]   ;;  %v8232_v51 = vld [vmem:[#allocation4 + $0xb1c] ss:$196 sps:$4 sm:$0xff]  }
 0x15a   :  { %v6215_v6 = vrot.slane %v6214_v61, 2  ;;  %v5379_v9 = vadd.f32 %v5378_v63, %v5377_v54  ;;  %v6208_v10 = vrot.slane %v6207_v38, 2  ;;  %v5392_v11 = vrot.slane %v5391_v48, 2  ;;  %4481 = vmatprep.subr.bf16.mxu1 %v8217_v49  ;;  %v8230_v57 = vld [vmem:[#allocation4 + $0xb18] ss:$196 sps:$4 sm:$0xff]  }
 0x15b   :  { %v6221_v12 = vadd.f32 %v6220_v0, %v6219_v59  ;;  %v5373_v15 = vrot.slane %v5372_v2, 1  ;;  %v6202_v17 = vadd.f32 %v6201_v4, %v6200_v58  ;;  %v5387_v18 = vrot.slane %v5386_v5, 1  ;;  %v8233_v58 = vld [vmem:[#allocation4 + $0xb20] ss:$196 sps:$4 sm:$0xff]   ;;  %v8239_v4 = vld [vmem:[#allocation4 + $0xca8] ss:$196 sps:$4 sm:$0xff]  }
 0x15c   :  { %v6216_v19 = vadd.f32 %v6215_v6, %v6214_v61  ;;  %v5380_v20 = vrot.slane %v5379_v9, 1  ;;  %v6209_v21 = vadd.f32 %v6208_v10, %v6207_v38  ;;  %v5393_v22 = vadd.f32 %v5392_v11, %v5391_v48  ;;  %4439 = vmatpush1.bf16.msra.mxu0 %v8212_v1  ;;  %v8238_v60 = vld [vmem:[#allocation4 + $0xca4] ss:$196 sps:$4 sm:$0xff]   ;;  %v8241_v48 = vld [vmem:[#allocation4 + $0xcac] ss:$196 sps:$4 sm:$0xff]  }
 0x15d   :  { %v6222_v25 = vrot.slane %v6221_v12, 2  ;;  %v5374_v26 = vadd.f32 %v5373_v15, %v5372_v2  ;;  %v6203_v29 = vrot.slane %v6202_v17, 1  ;;  %v5388_v30 = vadd.f32 %v5387_v18, %v5386_v5  ;;  %4482 = vmatpush1.bf16.msra.mxu1 %v8215_v7  ;;  %4440 = vmatprep.subr.bf16.mxu0 %v8220_v8  ;;  %v8236_v2 = vld [vmem:[#allocation4 + $0xca0] ss:$196 sps:$4 sm:$0xff]   ;;  %v8244_v8 = vld [vmem:[#allocation4 + $0xe2c] ss:$196 sps:$4 sm:$0xff]  }
 0x15e   :  { %v6217_v32 = vrot.slane %v6216_v19, 1  ;;  %v5381_v36 = vadd.f32 %v5380_v20, %v5379_v9  ;;  %v6210_v37 = vrot.slane %v6209_v21, 1  ;;  %v5394_v39 = vrot.slane %v5393_v22, 1  ;;  %4483 = vmatprep.subr.bf16.mxu1 %v8223_v14  ;;  %v8247_v9 = vld [vmem:[#allocation4 + $0xe34] ss:$196 sps:$4 sm:$0xff]   ;;  %v666_v18 = vld [vmem:[#allocation4 + $0x12c8] sm:$0xff] }
 0x15f   :  { %v6223_v40 = vadd.f32 %v6222_v25, %v6221_v12  ;;  %v6204_v44 = vadd.f32 %v6203_v29, %v6202_v17  ;;  %v5772_v5 = vrot.slane %v5764_v27, %v8807_v52  ;;  %v6602_v10 = vrot.slane %v6594_v31, %v8807_v52  ;;  %v8250_v27 = vld [vmem:[#allocation4 + $0xfb4] ss:$196 sps:$4 sm:$0xff]   ;;  %v8253_v14 = vld [vmem:[#allocation4 + $0xfbc] ss:$196 sps:$4 sm:$0xff]   ;;  %v8259_v31 = vld [vmem:[#allocation4 + $0x1144] ss:$196 sps:$4 sm:$0xff]  }
 0x160   :  { %v6218_v45 = vadd.f32 %v6217_v32, %v6216_v19  ;;  %v5734_v47 = vcombine.low %v5374_v26, %v5381_v36  ;;  %v6211_v49 = vadd.f32 %v6210_v37, %v6209_v21  ;;  %v5395_v43 = vadd.f32 %v5394_v39, %v5393_v22  ;;  %4441 = vmatpush1.bf16.msra.mxu0 %v8218_v13  ;;  %v8242_v13 = vld [vmem:[#allocation4 + $0xe28] ss:$196 sps:$4 sm:$0xff]   ;;  %v8248_v15 = vld [vmem:[#allocation4 + $0xfb0] ss:$196 sps:$4 sm:$0xff]   ;;  %v665_v17 = vld [vmem:[#allocation4 + $0x12c0] sm:$0xff] }
 0x161   :  { %v6224_v50 = vrot.slane %v6223_v40, 1  ;;  %4484 = vmatpush1.bf16.msra.mxu1 %v8221_v33  ;;  %4442 = vmatprep.subr.bf16.mxu0 %v8226_v35  ;;  %v7549_v19 = vcombine.low %v665_v17, %v665_v17  ;;  %v7551_v20 = vcombine.low %v666_v18, %v666_v18  ;;  %v8254_v21 = vld [vmem:[#allocation4 + $0x1138] ss:$196 sps:$4 sm:$0xff]   ;;  %v8257_v22 = vld [vmem:[#allocation4 + $0x1140] ss:$196 sps:$4 sm:$0xff]   ;;  %v7550_v25 = vcombine.high %v665_v17, %v665_v17 }
 0x162   :  { %v5756_v54 = vrot.slane %v5734_v47, %v8807_v52  ;;  %v6564_v55 = vcombine.low %v6204_v44, %v6211_v49  ;;  %v5735_v56 = vcombine.low %v5388_v30, %v5395_v43  ;;  %4485 = vmatprep.subr.bf16.mxu1 %v8229_v42  ;;  %v7552_v26 = vcombine.high %v666_v18, %v666_v18  ;;  %v8266_v32 = vld [vmem:[#allocation4 + $0x74] ss:$196 sps:$4 sm:$0xff]   ;;  %v8269_v33 = vld [vmem:[#allocation4 + $0x7c] ss:$196 sps:$4 sm:$0xff]   ;;  %v8275_v39 = vld [vmem:[#allocation4 + $0x204] ss:$196 sps:$4 sm:$0xff]  }
 0x163   :  { %v6225_v59 = vadd.f32 %v6224_v50, %v6223_v40  ;;  %v3840_v29 = vsel %vm3766_vm1, %v7549_v19, 0  ;;  %v3846_v30 = vsel %vm3766_vm1, %v7551_v20, 0  ;;  %v8264_v35 = vld [vmem:[#allocation4 + $0x70] ss:$196 sps:$4 sm:$0xff]   ;;  %v8267_v36 = vld [vmem:[#allocation4 + $0x78] ss:$196 sps:$4 sm:$0xff]  }
 0x164   :  { %v6586_v61 = vrot.slane %v6564_v55, %v8807_v52  ;;  %v5763_v63 = vrot.slane %v5735_v56, %v8807_v52  ;;  %4443 = vmatpush1.bf16.msra.mxu0 %v8224_v41  ;;  %v8272_v37 = vld [vmem:[#allocation4 + $0x1fc] ss:$196 sps:$4 sm:$0xff]   ;;  %v8281_v50 = vld [vmem:[#allocation4 + $0x38c] ss:$196 sps:$4 sm:$0xff]   ;;  %v8290_v17 = vld [vmem:[#allocation4 + $0x694] ss:$196 sps:$4 sm:$0xff]  }
 0x165   :  { %v6565_v38 = vcombine.low %v6218_v45, %v6225_v59  ;;  %4486 = vmatpush1.bf16.msra.mxu1 %v8227_v46  ;;  %4444 = vmatprep.subr.bf16.mxu0 %v8232_v51  ;;  %v8270_v40 = vld [vmem:[#allocation4 + $0x1f8] ss:$196 sps:$4 sm:$0xff]   ;;  %v8273_v41 = vld [vmem:[#allocation4 + $0x200] ss:$196 sps:$4 sm:$0xff]  }
 0x166   :  { %v5765_v0 = vcombine.low %v5756_v54, %v5763_v63  ;;  %4487 = vmatprep.subr.bf16.mxu1 %v8235_v53  ;;  %v8278_v45 = vld [vmem:[#allocation4 + $0x384] ss:$196 sps:$4 sm:$0xff]  }
 0x167   :  { %v6593_v1 = vrot.slane %v6565_v38, %v8807_v52 }
 0x168   :  { %v5779_v6 = vrot.slane %v5765_v0, %v8807_v52  ;;  %4445 = vmatpush1.bf16.msra.mxu0 %v8230_v57  ;;  %v8276_v57 = vld [vmem:[#allocation4 + $0x380] ss:$196 sps:$4 sm:$0xff]   ;;  %v8279_v0 = vld [vmem:[#allocation4 + $0x388] ss:$196 sps:$4 sm:$0xff]  }
 0x169   :  { %v6595_v7 = vcombine.low %v6586_v61, %v6593_v1  ;;  %4488 = vmatpush1.bf16.msra.mxu1 %v8233_v58  ;;  %4446 = vmatprep.subr.bf16.mxu0 %v8238_v60  ;;  %v8284_v1 = vld [vmem:[#allocation4 + $0x50c] ss:$196 sps:$4 sm:$0xff]  }
 0x16a   :  { %v5780_v11 = vcombine.low %v5772_v5, %v5779_v6  ;;  %4489 = vmatprep.subr.bf16.mxu1 %v8241_v48 }
 0x16b   :  { %v6609_v12 = vrot.slane %v6595_v7, %v8807_v52  ;;  %v8287_v7 = vld [vmem:[#allocation4 + $0x514] ss:$196 sps:$4 sm:$0xff]  }
 0x16c   :  { %4447 = vmatpush1.bf16.msra.mxu0 %v8236_v2  ;;  %6901 = vst [vmem:[%s9315_s3] sm:$0xff] %v5780_v11 }
 0x16d   :  { %v6610_v24 = vcombine.low %v6602_v10, %v6609_v12  ;;  %4490 = vmatpush1.bf16.msra.mxu1 %v8239_v4  ;;  %4448 = vmatprep.subr.bf16.mxu0 %v8244_v8 }
 0x16e   :  { %4491 = vmatprep.subr.bf16.mxu1 %v8247_v9 }
 0x16f   :  { %6915 = vst [vmem:[%s9316_s4] sm:$0xff] %v6610_v24 }
 0x170   :  { %4449 = vmatpush1.bf16.msra.mxu0 %v8242_v13 }
 0x171   :  { %4492 = vmatpush1.bf16.msra.mxu1 %v8245_v16  ;;  %4450 = vmatprep.subr.bf16.mxu0 %v8250_v27  ;;  %v8282_v27 = vld [vmem:[#allocation4 + $0x508] ss:$196 sps:$4 sm:$0xff]  }
 0x172   :  { %4493 = vmatprep.subr.bf16.mxu1 %v8253_v14 }
 0x174   :  { %4451 = vmatpush1.bf16.msra.mxu0 %v8248_v15 }
 0x175   :  { %4494 = vmatpush1.bf16.msra.mxu1 %v8251_v23  ;;  %4452 = vmatprep.subr.bf16.mxu0 %v8256_v28 }
 0x176   :  { %4495 = vmatprep.subr.bf16.mxu1 %v8259_v31  ;;  %v8285_v31 = vld [vmem:[#allocation4 + $0x510] ss:$196 sps:$4 sm:$0xff]  }
 0x178   :  { %4453 = vmatpush1.bf16.msra.mxu0 %v8254_v21 }
 0x179   :  { %4496 = vmatpush1.bf16.msra.mxu1 %v8257_v22  ;;  %7598 = vmatprep.subr.msk.bf16.mxu0 %vm3766_vm1, %v7550_v25  ;;  %v8293_v22 = vld [vmem:[#allocation4 + $0x69c] ss:$196 sps:$4 sm:$0xff]  }
 0x17a   :  { %7600 = vmatprep.subr.msk.bf16.mxu1 %vm3766_vm1, %v7552_v26 }
 0x17c   :  { %4455 = vmatpush1.bf16.msra.mxu0 %v3840_v29 }
 0x17d   :  { %4498 = vmatpush1.bf16.msra.mxu1 %v3846_v30  ;;  %4516 = vmatprep.subr.bf16.mxu0 %v8266_v32 }
 0x17e   :  { %4559 = vmatprep.subr.bf16.mxu1 %v8269_v33 }
 0x17f   :  { %4463 = vmatmul.mubr.bf16.vlgmr.msra.gmra.mrb[24].mxu0 %v8844_v62 }
 0x180   :  { %4506 = vmatmul.mubr.bf16.vlgmr.msra.gmra.mrb[24].mxu1 %v8844_v62  ;;  %4517 = vmatpush1.bf16.msra.mxu0 %v8264_v35 }
 0x181   :  { %4560 = vmatpush1.bf16.msra.mxu1 %v8267_v36  ;;  %4518 = vmatprep.subr.bf16.mxu0 %v8272_v37  ;;  %v8288_v37 = vld [vmem:[#allocation4 + $0x690] ss:$196 sps:$4 sm:$0xff]  }
 0x182   :  { %v4120_v42 = vpop.f32.mrb[8].mxu0  ;;  %v4163_v44 = vpop.f32.mrb[8].mxu1  ;;  %4561 = vmatprep.subr.bf16.mxu1 %v8275_v39  ;;  %7603 = vmatprep.mubr.msk.bf16.mxu0 %vm3762_vm0, %v8851_v3 }
 0x183   :  { %v6080_v46 = vmul.f32 %v4120_v42, %v4120_v42  ;;  %v6082_v47 = vmul.f32 %v4163_v44, %v4163_v44  ;;  %v4122_v49 = vpop.f32.mrb[9].mxu0  ;;  %v4165_v43 = vpop.f32.mrb[9].mxu1  ;;  %7605 = vmatprep.mubr.msk.bf16.mxu1 %vm3762_vm0, %v8851_v3 }
 0x184   :  { %v7677_v51 = vpack.c.bf16 %v4122_v49, %v4120_v42  ;;  %v6081_v53 = vmul.f32 %v4122_v49, %v4122_v49  ;;  %v7678_v54 = vpack.c.bf16 %v4165_v43, %v4163_v44  ;;  %v6083_v55 = vmul.f32 %v4165_v43, %v4165_v43  ;;  %v4124_v56 = vpop.f32.mrb[10].mxu0  ;;  %v4167_v59 = vpop.f32.mrb[10].mxu1  ;;  %4519 = vmatpush1.bf16.msra.mxu0 %v8270_v40 }
 0x185   :  { %v5396_v58 = vadd.f32 %v4124_v56, %v4120_v42  ;;  %v6129_v60 = vmul.f32 %v4124_v56, %v4124_v56  ;;  %v5410_v61 = vadd.f32 %v4167_v59, %v4163_v44  ;;  %v6131_v63 = vmul.f32 %v4167_v59, %v4167_v59  ;;  %4562 = vmatpush1.bf16.msra.mxu1 %v8273_v41  ;;  %v4126_v38 = vpop.f32.mrb[11].mxu0  ;;  %v4169_v48 = vpop.f32.mrb[11].mxu1  ;;  %v8291_v44 = vld [vmem:[#allocation4 + $0x698] ss:$196 sps:$4 sm:$0xff]  }
 0x186   :  { %5287 = vst [vmem:[%s9314_s2 + $0x20] sm:$0xff] %v7677_v51  ;;  %5288 = vst [vmem:[%s9314_s2 + $0x28] sm:$0xff] %v7678_v54  ;;  %v7702_v2 = vpack.c.bf16 %v4126_v38, %v4124_v56  ;;  %v5403_v4 = vadd.f32 %v4126_v38, %v4122_v49  ;;  %v6130_v5 = vmul.f32 %v4126_v38, %v4126_v38  ;;  %4520 = vmatprep.subr.bf16.mxu0 %v8278_v45  ;;  %v8296_v45 = vld [vmem:[#allocation4 + $0x81c] ss:$196 sps:$4 sm:$0xff]  }
 0x187   :  { %v7703_v6 = vpack.c.bf16 %v4169_v48, %v4167_v59  ;;  %v5397_v8 = vrot.slane %v5396_v58, 4  ;;  %v6226_v9 = vadd.f32 %v6129_v60, %v6080_v46  ;;  %v5411_v10 = vrot.slane %v5410_v61, 4  ;;  %4563 = vmatprep.subr.bf16.mxu1 %v8281_v50  ;;  %v8299_v50 = vld [vmem:[#allocation4 + $0x824] ss:$196 sps:$4 sm:$0xff]   ;;  %v8294_v60 = vld [vmem:[#allocation4 + $0x818] ss:$196 sps:$4 sm:$0xff]  }
 0x188   :  { %v6240_v11 = vadd.f32 %v6131_v63, %v6082_v47  ;;  %5312 = vst [vmem:[%s9314_s2 + $0xe4] sm:$0xff] %v7702_v2  ;;  %v5404_v12 = vrot.slane %v5403_v4, 4  ;;  %v6233_v13 = vadd.f32 %v6130_v5, %v6081_v53  ;;  %v5417_v16 = vadd.f32 %v4169_v48, %v4165_v43  ;;  %4521 = vmatpush1.bf16.msra.mxu0 %v8276_v57 }
 0x189   :  { %5313 = vst [vmem:[%s9314_s2 + $0xec] sm:$0xff] %v7703_v6  ;;  %v6132_v24 = vmul.f32 %v4169_v48, %v4169_v48  ;;  %v5398_v14 = vadd.f32 %v5397_v8, %v5396_v58  ;;  %v6227_v15 = vrot.slane %v6226_v9, 4  ;;  %v5412_v23 = vadd.f32 %v5411_v10, %v5410_v61  ;;  %4564 = vmatpush1.bf16.msra.mxu1 %v8279_v0  ;;  %v8297_v0 = vld [vmem:[#allocation4 + $0x820] ss:$196 sps:$4 sm:$0xff]  }
 0x18a   :  { %v6241_v28 = vrot.slane %v6240_v11, 4  ;;  %4522 = vmatprep.subr.bf16.mxu0 %v8284_v1  ;;  %v5405_v18 = vadd.f32 %v5404_v12, %v5403_v4  ;;  %v6234_v19 = vrot.slane %v6233_v13, 4  ;;  %v5418_v20 = vrot.slane %v5417_v16, 4  ;;  %4565 = vmatprep.subr.bf16.mxu1 %v8287_v7  ;;  %v8302_v1 = vld [vmem:[#allocation4 + $0x9a4] ss:$196 sps:$4 sm:$0xff]  }
 0x18b   :  { %v6247_v21 = vadd.f32 %v6132_v24, %v6083_v55  ;;  %v5399_v25 = vrot.slane %v5398_v14, 2  ;;  %v6228_v26 = vadd.f32 %v6227_v15, %v6226_v9  ;;  %v5413_v29 = vrot.slane %v5412_v23, 2  ;;  %v8305_v7 = vld [vmem:[#allocation4 + $0x9ac] ss:$196 sps:$4 sm:$0xff]  }
 0x18c   :  { %v6242_v30 = vadd.f32 %v6241_v28, %v6240_v11  ;;  %v5406_v32 = vrot.slane %v5405_v18, 2  ;;  %v6235_v33 = vadd.f32 %v6234_v19, %v6233_v13  ;;  %v5419_v35 = vadd.f32 %v5418_v20, %v5417_v16  ;;  %4523 = vmatpush1.bf16.msra.mxu0 %v8282_v27  ;;  %v8300_v16 = vld [vmem:[#allocation4 + $0x9a0] ss:$196 sps:$4 sm:$0xff]   ;;  %v8303_v24 = vld [vmem:[#allocation4 + $0x9a8] ss:$196 sps:$4 sm:$0xff]  }
 0x18d   :  { %v6248_v36 = vrot.slane %v6247_v21, 4  ;;  %v5400_v39 = vadd.f32 %v5399_v25, %v5398_v14  ;;  %v6229_v40 = vrot.slane %v6228_v26, 2  ;;  %v5414_v41 = vadd.f32 %v5413_v29, %v5412_v23  ;;  %4566 = vmatpush1.bf16.msra.mxu1 %v8285_v31  ;;  %4524 = vmatprep.subr.bf16.mxu0 %v8290_v17  ;;  %v8308_v27 = vld [vmem:[#allocation4 + $0xb2c] ss:$196 sps:$4 sm:$0xff]   ;;  %v8311_v31 = vld [vmem:[#allocation4 + $0xb34] ss:$196 sps:$4 sm:$0xff]  }
 0x18e   :  { %v6243_v42 = vrot.slane %v6242_v30, 2  ;;  %v5407_v46 = vadd.f32 %v5406_v32, %v5405_v18  ;;  %v6236_v47 = vrot.slane %v6235_v33, 2  ;;  %v5420_v49 = vrot.slane %v5419_v35, 2  ;;  %4567 = vmatprep.subr.bf16.mxu1 %v8293_v22  ;;  %v8306_v20 = vld [vmem:[#allocation4 + $0xb28] ss:$196 sps:$4 sm:$0xff]  }
 0x18f   :  { %v6249_v43 = vadd.f32 %v6248_v36, %v6247_v21  ;;  %v5401_v51 = vrot.slane %v5400_v39, 1  ;;  %v6230_v53 = vadd.f32 %v6229_v40, %v6228_v26  ;;  %v5415_v54 = vrot.slane %v5414_v41, 1  ;;  %v8309_v21 = vld [vmem:[#allocation4 + $0xb30] ss:$196 sps:$4 sm:$0xff]   ;;  %v8317_v29 = vld [vmem:[#allocation4 + $0xcbc] ss:$196 sps:$4 sm:$0xff]  }
 0x190   :  { %v6244_v55 = vadd.f32 %v6243_v42, %v6242_v30  ;;  %v5408_v56 = vrot.slane %v5407_v46, 1  ;;  %v6237_v59 = vadd.f32 %v6236_v47, %v6235_v33  ;;  %v5421_v57 = vadd.f32 %v5420_v49, %v5419_v35  ;;  %4525 = vmatpush1.bf16.msra.mxu0 %v8288_v37  ;;  %v8314_v22 = vld [vmem:[#allocation4 + $0xcb4] ss:$196 sps:$4 sm:$0xff]   ;;  %v8320_v35 = vld [vmem:[#allocation4 + $0xe3c] ss:$196 sps:$4 sm:$0xff]  }
 0x191   :  { %v6250_v58 = vrot.slane %v6249_v43, 2  ;;  %v5402_v61 = vadd.f32 %v5401_v51, %v5400_v39  ;;  %v6231_v63 = vrot.slane %v6230_v53, 1  ;;  %v5416_v38 = vadd.f32 %v5415_v54, %v5414_v41  ;;  %4568 = vmatpush1.bf16.msra.mxu1 %v8291_v44  ;;  %4526 = vmatprep.subr.bf16.mxu0 %v8296_v45  ;;  %v8312_v32 = vld [vmem:[#allocation4 + $0xcb0] ss:$196 sps:$4 sm:$0xff]   ;;  %v8315_v33 = vld [vmem:[#allocation4 + $0xcb8] ss:$196 sps:$4 sm:$0xff]  }
 0x192   :  { %v6245_v48 = vrot.slane %v6244_v55, 1  ;;  %v5409_v2 = vadd.f32 %v5408_v56, %v5407_v46  ;;  %v6238_v4 = vrot.slane %v6237_v59, 1  ;;  %v5422_v5 = vrot.slane %v5421_v57, 1  ;;  %4569 = vmatprep.subr.bf16.mxu1 %v8299_v50  ;;  %v8323_v36 = vld [vmem:[#allocation4 + $0xe44] ss:$196 sps:$4 sm:$0xff]   ;;  %v667_v47 = vld [vmem:[#allocation4 + $0x12d0] sm:$0xff] }
 0x193   :  { %v6251_v6 = vadd.f32 %v6250_v58, %v6249_v43  ;;  %v6232_v8 = vadd.f32 %v6231_v63, %v6230_v53  ;;  %v8318_v37 = vld [vmem:[#allocation4 + $0xe38] ss:$196 sps:$4 sm:$0xff]   ;;  %v8321_v39 = vld [vmem:[#allocation4 + $0xe40] ss:$196 sps:$4 sm:$0xff]   ;;  %v8329_v41 = vld [vmem:[#allocation4 + $0xfcc] ss:$196 sps:$4 sm:$0xff]   ;;  %v7554_v51 = vcombine.high %v667_v47, %v667_v47  ;;  %v7553_v53 = vcombine.low %v667_v47, %v667_v47 }
 0x194   :  { %v6246_v9 = vadd.f32 %v6245_v48, %v6244_v55  ;;  %v5781_v10 = vcombine.low %v5402_v61, %v5409_v2  ;;  %v6239_v11 = vadd.f32 %v6238_v4, %v6237_v59  ;;  %v5423_v12 = vadd.f32 %v5422_v5, %v5421_v57  ;;  %4527 = vmatpush1.bf16.msra.mxu0 %v8294_v60  ;;  %v8326_v40 = vld [vmem:[#allocation4 + $0xfc4] ss:$196 sps:$4 sm:$0xff]   ;;  %v8332_v45 = vld [vmem:[#allocation4 + $0x114c] ss:$196 sps:$4 sm:$0xff]   ;;  %v8335_v46 = vld [vmem:[#allocation4 + $0x1154] ss:$196 sps:$4 sm:$0xff]  }
 0x195   :  { %v6252_v13 = vrot.slane %v6251_v6, 1  ;;  %4570 = vmatpush1.bf16.msra.mxu1 %v8297_v0  ;;  %4528 = vmatprep.subr.bf16.mxu0 %v8302_v1  ;;  %v8324_v42 = vld [vmem:[#allocation4 + $0xfc0] ss:$196 sps:$4 sm:$0xff]   ;;  %v8327_v44 = vld [vmem:[#allocation4 + $0xfc8] ss:$196 sps:$4 sm:$0xff]   ;;  %v668_v49 = vld [vmem:[#allocation4 + $0x12d8] sm:$0xff] }
 0x196   :  { %v8912_v14 = vrot.slane %v5781_v10, %v8807_v52  ;;  %v6611_v15 = vcombine.low %v6232_v8, %v6239_v11  ;;  %v5782_v23 = vcombine.low %v5416_v38, %v5423_v12  ;;  %4571 = vmatprep.subr.bf16.mxu1 %v8305_v7  ;;  %v8330_v43 = vld [vmem:[#allocation4 + $0x1148] ss:$196 sps:$4 sm:$0xff]   ;;  %v8333_v50 = vld [vmem:[#allocation4 + $0x1150] ss:$196 sps:$4 sm:$0xff]   ;;  %v7556_v54 = vcombine.high %v668_v49, %v668_v49  ;;  %v8340_v60 = vld [vmem:[#allocation4 + $0x80] ss:$196 sps:$4 sm:$0xff]  }
 0x197   :  { %v6253_v28 = vadd.f32 %v6252_v13, %v6251_v6  ;;  %v7555_v55 = vcombine.low %v668_v49, %v668_v49  ;;  %v3852_v56 = vsel %vm3766_vm1, %v7553_v53, 0  ;;  %v8342_v59 = vld [vmem:[#allocation4 + $0x84] ss:$196 sps:$4 sm:$0xff]   ;;  %v8345_v58 = vld [vmem:[#allocation4 + $0x8c] ss:$196 sps:$4 sm:$0xff]  }
 0x198   :  { %v8915_v17 = vrot.slane %v6611_v15, %v8807_v52  ;;  %v8918_v18 = vrot.slane %v5782_v23, %v8807_v52  ;;  %4529 = vmatpush1.bf16.msra.mxu0 %v8300_v16  ;;  %v8343_v61 = vld [vmem:[#allocation4 + $0x88] ss:$196 sps:$4 sm:$0xff]   ;;  %v8351_v38 = vld [vmem:[#allocation4 + $0x214] ss:$196 sps:$4 sm:$0xff]  }
 0x199   :  { %v6612_v19 = vcombine.low %v6246_v9, %v6253_v28  ;;  %4572 = vmatpush1.bf16.msra.mxu1 %v8303_v24  ;;  %4530 = vmatprep.subr.bf16.mxu0 %v8308_v27  ;;  %v3858_v57 = vsel %vm3766_vm1, %v7555_v55, 0  ;;  %v8348_v63 = vld [vmem:[#allocation4 + $0x20c] ss:$196 sps:$4 sm:$0xff]   ;;  %v8354_v4 = vld [vmem:[#allocation4 + $0x394] ss:$196 sps:$4 sm:$0xff]  }
 0x19a   :  { %v5813_v25 = vcombine.low %v8912_v14, %v8918_v18  ;;  %4573 = vmatprep.subr.bf16.mxu1 %v8311_v31  ;;  %v8346_v48 = vld [vmem:[#allocation4 + $0x208] ss:$196 sps:$4 sm:$0xff]   ;;  %v8349_v0 = vld [vmem:[#allocation4 + $0x210] ss:$196 sps:$4 sm:$0xff]   ;;  %v8357_v9 = vld [vmem:[#allocation4 + $0x39c] ss:$196 sps:$4 sm:$0xff]  }
 0x19b   :  { %v8923_v26 = vrot.slane %v6612_v19, %v8807_v52  ;;  %v8352_v24 = vld [vmem:[#allocation4 + $0x390] ss:$196 sps:$4 sm:$0xff]  }
 0x19c   :  { %4531 = vmatpush1.bf16.msra.mxu0 %v8306_v20  ;;  %v8355_v20 = vld [vmem:[#allocation4 + $0x398] ss:$196 sps:$4 sm:$0xff]  }
 0x19d   :  { %v6643_v30 = vcombine.low %v8915_v17, %v8923_v26  ;;  %4574 = vmatpush1.bf16.msra.mxu1 %v8309_v21  ;;  %4532 = vmatprep.subr.bf16.mxu0 %v8314_v22  ;;  %v8360_v21 = vld [vmem:[#allocation4 + $0x51c] ss:$196 sps:$4 sm:$0xff]   ;;  %v8399_v14 = vld [vmem:[#allocation4 + $0xe54] ss:$196 sps:$4 sm:$0xff]  }
 0x19e   :  { %4575 = vmatprep.subr.bf16.mxu1 %v8317_v29  ;;  %v8400_v17 = vld [vmem:[#allocation4 + $0xfd0] ss:$196 sps:$4 sm:$0xff]   ;;  %v8403_v26 = vld [vmem:[#allocation4 + $0xfd8] ss:$196 sps:$4 sm:$0xff]  }
 0x1a0   :  { %4533 = vmatpush1.bf16.msra.mxu0 %v8312_v32 }
 0x1a1   :  { %4576 = vmatpush1.bf16.msra.mxu1 %v8315_v33  ;;  %4534 = vmatprep.subr.bf16.mxu0 %v8320_v35  ;;  %v8363_v33 = vld [vmem:[#allocation4 + $0x524] ss:$196 sps:$4 sm:$0xff]  }
 0x1a2   :  { %4577 = vmatprep.subr.bf16.mxu1 %v8323_v36 }
 0x1a4   :  { %4535 = vmatpush1.bf16.msra.mxu0 %v8318_v37 }
 0x1a5   :  { %4578 = vmatpush1.bf16.msra.mxu1 %v8321_v39  ;;  %4536 = vmatprep.subr.bf16.mxu0 %v8326_v40 }
 0x1a6   :  { %4579 = vmatprep.subr.bf16.mxu1 %v8329_v41 }
 0x1a8   :  { %4537 = vmatpush1.bf16.msra.mxu0 %v8324_v42 }
 0x1a9   :  { %4580 = vmatpush1.bf16.msra.mxu1 %v8327_v44  ;;  %4538 = vmatprep.subr.bf16.mxu0 %v8332_v45  ;;  %v8358_v45 = vld [vmem:[#allocation4 + $0x518] ss:$196 sps:$4 sm:$0xff]  }
 0x1aa   :  { %4581 = vmatprep.subr.bf16.mxu1 %v8335_v46 }
 0x1ac   :  { %4539 = vmatpush1.bf16.msra.mxu0 %v8330_v43 }
 0x1ad   :  { %4582 = vmatpush1.bf16.msra.mxu1 %v8333_v50  ;;  %7602 = vmatprep.subr.msk.bf16.mxu0 %vm3766_vm1, %v7554_v51  ;;  %v8361_v50 = vld [vmem:[#allocation4 + $0x520] ss:$196 sps:$4 sm:$0xff]  }
 0x1ae   :  { %7604 = vmatprep.subr.msk.bf16.mxu1 %vm3766_vm1, %v7556_v54  ;;  %v8366_v51 = vld [vmem:[#allocation4 + $0x6a4] ss:$196 sps:$4 sm:$0xff]  }
 0x1b0   :  { %4541 = vmatpush1.bf16.msra.mxu0 %v3852_v56 }
 0x1b1   :  { %4584 = vmatpush1.bf16.msra.mxu1 %v3858_v57  ;;  %4602 = vmatprep.subr.bf16.mxu0 %v8342_v59  ;;  %v8369_v59 = vld [vmem:[#allocation4 + $0x6ac] ss:$196 sps:$4 sm:$0xff]  }
 0x1b2   :  { %4645 = vmatprep.subr.bf16.mxu1 %v8345_v58 }
 0x1b3   :  { %4549 = vmatmul.mubr.bf16.vlgmr.msra.gmra.mrb[28].mxu0 %v8844_v62 }
 0x1b4   :  { %4592 = vmatmul.mubr.bf16.vlgmr.msra.gmra.mrb[28].mxu1 %v8844_v62  ;;  %4603 = vmatpush1.bf16.msra.mxu0 %v8340_v60 }
 0x1b5   :  { %4646 = vmatpush1.bf16.msra.mxu1 %v8343_v61  ;;  %4604 = vmatprep.subr.bf16.mxu0 %v8348_v63 }
 0x1b6   :  { %v4206_v1 = vpop.f32.mrb[12].mxu0  ;;  %v4249_v2 = vpop.f32.mrb[12].mxu1  ;;  %4647 = vmatprep.subr.bf16.mxu1 %v8351_v38  ;;  %7607 = vmatprep.mubr.msk.bf16.mxu0 %vm3762_vm0, %v8851_v3 }
 0x1b7   :  { %v6084_v5 = vmul.f32 %v4206_v1, %v4206_v1  ;;  %v6086_v6 = vmul.f32 %v4249_v2, %v4249_v2  ;;  %v4208_v7 = vpop.f32.mrb[13].mxu0  ;;  %v4251_v8 = vpop.f32.mrb[13].mxu1  ;;  %7609 = vmatprep.mubr.msk.bf16.mxu1 %vm3762_vm0, %v8851_v3 }
 0x1b8   :  { %v7679_v62 = vpack.c.bf16 %v4208_v7, %v4206_v1  ;;  %v6085_v10 = vmul.f32 %v4208_v7, %v4208_v7  ;;  %v7680_v11 = vpack.c.bf16 %v4251_v8, %v4249_v2  ;;  %v6087_v12 = vmul.f32 %v4251_v8, %v4251_v8  ;;  %v4210_v13 = vpop.f32.mrb[14].mxu0  ;;  %v4253_v16 = vpop.f32.mrb[14].mxu1  ;;  %4605 = vmatpush1.bf16.msra.mxu0 %v8346_v48 }
 0x1b9   :  { %v5424_v27 = vadd.f32 %v4210_v13, %v4206_v1  ;;  %v6133_v15 = vmul.f32 %v4210_v13, %v4210_v13  ;;  %v5438_v23 = vadd.f32 %v4253_v16, %v4249_v2  ;;  %v6135_v28 = vmul.f32 %v4253_v16, %v4253_v16  ;;  %4648 = vmatpush1.bf16.msra.mxu1 %v8349_v0  ;;  %v4212_v31 = vpop.f32.mrb[15].mxu0  ;;  %v4255_v19 = vpop.f32.mrb[15].mxu1  ;;  %v8364_v1 = vld [vmem:[#allocation4 + $0x6a0] ss:$196 sps:$4 sm:$0xff]  }
 0x1ba   :  { %5289 = vst [vmem:[%s9314_s2 + $0x30] sm:$0xff] %v7679_v62  ;;  %5290 = vst [vmem:[%s9314_s2 + $0x38] sm:$0xff] %v7680_v11  ;;  %v7704_v3 = vpack.c.bf16 %v4212_v31, %v4210_v13  ;;  %v5431_v22 = vadd.f32 %v4212_v31, %v4208_v7  ;;  %v6134_v29 = vmul.f32 %v4212_v31, %v4212_v31  ;;  %4606 = vmatprep.subr.bf16.mxu0 %v8354_v4  ;;  %v8367_v7 = vld [vmem:[#allocation4 + $0x6a8] ss:$196 sps:$4 sm:$0xff]  }
 0x1bb   :  { %v7705_v32 = vpack.c.bf16 %v4255_v19, %v4253_v16  ;;  %v5425_v35 = vrot.slane %v5424_v27, 4  ;;  %v6254_v36 = vadd.f32 %v6133_v15, %v6084_v5  ;;  %v5439_v37 = vrot.slane %v5438_v23, 4  ;;  %4649 = vmatprep.subr.bf16.mxu1 %v8357_v9 }
 0x1bc   :  { %v6268_v39 = vadd.f32 %v6135_v28, %v6086_v6  ;;  %5314 = vst [vmem:[%s9314_s2 + $0xf4] sm:$0xff] %v7704_v3  ;;  %v5432_v40 = vrot.slane %v5431_v22, 4  ;;  %v6261_v41 = vadd.f32 %v6134_v29, %v6085_v10  ;;  %v5445_v42 = vadd.f32 %v4255_v19, %v4251_v8  ;;  %4607 = vmatpush1.bf16.msra.mxu0 %v8352_v24  ;;  %v8372_v8 = vld [vmem:[#allocation4 + $0x82c] ss:$196 sps:$4 sm:$0xff]  }
 0x1bd   :  { %5315 = vst [vmem:[%s9314_s2 + $0xfc] sm:$0xff] %v7705_v32  ;;  %v6136_v44 = vmul.f32 %v4255_v19, %v4255_v19  ;;  %v5426_v46 = vadd.f32 %v5425_v35, %v5424_v27  ;;  %v6255_v47 = vrot.slane %v6254_v36, 4  ;;  %v5440_v49 = vadd.f32 %v5439_v37, %v5438_v23  ;;  %4650 = vmatpush1.bf16.msra.mxu1 %v8355_v20  ;;  %v8370_v19 = vld [vmem:[#allocation4 + $0x828] ss:$196 sps:$4 sm:$0xff]   ;;  %v8373_v29 = vld [vmem:[#allocation4 + $0x830] ss:$196 sps:$4 sm:$0xff]  }
 0x1be   :  { %v6269_v43 = vrot.slane %v6268_v39, 4  ;;  %4608 = vmatprep.subr.bf16.mxu0 %v8360_v21  ;;  %v5433_v53 = vadd.f32 %v5432_v40, %v5431_v22  ;;  %v6262_v54 = vrot.slane %v6261_v41, 4  ;;  %v5446_v55 = vrot.slane %v5445_v42, 4  ;;  %4651 = vmatprep.subr.bf16.mxu1 %v8363_v33  ;;  %v8378_v32 = vld [vmem:[#allocation4 + $0x9b4] ss:$196 sps:$4 sm:$0xff]  }
 0x1bf   :  { %v6275_v56 = vadd.f32 %v6136_v44, %v6087_v12  ;;  %v5427_v57 = vrot.slane %v5426_v46, 2  ;;  %v6256_v58 = vadd.f32 %v6255_v47, %v6254_v36  ;;  %v5441_v60 = vrot.slane %v5440_v49, 2  ;;  %v8375_v12 = vld [vmem:[#allocation4 + $0x834] ss:$196 sps:$4 sm:$0xff]  }
 0x1c0   :  { %v6270_v61 = vadd.f32 %v6269_v43, %v6268_v39  ;;  %v5434_v63 = vrot.slane %v5433_v53, 2  ;;  %v6263_v38 = vadd.f32 %v6262_v54, %v6261_v41  ;;  %v5447_v48 = vadd.f32 %v5446_v55, %v5445_v42  ;;  %4609 = vmatpush1.bf16.msra.mxu0 %v8358_v45  ;;  %v8381_v39 = vld [vmem:[#allocation4 + $0x9bc] ss:$196 sps:$4 sm:$0xff]   ;;  %v8376_v47 = vld [vmem:[#allocation4 + $0x9b0] ss:$196 sps:$4 sm:$0xff]  }
 0x1c1   :  { %v6276_v0 = vrot.slane %v6275_v56, 4  ;;  %v5428_v2 = vadd.f32 %v5427_v57, %v5426_v46  ;;  %v6257_v4 = vrot.slane %v6256_v58, 2  ;;  %v5442_v5 = vadd.f32 %v5441_v60, %v5440_v49  ;;  %4652 = vmatpush1.bf16.msra.mxu1 %v8361_v50  ;;  %4610 = vmatprep.subr.bf16.mxu0 %v8366_v51  ;;  %v8379_v49 = vld [vmem:[#allocation4 + $0x9b8] ss:$196 sps:$4 sm:$0xff]   ;;  %v8387_v55 = vld [vmem:[#allocation4 + $0xb44] ss:$196 sps:$4 sm:$0xff]  }
 0x1c2   :  { %v6271_v6 = vrot.slane %v6270_v61, 2  ;;  %v5435_v9 = vadd.f32 %v5434_v63, %v5433_v53  ;;  %v6264_v62 = vrot.slane %v6263_v38, 2  ;;  %v5448_v10 = vrot.slane %v5447_v48, 2  ;;  %4653 = vmatprep.subr.bf16.mxu1 %v8369_v59  ;;  %v8384_v43 = vld [vmem:[#allocation4 + $0xb3c] ss:$196 sps:$4 sm:$0xff]  }
 0x1c3   :  { %v6277_v11 = vadd.f32 %v6276_v0, %v6275_v56  ;;  %v5429_v13 = vrot.slane %v5428_v2, 1  ;;  %v6258_v16 = vadd.f32 %v6257_v4, %v6256_v58  ;;  %v5443_v24 = vrot.slane %v5442_v5, 1  ;;  %v8382_v58 = vld [vmem:[#allocation4 + $0xb38] ss:$196 sps:$4 sm:$0xff]   ;;  %v8385_v60 = vld [vmem:[#allocation4 + $0xb40] ss:$196 sps:$4 sm:$0xff]  }
 0x1c4   :  { %v6272_v27 = vadd.f32 %v6271_v6, %v6270_v61  ;;  %v5436_v15 = vrot.slane %v5435_v9, 1  ;;  %v6265_v23 = vadd.f32 %v6264_v62, %v6263_v38  ;;  %v5449_v28 = vadd.f32 %v5448_v10, %v5447_v48  ;;  %4611 = vmatpush1.bf16.msra.mxu0 %v8364_v1  ;;  %v8390_v61 = vld [vmem:[#allocation4 + $0xcc4] ss:$196 sps:$4 sm:$0xff]   ;;  %v8393_v48 = vld [vmem:[#allocation4 + $0xccc] ss:$196 sps:$4 sm:$0xff]  }
 0x1c5   :  { %v6278_v31 = vrot.slane %v6277_v11, 2  ;;  %v5430_v20 = vadd.f32 %v5429_v13, %v5428_v2  ;;  %v6259_v21 = vrot.slane %v6258_v16, 1  ;;  %v5444_v3 = vadd.f32 %v5443_v24, %v5442_v5  ;;  %4654 = vmatpush1.bf16.msra.mxu1 %v8367_v7  ;;  %4612 = vmatprep.subr.bf16.mxu0 %v8372_v8  ;;  %v8388_v4 = vld [vmem:[#allocation4 + $0xcc0] ss:$196 sps:$4 sm:$0xff]   ;;  %v8391_v5 = vld [vmem:[#allocation4 + $0xcc8] ss:$196 sps:$4 sm:$0xff]  }
 0x1c6   :  { %v6273_v22 = vrot.slane %v6272_v27, 1  ;;  %v5437_v33 = vadd.f32 %v5436_v15, %v5435_v9  ;;  %v6266_v35 = vrot.slane %v6265_v23, 1  ;;  %v5450_v36 = vrot.slane %v5449_v28, 1  ;;  %4655 = vmatprep.subr.bf16.mxu1 %v8375_v12  ;;  %v8396_v6 = vld [vmem:[#allocation4 + $0xe4c] ss:$196 sps:$4 sm:$0xff]   ;;  %v669_v13 = vld [vmem:[#allocation4 + $0x12e0] sm:$0xff] }
 0x1c7   :  { %v6279_v37 = vadd.f32 %v6278_v31, %v6277_v11  ;;  %v6260_v40 = vadd.f32 %v6259_v21, %v6258_v16  ;;  %v5821_v0 = vrot.slane %v5813_v25, %v8807_v52  ;;  %v6651_v7 = vrot.slane %v6643_v30, %v8807_v52  ;;  %v8394_v25 = vld [vmem:[#allocation4 + $0xe48] ss:$196 sps:$4 sm:$0xff]   ;;  %v8397_v62 = vld [vmem:[#allocation4 + $0xe50] ss:$196 sps:$4 sm:$0xff]   ;;  %v8405_v11 = vld [vmem:[#allocation4 + $0xfdc] ss:$196 sps:$4 sm:$0xff]  }
 0x1c8   :  { %v6274_v41 = vadd.f32 %v6273_v22, %v6272_v27  ;;  %v5783_v42 = vcombine.low %v5430_v20, %v5437_v33  ;;  %v6267_v44 = vadd.f32 %v6266_v35, %v6265_v23  ;;  %v5451_v45 = vadd.f32 %v5450_v36, %v5449_v28  ;;  %4613 = vmatpush1.bf16.msra.mxu0 %v8370_v19  ;;  %v8402_v10 = vld [vmem:[#allocation4 + $0xfd4] ss:$196 sps:$4 sm:$0xff]   ;;  %v8408_v30 = vld [vmem:[#allocation4 + $0x115c] ss:$196 sps:$4 sm:$0xff]   ;;  %v8411_v12 = vld [vmem:[#allocation4 + $0x1164] ss:$196 sps:$4 sm:$0xff]  }
 0x1c9   :  { %v6280_v46 = vrot.slane %v6279_v37, 1  ;;  %4656 = vmatpush1.bf16.msra.mxu1 %v8373_v29  ;;  %4614 = vmatprep.subr.bf16.mxu0 %v8378_v32  ;;  %v670_v16 = vld [vmem:[#allocation4 + $0x12e8] sm:$0xff]  ;;  %v8406_v24 = vld [vmem:[#allocation4 + $0x1158] ss:$196 sps:$4 sm:$0xff]   ;;  %v8409_v27 = vld [vmem:[#allocation4 + $0x1160] ss:$196 sps:$4 sm:$0xff]   ;;  %v7558_v15 = vcombine.high %v669_v13, %v669_v13  ;;  %v7557_v23 = vcombine.low %v669_v13, %v669_v13 }
 0x1ca   :  { %v5805_v50 = vrot.slane %v5783_v42, %v8807_v52  ;;  %v6613_v51 = vcombine.low %v6260_v40, %v6267_v44  ;;  %v5784_v53 = vcombine.low %v5444_v3, %v5451_v45  ;;  %4657 = vmatprep.subr.bf16.mxu1 %v8381_v39  ;;  %v7560_v28 = vcombine.high %v670_v16, %v670_v16  ;;  %v8418_v20 = vld [vmem:[#allocation4 + $0x94] ss:$196 sps:$4 sm:$0xff]   ;;  %v8421_v3 = vld [vmem:[#allocation4 + $0x9c] ss:$196 sps:$4 sm:$0xff]   ;;  %v8427_v33 = vld [vmem:[#allocation4 + $0x224] ss:$196 sps:$4 sm:$0xff]  }
 0x1cb   :  { %v6281_v54 = vadd.f32 %v6280_v46, %v6279_v37  ;;  %v7559_v31 = vcombine.low %v670_v16, %v670_v16  ;;  %v3864_v19 = vsel %vm3766_vm1, %v7557_v23, 0  ;;  %v8416_v22 = vld [vmem:[#allocation4 + $0x90] ss:$196 sps:$4 sm:$0xff]   ;;  %v8419_v29 = vld [vmem:[#allocation4 + $0x98] ss:$196 sps:$4 sm:$0xff]  }
 0x1cc   :  { %v6635_v56 = vrot.slane %v6613_v51, %v8807_v52  ;;  %v5812_v59 = vrot.slane %v5784_v53, %v8807_v52  ;;  %4615 = vmatpush1.bf16.msra.mxu0 %v8376_v47  ;;  %v8424_v32 = vld [vmem:[#allocation4 + $0x21c] ss:$196 sps:$4 sm:$0xff]   ;;  %v8442_v13 = vld [vmem:[#allocation4 + $0x6b4] ss:$196 sps:$4 sm:$0xff]  }
 0x1cd   :  { %v6614_v57 = vcombine.low %v6274_v41, %v6281_v54  ;;  %4658 = vmatpush1.bf16.msra.mxu1 %v8379_v49  ;;  %4616 = vmatprep.subr.bf16.mxu0 %v8384_v43  ;;  %v3870_v21 = vsel %vm3766_vm1, %v7559_v31, 0  ;;  %v8976_v35 = vld [vmem:[%s9312_s0] ss:$8 sps:$4 sm:$0xff]   ;;  %v8983_v42 = vld [vmem:[%s9312_s0 + $0x4] ss:$8 sps:$4 sm:$0xff]  }
 0x1ce   :  { %v5814_v63 = vcombine.low %v5805_v50, %v5812_v59  ;;  %4659 = vmatprep.subr.bf16.mxu1 %v8387_v55  ;;  %v8422_v36 = vld [vmem:[#allocation4 + $0x218] ss:$196 sps:$4 sm:$0xff]   ;;  %v8425_v37 = vld [vmem:[#allocation4 + $0x220] ss:$196 sps:$4 sm:$0xff]   ;;  %v8433_v49 = vld [vmem:[#allocation4 + $0x3ac] ss:$196 sps:$4 sm:$0xff]  }
 0x1cf   :  { %v6642_v38 = vrot.slane %v6614_v57, %v8807_v52  ;;  %v8430_v41 = vld [vmem:[#allocation4 + $0x3a4] ss:$196 sps:$4 sm:$0xff]   ;;  %v8445_v23 = vld [vmem:[#allocation4 + $0x6bc] ss:$196 sps:$4 sm:$0xff]  }
 0x1d0   :  { %v5828_v1 = vrot.slane %v5814_v63, %v8807_v52  ;;  %4617 = vmatpush1.bf16.msra.mxu0 %v8382_v58 }
 0x1d1   :  { %v6644_v2 = vcombine.low %v6635_v56, %v6642_v38  ;;  %4660 = vmatpush1.bf16.msra.mxu1 %v8385_v60  ;;  %4618 = vmatprep.subr.bf16.mxu0 %v8390_v61  ;;  %v8428_v56 = vld [vmem:[#allocation4 + $0x3a0] ss:$196 sps:$4 sm:$0xff]   ;;  %v8431_v38 = vld [vmem:[#allocation4 + $0x3a8] ss:$196 sps:$4 sm:$0xff]  }
 0x1d2   :  { %v5829_v8 = vcombine.low %v5821_v0, %v5828_v1  ;;  %4661 = vmatprep.subr.bf16.mxu1 %v8393_v48  ;;  %v8436_v48 = vld [vmem:[#allocation4 + $0x52c] ss:$196 sps:$4 sm:$0xff]  }
 0x1d3   :  { %v6658_v9 = vrot.slane %v6644_v2, %v8807_v52 }
 0x1d4   :  { %4619 = vmatpush1.bf16.msra.mxu0 %v8388_v4  ;;  %6902 = vst [vmem:[%s9315_s3 + $0x8] sm:$0xff] %v5829_v8 }
 0x1d5   :  { %v6659_v18 = vcombine.low %v6651_v7, %v6658_v9  ;;  %4662 = vmatpush1.bf16.msra.mxu1 %v8391_v5  ;;  %4620 = vmatprep.subr.bf16.mxu0 %v8396_v6  ;;  %v8439_v5 = vld [vmem:[#allocation4 + $0x534] ss:$196 sps:$4 sm:$0xff]  }
 0x1d6   :  { %4663 = vmatprep.subr.bf16.mxu1 %v8399_v14 }
 0x1d7   :  { %6916 = vst [vmem:[%s9316_s4 + $0x8] sm:$0xff] %v6659_v18 }
 0x1d8   :  { %4621 = vmatpush1.bf16.msra.mxu0 %v8394_v25 }
 0x1d9   :  { %4664 = vmatpush1.bf16.msra.mxu1 %v8397_v62  ;;  %4622 = vmatprep.subr.bf16.mxu0 %v8402_v10  ;;  %v8434_v10 = vld [vmem:[#allocation4 + $0x528] ss:$196 sps:$4 sm:$0xff]  }
 0x1da   :  { %4665 = vmatprep.subr.bf16.mxu1 %v8405_v11 }
 0x1dc   :  { %4623 = vmatpush1.bf16.msra.mxu0 %v8400_v17 }
 0x1dd   :  { %4666 = vmatpush1.bf16.msra.mxu1 %v8403_v26  ;;  %4624 = vmatprep.subr.bf16.mxu0 %v8408_v30 }
 0x1de   :  { %4667 = vmatprep.subr.bf16.mxu1 %v8411_v12  ;;  %v8437_v12 = vld [vmem:[#allocation4 + $0x530] ss:$196 sps:$4 sm:$0xff]  }
 0x1e0   :  { %4625 = vmatpush1.bf16.msra.mxu0 %v8406_v24 }
 0x1e1   :  { %4668 = vmatpush1.bf16.msra.mxu1 %v8409_v27  ;;  %7606 = vmatprep.subr.msk.bf16.mxu0 %vm3766_vm1, %v7558_v15 }
 0x1e2   :  { %7608 = vmatprep.subr.msk.bf16.mxu1 %vm3766_vm1, %v7560_v28 }
 0x1e4   :  { %4627 = vmatpush1.bf16.msra.mxu0 %v3864_v19 }
 0x1e5   :  { %4670 = vmatpush1.bf16.msra.mxu1 %v3870_v21  ;;  %4688 = vmatprep.subr.bf16.mxu0 %v8418_v20 }
 0x1e6   :  { %4731 = vmatprep.subr.bf16.mxu1 %v8421_v3 }
 0x1e7   :  { %4635 = vmatmul.mubr.bf16.vlgmr.msra.gmra.mrb[32].mxu0 %v8976_v35 }
 0x1e8   :  { %4678 = vmatmul.mubr.bf16.vlgmr.msra.gmra.mrb[32].mxu1 %v8976_v35  ;;  %4689 = vmatpush1.bf16.msra.mxu0 %v8416_v22 }
 0x1e9   :  { %4732 = vmatpush1.bf16.msra.mxu1 %v8419_v29  ;;  %4690 = vmatprep.subr.bf16.mxu0 %v8424_v32  ;;  %v8440_v32 = vld [vmem:[#allocation4 + $0x6b0] ss:$196 sps:$4 sm:$0xff]  }
 0x1ea   :  { %v4292_v39 = vpop.f32.mrb[16].mxu0  ;;  %v4335_v40 = vpop.f32.mrb[16].mxu1  ;;  %4733 = vmatprep.subr.bf16.mxu1 %v8427_v33  ;;  %7611 = vmatprep.mubr.msk.bf16.mxu0 %vm3762_vm0, %v8983_v42 }
 0x1eb   :  { %v6088_v44 = vmul.f32 %v4292_v39, %v4292_v39  ;;  %v6090_v45 = vmul.f32 %v4335_v40, %v4335_v40  ;;  %v4294_v46 = vpop.f32.mrb[17].mxu0  ;;  %v4337_v47 = vpop.f32.mrb[17].mxu1  ;;  %7613 = vmatprep.mubr.msk.bf16.mxu1 %vm3762_vm0, %v8983_v42 }
 0x1ec   :  { %v7681_v43 = vpack.c.bf16 %v4294_v46, %v4292_v39  ;;  %v6089_v50 = vmul.f32 %v4294_v46, %v4294_v46  ;;  %v7682_v51 = vpack.c.bf16 %v4337_v47, %v4335_v40  ;;  %v6091_v53 = vmul.f32 %v4337_v47, %v4337_v47  ;;  %v4296_v54 = vpop.f32.mrb[18].mxu0  ;;  %v4339_v55 = vpop.f32.mrb[18].mxu1  ;;  %4691 = vmatpush1.bf16.msra.mxu0 %v8422_v36 }
 0x1ed   :  { %v5452_v59 = vadd.f32 %v4296_v54, %v4292_v39  ;;  %v6137_v57 = vmul.f32 %v4296_v54, %v4296_v54  ;;  %v5466_v58 = vadd.f32 %v4339_v55, %v4335_v40  ;;  %v6139_v60 = vmul.f32 %v4339_v55, %v4339_v55  ;;  %4734 = vmatpush1.bf16.msra.mxu1 %v8425_v37  ;;  %v4298_v61 = vpop.f32.mrb[19].mxu0  ;;  %v4341_v63 = vpop.f32.mrb[19].mxu1  ;;  %v8443_v40 = vld [vmem:[#allocation4 + $0x6b8] ss:$196 sps:$4 sm:$0xff]  }
 0x1ee   :  { %5291 = vst [vmem:[%s9314_s2 + $0x40] sm:$0xff] %v7681_v43  ;;  %5292 = vst [vmem:[%s9314_s2 + $0x48] sm:$0xff] %v7682_v51  ;;  %v7706_v0 = vpack.c.bf16 %v4298_v61, %v4296_v54  ;;  %v5459_v1 = vadd.f32 %v4298_v61, %v4294_v46  ;;  %v6138_v2 = vmul.f32 %v4298_v61, %v4298_v61  ;;  %4692 = vmatprep.subr.bf16.mxu0 %v8430_v41  ;;  %v8448_v41 = vld [vmem:[#allocation4 + $0x83c] ss:$196 sps:$4 sm:$0xff]  }
 0x1ef   :  { %v7707_v4 = vpack.c.bf16 %v4341_v63, %v4339_v55  ;;  %v5453_v6 = vrot.slane %v5452_v59, 4  ;;  %v6282_v7 = vadd.f32 %v6137_v57, %v6088_v44  ;;  %v5467_v8 = vrot.slane %v5466_v58, 4  ;;  %4735 = vmatprep.subr.bf16.mxu1 %v8433_v49  ;;  %v8451_v49 = vld [vmem:[#allocation4 + $0x844] ss:$196 sps:$4 sm:$0xff]   ;;  %v8446_v57 = vld [vmem:[#allocation4 + $0x838] ss:$196 sps:$4 sm:$0xff]  }
 0x1f0   :  { %v6296_v9 = vadd.f32 %v6139_v60, %v6090_v45  ;;  %5316 = vst [vmem:[%s9314_s2 + $0x104] sm:$0xff] %v7706_v0  ;;  %v5460_v14 = vrot.slane %v5459_v1, 4  ;;  %v6289_v18 = vadd.f32 %v6138_v2, %v6089_v50  ;;  %v5473_v25 = vadd.f32 %v4341_v63, %v4337_v47  ;;  %4693 = vmatpush1.bf16.msra.mxu0 %v8428_v56 }
 0x1f1   :  { %5317 = vst [vmem:[%s9314_s2 + $0x10c] sm:$0xff] %v7707_v4  ;;  %v6140_v62 = vmul.f32 %v4341_v63, %v4341_v63  ;;  %v5454_v11 = vadd.f32 %v5453_v6, %v5452_v59  ;;  %v6283_v17 = vrot.slane %v6282_v7, 4  ;;  %v5468_v26 = vadd.f32 %v5467_v8, %v5466_v58  ;;  %4736 = vmatpush1.bf16.msra.mxu1 %v8431_v38  ;;  %v8449_v38 = vld [vmem:[#allocation4 + $0x840] ss:$196 sps:$4 sm:$0xff]  }
 0x1f2   :  { %v6297_v30 = vrot.slane %v6296_v9, 4  ;;  %4694 = vmatprep.subr.bf16.mxu0 %v8436_v48  ;;  %v5461_v16 = vadd.f32 %v5460_v14, %v5459_v1  ;;  %v6290_v24 = vrot.slane %v6289_v18, 4  ;;  %v5474_v27 = vrot.slane %v5473_v25, 4  ;;  %4737 = vmatprep.subr.bf16.mxu1 %v8439_v5  ;;  %v8454_v48 = vld [vmem:[#allocation4 + $0x9c4] ss:$196 sps:$4 sm:$0xff]  }
 0x1f3   :  { %v6303_v15 = vadd.f32 %v6140_v62, %v6091_v53  ;;  %v5455_v28 = vrot.slane %v5454_v11, 2  ;;  %v6284_v31 = vadd.f32 %v6283_v17, %v6282_v7  ;;  %v5469_v19 = vrot.slane %v5468_v26, 2  ;;  %v8457_v5 = vld [vmem:[#allocation4 + $0x9cc] ss:$196 sps:$4 sm:$0xff]  }
 0x1f4   :  { %v6298_v20 = vadd.f32 %v6297_v30, %v6296_v9  ;;  %v5462_v21 = vrot.slane %v5461_v16, 2  ;;  %v6291_v3 = vadd.f32 %v6290_v24, %v6289_v18  ;;  %v5475_v22 = vadd.f32 %v5474_v27, %v5473_v25  ;;  %4695 = vmatpush1.bf16.msra.mxu0 %v8434_v10  ;;  %v8452_v25 = vld [vmem:[#allocation4 + $0x9c0] ss:$196 sps:$4 sm:$0xff]   ;;  %v8455_v62 = vld [vmem:[#allocation4 + $0x9c8] ss:$196 sps:$4 sm:$0xff]  }
 0x1f5   :  { %v6304_v29 = vrot.slane %v6303_v15, 4  ;;  %v5456_v33 = vadd.f32 %v5455_v28, %v5454_v11  ;;  %v6285_v36 = vrot.slane %v6284_v31, 2  ;;  %v5470_v37 = vadd.f32 %v5469_v19, %v5468_v26  ;;  %4738 = vmatpush1.bf16.msra.mxu1 %v8437_v12  ;;  %4696 = vmatprep.subr.bf16.mxu0 %v8442_v13  ;;  %v8460_v10 = vld [vmem:[#allocation4 + $0xb4c] ss:$196 sps:$4 sm:$0xff]   ;;  %v8463_v12 = vld [vmem:[#allocation4 + $0xb54] ss:$196 sps:$4 sm:$0xff]  }
 0x1f6   :  { %v6299_v39 = vrot.slane %v6298_v20, 2  ;;  %v5463_v44 = vadd.f32 %v5462_v21, %v5461_v16  ;;  %v6292_v45 = vrot.slane %v6291_v3, 2  ;;  %v5476_v46 = vrot.slane %v5475_v22, 2  ;;  %4739 = vmatprep.subr.bf16.mxu1 %v8445_v23  ;;  %v8458_v27 = vld [vmem:[#allocation4 + $0xb48] ss:$196 sps:$4 sm:$0xff]  }
 0x1f7   :  { %v6305_v47 = vadd.f32 %v6304_v29, %v6303_v15  ;;  %v5457_v43 = vrot.slane %v5456_v33, 1  ;;  %v6286_v50 = vadd.f32 %v6285_v36, %v6284_v31  ;;  %v5471_v51 = vrot.slane %v5470_v37, 1  ;;  %v8461_v15 = vld [vmem:[#allocation4 + $0xb50] ss:$196 sps:$4 sm:$0xff]   ;;  %v8469_v19 = vld [vmem:[#allocation4 + $0xcdc] ss:$196 sps:$4 sm:$0xff]  }
 0x1f8   :  { %v6300_v53 = vadd.f32 %v6299_v39, %v6298_v20  ;;  %v5464_v54 = vrot.slane %v5463_v44, 1  ;;  %v6293_v55 = vadd.f32 %v6292_v45, %v6291_v3  ;;  %v5477_v56 = vadd.f32 %v5476_v46, %v5475_v22  ;;  %4697 = vmatpush1.bf16.msra.mxu0 %v8440_v32  ;;  %v8466_v23 = vld [vmem:[#allocation4 + $0xcd4] ss:$196 sps:$4 sm:$0xff]   ;;  %v8472_v22 = vld [vmem:[#allocation4 + $0xe5c] ss:$196 sps:$4 sm:$0xff]  }
 0x1f9   :  { %v6306_v59 = vrot.slane %v6305_v47, 2  ;;  %v5458_v58 = vadd.f32 %v5457_v43, %v5456_v33  ;;  %v6287_v60 = vrot.slane %v6286_v50, 1  ;;  %v5472_v61 = vadd.f32 %v5471_v51, %v5470_v37  ;;  %4740 = vmatpush1.bf16.msra.mxu1 %v8443_v40  ;;  %4698 = vmatprep.subr.bf16.mxu0 %v8448_v41  ;;  %v8464_v21 = vld [vmem:[#allocation4 + $0xcd0] ss:$196 sps:$4 sm:$0xff]   ;;  %v8467_v3 = vld [vmem:[#allocation4 + $0xcd8] ss:$196 sps:$4 sm:$0xff]  }
 0x1fa   :  { %v6301_v63 = vrot.slane %v6300_v53, 1  ;;  %v5465_v0 = vadd.f32 %v5464_v54, %v5463_v44  ;;  %v6294_v1 = vrot.slane %v6293_v55, 1  ;;  %v5478_v2 = vrot.slane %v5477_v56, 1  ;;  %4741 = vmatprep.subr.bf16.mxu1 %v8451_v49  ;;  %v8475_v29 = vld [vmem:[#allocation4 + $0xe64] ss:$196 sps:$4 sm:$0xff]   ;;  %v671_v45 = vld [vmem:[#allocation4 + $0x12f0] sm:$0xff] }
 0x1fb   :  { %v6307_v4 = vadd.f32 %v6306_v59, %v6305_v47  ;;  %v6288_v6 = vadd.f32 %v6287_v60, %v6286_v50  ;;  %v8470_v32 = vld [vmem:[#allocation4 + $0xe58] ss:$196 sps:$4 sm:$0xff]   ;;  %v8473_v33 = vld [vmem:[#allocation4 + $0xe60] ss:$196 sps:$4 sm:$0xff]   ;;  %v8481_v37 = vld [vmem:[#allocation4 + $0xfec] ss:$196 sps:$4 sm:$0xff]   ;;  %v7562_v43 = vcombine.high %v671_v45, %v671_v45  ;;  %v7561_v50 = vcombine.low %v671_v45, %v671_v45 }
 0x1fc   :  { %v6302_v7 = vadd.f32 %v6301_v63, %v6300_v53  ;;  %v5830_v8 = vcombine.low %v5458_v58, %v5465_v0  ;;  %v6295_v9 = vadd.f32 %v6294_v1, %v6293_v55  ;;  %v5479_v14 = vadd.f32 %v5478_v2, %v5477_v56  ;;  %4699 = vmatpush1.bf16.msra.mxu0 %v8446_v57  ;;  %v8478_v36 = vld [vmem:[#allocation4 + $0xfe4] ss:$196 sps:$4 sm:$0xff]   ;;  %v8484_v41 = vld [vmem:[#allocation4 + $0x116c] ss:$196 sps:$4 sm:$0xff]   ;;  %v8487_v44 = vld [vmem:[#allocation4 + $0x1174] ss:$196 sps:$4 sm:$0xff]  }
 0x1fd   :  { %v6308_v18 = vrot.slane %v6307_v4, 1  ;;  %4742 = vmatpush1.bf16.msra.mxu1 %v8449_v38  ;;  %4700 = vmatprep.subr.bf16.mxu0 %v8454_v48  ;;  %v8476_v39 = vld [vmem:[#allocation4 + $0xfe0] ss:$196 sps:$4 sm:$0xff]   ;;  %v8479_v40 = vld [vmem:[#allocation4 + $0xfe8] ss:$196 sps:$4 sm:$0xff]   ;;  %v672_v46 = vld [vmem:[#allocation4 + $0x12f8] sm:$0xff] }
 0x1fe   :  { %v9002_v11 = vrot.slane %v5830_v8, %v8807_v52  ;;  %v6660_v17 = vcombine.low %v6288_v6, %v6295_v9  ;;  %v5831_v26 = vcombine.low %v5472_v61, %v5479_v14  ;;  %4743 = vmatprep.subr.bf16.mxu1 %v8457_v5  ;;  %v8482_v47 = vld [vmem:[#allocation4 + $0x1168] ss:$196 sps:$4 sm:$0xff]   ;;  %v8485_v49 = vld [vmem:[#allocation4 + $0x1170] ss:$196 sps:$4 sm:$0xff]   ;;  %v7564_v51 = vcombine.high %v672_v46, %v672_v46  ;;  %v8492_v57 = vld [vmem:[#allocation4 + $0xa0] ss:$196 sps:$4 sm:$0xff]  }
 0x1ff   :  { %v6309_v30 = vadd.f32 %v6308_v18, %v6307_v4  ;;  %v7563_v53 = vcombine.low %v672_v46, %v672_v46  ;;  %v3876_v54 = vsel %vm3766_vm1, %v7561_v50, 0  ;;  %v8494_v55 = vld [vmem:[#allocation4 + $0xa4] ss:$196 sps:$4 sm:$0xff]   ;;  %v8497_v59 = vld [vmem:[#allocation4 + $0xac] ss:$196 sps:$4 sm:$0xff]  }
 0x200   :  { %v9005_v13 = vrot.slane %v6660_v17, %v8807_v52  ;;  %v9008_v16 = vrot.slane %v5831_v26, %v8807_v52  ;;  %4701 = vmatpush1.bf16.msra.mxu0 %v8452_v25  ;;  %v8495_v58 = vld [vmem:[#allocation4 + $0xa8] ss:$196 sps:$4 sm:$0xff]   ;;  %v8503_v61 = vld [vmem:[#allocation4 + $0x234] ss:$196 sps:$4 sm:$0xff]   ;;  %v8509_v5 = vld [vmem:[#allocation4 + $0x3bc] ss:$196 sps:$4 sm:$0xff]  }
 0x201   :  { %v6661_v24 = vcombine.low %v6302_v7, %v6309_v30  ;;  %4744 = vmatpush1.bf16.msra.mxu1 %v8455_v62  ;;  %4702 = vmatprep.subr.bf16.mxu0 %v8460_v10  ;;  %v3882_v56 = vsel %vm3766_vm1, %v7563_v53, 0  ;;  %v8500_v60 = vld [vmem:[#allocation4 + $0x22c] ss:$196 sps:$4 sm:$0xff]   ;;  %v8506_v0 = vld [vmem:[#allocation4 + $0x3b4] ss:$196 sps:$4 sm:$0xff]  }
 0x202   :  { %v5862_v28 = vcombine.low %v9002_v11, %v9008_v16  ;;  %4745 = vmatprep.subr.bf16.mxu1 %v8463_v12  ;;  %v8498_v63 = vld [vmem:[#allocation4 + $0x228] ss:$196 sps:$4 sm:$0xff]   ;;  %v8501_v38 = vld [vmem:[#allocation4 + $0x230] ss:$196 sps:$4 sm:$0xff]   ;;  %v8507_v12 = vld [vmem:[#allocation4 + $0x3b8] ss:$196 sps:$4 sm:$0xff]  }
 0x203   :  { %v9013_v31 = vrot.slane %v6661_v24, %v8807_v52  ;;  %v8504_v18 = vld [vmem:[#allocation4 + $0x3b0] ss:$196 sps:$4 sm:$0xff]   ;;  %v8512_v24 = vld [vmem:[#allocation4 + $0x53c] ss:$196 sps:$4 sm:$0xff]   ;;  %v8546_v16 = vld [vmem:[#allocation4 + $0xe68] ss:$196 sps:$4 sm:$0xff]  }
 0x204   :  { %4703 = vmatpush1.bf16.msra.mxu0 %v8458_v27 }
 0x205   :  { %v6692_v20 = vcombine.low %v9005_v13, %v9013_v31  ;;  %4746 = vmatpush1.bf16.msra.mxu1 %v8461_v15  ;;  %4704 = vmatprep.subr.bf16.mxu0 %v8466_v23  ;;  %v8555_v13 = vld [vmem:[#allocation4 + $0xff8] ss:$196 sps:$4 sm:$0xff]  }
 0x206   :  { %4747 = vmatprep.subr.bf16.mxu1 %v8469_v19  ;;  %v8560_v31 = vld [vmem:[#allocation4 + $0x117c] ss:$196 sps:$4 sm:$0xff]  }
 0x208   :  { %4705 = vmatpush1.bf16.msra.mxu0 %v8464_v21 }
 0x209   :  { %4748 = vmatpush1.bf16.msra.mxu1 %v8467_v3  ;;  %4706 = vmatprep.subr.bf16.mxu0 %v8472_v22  ;;  %v8515_v3 = vld [vmem:[#allocation4 + $0x544] ss:$196 sps:$4 sm:$0xff]  }
 0x20a   :  { %4749 = vmatprep.subr.bf16.mxu1 %v8475_v29 }
 0x20c   :  { %4707 = vmatpush1.bf16.msra.mxu0 %v8470_v32 }
 0x20d   :  { %4750 = vmatpush1.bf16.msra.mxu1 %v8473_v33  ;;  %4708 = vmatprep.subr.bf16.mxu0 %v8478_v36 }
 0x20e   :  { %4751 = vmatprep.subr.bf16.mxu1 %v8481_v37 }
 0x210   :  { %4709 = vmatpush1.bf16.msra.mxu0 %v8476_v39 }
 0x211   :  { %4752 = vmatpush1.bf16.msra.mxu1 %v8479_v40  ;;  %4710 = vmatprep.subr.bf16.mxu0 %v8484_v41  ;;  %v8510_v41 = vld [vmem:[#allocation4 + $0x538] ss:$196 sps:$4 sm:$0xff]  }
 0x212   :  { %4753 = vmatprep.subr.bf16.mxu1 %v8487_v44 }
 0x214   :  { %4711 = vmatpush1.bf16.msra.mxu0 %v8482_v47 }
 0x215   :  { %4754 = vmatpush1.bf16.msra.mxu1 %v8485_v49  ;;  %7610 = vmatprep.subr.msk.bf16.mxu0 %vm3766_vm1, %v7562_v43  ;;  %v8513_v49 = vld [vmem:[#allocation4 + $0x540] ss:$196 sps:$4 sm:$0xff]  }
 0x216   :  { %7612 = vmatprep.subr.msk.bf16.mxu1 %vm3766_vm1, %v7564_v51  ;;  %v8518_v43 = vld [vmem:[#allocation4 + $0x6c4] ss:$196 sps:$4 sm:$0xff]  }
 0x218   :  { %4713 = vmatpush1.bf16.msra.mxu0 %v3876_v54 }
 0x219   :  { %4756 = vmatpush1.bf16.msra.mxu1 %v3882_v56  ;;  %4774 = vmatprep.subr.bf16.mxu0 %v8494_v55  ;;  %v8521_v55 = vld [vmem:[#allocation4 + $0x6cc] ss:$196 sps:$4 sm:$0xff]  }
 0x21a   :  { %4817 = vmatprep.subr.bf16.mxu1 %v8497_v59 }
 0x21b   :  { %4721 = vmatmul.mubr.bf16.vlgmr.msra.gmra.mrb[36].mxu0 %v8976_v35 }
 0x21c   :  { %4764 = vmatmul.mubr.bf16.vlgmr.msra.gmra.mrb[36].mxu1 %v8976_v35  ;;  %4775 = vmatpush1.bf16.msra.mxu0 %v8492_v57 }
 0x21d   :  { %4818 = vmatpush1.bf16.msra.mxu1 %v8495_v58  ;;  %4776 = vmatprep.subr.bf16.mxu0 %v8500_v60 }
 0x21e   :  { %v4378_v48 = vpop.f32.mrb[20].mxu0  ;;  %4819 = vmatprep.subr.bf16.mxu1 %v8503_v61  ;;  %7615 = vmatprep.mubr.msk.bf16.mxu0 %vm3762_vm0, %v8983_v42 }
 0x21f   :  { %v6092_v1 = vmul.f32 %v4378_v48, %v4378_v48  ;;  %v4421_v2 = vpop.f32.mrb[20].mxu1  ;;  %v4380_v4 = vpop.f32.mrb[21].mxu0  ;;  %7617 = vmatprep.mubr.msk.bf16.mxu1 %vm3762_vm0, %v8983_v42 }
 0x220   :  { %v6094_v6 = vmul.f32 %v4421_v2, %v4421_v2  ;;  %v7683_v7 = vpack.c.bf16 %v4380_v4, %v4378_v48  ;;  %v6093_v8 = vmul.f32 %v4380_v4, %v4380_v4  ;;  %v4423_v9 = vpop.f32.mrb[21].mxu1  ;;  %v4382_v14 = vpop.f32.mrb[22].mxu0  ;;  %4777 = vmatpush1.bf16.msra.mxu0 %v8498_v63 }
 0x221   :  { %v7684_v25 = vpack.c.bf16 %v4423_v9, %v4421_v2  ;;  %v6095_v62 = vmul.f32 %v4423_v9, %v4423_v9  ;;  %v5480_v10 = vadd.f32 %v4382_v14, %v4378_v48  ;;  %v6141_v17 = vmul.f32 %v4382_v14, %v4382_v14  ;;  %v4425_v26 = vpop.f32.mrb[22].mxu1  ;;  %4820 = vmatpush1.bf16.msra.mxu1 %v8501_v38  ;;  %v4384_v30 = vpop.f32.mrb[23].mxu0  ;;  %v8516_v48 = vld [vmem:[#allocation4 + $0x6c0] ss:$196 sps:$4 sm:$0xff]  }
 0x222   :  { %5293 = vst [vmem:[%s9314_s2 + $0x50] sm:$0xff] %v7683_v7  ;;  %v5494_v27 = vadd.f32 %v4425_v26, %v4421_v2  ;;  %v6143_v15 = vmul.f32 %v4425_v26, %v4425_v26  ;;  %v7708_v23 = vpack.c.bf16 %v4384_v30, %v4382_v14  ;;  %v5487_v19 = vadd.f32 %v4384_v30, %v4380_v4  ;;  %v4427_v21 = vpop.f32.mrb[23].mxu1 }
 0x223   :  { %4778 = vmatprep.subr.bf16.mxu0 %v8506_v0  ;;  %5294 = vst [vmem:[%s9314_s2 + $0x58] sm:$0xff] %v7684_v25  ;;  %v5481_v22 = vrot.slane %v5480_v10, 4  ;;  %v6310_v29 = vadd.f32 %v6141_v17, %v6092_v1  ;;  %v6142_v32 = vmul.f32 %v4384_v30, %v4384_v30  ;;  %v7709_v33 = vpack.c.bf16 %v4427_v21, %v4425_v26 }
 0x224   :  { %4821 = vmatprep.subr.bf16.mxu1 %v8509_v5  ;;  %v5495_v36 = vrot.slane %v5494_v27, 4  ;;  %v6324_v37 = vadd.f32 %v6143_v15, %v6094_v6  ;;  %5318 = vst [vmem:[%s9314_s2 + $0x114] sm:$0xff] %v7708_v23  ;;  %v5488_v39 = vrot.slane %v5487_v19, 4  ;;  %v5501_v40 = vadd.f32 %v4427_v21, %v4423_v9  ;;  %4779 = vmatpush1.bf16.msra.mxu0 %v8504_v18  ;;  %v8519_v5 = vld [vmem:[#allocation4 + $0x6c8] ss:$196 sps:$4 sm:$0xff]  }
 0x225   :  { %v5482_v44 = vadd.f32 %v5481_v22, %v5480_v10  ;;  %v6311_v45 = vrot.slane %v6310_v29, 4  ;;  %v6317_v46 = vadd.f32 %v6142_v32, %v6093_v8  ;;  %5319 = vst [vmem:[%s9314_s2 + $0x11c] sm:$0xff] %v7709_v33  ;;  %v6144_v47 = vmul.f32 %v4427_v21, %v4427_v21  ;;  %4822 = vmatpush1.bf16.msra.mxu1 %v8507_v12  ;;  %v8524_v6 = vld [vmem:[#allocation4 + $0x84c] ss:$196 sps:$4 sm:$0xff]   ;;  %v8527_v18 = vld [vmem:[#allocation4 + $0x854] ss:$196 sps:$4 sm:$0xff]  }
 0x226   :  { %4780 = vmatprep.subr.bf16.mxu0 %v8512_v24  ;;  %v5496_v50 = vadd.f32 %v5495_v36, %v5494_v27  ;;  %v6325_v51 = vrot.slane %v6324_v37, 4  ;;  %v5489_v53 = vadd.f32 %v5488_v39, %v5487_v19  ;;  %v5502_v54 = vrot.slane %v5501_v40, 4  ;;  %4823 = vmatprep.subr.bf16.mxu1 %v8515_v3  ;;  %v8522_v27 = vld [vmem:[#allocation4 + $0x848] ss:$196 sps:$4 sm:$0xff]   ;;  %v8525_v3 = vld [vmem:[#allocation4 + $0x850] ss:$196 sps:$4 sm:$0xff]  }
 0x227   :  { %v5483_v56 = vrot.slane %v5482_v44, 2  ;;  %v6312_v59 = vadd.f32 %v6311_v45, %v6310_v29  ;;  %v6318_v57 = vrot.slane %v6317_v46, 4  ;;  %v6331_v58 = vadd.f32 %v6144_v47, %v6095_v62  ;;  %v8530_v22 = vld [vmem:[#allocation4 + $0x9d4] ss:$196 sps:$4 sm:$0xff]  }
 0x228   :  { %v5497_v60 = vrot.slane %v5496_v50, 2  ;;  %v6326_v61 = vadd.f32 %v6325_v51, %v6324_v37  ;;  %v5490_v63 = vrot.slane %v5489_v53, 2  ;;  %v5503_v38 = vadd.f32 %v5502_v54, %v5501_v40  ;;  %4781 = vmatpush1.bf16.msra.mxu0 %v8510_v41  ;;  %v8533_v37 = vld [vmem:[#allocation4 + $0x9dc] ss:$196 sps:$4 sm:$0xff]  }
 0x229   :  { %v5484_v0 = vadd.f32 %v5483_v56, %v5482_v44  ;;  %v6313_v1 = vrot.slane %v6312_v59, 2  ;;  %v6319_v2 = vadd.f32 %v6318_v57, %v6317_v46  ;;  %v6332_v4 = vrot.slane %v6331_v58, 4  ;;  %4824 = vmatpush1.bf16.msra.mxu1 %v8513_v49  ;;  %4782 = vmatprep.subr.bf16.mxu0 %v8518_v43  ;;  %v8528_v46 = vld [vmem:[#allocation4 + $0x9d0] ss:$196 sps:$4 sm:$0xff]   ;;  %v8536_v51 = vld [vmem:[#allocation4 + $0xb5c] ss:$196 sps:$4 sm:$0xff]  }
 0x22a   :  { %v5498_v7 = vadd.f32 %v5497_v60, %v5496_v50  ;;  %v6327_v8 = vrot.slane %v6326_v61, 2  ;;  %v5491_v9 = vadd.f32 %v5490_v63, %v5489_v53  ;;  %v5504_v14 = vrot.slane %v5503_v38, 2  ;;  %4825 = vmatprep.subr.bf16.mxu1 %v8521_v55  ;;  %v8531_v50 = vld [vmem:[#allocation4 + $0x9d8] ss:$196 sps:$4 sm:$0xff]   ;;  %v8539_v55 = vld [vmem:[#allocation4 + $0xb64] ss:$196 sps:$4 sm:$0xff]  }
 0x22b   :  { %v5485_v25 = vrot.slane %v5484_v0, 1  ;;  %v6314_v62 = vadd.f32 %v6313_v1, %v6312_v59  ;;  %v6320_v10 = vrot.slane %v6319_v2, 2  ;;  %v6333_v17 = vadd.f32 %v6332_v4, %v6331_v58  ;;  %v8534_v58 = vld [vmem:[#allocation4 + $0xb58] ss:$196 sps:$4 sm:$0xff]   ;;  %v8537_v63 = vld [vmem:[#allocation4 + $0xb60] ss:$196 sps:$4 sm:$0xff]  }
 0x22c   :  { %v5499_v26 = vrot.slane %v5498_v7, 1  ;;  %v6328_v30 = vadd.f32 %v6327_v8, %v6326_v61  ;;  %v5492_v12 = vrot.slane %v5491_v9, 1  ;;  %v5505_v24 = vadd.f32 %v5504_v14, %v5503_v38  ;;  %4783 = vmatpush1.bf16.msra.mxu0 %v8516_v48  ;;  %v8542_v38 = vld [vmem:[#allocation4 + $0xce4] ss:$196 sps:$4 sm:$0xff]   ;;  %v8548_v8 = vld [vmem:[#allocation4 + $0xe6c] ss:$196 sps:$4 sm:$0xff]  }
 0x22d   :  { %v5486_v15 = vadd.f32 %v5485_v25, %v5484_v0  ;;  %v6315_v23 = vrot.slane %v6314_v62, 1  ;;  %v6321_v19 = vadd.f32 %v6320_v10, %v6319_v2  ;;  %v6334_v21 = vrot.slane %v6333_v17, 2  ;;  %4826 = vmatpush1.bf16.msra.mxu1 %v8519_v5  ;;  %4784 = vmatprep.subr.bf16.mxu0 %v8524_v6  ;;  %v8545_v0 = vld [vmem:[#allocation4 + $0xcec] ss:$196 sps:$4 sm:$0xff]   ;;  %v8540_v5 = vld [vmem:[#allocation4 + $0xce0] ss:$196 sps:$4 sm:$0xff]  }
 0x22e   :  { %v5500_v29 = vadd.f32 %v5499_v26, %v5498_v7  ;;  %v6329_v32 = vrot.slane %v6328_v30, 1  ;;  %v5493_v33 = vadd.f32 %v5492_v12, %v5491_v9  ;;  %v5506_v36 = vrot.slane %v5505_v24, 1  ;;  %4827 = vmatprep.subr.bf16.mxu1 %v8527_v18  ;;  %v8543_v7 = vld [vmem:[#allocation4 + $0xce8] ss:$196 sps:$4 sm:$0xff]   ;;  %v8551_v14 = vld [vmem:[#allocation4 + $0xe74] ss:$196 sps:$4 sm:$0xff]  }
 0x22f   :  { %v6316_v39 = vadd.f32 %v6315_v23, %v6314_v62  ;;  %v6322_v40 = vrot.slane %v6321_v19, 1  ;;  %v6335_v41 = vadd.f32 %v6334_v21, %v6333_v17  ;;  %v5870_v2 = vrot.slane %v5862_v28, %v8807_v52  ;;  %v8549_v25 = vld [vmem:[#allocation4 + $0xe70] ss:$196 sps:$4 sm:$0xff]   ;;  %v8557_v10 = vld [vmem:[#allocation4 + $0xffc] ss:$196 sps:$4 sm:$0xff]  }
 0x230   :  { %v5832_v44 = vcombine.low %v5486_v15, %v5493_v33  ;;  %v5507_v45 = vadd.f32 %v5506_v36, %v5505_v24  ;;  %4785 = vmatpush1.bf16.msra.mxu0 %v8522_v27  ;;  %v6330_v47 = vadd.f32 %v6329_v32, %v6328_v30  ;;  %v6700_v18 = vrot.slane %v6692_v20, %v8807_v52  ;;  %v8554_v62 = vld [vmem:[#allocation4 + $0xff4] ss:$196 sps:$4 sm:$0xff]   ;;  %v8563_v20 = vld [vmem:[#allocation4 + $0x1184] ss:$196 sps:$4 sm:$0xff]   ;;  %v8576_v36 = vld [vmem:[#allocation4 + $0x23c] ss:$196 sps:$4 sm:$0xff]  }
 0x231   :  { %v6323_v49 = vadd.f32 %v6322_v40, %v6321_v19  ;;  %v6336_v43 = vrot.slane %v6335_v41, 1  ;;  %4828 = vmatpush1.bf16.msra.mxu1 %v8525_v3  ;;  %4786 = vmatprep.subr.bf16.mxu0 %v8530_v22  ;;  %v8552_v17 = vld [vmem:[#allocation4 + $0xff0] ss:$196 sps:$4 sm:$0xff]   ;;  %v673_v26 = vld [vmem:[#allocation4 + $0x1300] sm:$0xff]  ;;  %v674_v30 = vld [vmem:[#allocation4 + $0x1308] sm:$0xff] }
 0x232   :  { %v5854_v53 = vrot.slane %v5832_v44, %v8807_v52  ;;  %v5833_v54 = vcombine.low %v5500_v29, %v5507_v45  ;;  %4829 = vmatprep.subr.bf16.mxu1 %v8533_v37  ;;  %v8558_v12 = vld [vmem:[#allocation4 + $0x1178] ss:$196 sps:$4 sm:$0xff]   ;;  %v8561_v24 = vld [vmem:[#allocation4 + $0x1180] ss:$196 sps:$4 sm:$0xff]   ;;  %v7566_v27 = vcombine.high %v673_v26, %v673_v26  ;;  %v7565_v15 = vcombine.low %v673_v26, %v673_v26  ;;  %v8568_v32 = vld [vmem:[#allocation4 + $0xb0] ss:$196 sps:$4 sm:$0xff]  }
 0x233   :  { %v6662_v56 = vcombine.low %v6316_v39, %v6323_v49  ;;  %v6337_v59 = vadd.f32 %v6336_v43, %v6335_v41  ;;  %v7568_v23 = vcombine.high %v674_v30, %v674_v30  ;;  %v7567_v19 = vcombine.low %v674_v30, %v674_v30  ;;  %v8570_v3 = vld [vmem:[#allocation4 + $0xb4] ss:$196 sps:$4 sm:$0xff]   ;;  %v8573_v29 = vld [vmem:[#allocation4 + $0xbc] ss:$196 sps:$4 sm:$0xff]   ;;  %v8579_v37 = vld [vmem:[#allocation4 + $0x244] ss:$196 sps:$4 sm:$0xff]  }
 0x234   :  { %v5861_v57 = vrot.slane %v5833_v54, %v8807_v52  ;;  %4787 = vmatpush1.bf16.msra.mxu0 %v8528_v46  ;;  %v3888_v21 = vsel %vm3766_vm1, %v7565_v15, 0  ;;  %v8571_v33 = vld [vmem:[#allocation4 + $0xb8] ss:$196 sps:$4 sm:$0xff]   ;;  %v8577_v40 = vld [vmem:[#allocation4 + $0x240] ss:$196 sps:$4 sm:$0xff]  }
 0x235   :  { %v6684_v60 = vrot.slane %v6662_v56, %v8807_v52  ;;  %v6663_v61 = vcombine.low %v6330_v47, %v6337_v59  ;;  %4830 = vmatpush1.bf16.msra.mxu1 %v8531_v50  ;;  %4788 = vmatprep.subr.bf16.mxu0 %v8536_v51  ;;  %v3894_v22 = vsel %vm3766_vm1, %v7567_v19, 0  ;;  %v8574_v39 = vld [vmem:[#allocation4 + $0x238] ss:$196 sps:$4 sm:$0xff]   ;;  %v8582_v44 = vld [vmem:[#allocation4 + $0x3c4] ss:$196 sps:$4 sm:$0xff]  }
 0x236   :  { %v5863_v48 = vcombine.low %v5854_v53, %v5861_v57  ;;  %4831 = vmatprep.subr.bf16.mxu1 %v8539_v55  ;;  %v8585_v49 = vld [vmem:[#allocation4 + $0x3cc] ss:$196 sps:$4 sm:$0xff]   ;;  %v8580_v54 = vld [vmem:[#allocation4 + $0x3c0] ss:$196 sps:$4 sm:$0xff]  }
 0x237   :  { %v6691_v1 = vrot.slane %v6663_v61, %v8807_v52  ;;  %v8583_v61 = vld [vmem:[#allocation4 + $0x3c8] ss:$196 sps:$4 sm:$0xff]   ;;  %v8597_v30 = vld [vmem:[#allocation4 + $0x6dc] ss:$196 sps:$4 sm:$0xff]  }
 0x238   :  { %v5877_v4 = vrot.slane %v5863_v48, %v8807_v52  ;;  %4789 = vmatpush1.bf16.msra.mxu0 %v8534_v58 }
 0x239   :  { %v6693_v6 = vcombine.low %v6684_v60, %v6691_v1  ;;  %4832 = vmatpush1.bf16.msra.mxu1 %v8537_v63  ;;  %4790 = vmatprep.subr.bf16.mxu0 %v8542_v38  ;;  %v8588_v63 = vld [vmem:[#allocation4 + $0x54c] ss:$196 sps:$4 sm:$0xff]  }
 0x23a   :  { %v5878_v9 = vcombine.low %v5870_v2, %v5877_v4  ;;  %4833 = vmatprep.subr.bf16.mxu1 %v8545_v0  ;;  %v8591_v2 = vld [vmem:[#allocation4 + $0x554] ss:$196 sps:$4 sm:$0xff]  }
 0x23b   :  { %v6707_v11 = vrot.slane %v6693_v6, %v8807_v52 }
 0x23c   :  { %4791 = vmatpush1.bf16.msra.mxu0 %v8540_v5  ;;  %6903 = vst [vmem:[%s9315_s3 + $0x10] sm:$0xff] %v5878_v9 }
 0x23d   :  { %v6708_v28 = vcombine.low %v6700_v18, %v6707_v11  ;;  %4834 = vmatpush1.bf16.msra.mxu1 %v8543_v7  ;;  %4792 = vmatprep.subr.bf16.mxu0 %v8548_v8  ;;  %v8586_v11 = vld [vmem:[#allocation4 + $0x548] ss:$196 sps:$4 sm:$0xff]  }
 0x23e   :  { %4835 = vmatprep.subr.bf16.mxu1 %v8551_v14 }
 0x23f   :  { %6917 = vst [vmem:[%s9316_s4 + $0x10] sm:$0xff] %v6708_v28 }
 0x240   :  { %4793 = vmatpush1.bf16.msra.mxu0 %v8546_v16 }
 0x241   :  { %4836 = vmatpush1.bf16.msra.mxu1 %v8549_v25  ;;  %4794 = vmatprep.subr.bf16.mxu0 %v8554_v62 }
 0x242   :  { %4837 = vmatprep.subr.bf16.mxu1 %v8557_v10  ;;  %v8589_v10 = vld [vmem:[#allocation4 + $0x550] ss:$196 sps:$4 sm:$0xff]  }
 0x244   :  { %4795 = vmatpush1.bf16.msra.mxu0 %v8552_v17  ;;  %v8594_v17 = vld [vmem:[#allocation4 + $0x6d4] ss:$196 sps:$4 sm:$0xff]  }
 0x245   :  { %4838 = vmatpush1.bf16.msra.mxu1 %v8555_v13  ;;  %4796 = vmatprep.subr.bf16.mxu0 %v8560_v31 }
 0x246   :  { %4839 = vmatprep.subr.bf16.mxu1 %v8563_v20 }
 0x248   :  { %4797 = vmatpush1.bf16.msra.mxu0 %v8558_v12 }
 0x249   :  { %4840 = vmatpush1.bf16.msra.mxu1 %v8561_v24  ;;  %7614 = vmatprep.subr.msk.bf16.mxu0 %vm3766_vm1, %v7566_v27 }
 0x24a   :  { %7616 = vmatprep.subr.msk.bf16.mxu1 %vm3766_vm1, %v7568_v23 }
 0x24c   :  { %4799 = vmatpush1.bf16.msra.mxu0 %v3888_v21 }
 0x24d   :  { %4842 = vmatpush1.bf16.msra.mxu1 %v3894_v22  ;;  %4860 = vmatprep.subr.bf16.mxu0 %v8570_v3  ;;  %v8592_v22 = vld [vmem:[#allocation4 + $0x6d0] ss:$196 sps:$4 sm:$0xff]  }
 0x24e   :  { %4903 = vmatprep.subr.bf16.mxu1 %v8573_v29 }
 0x24f   :  { %4807 = vmatmul.mubr.bf16.vlgmr.msra.gmra.mrb[40].mxu0 %v8976_v35 }
 0x250   :  { %4850 = vmatmul.mubr.bf16.vlgmr.msra.gmra.mrb[40].mxu1 %v8976_v35  ;;  %4861 = vmatpush1.bf16.msra.mxu0 %v8568_v32 }
 0x251   :  { %4904 = vmatpush1.bf16.msra.mxu1 %v8571_v33  ;;  %4862 = vmatprep.subr.bf16.mxu0 %v8576_v36 }
 0x252   :  { %v4464_v41 = vpop.f32.mrb[24].mxu0  ;;  %4905 = vmatprep.subr.bf16.mxu1 %v8579_v37  ;;  %7619 = vmatprep.mubr.msk.bf16.mxu0 %vm3762_vm0, %v8983_v42  ;;  %v8595_v37 = vld [vmem:[#allocation4 + $0x6d8] ss:$196 sps:$4 sm:$0xff]  }
 0x253   :  { %v6096_v45 = vmul.f32 %v4464_v41, %v4464_v41  ;;  %v4507_v46 = vpop.f32.mrb[24].mxu1  ;;  %v4466_v47 = vpop.f32.mrb[25].mxu0  ;;  %7621 = vmatprep.mubr.msk.bf16.mxu1 %vm3762_vm0, %v8983_v42 }
 0x254   :  { %v6098_v43 = vmul.f32 %v4507_v46, %v4507_v46  ;;  %v7685_v35 = vpack.c.bf16 %v4466_v47, %v4464_v41  ;;  %v6097_v50 = vmul.f32 %v4466_v47, %v4466_v47  ;;  %v4509_v51 = vpop.f32.mrb[25].mxu1  ;;  %v4468_v53 = vpop.f32.mrb[26].mxu0  ;;  %4863 = vmatpush1.bf16.msra.mxu0 %v8574_v39  ;;  %v8600_v39 = vld [vmem:[#allocation4 + $0x85c] ss:$196 sps:$4 sm:$0xff]  }
 0x255   :  { %v7686_v55 = vpack.c.bf16 %v4509_v51, %v4507_v46  ;;  %v6099_v56 = vmul.f32 %v4509_v51, %v4509_v51  ;;  %v5508_v59 = vadd.f32 %v4468_v53, %v4464_v41  ;;  %v6145_v57 = vmul.f32 %v4468_v53, %v4468_v53  ;;  %v4511_v58 = vpop.f32.mrb[26].mxu1  ;;  %4906 = vmatpush1.bf16.msra.mxu1 %v8577_v40  ;;  %v4470_v60 = vpop.f32.mrb[27].mxu0 }
 0x256   :  { %5295 = vst [vmem:[%s9314_s2 + $0x60] sm:$0xff] %v7685_v35  ;;  %v5522_v42 = vadd.f32 %v4511_v58, %v4507_v46  ;;  %v6147_v38 = vmul.f32 %v4511_v58, %v4511_v58  ;;  %v7710_v48 = vpack.c.bf16 %v4470_v60, %v4468_v53  ;;  %v5515_v0 = vadd.f32 %v4470_v60, %v4466_v47  ;;  %v4513_v1 = vpop.f32.mrb[27].mxu1  ;;  %v8603_v46 = vld [vmem:[#allocation4 + $0x864] ss:$196 sps:$4 sm:$0xff]  }
 0x257   :  { %4864 = vmatprep.subr.bf16.mxu0 %v8582_v44  ;;  %5296 = vst [vmem:[%s9314_s2 + $0x68] sm:$0xff] %v7686_v55  ;;  %v5509_v4 = vrot.slane %v5508_v59, 4  ;;  %v6338_v5 = vadd.f32 %v6145_v57, %v6096_v45  ;;  %v6146_v6 = vmul.f32 %v4470_v60, %v4470_v60  ;;  %v7711_v7 = vpack.c.bf16 %v4513_v1, %v4511_v58  ;;  %v8598_v55 = vld [vmem:[#allocation4 + $0x858] ss:$196 sps:$4 sm:$0xff]   ;;  %v8601_v60 = vld [vmem:[#allocation4 + $0x860] ss:$196 sps:$4 sm:$0xff]  }
 0x258   :  { %4907 = vmatprep.subr.bf16.mxu1 %v8585_v49  ;;  %v5523_v8 = vrot.slane %v5522_v42, 4  ;;  %v6352_v9 = vadd.f32 %v6147_v38, %v6098_v43  ;;  %5320 = vst [vmem:[%s9314_s2 + $0x124] sm:$0xff] %v7710_v48  ;;  %v5516_v14 = vrot.slane %v5515_v0, 4  ;;  %v5529_v18 = vadd.f32 %v4513_v1, %v4509_v51  ;;  %4865 = vmatpush1.bf16.msra.mxu0 %v8580_v54 }
 0x259   :  { %v5510_v16 = vadd.f32 %v5509_v4, %v5508_v59  ;;  %v6339_v28 = vrot.slane %v6338_v5, 4  ;;  %v6345_v25 = vadd.f32 %v6146_v6, %v6097_v50  ;;  %5321 = vst [vmem:[%s9314_s2 + $0x12c] sm:$0xff] %v7711_v7  ;;  %v6148_v62 = vmul.f32 %v4513_v1, %v4513_v1  ;;  %4908 = vmatpush1.bf16.msra.mxu1 %v8583_v61  ;;  %v8606_v61 = vld [vmem:[#allocation4 + $0x9e4] ss:$196 sps:$4 sm:$0xff]  }
 0x25a   :  { %4866 = vmatprep.subr.bf16.mxu0 %v8588_v63  ;;  %v5524_v13 = vadd.f32 %v5523_v8, %v5522_v42  ;;  %v6353_v31 = vrot.slane %v6352_v9, 4  ;;  %v5517_v20 = vadd.f32 %v5516_v14, %v5515_v0  ;;  %v5530_v26 = vrot.slane %v5529_v18, 4  ;;  %4909 = vmatprep.subr.bf16.mxu1 %v8591_v2  ;;  %v8609_v0 = vld [vmem:[#allocation4 + $0x9ec] ss:$196 sps:$4 sm:$0xff]   ;;  %v8604_v7 = vld [vmem:[#allocation4 + $0x9e0] ss:$196 sps:$4 sm:$0xff]  }
 0x25b   :  { %v5511_v12 = vrot.slane %v5510_v16, 2  ;;  %v6340_v24 = vadd.f32 %v6339_v28, %v6338_v5  ;;  %v6346_v27 = vrot.slane %v6345_v25, 4  ;;  %v6359_v15 = vadd.f32 %v6148_v62, %v6099_v56 }
 0x25c   :  { %v5525_v23 = vrot.slane %v5524_v13, 2  ;;  %v6354_v19 = vadd.f32 %v6353_v31, %v6352_v9  ;;  %v5518_v21 = vrot.slane %v5517_v20, 2  ;;  %v5531_v3 = vadd.f32 %v5530_v26, %v5529_v18  ;;  %4867 = vmatpush1.bf16.msra.mxu0 %v8586_v11  ;;  %v8607_v18 = vld [vmem:[#allocation4 + $0x9e8] ss:$196 sps:$4 sm:$0xff]   ;;  %v8613_v26 = vld [vmem:[#allocation4 + $0xb70] ss:$196 sps:$4 sm:$0xff]  }
 0x25d   :  { %v5512_v29 = vadd.f32 %v5511_v12, %v5510_v16  ;;  %v6341_v32 = vrot.slane %v6340_v24, 2  ;;  %v6347_v33 = vadd.f32 %v6346_v27, %v6345_v25  ;;  %v6360_v36 = vrot.slane %v6359_v15, 4  ;;  %4910 = vmatpush1.bf16.msra.mxu1 %v8589_v10  ;;  %4868 = vmatprep.subr.bf16.mxu0 %v8594_v17  ;;  %v8612_v11 = vld [vmem:[#allocation4 + $0xb6c] ss:$196 sps:$4 sm:$0xff]   ;;  %v8615_v25 = vld [vmem:[#allocation4 + $0xb74] ss:$196 sps:$4 sm:$0xff]  }
 0x25e   :  { %v5526_v40 = vadd.f32 %v5525_v23, %v5524_v13  ;;  %v6355_v41 = vrot.slane %v6354_v19, 2  ;;  %v5519_v44 = vadd.f32 %v5518_v21, %v5517_v20  ;;  %v5532_v45 = vrot.slane %v5531_v3, 2  ;;  %4911 = vmatprep.subr.bf16.mxu1 %v8597_v30  ;;  %v8610_v13 = vld [vmem:[#allocation4 + $0xb68] ss:$196 sps:$4 sm:$0xff]   ;;  %v8618_v30 = vld [vmem:[#allocation4 + $0xcf4] ss:$196 sps:$4 sm:$0xff]  }
 0x25f   :  { %v5513_v47 = vrot.slane %v5512_v29, 1  ;;  %v6342_v49 = vadd.f32 %v6341_v32, %v6340_v24  ;;  %v6348_v43 = vrot.slane %v6347_v33, 2  ;;  %v6361_v35 = vadd.f32 %v6360_v36, %v6359_v15  ;;  %v8621_v24 = vld [vmem:[#allocation4 + $0xcfc] ss:$196 sps:$4 sm:$0xff]   ;;  %v8616_v15 = vld [vmem:[#allocation4 + $0xcf0] ss:$196 sps:$4 sm:$0xff]  }
 0x260   :  { %v5527_v50 = vrot.slane %v5526_v40, 1  ;;  %v6356_v51 = vadd.f32 %v6355_v41, %v6354_v19  ;;  %v5520_v53 = vrot.slane %v5519_v44, 1  ;;  %v5533_v54 = vadd.f32 %v5532_v45, %v5531_v3  ;;  %4869 = vmatpush1.bf16.msra.mxu0 %v8592_v22  ;;  %v8619_v19 = vld [vmem:[#allocation4 + $0xcf8] ss:$196 sps:$4 sm:$0xff]   ;;  %v8627_v3 = vld [vmem:[#allocation4 + $0xe84] ss:$196 sps:$4 sm:$0xff]  }
 0x261   :  { %v5514_v56 = vadd.f32 %v5513_v47, %v5512_v29  ;;  %v6343_v59 = vrot.slane %v6342_v49, 1  ;;  %v6349_v57 = vadd.f32 %v6348_v43, %v6347_v33  ;;  %v6362_v58 = vrot.slane %v6361_v35, 2  ;;  %4912 = vmatpush1.bf16.msra.mxu1 %v8595_v37  ;;  %4870 = vmatprep.subr.bf16.mxu0 %v8600_v39  ;;  %v8624_v21 = vld [vmem:[#allocation4 + $0xe7c] ss:$196 sps:$4 sm:$0xff]   ;;  %v8630_v32 = vld [vmem:[#allocation4 + $0x1004] ss:$196 sps:$4 sm:$0xff]  }
 0x262   :  { %v5528_v63 = vadd.f32 %v5527_v50, %v5526_v40  ;;  %v6357_v42 = vrot.slane %v6356_v51, 1  ;;  %v5521_v38 = vadd.f32 %v5520_v53, %v5519_v44  ;;  %v5534_v48 = vrot.slane %v5533_v54, 1  ;;  %4913 = vmatprep.subr.bf16.mxu1 %v8603_v46  ;;  %v8622_v22 = vld [vmem:[#allocation4 + $0xe78] ss:$196 sps:$4 sm:$0xff]   ;;  %v8625_v29 = vld [vmem:[#allocation4 + $0xe80] ss:$196 sps:$4 sm:$0xff]  }
 0x263   :  { %v6344_v1 = vadd.f32 %v6343_v59, %v6342_v49  ;;  %v6350_v2 = vrot.slane %v6349_v57, 1  ;;  %v6363_v4 = vadd.f32 %v6362_v58, %v6361_v35  ;;  %v8633_v33 = vld [vmem:[#allocation4 + $0x100c] ss:$196 sps:$4 sm:$0xff]   ;;  %v8628_v36 = vld [vmem:[#allocation4 + $0x1000] ss:$196 sps:$4 sm:$0xff]   ;;  %v676_v44 = vld [vmem:[#allocation4 + $0x1318] sm:$0xff] }
 0x264   :  { %v5879_v5 = vcombine.low %v5514_v56, %v5521_v38  ;;  %v5535_v6 = vadd.f32 %v5534_v48, %v5533_v54  ;;  %4871 = vmatpush1.bf16.msra.mxu0 %v8598_v55  ;;  %v6358_v8 = vadd.f32 %v6357_v42, %v6356_v51  ;;  %v8631_v37 = vld [vmem:[#allocation4 + $0x1008] ss:$196 sps:$4 sm:$0xff]   ;;  %v8639_v40 = vld [vmem:[#allocation4 + $0x1194] ss:$196 sps:$4 sm:$0xff]   ;;  %v7572_v43 = vcombine.high %v676_v44, %v676_v44  ;;  %v8644_v53 = vld [vmem:[#allocation4 + $0xc0] ss:$196 sps:$4 sm:$0xff]  }
 0x265   :  { %v6351_v9 = vadd.f32 %v6350_v2, %v6349_v57  ;;  %v6364_v14 = vrot.slane %v6363_v4, 1  ;;  %4914 = vmatpush1.bf16.msra.mxu1 %v8601_v60  ;;  %4872 = vmatprep.subr.bf16.mxu0 %v8606_v61  ;;  %v8636_v39 = vld [vmem:[#allocation4 + $0x118c] ss:$196 sps:$4 sm:$0xff]   ;;  %v7571_v35 = vcombine.low %v676_v44, %v676_v44  ;;  %v8693_v54 = vmov 0   ;;  %v9105_v55 = vld [vmem:[%s9312_s0] ss:$8 sps:$4 sm:$0xff]  }
 0x266   :  { %v9082_v16 = vrot.slane %v5879_v5, %v8807_v52  ;;  %v5880_v28 = vcombine.low %v5528_v63, %v5535_v6  ;;  %4915 = vmatprep.subr.bf16.mxu1 %v8609_v0  ;;  %v675_v41 = vld [vmem:[#allocation4 + $0x1310] sm:$0xff]  ;;  %v8634_v45 = vld [vmem:[#allocation4 + $0x1188] ss:$196 sps:$4 sm:$0xff]  }
 0x267   :  { %v6709_v62 = vcombine.low %v6344_v1, %v6351_v9  ;;  %v6365_v10 = vadd.f32 %v6364_v14, %v6363_v4  ;;  %v8637_v46 = vld [vmem:[#allocation4 + $0x1190] ss:$196 sps:$4 sm:$0xff]   ;;  %v7570_v47 = vcombine.high %v675_v41, %v675_v41  ;;  %v7569_v49 = vcombine.low %v675_v41, %v675_v41  ;;  %v8645_v56 = vld [vmem:[#allocation4 + $0x248] ss:$196 sps:$4 sm:$0xff]  }
 0x268   :  { %v9085_v17 = vrot.slane %v5880_v28, %v8807_v52  ;;  %4873 = vmatpush1.bf16.msra.mxu0 %v8604_v7  ;;  %v3906_v51 = vsel %vm3766_vm1, %v7571_v35, 0  ;;  %v8664_v59 = vld [vmem:[%s9312_s0 + $0x4] ss:$8 sps:$4 sm:$0xff]   ;;  %v8646_v1 = vld [vmem:[#allocation4 + $0x3d0] ss:$196 sps:$4 sm:$0xff]  }
 0x269   :  { %v9088_v31 = vrot.slane %v6709_v62, %v8807_v52  ;;  %v6710_v20 = vcombine.low %v6358_v8, %v6365_v10  ;;  %4916 = vmatpush1.bf16.msra.mxu1 %v8607_v18  ;;  %4874 = vmatprep.subr.bf16.mxu0 %v8612_v11  ;;  %v3900_v50 = vsel %vm3766_vm1, %v7569_v49, 0  ;;  %v8648_v49 = vld [vmem:[#allocation4 + $0x6e0] ss:$196 sps:$4 sm:$0xff]  }
 0x26a   :  { %v5911_v12 = vcombine.low %v9082_v16, %v9085_v17  ;;  %4917 = vmatprep.subr.bf16.mxu1 %v8615_v25  ;;  %v8654_v16 = vld [vmem:[#allocation4 + $0x1010] ss:$196 sps:$4 sm:$0xff]   ;;  %v8655_v17 = vld [vmem:[#allocation4 + $0x1198] ss:$196 sps:$4 sm:$0xff]  }
 0x26b   :  { %v9093_v27 = vrot.slane %v6710_v20, %v8807_v52 }
 0x26c   :  { %4875 = vmatpush1.bf16.msra.mxu0 %v8610_v13 }
 0x26d   :  { %v6741_v23 = vcombine.low %v9088_v31, %v9093_v27  ;;  %4918 = vmatpush1.bf16.msra.mxu1 %v8613_v26  ;;  %4876 = vmatprep.subr.bf16.mxu0 %v8618_v30  ;;  %v8656_v31 = vld [vmem:[#allocation4 + $0x1320] ss:$0 sps:$4 sm:$0xff]  }
 0x26e   :  { %4919 = vmatprep.subr.bf16.mxu1 %v8621_v24 }
 0x270   :  { %4877 = vmatpush1.bf16.msra.mxu0 %v8616_v15  ;;  %v8647_v15 = vld [vmem:[#allocation4 + $0x558] ss:$196 sps:$4 sm:$0xff]  }
 0x271   :  { %4920 = vmatpush1.bf16.msra.mxu1 %v8619_v19  ;;  %4878 = vmatprep.subr.bf16.mxu0 %v8624_v21 }
 0x272   :  { %4921 = vmatprep.subr.bf16.mxu1 %v8627_v3 }
 0x274   :  { %4879 = vmatpush1.bf16.msra.mxu0 %v8622_v22 }
 0x275   :  { %4922 = vmatpush1.bf16.msra.mxu1 %v8625_v29  ;;  %4880 = vmatprep.subr.bf16.mxu0 %v8630_v32 }
 0x276   :  { %4923 = vmatprep.subr.bf16.mxu1 %v8633_v33 }
 0x278   :  { %4881 = vmatpush1.bf16.msra.mxu0 %v8628_v36 }
 0x279   :  { %4924 = vmatpush1.bf16.msra.mxu1 %v8631_v37  ;;  %4882 = vmatprep.subr.bf16.mxu0 %v8636_v39 }
 0x27a   :  { %4925 = vmatprep.subr.bf16.mxu1 %v8639_v40 }
 0x27c   :  { %4883 = vmatpush1.bf16.msra.mxu0 %v8634_v45 }
 0x27d   :  { %4926 = vmatpush1.bf16.msra.mxu1 %v8637_v46  ;;  %7618 = vmatprep.subr.msk.bf16.mxu0 %vm3766_vm1, %v7570_v47 }
 0x27e   :  { %7620 = vmatprep.subr.msk.bf16.mxu1 %vm3766_vm1, %v7572_v43 }
 0x280   :  { %4885 = vmatpush1.bf16.msra.mxu0 %v3900_v50 }
 0x281   :  { %4928 = vmatpush1.bf16.msra.mxu1 %v3906_v51  ;;  %4946 = vmatprep.subr.bf16.mxu0 %v8693_v54 }
 0x283   :  { %4893 = vmatmul.mubr.bf16.vlgmr.msra.gmra.mrb[44].mxu0 %v9105_v55 }
 0x284   :  { %4936 = vmatmul.mubr.bf16.vlgmr.msra.gmra.mrb[44].mxu1 %v9105_v55  ;;  %4947 = vmatpush1.bf16.msra.mxu0 %v8644_v53 }
 0x285   :  { %4948 = vmatprep.subr.bf16.mxu0 %v8693_v54  ;;  %7622 = vmatprep.mubr.msk.bf16.mxu0 %vm3762_vm0, %v8664_v59 }
 0x286   :  { %v4550_v57 = vpop.f32.mrb[28].mxu0 }
 0x287   :  { %v6100_v58 = vmul.f32 %v4550_v57, %v4550_v57  ;;  %v4593_v60 = vpop.f32.mrb[28].mxu1  ;;  %v4552_v61 = vpop.f32.mrb[29].mxu0 }
 0x288   :  { %v6102_v63 = vmul.f32 %v4593_v60, %v4593_v60  ;;  %v7687_v42 = vpack.c.bf16 %v4552_v61, %v4550_v57  ;;  %v6101_v38 = vmul.f32 %v4552_v61, %v4552_v61  ;;  %v4595_v48 = vpop.f32.mrb[29].mxu1  ;;  %v4554_v0 = vpop.f32.mrb[30].mxu0  ;;  %4949 = vmatpush1.bf16.msra.mxu0 %v8645_v56 }
 0x289   :  { %v7688_v2 = vpack.c.bf16 %v4595_v48, %v4593_v60  ;;  %v6103_v4 = vmul.f32 %v4595_v48, %v4595_v48  ;;  %v5536_v5 = vadd.f32 %v4554_v0, %v4550_v57  ;;  %v6149_v6 = vmul.f32 %v4554_v0, %v4554_v0  ;;  %v4597_v7 = vpop.f32.mrb[30].mxu1  ;;  %v4556_v8 = vpop.f32.mrb[31].mxu0  ;;  %4950 = vmatprep.subr.bf16.mxu0 %v8693_v54 }
 0x28a   :  { %5297 = vst [vmem:[%s9314_s2 + $0x70] sm:$0xff] %v7687_v42  ;;  %v5550_v9 = vadd.f32 %v4597_v7, %v4593_v60  ;;  %v6151_v14 = vmul.f32 %v4597_v7, %v4597_v7  ;;  %v7712_v18 = vpack.c.bf16 %v4556_v8, %v4554_v0  ;;  %v5543_v11 = vadd.f32 %v4556_v8, %v4552_v61  ;;  %v4599_v28 = vpop.f32.mrb[31].mxu1 }
 0x28b   :  { %5298 = vst [vmem:[%s9314_s2 + $0x78] sm:$0xff] %v7688_v2  ;;  %v5537_v25 = vrot.slane %v5536_v5, 4  ;;  %v6366_v62 = vadd.f32 %v6149_v6, %v6100_v58  ;;  %v6150_v10 = vmul.f32 %v4556_v8, %v4556_v8  ;;  %v7713_v13 = vpack.c.bf16 %v4599_v28, %v4597_v7 }
 0x28c   :  { %v5551_v20 = vrot.slane %v5550_v9, 4  ;;  %v6380_v26 = vadd.f32 %v6151_v14, %v6102_v63  ;;  %5322 = vst [vmem:[%s9314_s2 + $0x134] sm:$0xff] %v7712_v18  ;;  %v5544_v30 = vrot.slane %v5543_v11, 4  ;;  %v5557_v24 = vadd.f32 %v4599_v28, %v4595_v48  ;;  %4951 = vmatpush1.bf16.msra.mxu0 %v8646_v1  ;;  %v8649_v1 = vld [vmem:[#allocation4 + $0x868] ss:$196 sps:$4 sm:$0xff]  }
 0x28d   :  { %v5538_v19 = vadd.f32 %v5537_v25, %v5536_v5  ;;  %v6367_v21 = vrot.slane %v6366_v62, 4  ;;  %v6373_v3 = vadd.f32 %v6150_v10, %v6101_v38  ;;  %5323 = vst [vmem:[%s9314_s2 + $0x13c] sm:$0xff] %v7713_v13  ;;  %v6152_v22 = vmul.f32 %v4599_v28, %v4599_v28  ;;  %4952 = vmatprep.subr.bf16.mxu0 %v8693_v54  ;;  %v8650_v10 = vld [vmem:[#allocation4 + $0x9f0] ss:$196 sps:$4 sm:$0xff]  }
 0x28e   :  { %v5552_v29 = vadd.f32 %v5551_v20, %v5550_v9  ;;  %v6381_v32 = vrot.slane %v6380_v26, 4  ;;  %v5545_v33 = vadd.f32 %v5544_v30, %v5543_v11  ;;  %v5558_v36 = vrot.slane %v5557_v24, 4 }
 0x28f   :  { %v5539_v37 = vrot.slane %v5538_v19, 2  ;;  %v6368_v39 = vadd.f32 %v6367_v21, %v6366_v62  ;;  %v6374_v40 = vrot.slane %v6373_v3, 4  ;;  %v6387_v41 = vadd.f32 %v6152_v22, %v6103_v4 }
 0x290   :  { %v5553_v44 = vrot.slane %v5552_v29, 2  ;;  %v6382_v45 = vadd.f32 %v6381_v32, %v6380_v26  ;;  %v5546_v46 = vrot.slane %v5545_v33, 2  ;;  %v5559_v47 = vadd.f32 %v5558_v36, %v5557_v24  ;;  %4953 = vmatpush1.bf16.msra.mxu0 %v8647_v15 }
 0x291   :  { %v5540_v43 = vadd.f32 %v5539_v37, %v5538_v19  ;;  %v6369_v35 = vrot.slane %v6368_v39, 2  ;;  %v6375_v50 = vadd.f32 %v6374_v40, %v6373_v3  ;;  %v6388_v51 = vrot.slane %v6387_v41, 4  ;;  %4954 = vmatprep.subr.bf16.mxu0 %v8693_v54  ;;  %v8651_v3 = vld [vmem:[#allocation4 + $0xb78] ss:$196 sps:$4 sm:$0xff]  }
 0x292   :  { %v5554_v53 = vadd.f32 %v5553_v44, %v5552_v29  ;;  %v6383_v56 = vrot.slane %v6382_v45, 2  ;;  %v5547_v59 = vadd.f32 %v5546_v46, %v5545_v33  ;;  %v5560_v57 = vrot.slane %v5559_v47, 2  ;;  %v8653_v46 = vld [vmem:[#allocation4 + $0xe88] ss:$196 sps:$4 sm:$0xff]  }
 0x293   :  { %v5541_v58 = vrot.slane %v5540_v43, 1  ;;  %v6370_v60 = vadd.f32 %v6369_v35, %v6368_v39  ;;  %v6376_v61 = vrot.slane %v6375_v50, 2  ;;  %v6389_v63 = vadd.f32 %v6388_v51, %v6387_v41  ;;  %v8652_v39 = vld [vmem:[#allocation4 + $0xd00] ss:$196 sps:$4 sm:$0xff]  }
 0x294   :  { %v5555_v42 = vrot.slane %v5554_v53, 1  ;;  %v6384_v38 = vadd.f32 %v6383_v56, %v6382_v45  ;;  %v5548_v48 = vrot.slane %v5547_v59, 1  ;;  %v5561_v0 = vadd.f32 %v5560_v57, %v5559_v47  ;;  %4955 = vmatpush1.bf16.msra.mxu0 %v8648_v49 }
 0x295   :  { %v5542_v2 = vadd.f32 %v5541_v58, %v5540_v43  ;;  %v6371_v4 = vrot.slane %v6370_v60, 1  ;;  %v6377_v5 = vadd.f32 %v6376_v61, %v6375_v50  ;;  %v6390_v6 = vrot.slane %v6389_v63, 2  ;;  %4956 = vmatprep.subr.bf16.mxu0 %v8693_v54 }
 0x296   :  { %v5556_v7 = vadd.f32 %v5555_v42, %v5554_v53  ;;  %v6385_v8 = vrot.slane %v6384_v38, 1  ;;  %v5549_v9 = vadd.f32 %v5548_v48, %v5547_v59  ;;  %v5562_v14 = vrot.slane %v5561_v0, 1 }
 0x297   :  { %v6372_v18 = vadd.f32 %v6371_v4, %v6370_v60  ;;  %v6378_v11 = vrot.slane %v6377_v5, 1  ;;  %v6391_v28 = vadd.f32 %v6390_v6, %v6389_v63  ;;  %v5919_v36 = vrot.slane %v5911_v12, %v8807_v52 }
 0x298   :  { %v5881_v25 = vcombine.low %v5542_v2, %v5549_v9  ;;  %v5563_v62 = vadd.f32 %v5562_v14, %v5561_v0  ;;  %4957 = vmatpush1.bf16.msra.mxu0 %v8649_v1  ;;  %v6386_v13 = vadd.f32 %v6385_v8, %v6384_v38  ;;  %v6749_v44 = vrot.slane %v6741_v23, %v8807_v52 }
 0x299   :  { %v6379_v20 = vadd.f32 %v6378_v11, %v6377_v5  ;;  %v6392_v26 = vrot.slane %v6391_v28, 1  ;;  %4958 = vmatprep.subr.bf16.mxu0 %v8693_v54  ;;  %v3912_v12 = vsel %vm3766_vm1, %v8656_v31, 0 }
 0x29a   :  { %v5903_v30 = vrot.slane %v5881_v25, %v8807_v52  ;;  %v5882_v24 = vcombine.low %v5556_v7, %v5563_v62 }
 0x29b   :  { %v6711_v15 = vcombine.low %v6372_v18, %v6379_v20  ;;  %v6393_v19 = vadd.f32 %v6392_v26, %v6391_v28 }
 0x29c   :  { %v5910_v21 = vrot.slane %v5882_v24, %v8807_v52  ;;  %4959 = vmatpush1.bf16.msra.mxu0 %v8650_v10 }
 0x29d   :  { %v6733_v22 = vrot.slane %v6711_v15, %v8807_v52  ;;  %v6712_v29 = vcombine.low %v6386_v13, %v6393_v19  ;;  %4960 = vmatprep.subr.bf16.mxu0 %v8693_v54 }
 0x29e   :  { %v5912_v32 = vcombine.low %v5903_v30, %v5910_v21 }
 0x29f   :  { %v6740_v33 = vrot.slane %v6712_v29, %v8807_v52 }
 0x2a0   :  { %v5926_v37 = vrot.slane %v5912_v32, %v8807_v52  ;;  %4961 = vmatpush1.bf16.msra.mxu0 %v8651_v3 }
 0x2a1   :  { %v6742_v40 = vcombine.low %v6733_v22, %v6740_v33  ;;  %4962 = vmatprep.subr.bf16.mxu0 %v8693_v54 }
 0x2a2   :  { %v5927_v41 = vcombine.low %v5919_v36, %v5926_v37 }
 0x2a3   :  { %v6756_v45 = vrot.slane %v6742_v40, %v8807_v52 }
 0x2a4   :  { %4963 = vmatpush1.bf16.msra.mxu0 %v8652_v39  ;;  %6904 = vst [vmem:[%s9315_s3 + $0x18] sm:$0xff] %v5927_v41 }
 0x2a5   :  { %v6757_v47 = vcombine.low %v6749_v44, %v6756_v45  ;;  %4964 = vmatprep.subr.bf16.mxu0 %v8693_v54 }
 0x2a7   :  { %6918 = vst [vmem:[%s9316_s4 + $0x18] sm:$0xff] %v6757_v47 }
 0x2a8   :  { %4965 = vmatpush1.bf16.msra.mxu0 %v8653_v46 }
 0x2a9   :  { %4966 = vmatprep.subr.bf16.mxu0 %v8693_v54 }
 0x2ac   :  { %4967 = vmatpush1.bf16.msra.mxu0 %v8654_v16 }
 0x2ad   :  { %4968 = vmatprep.subr.bf16.mxu0 %v8693_v54 }
 0x2b0   :  { %4969 = vmatpush1.bf16.msra.mxu0 %v8655_v17 }
 0x2b1   :  { %4970 = vmatprep.subr.bf16.mxu0 %v8693_v54 }
 0x2b4   :  { %4971 = vmatpush1.bf16.msra.mxu0 %v3912_v12 }
 0x2b7   :  { %4979 = vmatmul.mubr.bf16.vlgmr.msra.gmra.mrb[48].mxu0 %v9105_v55 }
 0x2ba   :  { %v4636_v27 = vpop.f32.mrb[32].mxu0 }
 0x2bb   :  { %v6104_v23 = vmul.f32 %v4636_v27, %v4636_v27  ;;  %v4679_v49 = vpop.f32.mrb[32].mxu1  ;;  %v4638_v43 = vpop.f32.mrb[33].mxu0 }
 0x2bc   :  { %v6106_v35 = vmul.f32 %v4679_v49, %v4679_v49  ;;  %v7689_v50 = vpack.c.bf16 %v4638_v43, %v4636_v27  ;;  %v6105_v51 = vmul.f32 %v4638_v43, %v4638_v43  ;;  %v4681_v53 = vpop.f32.mrb[33].mxu1  ;;  %v4640_v56 = vpop.f32.mrb[34].mxu0 }
 0x2bd   :  { %v7690_v59 = vpack.c.bf16 %v4681_v53, %v4679_v49  ;;  %v6107_v57 = vmul.f32 %v4681_v53, %v4681_v53  ;;  %v5564_v58 = vadd.f32 %v4640_v56, %v4636_v27  ;;  %v6153_v60 = vmul.f32 %v4640_v56, %v4640_v56  ;;  %v4683_v61 = vpop.f32.mrb[34].mxu1  ;;  %v4642_v54 = vpop.f32.mrb[35].mxu0 }
 0x2be   :  { %5299 = vst [vmem:[%s9314_s2 + $0x80] sm:$0xff] %v7689_v50  ;;  %v5578_v55 = vadd.f32 %v4683_v61, %v4679_v49  ;;  %v6155_v63 = vmul.f32 %v4683_v61, %v4683_v61  ;;  %v7714_v42 = vpack.c.bf16 %v4642_v54, %v4640_v56  ;;  %v5571_v38 = vadd.f32 %v4642_v54, %v4638_v43  ;;  %v4685_v48 = vpop.f32.mrb[35].mxu1 }
 0x2bf   :  { %5300 = vst [vmem:[%s9314_s2 + $0x88] sm:$0xff] %v7690_v59  ;;  %v5565_v0 = vrot.slane %v5564_v58, 4  ;;  %v6394_v1 = vadd.f32 %v6153_v60, %v6104_v23  ;;  %v6154_v2 = vmul.f32 %v4642_v54, %v4642_v54  ;;  %v7715_v4 = vpack.c.bf16 %v4685_v48, %v4683_v61 }
 0x2c0   :  { %v5579_v5 = vrot.slane %v5578_v55, 4  ;;  %v6408_v6 = vadd.f32 %v6155_v63, %v6106_v35  ;;  %5324 = vst [vmem:[%s9314_s2 + $0x144] sm:$0xff] %v7714_v42  ;;  %v5572_v7 = vrot.slane %v5571_v38, 4  ;;  %v5585_v8 = vadd.f32 %v4685_v48, %v4681_v53 }
 0x2c1   :  { %v5566_v9 = vadd.f32 %v5565_v0, %v5564_v58  ;;  %v6395_v14 = vrot.slane %v6394_v1, 4  ;;  %v6401_v18 = vadd.f32 %v6154_v2, %v6105_v51  ;;  %5325 = vst [vmem:[%s9314_s2 + $0x14c] sm:$0xff] %v7715_v4  ;;  %v6156_v11 = vmul.f32 %v4685_v48, %v4685_v48 }
 0x2c2   :  { %v5580_v28 = vadd.f32 %v5579_v5, %v5578_v55  ;;  %v6409_v25 = vrot.slane %v6408_v6, 4  ;;  %v5573_v62 = vadd.f32 %v5572_v7, %v5571_v38  ;;  %v5586_v10 = vrot.slane %v5585_v8, 4 }
 0x2c3   :  { %v5567_v13 = vrot.slane %v5566_v9, 2  ;;  %v6396_v20 = vadd.f32 %v6395_v14, %v6394_v1  ;;  %v6402_v26 = vrot.slane %v6401_v18, 4  ;;  %v6415_v30 = vadd.f32 %v6156_v11, %v6107_v57 }
 0x2c4   :  { %v5581_v24 = vrot.slane %v5580_v28, 2  ;;  %v6410_v15 = vadd.f32 %v6409_v25, %v6408_v6  ;;  %v5574_v19 = vrot.slane %v5573_v62, 2  ;;  %v5587_v21 = vadd.f32 %v5586_v10, %v5585_v8 }
 0x2c5   :  { %v5568_v3 = vadd.f32 %v5567_v13, %v5566_v9  ;;  %v6397_v22 = vrot.slane %v6396_v20, 2  ;;  %v6403_v29 = vadd.f32 %v6402_v26, %v6401_v18  ;;  %v6416_v32 = vrot.slane %v6415_v30, 4 }
 0x2c6   :  { %v5582_v33 = vadd.f32 %v5581_v24, %v5580_v28  ;;  %v6411_v36 = vrot.slane %v6410_v15, 2  ;;  %v5575_v37 = vadd.f32 %v5574_v19, %v5573_v62  ;;  %v5588_v39 = vrot.slane %v5587_v21, 2 }
 0x2c7   :  { %v5569_v40 = vrot.slane %v5568_v3, 1  ;;  %v6398_v41 = vadd.f32 %v6397_v22, %v6396_v20  ;;  %v6404_v44 = vrot.slane %v6403_v29, 2  ;;  %v6417_v45 = vadd.f32 %v6416_v32, %v6415_v30 }
 0x2c8   :  { %v5583_v46 = vrot.slane %v5582_v33, 1  ;;  %v6412_v47 = vadd.f32 %v6411_v36, %v6410_v15  ;;  %v5576_v16 = vrot.slane %v5575_v37, 1  ;;  %v5589_v17 = vadd.f32 %v5588_v39, %v5587_v21 }
 0x2c9   :  { %v5570_v31 = vadd.f32 %v5569_v40, %v5568_v3  ;;  %v6399_v12 = vrot.slane %v6398_v41, 1  ;;  %v6405_v27 = vadd.f32 %v6404_v44, %v6403_v29  ;;  %v6418_v23 = vrot.slane %v6417_v45, 2 }
 0x2ca   :  { %v5584_v49 = vadd.f32 %v5583_v46, %v5582_v33  ;;  %v6413_v43 = vrot.slane %v6412_v47, 1  ;;  %v5577_v35 = vadd.f32 %v5576_v16, %v5575_v37  ;;  %v5590_v50 = vrot.slane %v5589_v17, 1 }
 0x2cb   :  { %v6400_v51 = vadd.f32 %v6399_v12, %v6398_v41  ;;  %v6406_v53 = vrot.slane %v6405_v27, 1  ;;  %v6419_v56 = vadd.f32 %v6418_v23, %v6417_v45 }
 0x2cc   :  { %v5928_v59 = vcombine.low %v5570_v31, %v5577_v35  ;;  %v5591_v57 = vadd.f32 %v5590_v50, %v5589_v17  ;;  %v6414_v58 = vadd.f32 %v6413_v43, %v6412_v47 }
 0x2cd   :  { %v6407_v60 = vadd.f32 %v6406_v53, %v6405_v27  ;;  %v6420_v61 = vrot.slane %v6419_v56, 1 }
 0x2ce   :  { %v9172_v54 = vrot.slane %v5928_v59, %v8807_v52  ;;  %v5929_v55 = vcombine.low %v5584_v49, %v5591_v57 }
 0x2cf   :  { %v6758_v63 = vcombine.low %v6400_v51, %v6407_v60  ;;  %v6421_v42 = vadd.f32 %v6420_v61, %v6419_v56 }
 0x2d0   :  { %v9175_v38 = vrot.slane %v5929_v55, %v8807_v52 }
 0x2d1   :  { %v9178_v48 = vrot.slane %v6758_v63, %v8807_v52  ;;  %v6759_v0 = vcombine.low %v6414_v58, %v6421_v42 }
 0x2d2   :  { %v5960_v1 = vcombine.low %v9172_v54, %v9175_v38  ;;  %v8694_v54 = vmov 0.0  }
 0x2d3   :  { %v9183_v2 = vrot.slane %v6759_v0, %v8807_v52  ;;  %43 = vst.msk [vmem:[#allocation2 + $0x30] sm:$0x1] %vm9214_vm2, %v8694_v54  ;;  %50 = vst.msk [vmem:[#allocation3 + $0x30] sm:$0x1] %vm9214_vm2, %v8694_v54 }
 0x2d5   :  { %v6790_v4 = vcombine.low %v9178_v48, %v9183_v2 }
 0x2ee   :  { %v4722_v5 = vpop.f32.mrb[36].mxu0 }
 0x2ef   :  { %v6108_v6 = vmul.f32 %v4722_v5, %v4722_v5  ;;  %v4765_v7 = vpop.f32.mrb[36].mxu1  ;;  %v4724_v8 = vpop.f32.mrb[37].mxu0 }
 0x2f0   :  { %v6110_v9 = vmul.f32 %v4765_v7, %v4765_v7  ;;  %v7691_v14 = vpack.c.bf16 %v4724_v8, %v4722_v5  ;;  %v6109_v18 = vmul.f32 %v4724_v8, %v4724_v8  ;;  %v4767_v11 = vpop.f32.mrb[37].mxu1  ;;  %v4726_v28 = vpop.f32.mrb[38].mxu0 }
 0x2f1   :  { %v7692_v25 = vpack.c.bf16 %v4767_v11, %v4765_v7  ;;  %v6111_v62 = vmul.f32 %v4767_v11, %v4767_v11  ;;  %v5592_v10 = vadd.f32 %v4726_v28, %v4722_v5  ;;  %v6157_v13 = vmul.f32 %v4726_v28, %v4726_v28  ;;  %v4769_v20 = vpop.f32.mrb[38].mxu1  ;;  %v4728_v26 = vpop.f32.mrb[39].mxu0 }
 0x2f2   :  { %5301 = vst [vmem:[%s9314_s2 + $0x90] sm:$0xff] %v7691_v14  ;;  %v5606_v30 = vadd.f32 %v4769_v20, %v4765_v7  ;;  %v6159_v24 = vmul.f32 %v4769_v20, %v4769_v20  ;;  %v7716_v15 = vpack.c.bf16 %v4728_v26, %v4726_v28  ;;  %v5599_v19 = vadd.f32 %v4728_v26, %v4724_v8  ;;  %v4771_v21 = vpop.f32.mrb[39].mxu1 }
 0x2f3   :  { %5302 = vst [vmem:[%s9314_s2 + $0x98] sm:$0xff] %v7692_v25  ;;  %v5593_v3 = vrot.slane %v5592_v10, 4  ;;  %v6422_v22 = vadd.f32 %v6157_v13, %v6108_v6  ;;  %v6158_v29 = vmul.f32 %v4728_v26, %v4728_v26  ;;  %v7717_v32 = vpack.c.bf16 %v4771_v21, %v4769_v20 }
 0x2f4   :  { %v5607_v33 = vrot.slane %v5606_v30, 4  ;;  %v6436_v36 = vadd.f32 %v6159_v24, %v6110_v9  ;;  %5326 = vst [vmem:[%s9314_s2 + $0x154] sm:$0xff] %v7716_v15  ;;  %v5600_v37 = vrot.slane %v5599_v19, 4  ;;  %v5613_v39 = vadd.f32 %v4771_v21, %v4767_v11 }
 0x2f5   :  { %v5594_v40 = vadd.f32 %v5593_v3, %v5592_v10  ;;  %v6423_v41 = vrot.slane %v6422_v22, 4  ;;  %v6429_v44 = vadd.f32 %v6158_v29, %v6109_v18  ;;  %5327 = vst [vmem:[%s9314_s2 + $0x15c] sm:$0xff] %v7717_v32  ;;  %v6160_v45 = vmul.f32 %v4771_v21, %v4771_v21 }
 0x2f6   :  { %v5608_v46 = vadd.f32 %v5607_v33, %v5606_v30  ;;  %v6437_v47 = vrot.slane %v6436_v36, 4  ;;  %v5601_v16 = vadd.f32 %v5600_v37, %v5599_v19  ;;  %v5614_v17 = vrot.slane %v5613_v39, 4 }
 0x2f7   :  { %v5595_v31 = vrot.slane %v5594_v40, 2  ;;  %v6424_v12 = vadd.f32 %v6423_v41, %v6422_v22  ;;  %v6430_v27 = vrot.slane %v6429_v44, 4  ;;  %v6443_v23 = vadd.f32 %v6160_v45, %v6111_v62 }
 0x2f8   :  { %v5609_v49 = vrot.slane %v5608_v46, 2  ;;  %v6438_v43 = vadd.f32 %v6437_v47, %v6436_v36  ;;  %v5602_v35 = vrot.slane %v5601_v16, 2  ;;  %v5615_v50 = vadd.f32 %v5614_v17, %v5613_v39 }
 0x2f9   :  { %v5596_v51 = vadd.f32 %v5595_v31, %v5594_v40  ;;  %v6425_v53 = vrot.slane %v6424_v12, 2  ;;  %v6431_v56 = vadd.f32 %v6430_v27, %v6429_v44  ;;  %v6444_v59 = vrot.slane %v6443_v23, 4 }
 0x2fa   :  { %v5610_v57 = vadd.f32 %v5609_v49, %v5608_v46  ;;  %v6439_v58 = vrot.slane %v6438_v43, 2  ;;  %v5603_v60 = vadd.f32 %v5602_v35, %v5601_v16  ;;  %v5616_v61 = vrot.slane %v5615_v50, 2 }
 0x2fb   :  { %v5597_v55 = vrot.slane %v5596_v51, 1  ;;  %v6426_v63 = vadd.f32 %v6425_v53, %v6424_v12  ;;  %v6432_v42 = vrot.slane %v6431_v56, 2  ;;  %v6445_v0 = vadd.f32 %v6444_v59, %v6443_v23 }
 0x2fc   :  { %v5611_v5 = vrot.slane %v5610_v57, 1  ;;  %v6440_v6 = vadd.f32 %v6439_v58, %v6438_v43  ;;  %v5604_v7 = vrot.slane %v5603_v60, 1  ;;  %v5617_v8 = vadd.f32 %v5616_v61, %v5615_v50 }
 0x2fd   :  { %v5598_v9 = vadd.f32 %v5597_v55, %v5596_v51  ;;  %v6427_v14 = vrot.slane %v6426_v63, 1  ;;  %v6433_v18 = vadd.f32 %v6432_v42, %v6431_v56  ;;  %v6446_v11 = vrot.slane %v6445_v0, 2 }
 0x2fe   :  { %v5612_v28 = vadd.f32 %v5611_v5, %v5610_v57  ;;  %v6441_v25 = vrot.slane %v6440_v6, 1  ;;  %v5605_v62 = vadd.f32 %v5604_v7, %v5603_v60  ;;  %v5618_v10 = vrot.slane %v5617_v8, 1 }
 0x2ff   :  { %v6428_v13 = vadd.f32 %v6427_v14, %v6426_v63  ;;  %v6434_v20 = vrot.slane %v6433_v18, 1  ;;  %v6447_v26 = vadd.f32 %v6446_v11, %v6445_v0  ;;  %v5968_v41 = vrot.slane %v5960_v1, %v8807_v52 }
 0x300   :  { %v5930_v30 = vcombine.low %v5598_v9, %v5605_v62  ;;  %v5619_v24 = vadd.f32 %v5618_v10, %v5617_v8  ;;  %v6442_v15 = vadd.f32 %v6441_v25, %v6440_v6  ;;  %v6798_v47 = vrot.slane %v6790_v4, %v8807_v52 }
 0x301   :  { %v6435_v19 = vadd.f32 %v6434_v20, %v6433_v18  ;;  %v6448_v21 = vrot.slane %v6447_v26, 1 }
 0x302   :  { %v5952_v3 = vrot.slane %v5930_v30, %v8807_v52  ;;  %v5931_v22 = vcombine.low %v5612_v28, %v5619_v24 }
 0x303   :  { %v6760_v29 = vcombine.low %v6428_v13, %v6435_v19  ;;  %v6449_v32 = vadd.f32 %v6448_v21, %v6447_v26 }
 0x304   :  { %v5959_v33 = vrot.slane %v5931_v22, %v8807_v52 }
 0x305   :  { %v6782_v36 = vrot.slane %v6760_v29, %v8807_v52  ;;  %v6761_v37 = vcombine.low %v6442_v15, %v6449_v32 }
 0x306   :  { %v5961_v39 = vcombine.low %v5952_v3, %v5959_v33 }
 0x307   :  { %v6789_v40 = vrot.slane %v6761_v37, %v8807_v52 }
 0x308   :  { %v5975_v44 = vrot.slane %v5961_v39, %v8807_v52 }
 0x309   :  { %v6791_v45 = vcombine.low %v6782_v36, %v6789_v40 }
 0x30a   :  { %v5976_v46 = vcombine.low %v5968_v41, %v5975_v44 }
 0x30b   :  { %v6805_v16 = vrot.slane %v6791_v45, %v8807_v52 }
 0x30c   :  { %6905 = vst [vmem:[%s9315_s3 + $0x20] sm:$0xff] %v5976_v46 }
 0x30d   :  { %v6806_v17 = vcombine.low %v6798_v47, %v6805_v16 }
 0x30f   :  { %6919 = vst [vmem:[%s9316_s4 + $0x20] sm:$0xff] %v6806_v17 }
 0x322   :  { %v4808_v38 = vpop.f32.mrb[40].mxu0 }
 0x323   :  { %v6112_v34 = vmul.f32 %v4808_v38, %v4808_v38  ;;  %v4851_v48 = vpop.f32.mrb[40].mxu1  ;;  %v4810_v1 = vpop.f32.mrb[41].mxu0 }
 0x324   :  { %v6114_v2 = vmul.f32 %v4851_v48, %v4851_v48  ;;  %v7693_v4 = vpack.c.bf16 %v4810_v1, %v4808_v38  ;;  %v6113_v12 = vmul.f32 %v4810_v1, %v4810_v1  ;;  %v4853_v27 = vpop.f32.mrb[41].mxu1  ;;  %v4812_v23 = vpop.f32.mrb[42].mxu0 }
 0x325   :  { %v7694_v49 = vpack.c.bf16 %v4853_v27, %v4851_v48  ;;  %v6115_v43 = vmul.f32 %v4853_v27, %v4853_v27  ;;  %v5620_v35 = vadd.f32 %v4812_v23, %v4808_v38  ;;  %v6161_v50 = vmul.f32 %v4812_v23, %v4812_v23  ;;  %v4855_v51 = vpop.f32.mrb[42].mxu1  ;;  %v4814_v53 = vpop.f32.mrb[43].mxu0 }
 0x326   :  { %5303 = vst [vmem:[%s9314_s2 + $0xa0] sm:$0xff] %v7693_v4  ;;  %v5634_v56 = vadd.f32 %v4855_v51, %v4851_v48  ;;  %v6163_v59 = vmul.f32 %v4855_v51, %v4855_v51  ;;  %v7718_v57 = vpack.c.bf16 %v4814_v53, %v4812_v23  ;;  %v5627_v58 = vadd.f32 %v4814_v53, %v4810_v1  ;;  %v4857_v60 = vpop.f32.mrb[43].mxu1 }
 0x327   :  { %5304 = vst [vmem:[%s9314_s2 + $0xa8] sm:$0xff] %v7694_v49  ;;  %v5621_v61 = vrot.slane %v5620_v35, 4  ;;  %v6450_v55 = vadd.f32 %v6161_v50, %v6112_v34  ;;  %v6162_v63 = vmul.f32 %v4814_v53, %v4814_v53  ;;  %v7719_v42 = vpack.c.bf16 %v4857_v60, %v4855_v51 }
 0x328   :  { %v5635_v0 = vrot.slane %v5634_v56, 4  ;;  %v6464_v5 = vadd.f32 %v6163_v59, %v6114_v2  ;;  %5328 = vst [vmem:[%s9314_s2 + $0x164] sm:$0xff] %v7718_v57  ;;  %v5628_v6 = vrot.slane %v5627_v58, 4  ;;  %v5641_v7 = vadd.f32 %v4857_v60, %v4853_v27 }
 0x329   :  { %v5622_v8 = vadd.f32 %v5621_v61, %v5620_v35  ;;  %v6451_v9 = vrot.slane %v6450_v55, 4  ;;  %v6457_v14 = vadd.f32 %v6162_v63, %v6113_v12  ;;  %5329 = vst [vmem:[%s9314_s2 + $0x16c] sm:$0xff] %v7719_v42  ;;  %v6164_v18 = vmul.f32 %v4857_v60, %v4857_v60 }
 0x32a   :  { %v5636_v11 = vadd.f32 %v5635_v0, %v5634_v56  ;;  %v6465_v28 = vrot.slane %v6464_v5, 4  ;;  %v5629_v25 = vadd.f32 %v5628_v6, %v5627_v58  ;;  %v5642_v62 = vrot.slane %v5641_v7, 4 }
 0x32b   :  { %v5623_v10 = vrot.slane %v5622_v8, 2  ;;  %v6452_v13 = vadd.f32 %v6451_v9, %v6450_v55  ;;  %v6458_v20 = vrot.slane %v6457_v14, 4  ;;  %v6471_v26 = vadd.f32 %v6164_v18, %v6115_v43 }
 0x32c   :  { %v5637_v30 = vrot.slane %v5636_v11, 2  ;;  %v6466_v24 = vadd.f32 %v6465_v28, %v6464_v5  ;;  %v5630_v15 = vrot.slane %v5629_v25, 2  ;;  %v5643_v19 = vadd.f32 %v5642_v62, %v5641_v7 }
 0x32d   :  { %v5624_v21 = vadd.f32 %v5623_v10, %v5622_v8  ;;  %v6453_v3 = vrot.slane %v6452_v13, 2  ;;  %v6459_v22 = vadd.f32 %v6458_v20, %v6457_v14  ;;  %v6472_v29 = vrot.slane %v6471_v26, 4 }
 0x32e   :  { %v5638_v32 = vadd.f32 %v5637_v30, %v5636_v11  ;;  %v6467_v33 = vrot.slane %v6466_v24, 2  ;;  %v5631_v36 = vadd.f32 %v5630_v15, %v5629_v25  ;;  %v5644_v37 = vrot.slane %v5643_v19, 2 }
 0x32f   :  { %v5625_v39 = vrot.slane %v5624_v21, 1  ;;  %v6454_v40 = vadd.f32 %v6453_v3, %v6452_v13  ;;  %v6460_v41 = vrot.slane %v6459_v22, 2  ;;  %v6473_v44 = vadd.f32 %v6472_v29, %v6471_v26 }
 0x330   :  { %v5639_v45 = vrot.slane %v5638_v32, 1  ;;  %v6468_v46 = vadd.f32 %v6467_v33, %v6466_v24  ;;  %v5632_v47 = vrot.slane %v5631_v36, 1  ;;  %v5645_v16 = vadd.f32 %v5644_v37, %v5643_v19 }
 0x331   :  { %v5626_v17 = vadd.f32 %v5625_v39, %v5624_v21  ;;  %v6455_v54 = vrot.slane %v6454_v40, 1  ;;  %v6461_v38 = vadd.f32 %v6460_v41, %v6459_v22  ;;  %v6474_v34 = vrot.slane %v6473_v44, 2 }
 0x332   :  { %v5640_v48 = vadd.f32 %v5639_v45, %v5638_v32  ;;  %v6469_v1 = vrot.slane %v6468_v46, 1  ;;  %v5633_v2 = vadd.f32 %v5632_v47, %v5631_v36  ;;  %v5646_v4 = vrot.slane %v5645_v16, 1 }
 0x333   :  { %v6456_v12 = vadd.f32 %v6455_v54, %v6454_v40  ;;  %v6462_v27 = vrot.slane %v6461_v38, 1  ;;  %v6475_v23 = vadd.f32 %v6474_v34, %v6473_v44 }
 0x334   :  { %v5977_v49 = vcombine.low %v5626_v17, %v5633_v2  ;;  %v5647_v43 = vadd.f32 %v5646_v4, %v5645_v16  ;;  %v6470_v35 = vadd.f32 %v6469_v1, %v6468_v46 }
 0x335   :  { %v6463_v50 = vadd.f32 %v6462_v27, %v6461_v38  ;;  %v6476_v51 = vrot.slane %v6475_v23, 1 }
 0x336   :  { %v9241_v53 = vrot.slane %v5977_v49, %v8807_v52  ;;  %v5978_v56 = vcombine.low %v5640_v48, %v5647_v43 }
 0x337   :  { %v6807_v59 = vcombine.low %v6456_v12, %v6463_v50  ;;  %v6477_v57 = vadd.f32 %v6476_v51, %v6475_v23 }
 0x338   :  { %v9244_v58 = vrot.slane %v5978_v56, %v8807_v52 }
 0x339   :  { %v9247_v60 = vrot.slane %v6807_v59, %v8807_v52  ;;  %v6808_v61 = vcombine.low %v6470_v35, %v6477_v57 }
 0x33a   :  { %v6009_v55 = vcombine.low %v9241_v53, %v9244_v58 }
 0x33b   :  { %v9252_v63 = vrot.slane %v6808_v61, %v8807_v52 }
 0x33d   :  { %v6839_v42 = vcombine.low %v9247_v60, %v9252_v63 }
 0x356   :  { %v4894_v0 = vpop.f32.mrb[44].mxu0 }
 0x357   :  { %v6116_v5 = vmul.f32 %v4894_v0, %v4894_v0  ;;  %v4937_v6 = vpop.f32.mrb[44].mxu1  ;;  %v4896_v7 = vpop.f32.mrb[45].mxu0 }
 0x358   :  { %v6118_v8 = vmul.f32 %v4937_v6, %v4937_v6  ;;  %v7695_v9 = vpack.c.bf16 %v4896_v7, %v4894_v0  ;;  %v6117_v14 = vmul.f32 %v4896_v7, %v4896_v7  ;;  %v4939_v18 = vpop.f32.mrb[45].mxu1  ;;  %v4898_v11 = vpop.f32.mrb[46].mxu0 }
 0x359   :  { %v7696_v28 = vpack.c.bf16 %v4939_v18, %v4937_v6  ;;  %v6119_v25 = vmul.f32 %v4939_v18, %v4939_v18  ;;  %v5648_v62 = vadd.f32 %v4898_v11, %v4894_v0  ;;  %v6165_v10 = vmul.f32 %v4898_v11, %v4898_v11  ;;  %v4941_v13 = vpop.f32.mrb[46].mxu1  ;;  %v4900_v20 = vpop.f32.mrb[47].mxu0 }
 0x35a   :  { %5305 = vst [vmem:[%s9314_s2 + $0xb0] sm:$0xff] %v7695_v9  ;;  %v5662_v26 = vadd.f32 %v4941_v13, %v4937_v6  ;;  %v6167_v30 = vmul.f32 %v4941_v13, %v4941_v13  ;;  %v7720_v24 = vpack.c.bf16 %v4900_v20, %v4898_v11  ;;  %v5655_v15 = vadd.f32 %v4900_v20, %v4896_v7  ;;  %v4943_v19 = vpop.f32.mrb[47].mxu1 }
 0x35b   :  { %5306 = vst [vmem:[%s9314_s2 + $0xb8] sm:$0xff] %v7696_v28  ;;  %v5649_v21 = vrot.slane %v5648_v62, 4  ;;  %v6478_v3 = vadd.f32 %v6165_v10, %v6116_v5  ;;  %v6166_v22 = vmul.f32 %v4900_v20, %v4900_v20  ;;  %v7721_v29 = vpack.c.bf16 %v4943_v19, %v4941_v13 }
 0x35c   :  { %v5663_v32 = vrot.slane %v5662_v26, 4  ;;  %v6492_v33 = vadd.f32 %v6167_v30, %v6118_v8  ;;  %5330 = vst [vmem:[%s9314_s2 + $0x174] sm:$0xff] %v7720_v24  ;;  %v5656_v36 = vrot.slane %v5655_v15, 4  ;;  %v5669_v37 = vadd.f32 %v4943_v19, %v4939_v18 }
 0x35d   :  { %v5650_v39 = vadd.f32 %v5649_v21, %v5648_v62  ;;  %v6479_v40 = vrot.slane %v6478_v3, 4  ;;  %v6485_v41 = vadd.f32 %v6166_v22, %v6117_v14  ;;  %5331 = vst [vmem:[%s9314_s2 + $0x17c] sm:$0xff] %v7721_v29  ;;  %v6168_v44 = vmul.f32 %v4943_v19, %v4943_v19 }
 0x35e   :  { %v5664_v45 = vadd.f32 %v5663_v32, %v5662_v26  ;;  %v6493_v46 = vrot.slane %v6492_v33, 4  ;;  %v5657_v47 = vadd.f32 %v5656_v36, %v5655_v15  ;;  %v5670_v16 = vrot.slane %v5669_v37, 4 }
 0x35f   :  { %v5651_v17 = vrot.slane %v5650_v39, 2  ;;  %v6480_v54 = vadd.f32 %v6479_v40, %v6478_v3  ;;  %v6486_v38 = vrot.slane %v6485_v41, 4  ;;  %v6499_v34 = vadd.f32 %v6168_v44, %v6119_v25 }
 0x360   :  { %v5665_v48 = vrot.slane %v5664_v45, 2  ;;  %v6494_v1 = vadd.f32 %v6493_v46, %v6492_v33  ;;  %v5658_v2 = vrot.slane %v5657_v47, 2  ;;  %v5671_v4 = vadd.f32 %v5670_v16, %v5669_v37 }
 0x361   :  { %v5652_v12 = vadd.f32 %v5651_v17, %v5650_v39  ;;  %v6481_v27 = vrot.slane %v6480_v54, 2  ;;  %v6487_v23 = vadd.f32 %v6486_v38, %v6485_v41  ;;  %v6500_v49 = vrot.slane %v6499_v34, 4 }
 0x362   :  { %v5666_v43 = vadd.f32 %v5665_v48, %v5664_v45  ;;  %v6495_v35 = vrot.slane %v6494_v1, 2  ;;  %v5659_v50 = vadd.f32 %v5658_v2, %v5657_v47  ;;  %v5672_v51 = vrot.slane %v5671_v4, 2 }
 0x363   :  { %v5653_v56 = vrot.slane %v5652_v12, 1  ;;  %v6482_v59 = vadd.f32 %v6481_v27, %v6480_v54  ;;  %v6488_v57 = vrot.slane %v6487_v23, 2  ;;  %v6501_v61 = vadd.f32 %v6500_v49, %v6499_v34 }
 0x364   :  { %v5667_v0 = vrot.slane %v5666_v43, 1  ;;  %v6496_v5 = vadd.f32 %v6495_v35, %v6494_v1  ;;  %v5660_v6 = vrot.slane %v5659_v50, 1  ;;  %v5673_v7 = vadd.f32 %v5672_v51, %v5671_v4 }
 0x365   :  { %v5654_v8 = vadd.f32 %v5653_v56, %v5652_v12  ;;  %v6483_v9 = vrot.slane %v6482_v59, 1  ;;  %v6489_v14 = vadd.f32 %v6488_v57, %v6487_v23  ;;  %v6502_v18 = vrot.slane %v6501_v61, 2 }
 0x366   :  { %v5668_v11 = vadd.f32 %v5667_v0, %v5666_v43  ;;  %v6497_v28 = vrot.slane %v6496_v5, 1  ;;  %v5661_v25 = vadd.f32 %v5660_v6, %v5659_v50  ;;  %v5674_v62 = vrot.slane %v5673_v7, 1  ;;  %v6071_v0 = vld [vmem:[#allocation3 + $0x30] sm:$0x1] }
 0x367   :  { %v6484_v10 = vadd.f32 %v6483_v9, %v6482_v59  ;;  %v6490_v13 = vrot.slane %v6489_v14, 1  ;;  %v6503_v20 = vadd.f32 %v6502_v18, %v6501_v61  ;;  %v6017_v40 = vrot.slane %v6009_v55, %v8807_v52  ;;  %v5339_v59 = vld [vmem:[#allocation2 + $0x30] sm:$0x1] }
 0x368   :  { %v5979_v26 = vcombine.low %v5654_v8, %v5661_v25  ;;  %v5675_v30 = vadd.f32 %v5674_v62, %v5673_v7  ;;  %v6498_v24 = vadd.f32 %v6497_v28, %v6496_v5  ;;  %v6847_v46 = vrot.slane %v6839_v42, %v8807_v52 }
 0x369   :  { %v6491_v15 = vadd.f32 %v6490_v13, %v6489_v14  ;;  %v6504_v19 = vrot.slane %v6503_v20, 1 }
 0x36a   :  { %v6001_v21 = vrot.slane %v5979_v26, %v8807_v52  ;;  %v5980_v3 = vcombine.low %v5668_v11, %v5675_v30 }
 0x36b   :  { %v6809_v22 = vcombine.low %v6484_v10, %v6491_v15  ;;  %v6505_v29 = vadd.f32 %v6504_v19, %v6503_v20 }
 0x36c   :  { %v6008_v32 = vrot.slane %v5980_v3, %v8807_v52 }
 0x36d   :  { %v6831_v33 = vrot.slane %v6809_v22, %v8807_v52  ;;  %v6810_v36 = vcombine.low %v6498_v24, %v6505_v29 }
 0x36e   :  { %v6010_v37 = vcombine.low %v6001_v21, %v6008_v32 }
 0x36f   :  { %v6838_v39 = vrot.slane %v6810_v36, %v8807_v52 }
 0x370   :  { %v6024_v41 = vrot.slane %v6010_v37, %v8807_v52 }
 0x371   :  { %v6840_v44 = vcombine.low %v6831_v33, %v6838_v39 }
 0x372   :  { %v6025_v45 = vcombine.low %v6017_v40, %v6024_v41 }
 0x373   :  { %v6854_v47 = vrot.slane %v6840_v44, %v8807_v52 }
 0x374   :  { %6906 = vst [vmem:[%s9315_s3 + $0x28] sm:$0xff] %v6025_v45 }
 0x375   :  { %v6855_v16 = vcombine.low %v6847_v46, %v6854_v47 }
 0x377   :  { %6920 = vst [vmem:[%s9316_s4 + $0x28] sm:$0xff] %v6855_v16 }
 0x38a   :  { %v4980_v53 = vpop.f32.mrb[48].mxu0 }
 0x38b   :  { %v7697_v58 = vpack.c.bf16 %v4980_v53, %v4980_v53  ;;  %v4982_v55 = vpop.f32.mrb[49].mxu0  ;;  %v6120_v60 = vmul.f32 %v4980_v53, %v4980_v53 }
 0x38c   :  { %v4983_v17 = vpop.f32.mrb[50].mxu0 }
 0x38d   :  { %5307 = vst [vmem:[%s9314_s2 + $0xc0] sm:$0xf] %v7697_v58  ;;  %v7722_v63 = vpack.c.bf16 %v4983_v17, %v4983_v17  ;;  %v5676_v42 = vadd.f32 %v4983_v17, %v4980_v53  ;;  %v6169_v54 = vmul.f32 %v4983_v17, %v4983_v17  ;;  %v4985_v38 = vpop.f32.mrb[51].mxu0 }
 0x38f   :  { %5332 = vst [vmem:[%s9314_s2 + $0x184] sm:$0xf] %v7722_v63  ;;  %v5677_v34 = vrot.slane %v5676_v42, 4  ;;  %v6506_v48 = vadd.f32 %v6169_v54, %v6120_v60 }
 0x391   :  { %v5678_v1 = vadd.f32 %v5677_v34, %v5676_v42  ;;  %v6507_v2 = vrot.slane %v6506_v48, 4 }
 0x393   :  { %v5679_v4 = vrot.slane %v5678_v1, 2  ;;  %v6508_v12 = vadd.f32 %v6507_v2, %v6506_v48 }
 0x395   :  { %v5680_v27 = vadd.f32 %v5679_v4, %v5678_v1  ;;  %v6509_v23 = vrot.slane %v6508_v12, 2 }
 0x397   :  { %v5681_v49 = vrot.slane %v5680_v27, 1  ;;  %v6510_v43 = vadd.f32 %v6509_v23, %v6508_v12 }
 0x399   :  { %v5682_v35 = vadd.f32 %v5681_v49, %v5680_v27  ;;  %v6511_v50 = vrot.slane %v6510_v43, 1 }
 0x39b   :  { %v6032_v51 = vrot.slane %v5682_v35, %v8807_v52  ;;  %v6512_v56 = vadd.f32 %v6511_v50, %v6510_v43 }
 0x39d   :  { %v6039_v57 = vrot.slane %v6032_v51, %v8807_v52  ;;  %v6862_v61 = vrot.slane %v6512_v56, %v8807_v52 }
 0x39f   :  { %v6053_v5 = vadd.f32 %v6039_v57, %v5339_v59  ;;  %v6869_v6 = vrot.slane %v6862_v61, %v8807_v52 }
 0x3a1   :  { %6064 = vst.msk [vmem:[#allocation2 + $0x30] sm:$0x1] %vm9214_vm2, %v6053_v5  ;;  %v6883_v7 = vadd.f32 %v6869_v6, %v6071_v0 }
 0x3a3   :  { %6890 = vst.msk [vmem:[#allocation3 + $0x30] sm:$0x1] %vm9214_vm2, %v6883_v7 }
 0x3a8   :  { %v6900_v8 = vld [vmem:[#allocation2 + $0x30] sm:$0x1] }
 0x3a9   :  { %6907 = vst.msk [vmem:[%s9315_s3 + $0x30] sm:$0x1] %vm9214_vm2, %v6900_v8 }
 0x3aa   :  { %v6914_v9 = vld [vmem:[#allocation3 + $0x30] sm:$0x1] }
 0x3ab   :  { %6921 = vst.msk [vmem:[%s9316_s4 + $0x30] sm:$0x1] %vm9214_vm2, %v6914_v9 }
 0x3ac   :  { %6934 = vsyncpa [#allocation5], 1 }

// kernel: generator_forward.5
= control target key start
LH: loop header
LB: loop body
LE: loop exit
PB: predicated region body
PF: predicated region fallthrough
CT: control target
= control target key end

     0   :  { %v2835_v0 = vmov 0   ;;  %v2836_v39 = vmov 0.0   ;;  %vm2837_vm0 = vmmov 0   ;;  %vm1085_vm1 = vcmask 523264   ;;  %s3865_s1 = inlined_call_operand.vmem [shape: bf16[576,4], index: 1, kind: input, shape index: {}]   ;;  %s3866_s0 = inlined_call_operand.vmem [shape: bf16[400,576], index: 0, kind: input, shape index: {}]   ;;  %s3867_s2 = inlined_call_operand.vmem [shape: f32[1,4], index: 2, kind: input, shape index: {}]   ;;  %s3868_s3 = inlined_call_operand.vmem [shape: f32[400,4], index: 3, kind: output, shape index: {}]  }
   0x1   :  { %1161 = vmatprep.subr.bf16.mxu1 %v2835_v0  ;;  %1394 = vmatprep.subr.bf16.mxu0 %v2835_v0  ;;  %v2524_v1 = vld [vmem:[%s3865_s1] sm:$0xff]   ;;  %v2526_v3 = vld [vmem:[%s3865_s1 + $0x8] sm:$0xff]   ;;  %v2528_v5 = vld [vmem:[%s3865_s1 + $0x10] sm:$0xff]   ;;  %vm1910_vm2 = vcmask 31744  }
   0x2   :  { %v2866_v2 = vld [vmem:[%s3865_s1 + $0x80] sm:$0xff]   ;;  %1162 = vmatpush1.bf16.msra.mxu1 %v2524_v1  ;;  %v2876_v4 = vld [vmem:[%s3865_s1 + $0x88] sm:$0xff]   ;;  %v2887_v6 = vld [vmem:[%s3865_s1 + $0x90] sm:$0xff]  }
   0x3   :  { %1395 = vmatpush1.bf16.msra.mxu0 %v2866_v2  ;;  %1163 = vmatprep.subr.bf16.mxu1 %v2835_v0  ;;  %v2530_v7 = vld [vmem:[%s3865_s1 + $0x18] sm:$0xff]   ;;  %v2532_v9 = vld [vmem:[%s3865_s1 + $0x20] sm:$0xff]   ;;  %v2534_v11 = vld [vmem:[%s3865_s1 + $0x28] sm:$0xff]  }
   0x4   :  { %1396 = vmatprep.subr.bf16.mxu0 %v2835_v0  ;;  %v2898_v8 = vld [vmem:[%s3865_s1 + $0x98] sm:$0xff]   ;;  %v2909_v10 = vld [vmem:[%s3865_s1 + $0xa0] sm:$0xff]   ;;  %v2920_v12 = vld [vmem:[%s3865_s1 + $0xa8] sm:$0xff]  }
   0x5   :  { %v2536_v13 = vld [vmem:[%s3865_s1 + $0x30] sm:$0xff]   ;;  %v2538_v15 = vld [vmem:[%s3865_s1 + $0x38] sm:$0xff]   ;;  %v2540_v17 = vld [vmem:[%s3865_s1 + $0x40] sm:$0xff]  }
   0x6   :  { %1164 = vmatpush1.bf16.msra.mxu1 %v2526_v3  ;;  %v2931_v14 = vld [vmem:[%s3865_s1 + $0xb0] sm:$0xff]   ;;  %v2942_v16 = vld [vmem:[%s3865_s1 + $0xb8] sm:$0xff]   ;;  %v2953_v18 = vld [vmem:[%s3865_s1 + $0xc0] sm:$0xff]  }
   0x7   :  { %1397 = vmatpush1.bf16.msra.mxu0 %v2876_v4  ;;  %1165 = vmatprep.subr.bf16.mxu1 %v2835_v0  ;;  %v2558_v19 = vld [vmem:[%s3866_s0 + $0x4] ss:$20 sps:$4 sm:$0xff]   ;;  %v2542_v20 = vld [vmem:[%s3865_s1 + $0x48] sm:$0xff]   ;;  %v2544_v23 = vld [vmem:[%s3865_s1 + $0x50] sm:$0xff]  }
   0x8   :  { %1398 = vmatprep.subr.bf16.mxu0 %v2835_v0  ;;  %v2561_v21 = vld [vmem:[%s3866_s0 + $0xc] ss:$20 sps:$4 sm:$0xff]   ;;  %1193 = vmatprep.mubr.bf16.mxu1 %v2558_v19  ;;  %v2981_v24 = vld [vmem:[%s3865_s1 + $0xd0] sm:$0xff]   ;;  %v2546_v25 = vld [vmem:[%s3865_s1 + $0x58] sm:$0xff]  }
   0x9   :  { %v2970_v22 = vld [vmem:[%s3865_s1 + $0xc8] sm:$0xff]   ;;  %1426 = vmatprep.mubr.bf16.mxu0 %v2561_v21  ;;  %v2992_v26 = vld [vmem:[%s3865_s1 + $0xd8] sm:$0xff]   ;;  %v2548_v27 = vld [vmem:[%s3865_s1 + $0x60] sm:$0xff]  }
   0xa   :  { %1166 = vmatpush1.bf16.msra.mxu1 %v2528_v5  ;;  %v3003_v28 = vld [vmem:[%s3865_s1 + $0xe0] sm:$0xff]   ;;  %v2550_v29 = vld [vmem:[%s3865_s1 + $0x68] sm:$0xff]   ;;  %v2552_v31 = vld [vmem:[%s3865_s1 + $0x70] sm:$0xff]  }
   0xb   :  { %1399 = vmatpush1.bf16.msra.mxu0 %v2887_v6  ;;  %1167 = vmatprep.subr.bf16.mxu1 %v2835_v0  ;;  %v3014_v30 = vld [vmem:[%s3865_s1 + $0xe8] sm:$0xff]   ;;  %v3025_v32 = vld [vmem:[%s3865_s1 + $0xf0] sm:$0xff]   ;;  %v2554_v33 = vld [vmem:[%s3865_s1 + $0x78] sm:$0xff]  }
   0xc   :  { %1400 = vmatprep.subr.bf16.mxu0 %v2835_v0  ;;  %v3036_v34 = vld [vmem:[%s3865_s1 + $0xf8] sm:$0xff]   ;;  %v2556_v35 = vld [vmem:[%s3866_s0] ss:$20 sps:$4 sm:$0xff]   ;;  %v2581_v41 = vld [vmem:[%s3865_s1 + $0x108] sm:$0xff]  }
   0xd   :  { %v2559_v36 = vld [vmem:[%s3866_s0 + $0x8] ss:$20 sps:$4 sm:$0xff]   ;;  %v2563_v37 = vld [vmem:[%s3866_s0 + $0x2c] ss:$20 sps:$4 sm:$0xff]   ;;  %v2568_v43 = vld [vmem:[%s3866_s0 + $0x30] ss:$20 sps:$4 sm:$0xff]  }
   0xe   :  { %1168 = vmatpush1.bf16.msra.mxu1 %v2530_v7  ;;  %v2562_v38 = vld [vmem:[%s3865_s1 + $0x100] sm:$0xff]   ;;  %v2565_v40 = vld [vmem:[%s3866_s0 + $0x34] ss:$20 sps:$4 sm:$0xff]   ;;  %v2571_v45 = vld [vmem:[%s3866_s0 + $0x5c] ss:$20 sps:$4 sm:$0xff]  }
   0xf   :  { %1401 = vmatpush1.bf16.msra.mxu0 %v2898_v8  ;;  %1169 = vmatprep.subr.bf16.mxu1 %v2835_v0  ;;  %v2567_v42 = vld [vmem:[%s3866_s0 + $0x28] ss:$20 sps:$4 sm:$0xff]   ;;  %v2600_v46 = vld [vmem:[%s3865_s1 + $0x110] sm:$0xff]   ;;  %v2574_v49 = vld [vmem:[%s3866_s0 + $0x58] ss:$20 sps:$4 sm:$0xff]  }
  0x10   :  { %1402 = vmatprep.subr.bf16.mxu0 %v2835_v0  ;;  %v2569_v44 = vld [vmem:[%s3866_s0 + $0x54] ss:$20 sps:$4 sm:$0xff]   ;;  %v2623_v47 = vld [vmem:[%s3865_s1 + $0x118] sm:$0xff]   ;;  %v2573_v48 = vld [vmem:[%s3866_s0 + $0x50] ss:$20 sps:$4 sm:$0xff]  }
  0x11   :  { %v2575_v50 = vld [vmem:[%s3866_s0 + $0x7c] ss:$20 sps:$4 sm:$0xff]   ;;  %v2577_v51 = vld [vmem:[%s3866_s0 + $0x84] ss:$20 sps:$4 sm:$0xff]   ;;  %v2580_v53 = vld [vmem:[%s3866_s0 + $0x80] ss:$20 sps:$4 sm:$0xff]  }
  0x12   :  { %1170 = vmatpush1.bf16.msra.mxu1 %v2532_v9  ;;  %v2579_v52 = vld [vmem:[%s3866_s0 + $0x78] ss:$20 sps:$4 sm:$0xff]   ;;  %v2586_v56 = vld [vmem:[%s3866_s0 + $0xa0] ss:$20 sps:$4 sm:$0xff]   ;;  %v2587_v57 = vld [vmem:[%s3866_s0 + $0xa8] ss:$20 sps:$4 sm:$0xff]  }
  0x13   :  { %1403 = vmatpush1.bf16.msra.mxu0 %v2909_v10  ;;  %1171 = vmatprep.subr.bf16.mxu1 %v2835_v0  ;;  %v2582_v54 = vld [vmem:[%s3866_s0 + $0xa4] ss:$20 sps:$4 sm:$0xff]   ;;  %v2584_v55 = vld [vmem:[%s3866_s0 + $0xac] ss:$20 sps:$4 sm:$0xff]   ;;  %v2590_v59 = vld [vmem:[%s3866_s0 + $0xd4] ss:$20 sps:$4 sm:$0xff]  }
  0x14   :  { %1404 = vmatprep.subr.bf16.mxu0 %v2835_v0  ;;  %v2588_v58 = vld [vmem:[%s3866_s0 + $0xcc] ss:$20 sps:$4 sm:$0xff]   ;;  %v2592_v60 = vld [vmem:[%s3866_s0 + $0xc8] ss:$20 sps:$4 sm:$0xff]   ;;  %v2593_v61 = vld [vmem:[%s3866_s0 + $0xd0] ss:$20 sps:$4 sm:$0xff]  }
  0x15   :  { %v2594_v62 = vld [vmem:[%s3866_s0 + $0xf4] ss:$20 sps:$4 sm:$0xff]   ;;  %v2596_v63 = vld [vmem:[%s3866_s0 + $0xfc] ss:$20 sps:$4 sm:$0xff]   ;;  %v2605_v5 = vld [vmem:[%s3866_s0 + $0x118] ss:$20 sps:$4 sm:$0xff]  }
  0x16   :  { %1172 = vmatpush1.bf16.msra.mxu1 %v2534_v11  ;;  %v2598_v1 = vld [vmem:[%s3866_s0 + $0xf0] ss:$20 sps:$4 sm:$0xff]   ;;  %v2611_v9 = vld [vmem:[%s3866_s0 + $0x140] ss:$20 sps:$4 sm:$0xff]  }
  0x17   :  { %1405 = vmatpush1.bf16.msra.mxu0 %v2920_v12  ;;  %1173 = vmatprep.subr.bf16.mxu1 %v2835_v0  ;;  %v2601_v3 = vld [vmem:[%s3866_s0 + $0x11c] ss:$20 sps:$4 sm:$0xff]   ;;  %v2607_v7 = vld [vmem:[%s3866_s0 + $0x144] ss:$20 sps:$4 sm:$0xff]   ;;  %v2613_v11 = vld [vmem:[%s3866_s0 + $0x16c] ss:$20 sps:$4 sm:$0xff]  }
  0x18   :  { %1406 = vmatprep.subr.bf16.mxu0 %v2835_v0  ;;  %v2628_v19 = vld [vmem:[%s3866_s0 + $0x1c4] ss:$20 sps:$4 sm:$0xff]   ;;  %v2631_v21 = vld [vmem:[%s3866_s0 + $0x1c0] ss:$20 sps:$4 sm:$0xff]  }
  0x1a   :  { %1174 = vmatpush1.bf16.msra.mxu1 %v2536_v13  ;;  %v2618_v13 = vld [vmem:[%s3866_s0 + $0x170] ss:$20 sps:$4 sm:$0xff]  }
  0x1b   :  { %1407 = vmatpush1.bf16.msra.mxu0 %v2931_v14  ;;  %1175 = vmatprep.subr.bf16.mxu1 %v2835_v0 }
  0x1c   :  { %1408 = vmatprep.subr.bf16.mxu0 %v2835_v0 }
  0x1e   :  { %1176 = vmatpush1.bf16.msra.mxu1 %v2538_v15  ;;  %v2621_v15 = vld [vmem:[%s3866_s0 + $0x19c] ss:$20 sps:$4 sm:$0xff]  }
  0x1f   :  { %1409 = vmatpush1.bf16.msra.mxu0 %v2942_v16  ;;  %1177 = vmatprep.subr.bf16.mxu1 %v2835_v0 }
  0x20   :  { %1410 = vmatprep.subr.bf16.mxu0 %v2835_v0 }
  0x22   :  { %1178 = vmatpush1.bf16.msra.mxu1 %v2540_v17  ;;  %v2625_v17 = vld [vmem:[%s3866_s0 + $0x198] ss:$20 sps:$4 sm:$0xff]  }
  0x23   :  { %1411 = vmatpush1.bf16.msra.mxu0 %v2953_v18  ;;  %1179 = vmatprep.subr.bf16.mxu1 %v2835_v0 }
  0x24   :  { %1412 = vmatprep.subr.bf16.mxu0 %v2835_v0 }
  0x26   :  { %1180 = vmatpush1.bf16.msra.mxu1 %v2542_v20  ;;  %v2630_v20 = vld [vmem:[%s3866_s0 + $0x1b8] ss:$20 sps:$4 sm:$0xff]  }
  0x27   :  { %1413 = vmatpush1.bf16.msra.mxu0 %v2970_v22  ;;  %1181 = vmatprep.subr.bf16.mxu1 %v2835_v0 }
  0x28   :  { %1414 = vmatprep.subr.bf16.mxu0 %v2835_v0 }
  0x2a   :  { %1182 = vmatpush1.bf16.msra.mxu1 %v2544_v23  ;;  %v2634_v23 = vld [vmem:[%s3866_s0 + $0x1ec] ss:$20 sps:$4 sm:$0xff]  }
  0x2b   :  { %1415 = vmatpush1.bf16.msra.mxu0 %v2981_v24  ;;  %1183 = vmatprep.subr.bf16.mxu1 %v2835_v0 }
  0x2c   :  { %1416 = vmatprep.subr.bf16.mxu0 %v2835_v0 }
  0x2e   :  { %1184 = vmatpush1.bf16.msra.mxu1 %v2546_v25  ;;  %v2637_v25 = vld [vmem:[%s3866_s0 + $0x1e8] ss:$20 sps:$4 sm:$0xff]  }
  0x2f   :  { %1417 = vmatpush1.bf16.msra.mxu0 %v2992_v26  ;;  %1185 = vmatprep.subr.bf16.mxu1 %v2835_v0 }
  0x30   :  { %1418 = vmatprep.subr.bf16.mxu0 %v2835_v0 }
  0x32   :  { %1186 = vmatpush1.bf16.msra.mxu1 %v2548_v27  ;;  %v2640_v27 = vld [vmem:[%s3866_s0 + $0x208] ss:$20 sps:$4 sm:$0xff]  }
  0x33   :  { %1419 = vmatpush1.bf16.msra.mxu0 %v3003_v28  ;;  %1187 = vmatprep.subr.bf16.mxu1 %v2835_v0 }
  0x34   :  { %1420 = vmatprep.subr.bf16.mxu0 %v2835_v0 }
  0x36   :  { %1188 = vmatpush1.bf16.msra.mxu1 %v2550_v29  ;;  %v2642_v29 = vld [vmem:[%s3866_s0 + $0x234] ss:$20 sps:$4 sm:$0xff]  }
  0x37   :  { %1421 = vmatpush1.bf16.msra.mxu0 %v3014_v30  ;;  %1189 = vmatprep.subr.bf16.mxu1 %v2835_v0 }
  0x38   :  { %1422 = vmatprep.subr.bf16.mxu0 %v2835_v0 }
  0x3a   :  { %1190 = vmatpush1.bf16.msra.mxu1 %v2552_v31  ;;  %v2645_v31 = vld [vmem:[%s3866_s0 + $0x38] ss:$20 sps:$4 sm:$0xff]  }
  0x3b   :  { %1423 = vmatpush1.bf16.msra.mxu0 %v3025_v32  ;;  %1191 = vmatprep.subr.bf16.mxu1 %v2835_v0 }
  0x3c   :  { %1424 = vmatprep.subr.bf16.mxu0 %v2835_v0 }
  0x3e   :  { %1192 = vmatpush1.bf16.msra.mxu1 %v2554_v33  ;;  %v2648_v33 = vld [vmem:[%s3866_s0 + $0x258] ss:$20 sps:$4 sm:$0xff]  }
  0x3f   :  { %1425 = vmatpush1.bf16.msra.mxu0 %v3036_v34  ;;  %2289 = vmatprep.subr.bf16.mxu1 %v2835_v0 }
  0x40   :  { %2181 = vmatprep.subr.bf16.mxu0 %v2836_v39 }
  0x41   :  { %1194 = vmatmul.mubr.bf16.vlgmr.msra.gmra.mrb[0].mxu1 %v2556_v35  ;;  %v2650_v35 = vld [vmem:[%s3866_s0 + $0x284] ss:$20 sps:$4 sm:$0xff]  }
  0x42   :  { %1427 = vmatmul.mubr.bf16.vlgmr.msra.gmra.mrb[0].mxu0 %v2559_v36  ;;  %1201 = vmatprep.mubr.bf16.mxu1 %v2563_v37  ;;  %v2652_v36 = vld [vmem:[%s3866_s0 + $0x280] ss:$20 sps:$4 sm:$0xff]   ;;  %v2653_v37 = vld [vmem:[%s3866_s0 + $0x88] ss:$20 sps:$4 sm:$0xff]  }
  0x43   :  { %2182 = vmatpush3.bf16.msra.mxu0 %v2562_v38  ;;  %2305 = vmatpush1.bf16.msra.mxu1 %v2866_v2  ;;  %v2599_v2 = vld [vmem:[%s3866_s0 + $0xf8] ss:$20 sps:$4 sm:$0xff]  }
  0x44   :  { %1434 = vmatprep.mubr.bf16.mxu0 %v2565_v40  ;;  %2290 = vmatprep.subr.bf16.mxu1 %v2835_v0  ;;  %v2654_v38 = vld [vmem:[%s3866_s0 + $0x2ac] ss:$20 sps:$4 sm:$0xff]   ;;  %v2656_v40 = vld [vmem:[%s3866_s0 + $0x2a8] ss:$20 sps:$4 sm:$0xff]  }
  0x45   :  { %2183 = vmatprep.subr.bf16.mxu0 %v2836_v39 }
  0x47   :  { %2306 = vmatpush1.bf16.msra.mxu1 %v2876_v4  ;;  %2184 = vmatpush3.bf16.msra.mxu0 %v2581_v41  ;;  %v2603_v4 = vld [vmem:[%s3866_s0 + $0x124] ss:$20 sps:$4 sm:$0xff]  }
  0x48   :  { %2291 = vmatprep.subr.bf16.mxu1 %v2835_v0  ;;  %2185 = vmatprep.subr.bf16.mxu0 %v2836_v39  ;;  %v2657_v41 = vld [vmem:[%s3866_s0 + $0xb0] ss:$20 sps:$4 sm:$0xff]  }
  0x49   :  { %1202 = vmatmul.mubr.bf16.gmra.mrb[4].mxu1 %v2567_v42  ;;  %v2658_v42 = vld [vmem:[%s3866_s0 + $0x2d4] ss:$20 sps:$4 sm:$0xff]  }
  0x4a   :  { %1435 = vmatmul.mubr.bf16.gmra.mrb[4].mxu0 %v2568_v43  ;;  %1209 = vmatprep.mubr.bf16.mxu1 %v2569_v44  ;;  %v2660_v43 = vld [vmem:[%s3866_s0 + $0x2d0] ss:$20 sps:$4 sm:$0xff]   ;;  %v2661_v44 = vld [vmem:[%s3866_s0 + $0xd8] ss:$20 sps:$4 sm:$0xff]  }
  0x4b   :  { %1442 = vmatprep.mubr.bf16.mxu0 %v2571_v45  ;;  %2307 = vmatpush1.bf16.msra.mxu1 %v2887_v6  ;;  %v2606_v6 = vld [vmem:[%s3866_s0 + $0x120] ss:$20 sps:$4 sm:$0xff]   ;;  %v2662_v45 = vld [vmem:[%s3866_s0 + $0x2fc] ss:$20 sps:$4 sm:$0xff]  }
  0x4c   :  { %2292 = vmatprep.subr.bf16.mxu1 %v2835_v0  ;;  %2186 = vmatpush3.bf16.msra.mxu0 %v2600_v46  ;;  %v2664_v46 = vld [vmem:[%s3866_s0 + $0x2f8] ss:$20 sps:$4 sm:$0xff]  }
  0x4d   :  { %2187 = vmatprep.subr.bf16.mxu0 %v2836_v39 }
  0x4f   :  { %2308 = vmatpush1.bf16.msra.mxu1 %v2898_v8  ;;  %v2609_v8 = vld [vmem:[%s3866_s0 + $0x14c] ss:$20 sps:$4 sm:$0xff]  }
  0x50   :  { %2293 = vmatprep.subr.bf16.mxu1 %v2835_v0  ;;  %2188 = vmatpush3.bf16.msra.mxu0 %v2623_v47  ;;  %v2665_v47 = vld [vmem:[%s3866_s0 + $0x100] ss:$20 sps:$4 sm:$0xff]  }
  0x51   :  { %1210 = vmatmul.mubr.bf16.gmra.mrb[8].mxu1 %v2573_v48  ;;  %v2666_v48 = vld [vmem:[%s3866_s0 + $0x324] ss:$20 sps:$4 sm:$0xff]  }
  0x52   :  { %1443 = vmatmul.mubr.bf16.gmra.mrb[8].mxu0 %v2574_v49  ;;  %1217 = vmatprep.mubr.bf16.mxu1 %v2575_v50  ;;  %v2668_v49 = vld [vmem:[%s3866_s0 + $0x320] ss:$20 sps:$4 sm:$0xff]   ;;  %v2669_v50 = vld [vmem:[%s3866_s0 + $0x128] ss:$20 sps:$4 sm:$0xff]  }
  0x53   :  { %1450 = vmatprep.mubr.bf16.mxu0 %v2577_v51  ;;  %2309 = vmatpush1.bf16.msra.mxu1 %v2909_v10  ;;  %v2612_v10 = vld [vmem:[%s3866_s0 + $0x148] ss:$20 sps:$4 sm:$0xff]   ;;  %v2670_v51 = vld [vmem:[%s3866_s0 + $0x34c] ss:$20 sps:$4 sm:$0xff]  }
  0x54   :  { %2294 = vmatprep.subr.bf16.mxu1 %v2835_v0 }
  0x57   :  { %2310 = vmatpush1.bf16.msra.mxu1 %v2920_v12  ;;  %v2615_v12 = vld [vmem:[%s3866_s0 + $0x174] ss:$20 sps:$4 sm:$0xff]  }
  0x58   :  { %2295 = vmatprep.subr.bf16.mxu1 %v2835_v0 }
  0x59   :  { %1218 = vmatmul.mubr.bf16.gmra.mrb[12].mxu1 %v2579_v52  ;;  %v2672_v52 = vld [vmem:[%s3866_s0 + $0x348] ss:$20 sps:$4 sm:$0xff]  }
  0x5a   :  { %1451 = vmatmul.mubr.bf16.gmra.mrb[12].mxu0 %v2580_v53  ;;  %1225 = vmatprep.mubr.bf16.mxu1 %v2582_v54  ;;  %v2673_v53 = vld [vmem:[%s3866_s0 + $0x150] ss:$20 sps:$4 sm:$0xff]   ;;  %v2674_v54 = vld [vmem:[%s3866_s0 + $0x374] ss:$20 sps:$4 sm:$0xff]  }
  0x5b   :  { %1458 = vmatprep.mubr.bf16.mxu0 %v2584_v55  ;;  %2311 = vmatpush1.bf16.msra.mxu1 %v2931_v14  ;;  %v2619_v14 = vld [vmem:[%s3866_s0 + $0x194] ss:$20 sps:$4 sm:$0xff]   ;;  %v2676_v55 = vld [vmem:[%s3866_s0 + $0x370] ss:$20 sps:$4 sm:$0xff]  }
  0x5c   :  { %2296 = vmatprep.subr.bf16.mxu1 %v2835_v0 }
  0x5f   :  { %2312 = vmatpush1.bf16.msra.mxu1 %v2942_v16  ;;  %v2624_v16 = vld [vmem:[%s3866_s0 + $0x190] ss:$20 sps:$4 sm:$0xff]  }
  0x60   :  { %2297 = vmatprep.subr.bf16.mxu1 %v2835_v0 }
  0x61   :  { %1226 = vmatmul.mubr.bf16.gmra.mrb[16].mxu1 %v2586_v56  ;;  %v2677_v56 = vld [vmem:[%s3866_s0 + $0x178] ss:$20 sps:$4 sm:$0xff]  }
  0x62   :  { %1459 = vmatmul.mubr.bf16.gmra.mrb[16].mxu0 %v2587_v57  ;;  %1233 = vmatprep.mubr.bf16.mxu1 %v2588_v58  ;;  %v2678_v57 = vld [vmem:[%s3866_s0 + $0x39c] ss:$20 sps:$4 sm:$0xff]   ;;  %v2680_v58 = vld [vmem:[%s3866_s0 + $0x398] ss:$20 sps:$4 sm:$0xff]  }
  0x63   :  { %1466 = vmatprep.mubr.bf16.mxu0 %v2590_v59  ;;  %2313 = vmatpush1.bf16.msra.mxu1 %v2953_v18  ;;  %v2626_v18 = vld [vmem:[%s3866_s0 + $0x1bc] ss:$20 sps:$4 sm:$0xff]   ;;  %v2681_v59 = vld [vmem:[%s3866_s0 + $0x1a0] ss:$20 sps:$4 sm:$0xff]  }
  0x64   :  { %2298 = vmatprep.subr.bf16.mxu1 %v2835_v0 }
  0x67   :  { %2314 = vmatpush1.bf16.msra.mxu1 %v2970_v22  ;;  %v2632_v22 = vld [vmem:[%s3866_s0 + $0x1e4] ss:$20 sps:$4 sm:$0xff]  }
  0x68   :  { %2299 = vmatprep.subr.bf16.mxu1 %v2835_v0 }
  0x69   :  { %1234 = vmatmul.mubr.bf16.gmra.mrb[20].mxu1 %v2592_v60  ;;  %v2682_v60 = vld [vmem:[%s3866_s0 + $0x3c4] ss:$20 sps:$4 sm:$0xff]  }
  0x6a   :  { %1467 = vmatmul.mubr.bf16.gmra.mrb[20].mxu0 %v2593_v61  ;;  %1241 = vmatprep.mubr.bf16.mxu1 %v2594_v62  ;;  %v2684_v61 = vld [vmem:[%s3866_s0 + $0x3c0] ss:$20 sps:$4 sm:$0xff]   ;;  %v2685_v62 = vld [vmem:[%s3866_s0 + $0x1c8] ss:$20 sps:$4 sm:$0xff]  }
  0x6b   :  { %1474 = vmatprep.mubr.bf16.mxu0 %v2596_v63  ;;  %2315 = vmatpush1.bf16.msra.mxu1 %v2981_v24  ;;  %v2636_v24 = vld [vmem:[%s3866_s0 + $0x1e0] ss:$20 sps:$4 sm:$0xff]  }
  0x6c   :  { %2300 = vmatprep.subr.bf16.mxu1 %v2835_v0  ;;  %v2688_v63 = vld [vmem:[%s3866_s0 + $0x214] ss:$20 sps:$4 sm:$0xff]  }
  0x6f   :  { %2316 = vmatpush1.bf16.msra.mxu1 %v2992_v26  ;;  %v2638_v26 = vld [vmem:[%s3866_s0 + $0x20c] ss:$20 sps:$4 sm:$0xff]  }
  0x70   :  { %2301 = vmatprep.subr.bf16.mxu1 %v2835_v0 }
  0x71   :  { %1242 = vmatmul.mubr.bf16.gmra.mrb[24].mxu1 %v2598_v1  ;;  %v2686_v1 = vld [vmem:[%s3866_s0 + $0x210] ss:$20 sps:$4 sm:$0xff]  }
  0x72   :  { %1475 = vmatmul.mubr.bf16.gmra.mrb[24].mxu0 %v2599_v2  ;;  %1249 = vmatprep.mubr.bf16.mxu1 %v2601_v3  ;;  %v2689_v2 = vld [vmem:[%s3866_s0 + $0x1f0] ss:$20 sps:$4 sm:$0xff]  }
  0x73   :  { %1482 = vmatprep.mubr.bf16.mxu0 %v2603_v4  ;;  %2317 = vmatpush1.bf16.msra.mxu1 %v3003_v28  ;;  %v2641_v28 = vld [vmem:[%s3866_s0 + $0x10] ss:$20 sps:$4 sm:$0xff]   ;;  %v2692_v4 = vld [vmem:[%s3866_s0 + $0x238] ss:$20 sps:$4 sm:$0xff]  }
  0x74   :  { %2302 = vmatprep.subr.bf16.mxu1 %v2835_v0  ;;  %v2690_v3 = vld [vmem:[%s3866_s0 + $0x23c] ss:$20 sps:$4 sm:$0xff]  }
  0x77   :  { %2318 = vmatpush1.bf16.msra.mxu1 %v3014_v30  ;;  %v2644_v30 = vld [vmem:[%s3866_s0 + $0x230] ss:$20 sps:$4 sm:$0xff]  }
  0x78   :  { %2303 = vmatprep.subr.bf16.mxu1 %v2835_v0 }
  0x79   :  { %1250 = vmatmul.mubr.bf16.gmra.mrb[28].mxu1 %v2605_v5  ;;  %v2693_v5 = vld [vmem:[%s3866_s0 + $0x218] ss:$20 sps:$4 sm:$0xff]  }
  0x7a   :  { %1483 = vmatmul.mubr.bf16.gmra.mrb[28].mxu0 %v2606_v6  ;;  %1257 = vmatprep.mubr.bf16.mxu1 %v2607_v7  ;;  %v2694_v6 = vld [vmem:[%s3866_s0 + $0x264] ss:$20 sps:$4 sm:$0xff]  }
  0x7b   :  { %1490 = vmatprep.mubr.bf16.mxu0 %v2609_v8  ;;  %2319 = vmatpush1.bf16.msra.mxu1 %v3025_v32  ;;  %v2646_v32 = vld [vmem:[%s3866_s0 + $0x25c] ss:$20 sps:$4 sm:$0xff]  }
  0x7c   :  { %2304 = vmatprep.subr.bf16.mxu1 %v2835_v0  ;;  %v2617_v0 = vld [vmem:[%s3866_s0 + $0x168] ss:$20 sps:$4 sm:$0xff]  }
  0x7f   :  { %2320 = vmatpush1.bf16.msra.mxu1 %v3036_v34  ;;  %v2649_v34 = vld [vmem:[%s3866_s0 + $0x60] ss:$20 sps:$4 sm:$0xff]  }
  0x81   :  { %1258 = vmatmul.mubr.bf16.gmra.mrb[32].mxu1 %v2611_v9  ;;  %v2696_v9 = vld [vmem:[%s3866_s0 + $0x260] ss:$20 sps:$4 sm:$0xff]  }
  0x82   :  { %1491 = vmatmul.mubr.bf16.gmra.mrb[32].mxu0 %v2612_v10  ;;  %1265 = vmatprep.mubr.bf16.mxu1 %v2613_v11  ;;  %v2697_v10 = vld [vmem:[%s3866_s0 + $0x240] ss:$20 sps:$4 sm:$0xff]  }
  0x83   :  { %1498 = vmatprep.mubr.bf16.mxu0 %v2615_v12  ;;  %v2698_v12 = vld [vmem:[%s3866_s0 + $0x28c] ss:$20 sps:$4 sm:$0xff]  }
  0x89   :  { %1266 = vmatmul.mubr.bf16.gmra.mrb[36].mxu1 %v2617_v0 }
  0x8a   :  { %1499 = vmatmul.mubr.bf16.gmra.mrb[36].mxu0 %v2618_v13  ;;  %1273 = vmatprep.mubr.bf16.mxu1 %v2619_v14 }
  0x8b   :  { %1506 = vmatprep.mubr.bf16.mxu0 %v2621_v15  ;;  %v2700_v15 = vld [vmem:[%s3866_s0 + $0x288] ss:$20 sps:$4 sm:$0xff]  }
  0x91   :  { %1274 = vmatmul.mubr.bf16.gmra.mrb[40].mxu1 %v2624_v16  ;;  %v2701_v16 = vld [vmem:[%s3866_s0 + $0x268] ss:$20 sps:$4 sm:$0xff]  }
  0x92   :  { %1507 = vmatmul.mubr.bf16.gmra.mrb[40].mxu0 %v2625_v17  ;;  %1281 = vmatprep.mubr.bf16.mxu1 %v2626_v18  ;;  %v2702_v18 = vld [vmem:[%s3866_s0 + $0x2b4] ss:$20 sps:$4 sm:$0xff]  }
  0x93   :  { %1514 = vmatprep.mubr.bf16.mxu0 %v2628_v19 }
  0x99   :  { %1282 = vmatmul.mubr.bf16.gmra.mrb[44].mxu1 %v2630_v20 }
  0x9a   :  { %1515 = vmatmul.mubr.bf16.gmra.mrb[44].mxu0 %v2631_v21  ;;  %1289 = vmatprep.mubr.bf16.mxu1 %v2632_v22  ;;  %v2704_v22 = vld [vmem:[%s3866_s0 + $0x2b0] ss:$20 sps:$4 sm:$0xff]  }
  0x9b   :  { %1522 = vmatprep.mubr.bf16.mxu0 %v2634_v23  ;;  %v2705_v23 = vld [vmem:[%s3866_s0 + $0x290] ss:$20 sps:$4 sm:$0xff]  }
  0xa1   :  { %1290 = vmatmul.mubr.bf16.gmra.mrb[48].mxu1 %v2636_v24 }
  0xa2   :  { %1523 = vmatmul.mubr.bf16.gmra.mrb[48].mxu0 %v2637_v25  ;;  %1297 = vmatprep.mubr.bf16.mxu1 %v2638_v26  ;;  %v2706_v25 = vld [vmem:[%s3866_s0 + $0x2dc] ss:$20 sps:$4 sm:$0xff]  }
  0xa3   :  { %2189 = vmatprep.mubr.msk.bf16.mxu0 %vm2837_vm0, %v2836_v39 }
  0xa9   :  { %1298 = vmatmul.mubr.bf16.gmra.mrb[52].mxu1 %v2640_v27 }
  0xaa   :  { %2190 = vmatmul.mubr.msk.bf16.vlgmr.msra.gmra.mrb[0].mxu0 %vm1085_vm1, %v2641_v28  ;;  %1305 = vmatprep.mubr.bf16.mxu1 %v2642_v29  ;;  %v2708_v29 = vld [vmem:[%s3866_s0 + $0x2d8] ss:$20 sps:$4 sm:$0xff]  }
  0xab   :  { %2193 = vmatprep.mubr.msk.bf16.mxu0 %vm2837_vm0, %v2836_v39 }
  0xb1   :  { %1306 = vmatmul.mubr.bf16.gmra.mrb[56].mxu1 %v2644_v30  ;;  %v2709_v30 = vld [vmem:[%s3866_s0 + $0x2b8] ss:$20 sps:$4 sm:$0xff]  }
  0xb2   :  { %2194 = vmatmul.mubr.msk.bf16.gmra.mrb[4].mxu0 %vm1085_vm1, %v2645_v31  ;;  %1313 = vmatprep.mubr.bf16.mxu1 %v2646_v32  ;;  %v2710_v32 = vld [vmem:[%s3866_s0 + $0x304] ss:$20 sps:$4 sm:$0xff]  }
  0xb3   :  { %2197 = vmatprep.mubr.msk.bf16.mxu0 %vm2837_vm0, %v2836_v39 }
  0xb9   :  { %1314 = vmatmul.mubr.bf16.gmra.mrb[60].mxu1 %v2648_v33 }
  0xba   :  { %2198 = vmatmul.mubr.msk.bf16.gmra.mrb[8].mxu0 %vm1085_vm1, %v2649_v34  ;;  %1321 = vmatprep.mubr.bf16.mxu1 %v2650_v35 }
  0xbb   :  { %2201 = vmatprep.mubr.msk.bf16.mxu0 %vm2837_vm0, %v2836_v39 }
  0xc1   :  { %1322 = vmatmul.mubr.bf16.gmra.mrb[64].mxu1 %v2652_v36  ;;  %v2712_v36 = vld [vmem:[%s3866_s0 + $0x300] ss:$20 sps:$4 sm:$0xff]  }
  0xc2   :  { %2202 = vmatmul.mubr.msk.bf16.gmra.mrb[12].mxu0 %vm1085_vm1, %v2653_v37  ;;  %1329 = vmatprep.mubr.bf16.mxu1 %v2654_v38  ;;  %v2713_v37 = vld [vmem:[%s3866_s0 + $0x2e0] ss:$20 sps:$4 sm:$0xff]  }
  0xc3   :  { %2205 = vmatprep.mubr.msk.bf16.mxu0 %vm2837_vm0, %v2836_v39 }
  0xc9   :  { %1330 = vmatmul.mubr.bf16.gmra.mrb[68].mxu1 %v2656_v40  ;;  %v2714_v40 = vld [vmem:[%s3866_s0 + $0x32c] ss:$20 sps:$4 sm:$0xff]  }
  0xca   :  { %2206 = vmatmul.mubr.msk.bf16.gmra.mrb[16].mxu0 %vm1085_vm1, %v2657_v41  ;;  %1337 = vmatprep.mubr.bf16.mxu1 %v2658_v42 }
  0xcb   :  { %2209 = vmatprep.mubr.msk.bf16.mxu0 %vm2837_vm0, %v2836_v39 }
  0xd1   :  { %1338 = vmatmul.mubr.bf16.gmra.mrb[72].mxu1 %v2660_v43 }
  0xd2   :  { %2210 = vmatmul.mubr.msk.bf16.gmra.mrb[20].mxu0 %vm1085_vm1, %v2661_v44  ;;  %1345 = vmatprep.mubr.bf16.mxu1 %v2662_v45  ;;  %v2716_v44 = vld [vmem:[%s3866_s0 + $0x328] ss:$20 sps:$4 sm:$0xff]  }
  0xd3   :  { %2213 = vmatprep.mubr.msk.bf16.mxu0 %vm2837_vm0, %v2836_v39  ;;  %v2717_v45 = vld [vmem:[%s3866_s0 + $0x308] ss:$20 sps:$4 sm:$0xff]  }
  0xd9   :  { %1346 = vmatmul.mubr.bf16.gmra.mrb[76].mxu1 %v2664_v46 }
  0xda   :  { %2214 = vmatmul.mubr.msk.bf16.gmra.mrb[24].mxu0 %vm1085_vm1, %v2665_v47  ;;  %1353 = vmatprep.mubr.bf16.mxu1 %v2666_v48  ;;  %v2718_v47 = vld [vmem:[%s3866_s0 + $0x354] ss:$20 sps:$4 sm:$0xff]  }
  0xdb   :  { %2217 = vmatprep.mubr.msk.bf16.mxu0 %vm2837_vm0, %v2836_v39 }
  0xe1   :  { %1354 = vmatmul.mubr.bf16.gmra.mrb[80].mxu1 %v2668_v49 }
  0xe2   :  { %2218 = vmatmul.mubr.msk.bf16.gmra.mrb[28].mxu0 %vm1085_vm1, %v2669_v50  ;;  %1361 = vmatprep.mubr.bf16.mxu1 %v2670_v51  ;;  %v2720_v51 = vld [vmem:[%s3866_s0 + $0x350] ss:$20 sps:$4 sm:$0xff]  }
  0xe3   :  { %2221 = vmatprep.mubr.msk.bf16.mxu0 %vm2837_vm0, %v2836_v39 }
  0xe9   :  { %1362 = vmatmul.mubr.bf16.gmra.mrb[84].mxu1 %v2672_v52  ;;  %v2721_v52 = vld [vmem:[%s3866_s0 + $0x330] ss:$20 sps:$4 sm:$0xff]  }
  0xea   :  { %2222 = vmatmul.mubr.msk.bf16.gmra.mrb[32].mxu0 %vm1085_vm1, %v2673_v53  ;;  %1369 = vmatprep.mubr.bf16.mxu1 %v2674_v54  ;;  %v2722_v54 = vld [vmem:[%s3866_s0 + $0x37c] ss:$20 sps:$4 sm:$0xff]  }
  0xeb   :  { %2225 = vmatprep.mubr.msk.bf16.mxu0 %vm2837_vm0, %v2836_v39 }
  0xf1   :  { %1370 = vmatmul.mubr.bf16.gmra.mrb[88].mxu1 %v2676_v55 }
  0xf2   :  { %2226 = vmatmul.mubr.msk.bf16.gmra.mrb[36].mxu0 %vm1085_vm1, %v2677_v56  ;;  %1377 = vmatprep.mubr.bf16.mxu1 %v2678_v57 }
  0xf3   :  { %2229 = vmatprep.mubr.msk.bf16.mxu0 %vm2837_vm0, %v2836_v39 }
  0xf9   :  { %1378 = vmatmul.mubr.bf16.gmra.mrb[92].mxu1 %v2680_v58  ;;  %v2724_v58 = vld [vmem:[%s3866_s0 + $0x378] ss:$20 sps:$4 sm:$0xff]  }
  0xfa   :  { %2230 = vmatmul.mubr.msk.bf16.gmra.mrb[40].mxu0 %vm1085_vm1, %v2681_v59  ;;  %1385 = vmatprep.mubr.bf16.mxu1 %v2682_v60  ;;  %v2725_v59 = vld [vmem:[%s3866_s0 + $0x358] ss:$20 sps:$4 sm:$0xff]  }
  0xfb   :  { %2233 = vmatprep.mubr.msk.bf16.mxu0 %vm2837_vm0, %v2836_v39 }
 0x101   :  { %1386 = vmatmul.mubr.bf16.gmra.mrb[96].mxu1 %v2684_v61  ;;  %v2726_v61 = vld [vmem:[%s3866_s0 + $0x3a4] ss:$20 sps:$4 sm:$0xff]  }
 0x102   :  { %2234 = vmatmul.mubr.msk.bf16.gmra.mrb[44].mxu0 %vm1085_vm1, %v2685_v62  ;;  %1530 = vmatprep.mubr.bf16.mxu1 %v2688_v63 }
 0x103   :  { %2237 = vmatprep.mubr.msk.bf16.mxu0 %vm2837_vm0, %v2836_v39 }
 0x109   :  { %1531 = vmatmul.mubr.bf16.vlgmr.msra.gmra.mrb[52].mxu1 %v2686_v1 }
 0x10a   :  { %2238 = vmatmul.mubr.msk.bf16.gmra.mrb[48].mxu0 %vm1085_vm1, %v2689_v2  ;;  %1538 = vmatprep.mubr.bf16.mxu1 %v2690_v3  ;;  %v2728_v2 = vld [vmem:[%s3866_s0 + $0x3a0] ss:$20 sps:$4 sm:$0xff]  }
 0x10b   :  { %2241 = vmatprep.mubr.msk.bf16.mxu0 %vm2837_vm0, %v2836_v39  ;;  %v2729_v3 = vld [vmem:[%s3866_s0 + $0x380] ss:$20 sps:$4 sm:$0xff]  }
 0x111   :  { %1539 = vmatmul.mubr.bf16.gmra.mrb[56].mxu1 %v2692_v4 }
 0x112   :  { %2242 = vmatmul.mubr.msk.bf16.gmra.mrb[52].mxu0 %vm1085_vm1, %v2693_v5  ;;  %1546 = vmatprep.mubr.bf16.mxu1 %v2694_v6  ;;  %v2730_v5 = vld [vmem:[%s3866_s0 + $0x3cc] ss:$20 sps:$4 sm:$0xff]  }
 0x113   :  { %2245 = vmatprep.mubr.msk.bf16.mxu0 %vm2837_vm0, %v2836_v39 }
 0x114   :  { %v3411_v7 = vpop.f32.mrb[0].mxu1 }
 0x115   :  { %v1197_v8 = vpop.f32.mrb[1].mxu1 }
 0x116   :  { %v3419_v11 = vpop.f32.mrb[2].mxu1 }
 0x117   :  { %v1200_v0 = vpop.f32.mrb[3].mxu1 }
 0x119   :  { %1547 = vmatmul.mubr.bf16.gmra.mrb[60].mxu1 %v2696_v9 }
 0x11a   :  { %2246 = vmatmul.mubr.msk.bf16.gmra.mrb[56].mxu0 %vm1085_vm1, %v2697_v10  ;;  %1554 = vmatprep.mubr.bf16.mxu1 %v2698_v12  ;;  %v2732_v10 = vld [vmem:[%s3866_s0 + $0x3c8] ss:$20 sps:$4 sm:$0xff]  }
 0x11b   :  { %2249 = vmatprep.mubr.msk.bf16.mxu0 %vm2837_vm0, %v2836_v39  ;;  %v2733_v12 = vld [vmem:[%s3866_s0 + $0x3a8] ss:$20 sps:$4 sm:$0xff]  }
 0x11c   :  { %v3427_v13 = vpop.f32.mrb[4].mxu1 }
 0x11d   :  { %v1205_v14 = vpop.f32.mrb[5].mxu1 }
 0x11e   :  { %v3435_v17 = vpop.f32.mrb[6].mxu1 }
 0x11f   :  { %v1208_v19 = vpop.f32.mrb[7].mxu1 }
 0x121   :  { %1555 = vmatmul.mubr.bf16.gmra.mrb[64].mxu1 %v2700_v15 }
 0x122   :  { %2250 = vmatmul.mubr.msk.bf16.gmra.mrb[60].mxu0 %vm1085_vm1, %v2701_v16  ;;  %1562 = vmatprep.mubr.bf16.mxu1 %v2702_v18  ;;  %v2734_v18 = vld [vmem:[%s3866_s0 + $0x3d0] ss:$20 sps:$4 sm:$0xff]  }
 0x123   :  { %2253 = vmatprep.mubr.msk.bf16.mxu0 %vm2837_vm0, %v2836_v39 }
 0x124   :  { %v3443_v20 = vpop.f32.mrb[8].mxu1 }
 0x125   :  { %v1213_v21 = vpop.f32.mrb[9].mxu1 }
 0x126   :  { %v3451_v24 = vpop.f32.mrb[10].mxu1 }
 0x127   :  { %v1216_v26 = vpop.f32.mrb[11].mxu1 }
 0x129   :  { %1563 = vmatmul.mubr.bf16.gmra.mrb[68].mxu1 %v2704_v22 }
 0x12a   :  { %2254 = vmatmul.mubr.msk.bf16.gmra.mrb[64].mxu0 %vm1085_vm1, %v2705_v23  ;;  %1570 = vmatprep.mubr.bf16.mxu1 %v2706_v25 }
 0x12b   :  { %2257 = vmatprep.mubr.msk.bf16.mxu0 %vm2837_vm0, %v2836_v39 }
 0x12c   :  { %v3459_v27 = vpop.f32.mrb[12].mxu1 }
 0x12d   :  { %v1221_v28 = vpop.f32.mrb[13].mxu1 }
 0x12e   :  { %v3467_v31 = vpop.f32.mrb[14].mxu1 }
 0x12f   :  { %v1224_v33 = vpop.f32.mrb[15].mxu1 }
 0x131   :  { %1571 = vmatmul.mubr.bf16.gmra.mrb[72].mxu1 %v2708_v29 }
 0x132   :  { %2258 = vmatmul.mubr.msk.bf16.gmra.mrb[68].mxu0 %vm1085_vm1, %v2709_v30  ;;  %1578 = vmatprep.mubr.bf16.mxu1 %v2710_v32  ;;  %v3587_v32 = vld [vmem:[%s3867_s2] ss:$0 sm:$0xff] }
 0x133   :  { %2261 = vmatprep.mubr.msk.bf16.mxu0 %vm2837_vm0, %v2836_v39  ;;  %v1196_v33 = vadd.f32 %v3587_v32, %v3411_v7 }
 0x134   :  { %v3475_v34 = vpop.f32.mrb[16].mxu1 }
 0x135   :  { %v1229_v35 = vpop.f32.mrb[17].mxu1 }
 0x136   :  { %v3483_v38 = vpop.f32.mrb[18].mxu1 }
 0x137   :  { %v1232_v41 = vpop.f32.mrb[19].mxu1 }
 0x139   :  { %1579 = vmatmul.mubr.bf16.gmra.mrb[76].mxu1 %v2712_v36  ;;  %v1199_v36 = vadd.f32 %v3587_v32, %v3419_v11 }
 0x13a   :  { %2262 = vmatmul.mubr.msk.bf16.gmra.mrb[72].mxu0 %vm1085_vm1, %v2713_v37  ;;  %1586 = vmatprep.mubr.bf16.mxu1 %v2714_v40 }
 0x13b   :  { %2265 = vmatprep.mubr.msk.bf16.mxu0 %vm2837_vm0, %v2836_v39 }
 0x13c   :  { %v3491_v42 = vpop.f32.mrb[20].mxu1 }
 0x13d   :  { %v1237_v43 = vpop.f32.mrb[21].mxu1 }
 0x13e   :  { %v3499_v46 = vpop.f32.mrb[22].mxu1 }
 0x13f   :  { %v1240_v48 = vpop.f32.mrb[23].mxu1 }
 0x140   :  { %v1207_v48 = vadd.f32 %v3587_v32, %v3435_v17 }
 0x141   :  { %1587 = vmatmul.mubr.bf16.gmra.mrb[80].mxu1 %v2716_v44 }
 0x142   :  { %2266 = vmatmul.mubr.msk.bf16.gmra.mrb[76].mxu0 %vm1085_vm1, %v2717_v45  ;;  %1594 = vmatprep.mubr.bf16.mxu1 %v2718_v47  ;;  %v1204_v45 = vadd.f32 %v3587_v32, %v3427_v13  ;;  %v1212_v13 = vadd.f32 %v3587_v32, %v3443_v20 }
 0x143   :  { %2269 = vmatprep.mubr.msk.bf16.mxu0 %vm2837_vm0, %v2836_v39 }
 0x144   :  { %v3507_v49 = vpop.f32.mrb[24].mxu1 }
 0x145   :  { %v1245_v50 = vpop.f32.mrb[25].mxu1 }
 0x146   :  { %v3515_v53 = vpop.f32.mrb[26].mxu1 }
 0x147   :  { %v1248_v55 = vpop.f32.mrb[27].mxu1 }
 0x149   :  { %1595 = vmatmul.mubr.bf16.gmra.mrb[84].mxu1 %v2720_v51 }
 0x14a   :  { %2270 = vmatmul.mubr.msk.bf16.gmra.mrb[80].mxu0 %vm1085_vm1, %v2721_v52  ;;  %1602 = vmatprep.mubr.bf16.mxu1 %v2722_v54 }
 0x14b   :  { %2273 = vmatprep.mubr.msk.bf16.mxu0 %vm2837_vm0, %v2836_v39 }
 0x14c   :  { %v3523_v56 = vpop.f32.mrb[28].mxu1 }
 0x14d   :  { %v1253_v57 = vpop.f32.mrb[29].mxu1 }
 0x14e   :  { %v3531_v60 = vpop.f32.mrb[30].mxu1  ;;  %v1215_v57 = vadd.f32 %v3587_v32, %v3451_v24 }
 0x14f   :  { %v1256_v62 = vpop.f32.mrb[31].mxu1 }
 0x151   :  { %1603 = vmatmul.mubr.bf16.gmra.mrb[88].mxu1 %v2724_v58 }
 0x152   :  { %2274 = vmatmul.mubr.msk.bf16.gmra.mrb[84].mxu0 %vm1085_vm1, %v2725_v59  ;;  %1610 = vmatprep.mubr.bf16.mxu1 %v2726_v61 }
 0x153   :  { %2277 = vmatprep.mubr.msk.bf16.mxu0 %vm2837_vm0, %v2836_v39 }
 0x154   :  { %v3539_v63 = vpop.f32.mrb[32].mxu1 }
 0x155   :  { %v1261_v1 = vpop.f32.mrb[33].mxu1 }
 0x156   :  { %v3547_v4 = vpop.f32.mrb[34].mxu1 }
 0x157   :  { %v1264_v6 = vpop.f32.mrb[35].mxu1 }
 0x159   :  { %1611 = vmatmul.mubr.bf16.gmra.mrb[92].mxu1 %v2728_v2 }
 0x15a   :  { %2278 = vmatmul.mubr.msk.bf16.gmra.mrb[88].mxu0 %vm1085_vm1, %v2729_v3  ;;  %1618 = vmatprep.mubr.bf16.mxu1 %v2730_v5  ;;  %v1220_v3 = vadd.f32 %v3587_v32, %v3459_v27  ;;  %v1223_v5 = vadd.f32 %v3587_v32, %v3467_v31 }
 0x15b   :  { %2281 = vmatprep.mubr.msk.bf16.mxu0 %vm2837_vm0, %v2836_v39 }
 0x15c   :  { %v3555_v8 = vpop.f32.mrb[36].mxu1 }
 0x15d   :  { %v1269_v9 = vpop.f32.mrb[37].mxu1 }
 0x15e   :  { %v3563_v0 = vpop.f32.mrb[38].mxu1 }
 0x15f   :  { %v1272_v14 = vpop.f32.mrb[39].mxu1 }
 0x161   :  { %1619 = vmatmul.mubr.bf16.gmra.mrb[96].mxu1 %v2732_v10 }
 0x162   :  { %2282 = vmatmul.mubr.msk.bf16.gmra.mrb[92].mxu0 %vm1085_vm1, %v2733_v12 }
 0x163   :  { %2285 = vmatprep.mubr.msk.bf16.mxu0 %vm2837_vm0, %v2836_v39 }
 0x164   :  { %v3568_v15 = vpop.f32.mrb[40].mxu1 }
 0x165   :  { %v1277_v16 = vpop.f32.mrb[41].mxu1 }
 0x166   :  { %v3573_v19 = vpop.f32.mrb[42].mxu1 }
 0x167   :  { %v1280_v21 = vpop.f32.mrb[43].mxu1 }
 0x168   :  { %v1231_v21 = vadd.f32 %v3587_v32, %v3483_v38 }
 0x16a   :  { %2286 = vmatmul.mubr.msk.bf16.gmra.mrb[96].mxu0 %vm1085_vm1, %v2734_v18  ;;  %v1228_v18 = vadd.f32 %v3587_v32, %v3475_v34 }
 0x16c   :  { %v3576_v22 = vpop.f32.mrb[44].mxu1 }
 0x16d   :  { %v1285_v23 = vpop.f32.mrb[45].mxu1 }
 0x16e   :  { %v3578_v25 = vpop.f32.mrb[46].mxu1 }
 0x16f   :  { %v1288_v26 = vpop.f32.mrb[47].mxu1 }
 0x174   :  { %v3580_v28 = vpop.f32.mrb[48].mxu1 }
 0x175   :  { %v1293_v39 = vpop.f32.mrb[49].mxu1 }
 0x176   :  { %v3582_v29 = vpop.f32.mrb[50].mxu1 }
 0x177   :  { %v1296_v30 = vpop.f32.mrb[51].mxu1 }
 0x17d   :  { %v1661_v35 = vpop.f32.mrb[0].mxu0 }
 0x17e   :  { %v2322_v37 = vadd.f32 %v1661_v35, %v1196_v33  ;;  %v2191_v40 = vpop.f32.mrb[1].mxu0 }
 0x17f   :  { %v1664_v41 = vpop.f32.mrb[2].mxu0 }
 0x180   :  { %2735 = vtanh.f32 %v2322_v37  ;;  %v2324_v43 = vadd.f32 %v1664_v41, %v1199_v36  ;;  %v2192_v44 = vpop.f32.mrb[3].mxu0  ;;  %v1236_v36 = vadd.f32 %v3587_v32, %v3491_v42  ;;  %v1239_v37 = vadd.f32 %v3587_v32, %v3499_v46 }
 0x182   :  { %2737 = vtanh.f32 %v2324_v43 }
 0x185   :  { %v1669_v47 = vpop.f32.mrb[4].mxu0 }
 0x186   :  { %v2326_v50 = vadd.f32 %v1669_v47, %v1204_v45  ;;  %v2195_v7 = vpop.f32.mrb[5].mxu0 }
 0x187   :  { %v1672_v51 = vpop.f32.mrb[6].mxu0 }
 0x188   :  { %2739 = vtanh.f32 %v2326_v50  ;;  %v2328_v11 = vadd.f32 %v1672_v51, %v1207_v48  ;;  %v2196_v52 = vpop.f32.mrb[7].mxu0  ;;  %v1244_v48 = vadd.f32 %v3587_v32, %v3507_v49  ;;  %v1247_v50 = vadd.f32 %v3587_v32, %v3515_v53 }
 0x18a   :  { %v2736_v54 = vpop.eup %2735  ;;  %2741 = vtanh.f32 %v2328_v11 }
 0x18b   :  { %1911 = vst.msk [vmem:[%s3868_s3] sm:$0xff] %vm1910_vm2, %v2736_v54 }
 0x18c   :  { %v2738_v55 = vpop.eup %2737 }
 0x18d   :  { %1912 = vst.msk [vmem:[%s3868_s3 + $0x8] sm:$0xff] %vm1910_vm2, %v2738_v55  ;;  %v1677_v17 = vpop.f32.mrb[8].mxu0 }
 0x18e   :  { %v2330_v58 = vadd.f32 %v1677_v17, %v1212_v13  ;;  %v2199_v59 = vpop.f32.mrb[9].mxu0  ;;  %v1252_v13 = vadd.f32 %v3587_v32, %v3523_v56  ;;  %v1255_v17 = vadd.f32 %v3587_v32, %v3531_v60 }
 0x18f   :  { %v1680_v61 = vpop.f32.mrb[10].mxu0 }
 0x190   :  { %2743 = vtanh.f32 %v2330_v58  ;;  %v2332_v62 = vadd.f32 %v1680_v61, %v1215_v57  ;;  %v2200_v1 = vpop.f32.mrb[11].mxu0 }
 0x192   :  { %v2740_v2 = vpop.eup %2739  ;;  %2745 = vtanh.f32 %v2332_v62 }
 0x193   :  { %1913 = vst.msk [vmem:[%s3868_s3 + $0x10] sm:$0xff] %vm1910_vm2, %v2740_v2  ;;  %v1260_v2 = vadd.f32 %v3587_v32, %v3539_v63 }
 0x194   :  { %v2742_v20 = vpop.eup %2741 }
 0x195   :  { %1914 = vst.msk [vmem:[%s3868_s3 + $0x18] sm:$0xff] %vm1910_vm2, %v2742_v20  ;;  %v1685_v24 = vpop.f32.mrb[12].mxu0  ;;  %v1263_v20 = vadd.f32 %v3587_v32, %v3547_v4 }
 0x196   :  { %v2334_v6 = vadd.f32 %v1685_v24, %v1220_v3  ;;  %v2203_v9 = vpop.f32.mrb[13].mxu0 }
 0x197   :  { %v1688_v10 = vpop.f32.mrb[14].mxu0 }
 0x198   :  { %2747 = vtanh.f32 %v2334_v6  ;;  %v2336_v12 = vadd.f32 %v1688_v10, %v1223_v5  ;;  %v2204_v14 = vpop.f32.mrb[15].mxu0 }
 0x199   :  { %v1271_v14 = vadd.f32 %v3587_v32, %v3563_v0 }
 0x19a   :  { %v2744_v16 = vpop.eup %2743  ;;  %2749 = vtanh.f32 %v2336_v12  ;;  %v1268_v12 = vadd.f32 %v3587_v32, %v3555_v8 }
 0x19b   :  { %1915 = vst.msk [vmem:[%s3868_s3 + $0x20] sm:$0xff] %vm1910_vm2, %v2744_v16 }
 0x19c   :  { %v2746_v27 = vpop.eup %2745 }
 0x19d   :  { %1916 = vst.msk [vmem:[%s3868_s3 + $0x28] sm:$0xff] %vm1910_vm2, %v2746_v27  ;;  %v1693_v31 = vpop.f32.mrb[16].mxu0 }
 0x19e   :  { %v2338_v23 = vadd.f32 %v1693_v31, %v1228_v18  ;;  %v2207_v26 = vpop.f32.mrb[17].mxu0 }
 0x19f   :  { %v1696_v39 = vpop.f32.mrb[18].mxu0  ;;  %v1276_v26 = vadd.f32 %v3587_v32, %v3568_v15 }
 0x1a0   :  { %2751 = vtanh.f32 %v2338_v23  ;;  %v2340_v30 = vadd.f32 %v1696_v39, %v1231_v21  ;;  %v2208_v33 = vpop.f32.mrb[19].mxu0  ;;  %v1279_v39 = vadd.f32 %v3587_v32, %v3573_v19 }
 0x1a2   :  { %v2748_v35 = vpop.eup %2747  ;;  %2753 = vtanh.f32 %v2340_v30 }
 0x1a3   :  { %1917 = vst.msk [vmem:[%s3868_s3 + $0x30] sm:$0xff] %vm1910_vm2, %v2748_v35 }
 0x1a4   :  { %v2750_v34 = vpop.eup %2749 }
 0x1a5   :  { %1918 = vst.msk [vmem:[%s3868_s3 + $0x38] sm:$0xff] %vm1910_vm2, %v2750_v34  ;;  %v1701_v38 = vpop.f32.mrb[20].mxu0 }
 0x1a6   :  { %v2342_v40 = vadd.f32 %v1701_v38, %v1236_v36  ;;  %v2211_v41 = vpop.f32.mrb[21].mxu0 }
 0x1a7   :  { %v1704_v43 = vpop.f32.mrb[22].mxu0 }
 0x1a8   :  { %2755 = vtanh.f32 %v2342_v40  ;;  %v2344_v44 = vadd.f32 %v1704_v43, %v1239_v37  ;;  %v2212_v45 = vpop.f32.mrb[23].mxu0  ;;  %v1284_v37 = vadd.f32 %v3587_v32, %v3576_v22  ;;  %v1287_v40 = vadd.f32 %v3587_v32, %v3578_v25 }
 0x1aa   :  { %v2752_v47 = vpop.eup %2751  ;;  %2757 = vtanh.f32 %v2344_v44 }
 0x1ab   :  { %1919 = vst.msk [vmem:[%s3868_s3 + $0x40] sm:$0xff] %vm1910_vm2, %v2752_v47 }
 0x1ac   :  { %v2754_v42 = vpop.eup %2753 }
 0x1ad   :  { %1920 = vst.msk [vmem:[%s3868_s3 + $0x48] sm:$0xff] %vm1910_vm2, %v2754_v42  ;;  %v1709_v46 = vpop.f32.mrb[24].mxu0 }
 0x1ae   :  { %v2346_v7 = vadd.f32 %v1709_v46, %v1244_v48  ;;  %v2215_v51 = vpop.f32.mrb[25].mxu0  ;;  %v1292_v48 = vadd.f32 %v3587_v32, %v3580_v28 }
 0x1af   :  { %v1712_v11 = vpop.f32.mrb[26].mxu0 }
 0x1b0   :  { %2759 = vtanh.f32 %v2346_v7  ;;  %v2348_v52 = vadd.f32 %v1712_v11, %v1247_v50  ;;  %v2216_v54 = vpop.f32.mrb[27].mxu0  ;;  %v1295_v7 = vadd.f32 %v3587_v32, %v3582_v29 }
 0x1b2   :  { %v2756_v55 = vpop.eup %2755  ;;  %2761 = vtanh.f32 %v2348_v52 }
 0x1b3   :  { %1921 = vst.msk [vmem:[%s3868_s3 + $0x50] sm:$0xff] %vm1910_vm2, %v2756_v55 }
 0x1b4   :  { %v2758_v49 = vpop.eup %2757 }
 0x1b5   :  { %1922 = vst.msk [vmem:[%s3868_s3 + $0x58] sm:$0xff] %vm1910_vm2, %v2758_v49  ;;  %v1717_v53 = vpop.f32.mrb[28].mxu0 }
 0x1b6   :  { %v2350_v57 = vadd.f32 %v1717_v53, %v1252_v13  ;;  %v2219_v58 = vpop.f32.mrb[29].mxu0 }
 0x1b7   :  { %v1720_v59 = vpop.f32.mrb[30].mxu0 }
 0x1b8   :  { %2763 = vtanh.f32 %v2350_v57  ;;  %v2352_v61 = vadd.f32 %v1720_v59, %v1255_v17  ;;  %v2220_v62 = vpop.f32.mrb[31].mxu0 }
 0x1ba   :  { %v2760_v1 = vpop.eup %2759  ;;  %2765 = vtanh.f32 %v2352_v61 }
 0x1bb   :  { %1923 = vst.msk [vmem:[%s3868_s3 + $0x60] sm:$0xff] %vm1910_vm2, %v2760_v1 }
 0x1bc   :  { %v2762_v56 = vpop.eup %2761 }
 0x1bd   :  { %1924 = vst.msk [vmem:[%s3868_s3 + $0x68] sm:$0xff] %vm1910_vm2, %v2762_v56  ;;  %v1725_v60 = vpop.f32.mrb[32].mxu0 }
 0x1be   :  { %v2354_v3 = vadd.f32 %v1725_v60, %v1260_v2  ;;  %v2223_v24 = vpop.f32.mrb[33].mxu0 }
 0x1bf   :  { %v1728_v5 = vpop.f32.mrb[34].mxu0 }
 0x1c0   :  { %2767 = vtanh.f32 %v2354_v3  ;;  %v2356_v6 = vadd.f32 %v1728_v5, %v1263_v20  ;;  %v2224_v9 = vpop.f32.mrb[35].mxu0 }
 0x1c2   :  { %v2764_v10 = vpop.eup %2763  ;;  %2769 = vtanh.f32 %v2356_v6 }
 0x1c3   :  { %1925 = vst.msk [vmem:[%s3868_s3 + $0x70] sm:$0xff] %vm1910_vm2, %v2764_v10 }
 0x1c4   :  { %v2766_v63 = vpop.eup %2765 }
 0x1c5   :  { %1926 = vst.msk [vmem:[%s3868_s3 + $0x78] sm:$0xff] %vm1910_vm2, %v2766_v63  ;;  %v1733_v4 = vpop.f32.mrb[36].mxu0 }
 0x1c6   :  { %v2358_v16 = vadd.f32 %v1733_v4, %v1268_v12  ;;  %v2227_v27 = vpop.f32.mrb[37].mxu0 }
 0x1c7   :  { %v1736_v18 = vpop.f32.mrb[38].mxu0 }
 0x1c8   :  { %2771 = vtanh.f32 %v2358_v16  ;;  %v2360_v31 = vadd.f32 %v1736_v18, %v1271_v14  ;;  %v2228_v21 = vpop.f32.mrb[39].mxu0 }
 0x1ca   :  { %v2768_v23 = vpop.eup %2767  ;;  %2773 = vtanh.f32 %v2360_v31 }
 0x1cb   :  { %1927 = vst.msk [vmem:[%s3868_s3 + $0x80] sm:$0xff] %vm1910_vm2, %v2768_v23 }
 0x1cc   :  { %v2770_v8 = vpop.eup %2769 }
 0x1cd   :  { %1928 = vst.msk [vmem:[%s3868_s3 + $0x88] sm:$0xff] %vm1910_vm2, %v2770_v8  ;;  %v1741_v0 = vpop.f32.mrb[40].mxu0 }
 0x1ce   :  { %v2362_v30 = vadd.f32 %v1741_v0, %v1276_v26  ;;  %v2231_v33 = vpop.f32.mrb[41].mxu0 }
 0x1cf   :  { %v1744_v35 = vpop.f32.mrb[42].mxu0 }
 0x1d0   :  { %2775 = vtanh.f32 %v2362_v30  ;;  %v2364_v34 = vadd.f32 %v1744_v35, %v1279_v39  ;;  %v2232_v36 = vpop.f32.mrb[43].mxu0 }
 0x1d2   :  { %v2772_v38 = vpop.eup %2771  ;;  %2777 = vtanh.f32 %v2364_v34 }
 0x1d3   :  { %1929 = vst.msk [vmem:[%s3868_s3 + $0x90] sm:$0xff] %vm1910_vm2, %v2772_v38 }
 0x1d4   :  { %v2774_v15 = vpop.eup %2773 }
 0x1d5   :  { %1930 = vst.msk [vmem:[%s3868_s3 + $0x98] sm:$0xff] %vm1910_vm2, %v2774_v15  ;;  %v1749_v19 = vpop.f32.mrb[44].mxu0 }
 0x1d6   :  { %v2366_v41 = vadd.f32 %v1749_v19, %v1284_v37  ;;  %v2235_v43 = vpop.f32.mrb[45].mxu0 }
 0x1d7   :  { %v1752_v44 = vpop.f32.mrb[46].mxu0 }
 0x1d8   :  { %2779 = vtanh.f32 %v2366_v41  ;;  %v2368_v45 = vadd.f32 %v1752_v44, %v1287_v40  ;;  %v2236_v47 = vpop.f32.mrb[47].mxu0 }
 0x1da   :  { %v2776_v42 = vpop.eup %2775  ;;  %2781 = vtanh.f32 %v2368_v45 }
 0x1db   :  { %1931 = vst.msk [vmem:[%s3868_s3 + $0xa0] sm:$0xff] %vm1910_vm2, %v2776_v42 }
 0x1dc   :  { %v2778_v22 = vpop.eup %2777  ;;  %v1532_v46 = vpop.f32.mrb[52].mxu1 }
 0x1dd   :  { %1932 = vst.msk [vmem:[%s3868_s3 + $0xa8] sm:$0xff] %vm1910_vm2, %v2778_v22  ;;  %v1757_v25 = vpop.f32.mrb[48].mxu0  ;;  %v1534_v50 = vpop.f32.mrb[53].mxu1  ;;  %v2373_v17 = vadd.f32 %v3587_v32, %v1532_v46 }
 0x1de   :  { %v2370_v51 = vadd.f32 %v1757_v25, %v1292_v48  ;;  %v2239_v11 = vpop.f32.mrb[49].mxu0  ;;  %v1535_v52 = vpop.f32.mrb[54].mxu1 }
 0x1df   :  { %v1760_v54 = vpop.f32.mrb[50].mxu0  ;;  %v1537_v55 = vpop.f32.mrb[55].mxu1  ;;  %v2375_v59 = vadd.f32 %v3587_v32, %v1535_v52 }
 0x1e0   :  { %2783 = vtanh.f32 %v2370_v51  ;;  %v2372_v49 = vadd.f32 %v1760_v54, %v1295_v7  ;;  %v2240_v13 = vpop.f32.mrb[51].mxu0 }
 0x1e2   :  { %v2780_v28 = vpop.eup %2779  ;;  %2785 = vtanh.f32 %v2372_v49 }
 0x1e3   :  { %1933 = vst.msk [vmem:[%s3868_s3 + $0xb0] sm:$0xff] %vm1910_vm2, %v2780_v28 }
 0x1e4   :  { %v2782_v53 = vpop.eup %2781  ;;  %v1540_v57 = vpop.f32.mrb[56].mxu1 }
 0x1e5   :  { %1934 = vst.msk [vmem:[%s3868_s3 + $0xb8] sm:$0xff] %vm1910_vm2, %v2782_v53  ;;  %v1765_v29 = vpop.f32.mrb[52].mxu0  ;;  %v1542_v58 = vpop.f32.mrb[57].mxu1  ;;  %v2377_v5 = vadd.f32 %v3587_v32, %v1540_v57 }
 0x1e6   :  { %v2374_v61 = vadd.f32 %v2373_v17, %v1765_v29  ;;  %v2243_v62 = vpop.f32.mrb[53].mxu0  ;;  %v1543_v1 = vpop.f32.mrb[58].mxu1 }
 0x1e7   :  { %v1768_v56 = vpop.f32.mrb[54].mxu0  ;;  %v1545_v2 = vpop.f32.mrb[59].mxu1  ;;  %v2379_v63 = vadd.f32 %v3587_v32, %v1543_v1 }
 0x1e8   :  { %2787 = vtanh.f32 %v2374_v61  ;;  %v2376_v60 = vadd.f32 %v2375_v59, %v1768_v56  ;;  %v2244_v20 = vpop.f32.mrb[55].mxu0 }
 0x1ea   :  { %v2784_v3 = vpop.eup %2783  ;;  %2789 = vtanh.f32 %v2376_v60 }
 0x1eb   :  { %1935 = vst.msk [vmem:[%s3868_s3 + $0xc0] sm:$0xff] %vm1910_vm2, %v2784_v3 }
 0x1ec   :  { %v2786_v24 = vpop.eup %2785  ;;  %v1548_v6 = vpop.f32.mrb[60].mxu1 }
 0x1ed   :  { %1936 = vst.msk [vmem:[%s3868_s3 + $0xc8] sm:$0xff] %vm1910_vm2, %v2786_v24  ;;  %v1773_v9 = vpop.f32.mrb[56].mxu0  ;;  %v1550_v10 = vpop.f32.mrb[61].mxu1  ;;  %v2381_v8 = vadd.f32 %v3587_v32, %v1548_v6 }
 0x1ee   :  { %v2378_v12 = vadd.f32 %v2377_v5, %v1773_v9  ;;  %v2247_v4 = vpop.f32.mrb[57].mxu0  ;;  %v1551_v14 = vpop.f32.mrb[62].mxu1 }
 0x1ef   :  { %v1776_v16 = vpop.f32.mrb[58].mxu0  ;;  %v1553_v27 = vpop.f32.mrb[63].mxu1  ;;  %v2383_v30 = vadd.f32 %v3587_v32, %v1551_v14 }
 0x1f0   :  { %2791 = vtanh.f32 %v2378_v12  ;;  %v2380_v18 = vadd.f32 %v2379_v63, %v1776_v16  ;;  %v2248_v31 = vpop.f32.mrb[59].mxu0 }
 0x1f2   :  { %v2788_v21 = vpop.eup %2787  ;;  %2793 = vtanh.f32 %v2380_v18 }
 0x1f3   :  { %1937 = vst.msk [vmem:[%s3868_s3 + $0xd0] sm:$0xff] %vm1910_vm2, %v2788_v21 }
 0x1f4   :  { %v2790_v23 = vpop.eup %2789  ;;  %v1556_v26 = vpop.f32.mrb[64].mxu1 }
 0x1f5   :  { %1938 = vst.msk [vmem:[%s3868_s3 + $0xd8] sm:$0xff] %vm1910_vm2, %v2790_v23  ;;  %v1781_v0 = vpop.f32.mrb[60].mxu0  ;;  %v1558_v39 = vpop.f32.mrb[65].mxu1  ;;  %v2385_v41 = vadd.f32 %v3587_v32, %v1556_v26 }
 0x1f6   :  { %v2382_v33 = vadd.f32 %v2381_v8, %v1781_v0  ;;  %v2251_v35 = vpop.f32.mrb[61].mxu0  ;;  %v1559_v34 = vpop.f32.mrb[66].mxu1 }
 0x1f7   :  { %v1784_v36 = vpop.f32.mrb[62].mxu0  ;;  %v1561_v38 = vpop.f32.mrb[67].mxu1  ;;  %v2387_v47 = vadd.f32 %v3587_v32, %v1559_v34 }
 0x1f8   :  { %2795 = vtanh.f32 %v2382_v33  ;;  %v2384_v15 = vadd.f32 %v2383_v30, %v1784_v36  ;;  %v2252_v37 = vpop.f32.mrb[63].mxu0 }
 0x1fa   :  { %v2792_v19 = vpop.eup %2791  ;;  %2797 = vtanh.f32 %v2384_v15 }
 0x1fb   :  { %1939 = vst.msk [vmem:[%s3868_s3 + $0xe0] sm:$0xff] %vm1910_vm2, %v2792_v19 }
 0x1fc   :  { %v2794_v40 = vpop.eup %2793  ;;  %v1564_v43 = vpop.f32.mrb[68].mxu1 }
 0x1fd   :  { %1940 = vst.msk [vmem:[%s3868_s3 + $0xe8] sm:$0xff] %vm1910_vm2, %v2794_v40  ;;  %v1789_v44 = vpop.f32.mrb[64].mxu0  ;;  %v1566_v45 = vpop.f32.mrb[69].mxu1  ;;  %v2389_v52 = vadd.f32 %v3587_v32, %v1564_v43 }
 0x1fe   :  { %v2386_v42 = vadd.f32 %v2385_v41, %v1789_v44  ;;  %v2255_v22 = vpop.f32.mrb[65].mxu0  ;;  %v1567_v48 = vpop.f32.mrb[70].mxu1 }
 0x1ff   :  { %v1792_v46 = vpop.f32.mrb[66].mxu0  ;;  %v1569_v25 = vpop.f32.mrb[71].mxu1  ;;  %v2391_v13 = vadd.f32 %v3587_v32, %v1567_v48 }
 0x200   :  { %2799 = vtanh.f32 %v2386_v42  ;;  %v2388_v50 = vadd.f32 %v2387_v47, %v1792_v46  ;;  %v2256_v7 = vpop.f32.mrb[67].mxu0 }
 0x202   :  { %v2796_v51 = vpop.eup %2795  ;;  %2801 = vtanh.f32 %v2388_v50 }
 0x203   :  { %1941 = vst.msk [vmem:[%s3868_s3 + $0xf0] sm:$0xff] %vm1910_vm2, %v2796_v51 }
 0x204   :  { %v2798_v11 = vpop.eup %2797  ;;  %v1572_v54 = vpop.f32.mrb[72].mxu1 }
 0x205   :  { %1942 = vst.msk [vmem:[%s3868_s3 + $0xf8] sm:$0xff] %vm1910_vm2, %v2798_v11  ;;  %v1797_v55 = vpop.f32.mrb[68].mxu0  ;;  %v1574_v49 = vpop.f32.mrb[73].mxu1  ;;  %v2393_v1 = vadd.f32 %v3587_v32, %v1572_v54 }
 0x206   :  { %v2390_v28 = vadd.f32 %v2389_v52, %v1797_v55  ;;  %v2259_v53 = vpop.f32.mrb[69].mxu0  ;;  %v1575_v17 = vpop.f32.mrb[74].mxu1 }
 0x207   :  { %v1800_v57 = vpop.f32.mrb[70].mxu0  ;;  %v1577_v29 = vpop.f32.mrb[75].mxu1  ;;  %v2395_v20 = vadd.f32 %v3587_v32, %v1575_v17 }
 0x208   :  { %2803 = vtanh.f32 %v2390_v28  ;;  %v2392_v58 = vadd.f32 %v2391_v13, %v1800_v57  ;;  %v2260_v59 = vpop.f32.mrb[71].mxu0 }
 0x20a   :  { %v2800_v61 = vpop.eup %2799  ;;  %2805 = vtanh.f32 %v2392_v58 }
 0x20b   :  { %1943 = vst.msk [vmem:[%s3868_s3 + $0x100] sm:$0xff] %vm1910_vm2, %v2800_v61 }
 0x20c   :  { %v2802_v62 = vpop.eup %2801  ;;  %v1580_v56 = vpop.f32.mrb[76].mxu1 }
 0x20d   :  { %1944 = vst.msk [vmem:[%s3868_s3 + $0x108] sm:$0xff] %vm1910_vm2, %v2802_v62  ;;  %v1805_v2 = vpop.f32.mrb[72].mxu0  ;;  %v1582_v60 = vpop.f32.mrb[77].mxu1  ;;  %v2397_v14 = vadd.f32 %v3587_v32, %v1580_v56 }
 0x20e   :  { %v2394_v3 = vadd.f32 %v2393_v1, %v1805_v2  ;;  %v2263_v24 = vpop.f32.mrb[73].mxu0  ;;  %v1583_v5 = vpop.f32.mrb[78].mxu1 }
 0x20f   :  { %v1808_v6 = vpop.f32.mrb[74].mxu0  ;;  %v1585_v9 = vpop.f32.mrb[79].mxu1  ;;  %v2399_v31 = vadd.f32 %v3587_v32, %v1583_v5 }
 0x210   :  { %2807 = vtanh.f32 %v2394_v3  ;;  %v2396_v10 = vadd.f32 %v2395_v20, %v1808_v6  ;;  %v2264_v63 = vpop.f32.mrb[75].mxu0 }
 0x212   :  { %v2804_v12 = vpop.eup %2803  ;;  %2809 = vtanh.f32 %v2396_v10 }
 0x213   :  { %1945 = vst.msk [vmem:[%s3868_s3 + $0x110] sm:$0xff] %vm1910_vm2, %v2804_v12 }
 0x214   :  { %v2806_v4 = vpop.eup %2805  ;;  %v1588_v16 = vpop.f32.mrb[80].mxu1 }
 0x215   :  { %1946 = vst.msk [vmem:[%s3868_s3 + $0x118] sm:$0xff] %vm1910_vm2, %v2806_v4  ;;  %v1813_v27 = vpop.f32.mrb[76].mxu0  ;;  %v1590_v18 = vpop.f32.mrb[81].mxu1  ;;  %v2401_v34 = vadd.f32 %v3587_v32, %v1588_v16 }
 0x216   :  { %v2398_v21 = vadd.f32 %v2397_v14, %v1813_v27  ;;  %v2267_v23 = vpop.f32.mrb[77].mxu0  ;;  %v1591_v8 = vpop.f32.mrb[82].mxu1 }
 0x217   :  { %v1816_v26 = vpop.f32.mrb[78].mxu0  ;;  %v1593_v0 = vpop.f32.mrb[83].mxu1  ;;  %v2403_v37 = vadd.f32 %v3587_v32, %v1591_v8 }
 0x218   :  { %2811 = vtanh.f32 %v2398_v21  ;;  %v2400_v39 = vadd.f32 %v2399_v31, %v1816_v26  ;;  %v2268_v30 = vpop.f32.mrb[79].mxu0 }
 0x21a   :  { %v2808_v33 = vpop.eup %2807  ;;  %2813 = vtanh.f32 %v2400_v39 }
 0x21b   :  { %1947 = vst.msk [vmem:[%s3868_s3 + $0x120] sm:$0xff] %vm1910_vm2, %v2808_v33 }
 0x21c   :  { %v2810_v35 = vpop.eup %2809  ;;  %v1596_v36 = vpop.f32.mrb[84].mxu1 }
 0x21d   :  { %1948 = vst.msk [vmem:[%s3868_s3 + $0x128] sm:$0xff] %vm1910_vm2, %v2810_v35  ;;  %v1821_v38 = vpop.f32.mrb[80].mxu0  ;;  %v1598_v15 = vpop.f32.mrb[85].mxu1  ;;  %v2405_v48 = vadd.f32 %v3587_v32, %v1596_v36 }
 0x21e   :  { %v2402_v19 = vadd.f32 %v2401_v34, %v1821_v38  ;;  %v2271_v40 = vpop.f32.mrb[81].mxu0  ;;  %v1599_v41 = vpop.f32.mrb[86].mxu1 }
 0x21f   :  { %v1824_v43 = vpop.f32.mrb[82].mxu0  ;;  %v1601_v44 = vpop.f32.mrb[87].mxu1  ;;  %v2407_v7 = vadd.f32 %v3587_v32, %v1599_v41 }
 0x220   :  { %2815 = vtanh.f32 %v2402_v19  ;;  %v2404_v45 = vadd.f32 %v2403_v37, %v1824_v43  ;;  %v2272_v47 = vpop.f32.mrb[83].mxu0 }
 0x222   :  { %v2812_v42 = vpop.eup %2811  ;;  %2817 = vtanh.f32 %v2404_v45 }
 0x223   :  { %1949 = vst.msk [vmem:[%s3868_s3 + $0x130] sm:$0xff] %vm1910_vm2, %v2812_v42 }
 0x224   :  { %v2814_v22 = vpop.eup %2813  ;;  %v1604_v46 = vpop.f32.mrb[88].mxu1 }
 0x225   :  { %1950 = vst.msk [vmem:[%s3868_s3 + $0x138] sm:$0xff] %vm1910_vm2, %v2814_v22  ;;  %v1829_v25 = vpop.f32.mrb[84].mxu0  ;;  %v1606_v50 = vpop.f32.mrb[89].mxu1  ;;  %v2409_v17 = vadd.f32 %v3587_v32, %v1604_v46 }
 0x226   :  { %v2406_v51 = vadd.f32 %v2405_v48, %v1829_v25  ;;  %v2275_v11 = vpop.f32.mrb[85].mxu0  ;;  %v1607_v52 = vpop.f32.mrb[90].mxu1 }
 0x227   :  { %v1832_v54 = vpop.f32.mrb[86].mxu0  ;;  %v1609_v55 = vpop.f32.mrb[91].mxu1  ;;  %v2411_v59 = vadd.f32 %v3587_v32, %v1607_v52 }
 0x228   :  { %2819 = vtanh.f32 %v2406_v51  ;;  %v2408_v49 = vadd.f32 %v2407_v7, %v1832_v54  ;;  %v2276_v13 = vpop.f32.mrb[87].mxu0 }
 0x22a   :  { %v2816_v28 = vpop.eup %2815  ;;  %2821 = vtanh.f32 %v2408_v49 }
 0x22b   :  { %1951 = vst.msk [vmem:[%s3868_s3 + $0x140] sm:$0xff] %vm1910_vm2, %v2816_v28 }
 0x22c   :  { %v2818_v53 = vpop.eup %2817  ;;  %v1612_v57 = vpop.f32.mrb[92].mxu1 }
 0x22d   :  { %1952 = vst.msk [vmem:[%s3868_s3 + $0x148] sm:$0xff] %vm1910_vm2, %v2818_v53  ;;  %v1837_v29 = vpop.f32.mrb[88].mxu0  ;;  %v1614_v58 = vpop.f32.mrb[93].mxu1  ;;  %v2413_v5 = vadd.f32 %v3587_v32, %v1612_v57 }
 0x22e   :  { %v2410_v61 = vadd.f32 %v2409_v17, %v1837_v29  ;;  %v2279_v62 = vpop.f32.mrb[89].mxu0  ;;  %v1615_v1 = vpop.f32.mrb[94].mxu1 }
 0x22f   :  { %v1840_v56 = vpop.f32.mrb[90].mxu0  ;;  %v1617_v2 = vpop.f32.mrb[95].mxu1  ;;  %v2415_v63 = vadd.f32 %v3587_v32, %v1615_v1 }
 0x230   :  { %2823 = vtanh.f32 %v2410_v61  ;;  %v2412_v60 = vadd.f32 %v2411_v59, %v1840_v56  ;;  %v2280_v20 = vpop.f32.mrb[91].mxu0 }
 0x232   :  { %v2820_v3 = vpop.eup %2819  ;;  %2825 = vtanh.f32 %v2412_v60 }
 0x233   :  { %1953 = vst.msk [vmem:[%s3868_s3 + $0x150] sm:$0xff] %vm1910_vm2, %v2820_v3 }
 0x234   :  { %v2822_v24 = vpop.eup %2821  ;;  %v1620_v6 = vpop.f32.mrb[96].mxu1 }
 0x235   :  { %1954 = vst.msk [vmem:[%s3868_s3 + $0x158] sm:$0xff] %vm1910_vm2, %v2822_v24  ;;  %v1845_v9 = vpop.f32.mrb[92].mxu0  ;;  %v1622_v10 = vpop.f32.mrb[97].mxu1  ;;  %v2417_v8 = vadd.f32 %v3587_v32, %v1620_v6 }
 0x236   :  { %v2414_v12 = vadd.f32 %v2413_v5, %v1845_v9  ;;  %v2283_v4 = vpop.f32.mrb[93].mxu0  ;;  %v1623_v14 = vpop.f32.mrb[98].mxu1 }
 0x237   :  { %v1848_v16 = vpop.f32.mrb[94].mxu0  ;;  %v1625_v27 = vpop.f32.mrb[99].mxu1  ;;  %v2419_v0 = vadd.f32 %v3587_v32, %v1623_v14 }
 0x238   :  { %2827 = vtanh.f32 %v2414_v12  ;;  %v2416_v18 = vadd.f32 %v2415_v63, %v1848_v16  ;;  %v2284_v31 = vpop.f32.mrb[95].mxu0 }
 0x23a   :  { %v2824_v21 = vpop.eup %2823  ;;  %2829 = vtanh.f32 %v2416_v18 }
 0x23b   :  { %1955 = vst.msk [vmem:[%s3868_s3 + $0x160] sm:$0xff] %vm1910_vm2, %v2824_v21 }
 0x23c   :  { %v2826_v23 = vpop.eup %2825 }
 0x23d   :  { %1956 = vst.msk [vmem:[%s3868_s3 + $0x168] sm:$0xff] %vm1910_vm2, %v2826_v23  ;;  %v1853_v26 = vpop.f32.mrb[96].mxu0 }
 0x23e   :  { %v2418_v39 = vadd.f32 %v2417_v8, %v1853_v26  ;;  %v2287_v30 = vpop.f32.mrb[97].mxu0 }
 0x23f   :  { %v1856_v33 = vpop.f32.mrb[98].mxu0 }
 0x240   :  { %2831 = vtanh.f32 %v2418_v39  ;;  %v2420_v35 = vadd.f32 %v2419_v0, %v1856_v33  ;;  %v2288_v34 = vpop.f32.mrb[99].mxu0 }
 0x242   :  { %v2828_v36 = vpop.eup %2827  ;;  %2833 = vtanh.f32 %v2420_v35 }
 0x243   :  { %1957 = vst.msk [vmem:[%s3868_s3 + $0x170] sm:$0xff] %vm1910_vm2, %v2828_v36 }
 0x244   :  { %v2830_v38 = vpop.eup %2829 }
 0x245   :  { %1958 = vst.msk [vmem:[%s3868_s3 + $0x178] sm:$0xff] %vm1910_vm2, %v2830_v38 }
 0x24a   :  { %v2832_v32 = vpop.eup %2831 }
 0x24b   :  { %1959 = vst.msk [vmem:[%s3868_s3 + $0x180] sm:$0xff] %vm1910_vm2, %v2832_v32 }
 0x24c   :  { %v2834_v15 = vpop.eup %2833 }
 0x24d   :  { %1960 = vst.msk [vmem:[%s3868_s3 + $0x188] sm:$0xff] %vm1910_vm2, %v2834_v15 }

</bundles_post_ra>
